<compile_context>
chip_gen: v7x
topology: tpu7x:2x2x1
jax: 0.10.0
libtpu: 0.0.40
codegen_flags: <defaults>
</compile_context>

<pallas_src>
import functools

import jax
import jax.numpy as jnp
from jax.experimental import pallas as pl
from jax.experimental.pallas import tpu as pltpu

EPS = 1e-5
LANE = 128


def _round_up(v, m):
    return -(-v // m) * m


# ----------------------------------------------------------------------------
# Fused Pallas kernel
# ----------------------------------------------------------------------------
def _bottleneck_kernel(x_ref, w1_ref, b1_ref, w2_ref, b2_ref, w3_ref, b3_ref,
                       *rest, Ho, Wo, use_proj):
    if use_proj:
        wi_ref, bi_ref, o_ref, s_ref = rest
    else:
        o_ref, s_ref = rest

    B = x_ref.shape[0]                       # images per grid step
    Cmid = w1_ref.shape[1]
    Hp, Wp = Ho + 2, Wo + 2
    Mp = Hp * Wp                             # rows of the flattened padded plane
    OFF = Wp + 8                             # >= Wp+1 margin rows above/below

    # --- zero only the 1-pixel padding ring of the flattened padded plane ----
    # Interior rows are fully overwritten for every image; rows outside the
    # padded plane only ever feed output rows that are discarded.
    ring_long = jnp.zeros((Wp + 1, Cmid), jnp.bfloat16)
    ring_pair = jnp.zeros((2, Cmid), jnp.bfloat16)
    s_ref[pl.ds(OFF, Wp + 1), :] = ring_long                      # top ring + left col of row 1
    s_ref[pl.ds(OFF + Ho * Wp + Wp - 1, Wp + 1), :] = ring_long   # right col of row Ho + bottom ring
    for i in range(1, Ho):
        s_ref[pl.ds(OFF + i * Wp + Wp - 1, 2), :] = ring_pair     # right col of row i + left col of row i+1

    w1 = w1_ref[...]
    w3 = w3_ref[...]
    b1 = b1_ref[...]
    b2 = b2_ref[...]
    b3 = b3_ref[...]

    for b in range(B):
        x = x_ref[b]                                   # (M, Cpin) f32
        xb = x.astype(jnp.bfloat16)

        # --- conv1 (1x1, stride handled at host) + bn1 + relu ---------------
        h1 = jnp.dot(xb, w1, preferred_element_type=jnp.float32) + b1
        h1 = jnp.maximum(h1, 0.0).astype(jnp.bfloat16)             # (M, Cmid)

        # --- stage interior rows of the zero-padded plane (flat layout) -----
        for i in range(Ho):
            s_ref[pl.ds(OFF + (i + 1) * Wp + 1, Wo), :] = h1[i * Wo:(i + 1) * Wo, :]

        # --- conv2 (3x3, pad=1): 9 lane-dense matmuls over sublane-shifted
        #     slabs of the flat staging buffer (no per-patch reshapes) --------
        dots = []
        for kh in range(3):
            for kw in range(3):
                d = (kh - 1) * Wp + (kw - 1)
                slab = s_ref[pl.ds(OFF + d, Mp), :]                # (Mp, Cmid)
                dots.append(jnp.dot(slab, w2_ref[kh * 3 + kw],
                                    preferred_element_type=jnp.float32))
        while len(dots) > 1:                                       # balanced tree-sum
            nxt = [dots[i] + dots[i + 1] for i in range(0, len(dots) - 1, 2)]
            if len(dots) % 2:
                nxt.append(dots[-1])
            dots = nxt
        h2_all = jnp.maximum(dots[0] + b2, 0.0).astype(jnp.bfloat16)   # (Mp, Cmid)

        # drop the padding-ring rows -> (Ho*Wo, Cmid), raster order
        h2 = jnp.concatenate(
            [h2_all[(i + 1) * Wp + 1:(i + 1) * Wp + 1 + Wo, :] for i in range(Ho)],
            axis=0)

        # --- conv3 (1x1) + bn3, skip branch, add, relu -----------------------
        main = jnp.dot(h2, w3, preferred_element_type=jnp.float32) + b3
        if use_proj:
            skip = jnp.dot(xb, wi_ref[...],
                           preferred_element_type=jnp.float32) + bi_ref[...]
        else:
            skip = x                        # exact f32 identity skip (Cpin == Cpout)
        o_ref[b] = jnp.maximum(main + skip, 0.0).astype(o_ref.dtype)


def _fused_bottleneck_call(operands, *, B_blk, Ho, Wo, Cpin, Cpmid, Cpout, use_proj):
    x3d = operands[0]
    N, M, _ = x3d.shape
    steps = N // B_blk
    Hp, Wp = Ho + 2, Wo + 2
    R = Hp * Wp + 2 * (Wp + 8)              # flat staging rows (+ margins)

    in_specs = [
        pl.BlockSpec((B_blk, M, Cpin), lambda n: (n, 0, 0)),     # activations (f32)
        pl.BlockSpec((Cpin, Cpmid), lambda n: (0, 0)),           # w1 (bn1 scale folded)
        pl.BlockSpec((1, Cpmid), lambda n: (0, 0)),              # bn1 shift
        pl.BlockSpec((9, Cpmid, Cpmid), lambda n: (0, 0, 0)),    # w2 (bn2 scale folded)
        pl.BlockSpec((1, Cpmid), lambda n: (0, 0)),              # bn2 shift
        pl.BlockSpec((Cpmid, Cpout), lambda n: (0, 0)),          # w3 (bn3 scale folded)
        pl.BlockSpec((1, Cpout), lambda n: (0, 0)),              # bn3 shift
    ]
    if use_proj:
        in_specs += [
            pl.BlockSpec((Cpin, Cpout), lambda n: (0, 0)),       # projection weight
            pl.BlockSpec((1, Cpout), lambda n: (0, 0)),          # projection bn shift
        ]

    kernel = functools.partial(_bottleneck_kernel, Ho=Ho, Wo=Wo, use_proj=use_proj)
    return pl.pallas_call(
        kernel,
        out_shape=jax.ShapeDtypeStruct((N, M, Cpout), jnp.float32),
        grid_spec=pltpu.PrefetchScalarGridSpec(
            num_scalar_prefetch=0,
            grid=(steps,),
            in_specs=in_specs,
            out_specs=pl.BlockSpec((B_blk, M, Cpout), lambda n: (n, 0, 0)),
            scratch_shapes=[pltpu.VMEM((R, Cpmid), jnp.bfloat16)],
        ),
        compiler_params=pltpu.CompilerParams(
            dimension_semantics=("parallel",),
            # 32 MiB keeps headroom on v7x's 64 MiB VMEM; v5e/v6e (128 MiB) have
            # plenty of slack. Actual per-step usage here is ~2 MiB.
            vmem_limit_bytes=32 * 1024 * 1024,
        ),
    )(*operands)


# ----------------------------------------------------------------------------
# BN folding / parameter setup (plain JAX glue)
# ----------------------------------------------------------------------------
def fold_bn(gamma, beta, mean, var):
    scale = gamma / jnp.sqrt(var + EPS)
    shift = beta - mean * scale
    return scale, shift


def init_params(key, in_channels, out_channels, expansion, stride):
    cout = out_channels * expansion
    ks = jax.random.split(key, 8)

    def bn_params(k, c):
        k1, k2, k3, k4 = jax.random.split(k, 4)
        gamma = 1.0 + 0.1 * jax.random.normal(k1, (c,), jnp.float32)
        beta = 0.1 * jax.random.normal(k2, (c,), jnp.float32)
        mean = 0.05 * jax.random.normal(k3, (c,), jnp.float32)
        var = 1.0 + 0.1 * jax.random.uniform(k4, (c,), jnp.float32)
        return gamma, beta, mean, var

    p = {}
    # torch conv weight layout: (Cout, Cin, kH, kW)
    p["w1"] = 0.1 * jax.random.normal(ks[0], (out_channels, in_channels, 1, 1), jnp.float32)
    p["bn1"] = bn_params(ks[1], out_channels)
    p["w2"] = 0.1 * jax.random.normal(ks[2], (out_channels, out_channels, 3, 3), jnp.float32)
    p["bn2"] = bn_params(ks[3], out_channels)
    p["w3"] = 0.1 * jax.random.normal(ks[4], (cout, out_channels, 1, 1), jnp.float32)
    p["bn3"] = bn_params(ks[5], cout)
    if (stride != 1) or (in_channels != cout):
        p["wid"] = 0.1 * jax.random.normal(ks[6], (cout, in_channels, 1, 1), jnp.float32)
        p["bnid"] = bn_params(ks[7], cout)
    return p


# ----------------------------------------------------------------------------
# BottleNeck forward (single fused Pallas kernel + thin JAX glue)
# ----------------------------------------------------------------------------
def _pick_batch_block(N, M):
    """Images per grid step: target <=2048 rows/step, keep >=2 grid steps."""
    best = 1
    for b in range(1, N + 1):
        if N % b:
            continue
        if b * M > 2048:
            continue
        if N >= 2 and (N // b) < 2:
            continue
        best = b
    return best


def bottleneck_forward(x_nchw, params, *, stride=1):
    N, Cin, H, W = x_nchw.shape
    use_proj = "wid" in params
    Cmid = params["w1"].shape[0]
    Cout = params["w3"].shape[0]
    Cpin, Cpmid, Cpout = (_round_up(c, LANE) for c in (Cin, Cmid, Cout))

    # NCHW -> NHWC at the boundary only; the strided 1x1 conv1 == spatial
    # subsample + channel matmul; flatten spatial dims to rows and zero-pad the
    # channel (lane) axis to a multiple of 128.  Kept f32 so the identity-skip
    # add is exact (matmul operands are cast to bf16 inside the kernel).
    x_nhwc = jnp.transpose(x_nchw, (0, 2, 3, 1))
    x_s = x_nhwc[:, ::stride, ::stride, :]
    Ho, Wo = x_s.shape[1], x_s.shape[2]
    M = Ho * Wo
    x3d = jnp.pad(x_s.reshape(N, M, Cin), ((0, 0), (0, 0), (0, Cpin - Cin)))

    # Fold BN scale into conv weights (per output channel), keep shifts in f32,
    # zero-pad all channel dims to 128 multiples, cast weights to bf16.
    s1, b1 = fold_bn(*params["bn1"])
    w1 = params["w1"][:, :, 0, 0].T * s1[None, :]                         # (Cin, Cmid)
    w1 = jnp.pad(w1, ((0, Cpin - Cin), (0, Cpmid - Cmid))).astype(jnp.bfloat16)
    b1 = jnp.pad(b1, (0, Cpmid - Cmid)).reshape(1, Cpmid)

    s2, b2 = fold_bn(*params["bn2"])
    w2 = jnp.transpose(params["w2"], (2, 3, 1, 0)) * s2[None, None, None, :]
    w2 = w2.reshape(9, Cmid, Cmid)                                        # idx = kh*3+kw
    w2 = jnp.pad(w2, ((0, 0), (0, Cpmid - Cmid), (0, Cpmid - Cmid))).astype(jnp.bfloat16)
    b2 = jnp.pad(b2, (0, Cpmid - Cmid)).reshape(1, Cpmid)

    s3, b3 = fold_bn(*params["bn3"])
    w3 = params["w3"][:, :, 0, 0].T * s3[None, :]                         # (Cmid, Cout)
    w3 = jnp.pad(w3, ((0, Cpmid - Cmid), (0, Cpout - Cout))).astype(jnp.bfloat16)
    b3 = jnp.pad(b3, (0, Cpout - Cout)).reshape(1, Cpout)

    operands = [x3d, w1, b1, w2, b2, w3, b3]
    if use_proj:
        si, bi = fold_bn(*params["bnid"])
        wi = params["wid"][:, :, 0, 0].T * si[None, :]                    # (Cin, Cout)
        wi = jnp.pad(wi, ((0, Cpin - Cin), (0, Cpout - Cout))).astype(jnp.bfloat16)
        bi = jnp.pad(bi, (0, Cpout - Cout)).reshape(1, Cpout)
        operands += [wi, bi]

    B_blk = _pick_batch_block(N, M)
    out3d = _fused_bottleneck_call(operands, B_blk=B_blk, Ho=Ho, Wo=Wo,
                                   Cpin=Cpin, Cpmid=Cpmid, Cpout=Cpout,
                                   use_proj=use_proj)
    out = out3d[:, :, :Cout].reshape(N, Ho, Wo, Cout)
    return jnp.transpose(out, (0, 3, 1, 2))            # back to NCHW


# ----------------------------------------------------------------------------
# Pure-JAX reference (lax conv, f32) for verification
# ----------------------------------------------------------------------------
def bottleneck_reference(x, params, *, stride=1):
    def conv(x, w, stride=1, pad=0):
        return jax.lax.conv_general_dilated(
            x, w, (stride, stride), [(pad, pad), (pad, pad)],
            dimension_numbers=("NCHW", "OIHW", "NCHW"))

    def bn(x, bn_p):
        gamma, beta, mean, var = bn_p
        s = gamma / jnp.sqrt(var + EPS)
        return x * s[None, :, None, None] + (beta - mean * s)[None, :, None, None]

    out = jax.nn.relu(bn(conv(x, params["w1"], stride=stride), params["bn1"]))
    out = jax.nn.relu(bn(conv(out, params["w2"], pad=1), params["bn2"]))
    out = bn(conv(out, params["w3"]), params["bn3"])
    if "wid" in params:
        ident = bn(conv(x, params["wid"], stride=stride), params["bnid"])
    else:
        ident = x
    return jax.nn.relu(out + ident)


# ----------------------------------------------------------------------------
if __name__ == "__main__":
    key = jax.random.PRNGKey(0)

    # (N, Cin, H, W, out_channels, expansion, stride)
    configs = [
        (2, 8, 16, 16, 8, 4, 1),    # projection skip (Cin != Cout)
        (2, 32, 16, 16, 8, 4, 1),   # identity skip   (Cin == Cout, stride 1)
        (2, 8, 16, 16, 16, 4, 2),   # strided + projection skip
        (4, 8, 16, 16, 8, 4, 1),    # multi-image grid step (B_blk = 2)
    ]

    for idx, (N, Cin, H, W, oc, exp, stride) in enumerate(configs):
        kx, kp, key = jax.random.split(key, 3)
        x = jax.random.normal(kx, (N, Cin, H, W), jnp.float32)
        params = init_params(kp, Cin, oc, exp, stride)

        fwd = jax.jit(functools.partial(bottleneck_forward, stride=stride))
        y = jax.block_until_ready(fwd(x, params))
        y_ref = jax.block_until_ready(bottleneck_reference(x, params, stride=stride))

        Ho, Wo = -(-H // stride), -(-W // stride)
        assert y.shape == (N, oc * exp, Ho, Wo), f"bad shape in config {idx}"
        # bf16 matmul operands with f32 accumulation -> loosened tolerance.
        assert jnp.allclose(y, y_ref, rtol=5e-2, atol=5e-2), \
            f"mismatch vs JAX reference in config {idx}"

    print("KERNEL_OK")
</pallas_src>

<mosaic_0001>
module attributes {stable_mosaic.version = 11 : i64} {
  func.func @_bottleneck_kernel(%arg0: i32, %arg1: memref<1x256x128xf32, #tpu.memory_space<vmem>>, %arg2: memref<128x128xbf16, #tpu.memory_space<vmem>>, %arg3: memref<1x128xf32, #tpu.memory_space<vmem>>, %arg4: memref<9x128x128xbf16, #tpu.memory_space<vmem>>, %arg5: memref<1x128xf32, #tpu.memory_space<vmem>>, %arg6: memref<128x128xbf16, #tpu.memory_space<vmem>>, %arg7: memref<1x128xf32, #tpu.memory_space<vmem>>, %arg8: memref<128x128xbf16, #tpu.memory_space<vmem>>, %arg9: memref<1x128xf32, #tpu.memory_space<vmem>>, %arg10: memref<1x256x128xf32, #tpu.memory_space<vmem>>, %arg11: memref<376x128xbf16, #tpu.memory_space<vmem>>) attributes {dimension_semantics = [#tpu.dimension_semantics<parallel>], iteration_bounds = array<i64: 2>, scalar_prefetch = 0 : i64, scratch_operands = 1 : i64, tpu.core_type = #tpu.core_type<tc>, window_params = [{transform_indices = @transform_0, window_bounds = array<i64: 1, 256, 128>}, {pipeline_mode = #tpu.pipeline_mode<synchronous>, transform_indices = @transform_1, window_bounds = array<i64: 128, 128>}, {pipeline_mode = #tpu.pipeline_mode<synchronous>, transform_indices = @transform_2, window_bounds = array<i64: 1, 128>}, {pipeline_mode = #tpu.pipeline_mode<synchronous>, transform_indices = @transform_3, window_bounds = array<i64: 9, 128, 128>}, {pipeline_mode = #tpu.pipeline_mode<synchronous>, transform_indices = @transform_4, window_bounds = array<i64: 1, 128>}, {pipeline_mode = #tpu.pipeline_mode<synchronous>, transform_indices = @transform_5, window_bounds = array<i64: 128, 128>}, {pipeline_mode = #tpu.pipeline_mode<synchronous>, transform_indices = @transform_6, window_bounds = array<i64: 1, 128>}, {pipeline_mode = #tpu.pipeline_mode<synchronous>, transform_indices = @transform_7, window_bounds = array<i64: 128, 128>}, {pipeline_mode = #tpu.pipeline_mode<synchronous>, transform_indices = @transform_8, window_bounds = array<i64: 1, 128>}, {transform_indices = @transform_9, window_bounds = array<i64: 1, 256, 128>}]} {
    %cst = arith.constant 0.000000e+00 : bf16
    %0 = vector.broadcast %cst : bf16 to vector<19x128xbf16>
    %cst_0 = arith.constant 0.000000e+00 : bf16
    %1 = vector.broadcast %cst_0 : bf16 to vector<2x128xbf16>
    %c26 = arith.constant 26 : index
    %c0 = arith.constant 0 : index
    %2 = vector.load %arg11[%c26, %c0] : memref<376x128xbf16, #tpu.memory_space<vmem>>, vector<19x128xbf16>
    tpu.vector_store %arg11[%c26, %c0], %0 {strides = array<i32>} : memref<376x128xbf16, #tpu.memory_space<vmem>>, vector<19x128xbf16>,
    %c331 = arith.constant 331 : index
    %c0_1 = arith.constant 0 : index
    %3 = vector.load %arg11[%c331, %c0_1] : memref<376x128xbf16, #tpu.memory_space<vmem>>, vector<19x128xbf16>
    tpu.vector_store %arg11[%c331, %c0_1], %0 {strides = array<i32>} : memref<376x128xbf16, #tpu.memory_space<vmem>>, vector<19x128xbf16>,
    %c61 = arith.constant 61 : index
    %c0_2 = arith.constant 0 : index
    %4 = vector.load %arg11[%c61, %c0_2] : memref<376x128xbf16, #tpu.memory_space<vmem>>, vector<2x128xbf16>
    tpu.vector_store %arg11[%c61, %c0_2], %1 {strides = array<i32>} : memref<376x128xbf16, #tpu.memory_space<vmem>>, vector<2x128xbf16>,
    %c79 = arith.constant 79 : index
    %c0_3 = arith.constant 0 : index
    %5 = vector.load %arg11[%c79, %c0_3] : memref<376x128xbf16, #tpu.memory_space<vmem>>, vector<2x128xbf16>
    tpu.vector_store %arg11[%c79, %c0_3], %1 {strides = array<i32>} : memref<376x128xbf16, #tpu.memory_space<vmem>>, vector<2x128xbf16>,
    %c97 = arith.constant 97 : index
    %c0_4 = arith.constant 0 : index
    %6 = vector.load %arg11[%c97, %c0_4] : memref<376x128xbf16, #tpu.memory_space<vmem>>, vector<2x128xbf16>
    tpu.vector_store %arg11[%c97, %c0_4], %1 {strides = array<i32>} : memref<376x128xbf16, #tpu.memory_space<vmem>>, vector<2x128xbf16>,
    %c115 = arith.constant 115 : index
    %c0_5 = arith.constant 0 : index
    %7 = vector.load %arg11[%c115, %c0_5] : memref<376x128xbf16, #tpu.memory_space<vmem>>, vector<2x128xbf16>
    tpu.vector_store %arg11[%c115, %c0_5], %1 {strides = array<i32>} : memref<376x128xbf16, #tpu.memory_space<vmem>>, vector<2x128xbf16>,
    %c133 = arith.constant 133 : index
    %c0_6 = arith.constant 0 : index
    %8 = vector.load %arg11[%c133, %c0_6] : memref<376x128xbf16, #tpu.memory_space<vmem>>, vector<2x128xbf16>
    tpu.vector_store %arg11[%c133, %c0_6], %1 {strides = array<i32>} : memref<376x128xbf16, #tpu.memory_space<vmem>>, vector<2x128xbf16>,
    %c151 = arith.constant 151 : index
    %c0_7 = arith.constant 0 : index
    %9 = vector.load %arg11[%c151, %c0_7] : memref<376x128xbf16, #tpu.memory_space<vmem>>, vector<2x128xbf16>
    tpu.vector_store %arg11[%c151, %c0_7], %1 {strides = array<i32>} : memref<376x128xbf16, #tpu.memory_space<vmem>>, vector<2x128xbf16>,
    %c169 = arith.constant 169 : index
    %c0_8 = arith.constant 0 : index
    %10 = vector.load %arg11[%c169, %c0_8] : memref<376x128xbf16, #tpu.memory_space<vmem>>, vector<2x128xbf16>
    tpu.vector_store %arg11[%c169, %c0_8], %1 {strides = array<i32>} : memref<376x128xbf16, #tpu.memory_space<vmem>>, vector<2x128xbf16>,
    %c187 = arith.constant 187 : index
    %c0_9 = arith.constant 0 : index
    %11 = vector.load %arg11[%c187, %c0_9] : memref<376x128xbf16, #tpu.memory_space<vmem>>, vector<2x128xbf16>
    tpu.vector_store %arg11[%c187, %c0_9], %1 {strides = array<i32>} : memref<376x128xbf16, #tpu.memory_space<vmem>>, vector<2x128xbf16>,
    %c205 = arith.constant 205 : index
    %c0_10 = arith.constant 0 : index
    %12 = vector.load %arg11[%c205, %c0_10] : memref<376x128xbf16, #tpu.memory_space<vmem>>, vector<2x128xbf16>
    tpu.vector_store %arg11[%c205, %c0_10], %1 {strides = array<i32>} : memref<376x128xbf16, #tpu.memory_space<vmem>>, vector<2x128xbf16>,
    %c223 = arith.constant 223 : index
    %c0_11 = arith.constant 0 : index
    %13 = vector.load %arg11[%c223, %c0_11] : memref<376x128xbf16, #tpu.memory_space<vmem>>, vector<2x128xbf16>
    tpu.vector_store %arg11[%c223, %c0_11], %1 {strides = array<i32>} : memref<376x128xbf16, #tpu.memory_space<vmem>>, vector<2x128xbf16>,
    %c241 = arith.constant 241 : index
    %c0_12 = arith.constant 0 : index
    %14 = vector.load %arg11[%c241, %c0_12] : memref<376x128xbf16, #tpu.memory_space<vmem>>, vector<2x128xbf16>
    tpu.vector_store %arg11[%c241, %c0_12], %1 {strides = array<i32>} : memref<376x128xbf16, #tpu.memory_space<vmem>>, vector<2x128xbf16>,
    %c259 = arith.constant 259 : index
    %c0_13 = arith.constant 0 : index
    %15 = vector.load %arg11[%c259, %c0_13] : memref<376x128xbf16, #tpu.memory_space<vmem>>, vector<2x128xbf16>
    tpu.vector_store %arg11[%c259, %c0_13], %1 {strides = array<i32>} : memref<376x128xbf16, #tpu.memory_space<vmem>>, vector<2x128xbf16>,
    %c277 = arith.constant 277 : index
    %c0_14 = arith.constant 0 : index
    %16 = vector.load %arg11[%c277, %c0_14] : memref<376x128xbf16, #tpu.memory_space<vmem>>, vector<2x128xbf16>
    tpu.vector_store %arg11[%c277, %c0_14], %1 {strides = array<i32>} : memref<376x128xbf16, #tpu.memory_space<vmem>>, vector<2x128xbf16>,
    %c295 = arith.constant 295 : index
    %c0_15 = arith.constant 0 : index
    %17 = vector.load %arg11[%c295, %c0_15] : memref<376x128xbf16, #tpu.memory_space<vmem>>, vector<2x128xbf16>
    tpu.vector_store %arg11[%c295, %c0_15], %1 {strides = array<i32>} : memref<376x128xbf16, #tpu.memory_space<vmem>>, vector<2x128xbf16>,
    %c313 = arith.constant 313 : index
    %c0_16 = arith.constant 0 : index
    %18 = vector.load %arg11[%c313, %c0_16] : memref<376x128xbf16, #tpu.memory_space<vmem>>, vector<2x128xbf16>
    tpu.vector_store %arg11[%c313, %c0_16], %1 {strides = array<i32>} : memref<376x128xbf16, #tpu.memory_space<vmem>>, vector<2x128xbf16>,
    %c0_17 = arith.constant 0 : index
    %c0_18 = arith.constant 0 : index
    %19 = vector.load %arg2[%c0_17, %c0_18] : memref<128x128xbf16, #tpu.memory_space<vmem>>, vector<128x128xbf16>
    %c0_19 = arith.constant 0 : index
    %c0_20 = arith.constant 0 : index
    %20 = vector.load %arg6[%c0_19, %c0_20] : memref<128x128xbf16, #tpu.memory_space<vmem>>, vector<128x128xbf16>
    %c0_21 = arith.constant 0 : index
    %c0_22 = arith.constant 0 : index
    %21 = vector.load %arg3[%c0_21, %c0_22] : memref<1x128xf32, #tpu.memory_space<vmem>>, vector<1x128xf32>
    %c0_23 = arith.constant 0 : index
    %c0_24 = arith.constant 0 : index
    %22 = vector.load %arg5[%c0_23, %c0_24] : memref<1x128xf32, #tpu.memory_space<vmem>>, vector<1x128xf32>
    %c0_25 = arith.constant 0 : index
    %c0_26 = arith.constant 0 : index
    %23 = vector.load %arg7[%c0_25, %c0_26] : memref<1x128xf32, #tpu.memory_space<vmem>>, vector<1x128xf32>
    %c0_27 = arith.constant 0 : index
    %c0_28 = arith.constant 0 : index
    %c0_29 = arith.constant 0 : index
    %24 = vector.load %arg1[%c0_27, %c0_28, %c0_29] : memref<1x256x128xf32, #tpu.memory_space<vmem>>, vector<1x256x128xf32>
    %25 = vector.shape_cast %24 : vector<1x256x128xf32> to vector<256x128xf32>
    %26 = arith.truncf %25 : vector<256x128xf32> to vector<256x128xbf16>
    %cst_30 = arith.constant dense<0.000000e+00> : vector<256x128xf32>
    %27 = tpu.matmul %26, %19, %cst_30 {dimension_numbers = #tpu.dot_dimension_numbers<[1], [0], [0], [1], [0, 0, 1, 1], [], []>} : vector<256x128xbf16>, vector<128x128xbf16>, vector<256x128xf32> -> vector<256x128xf32>
    %28 = vector.broadcast %21 : vector<1x128xf32> to vector<256x128xf32>
    %29 = arith.addf %27, %28 : vector<256x128xf32>
    %cst_31 = arith.constant 0.000000e+00 : f32
    %30 = vector.broadcast %cst_31 : f32 to vector<256x128xf32>
    %31 = arith.maximumf %29, %30 : vector<256x128xf32>
    %32 = arith.truncf %31 : vector<256x128xf32> to vector<256x128xbf16>
    %33 = vector.extract_strided_slice %32 {offsets = [0, 0], sizes = [16, 128], strides = [1, 1]} : vector<256x128xbf16> to vector<16x128xbf16>
    %c45 = arith.constant 45 : index
    %c0_32 = arith.constant 0 : index
    %34 = vector.load %arg11[%c45, %c0_32] : memref<376x128xbf16, #tpu.memory_space<vmem>>, vector<16x128xbf16>
    tpu.vector_store %arg11[%c45, %c0_32], %33 {strides = array<i32>} : memref<376x128xbf16, #tpu.memory_space<vmem>>, vector<16x128xbf16>,
    %35 = vector.extract_strided_slice %32 {offsets = [16, 0], sizes = [16, 128], strides = [1, 1]} : vector<256x128xbf16> to vector<16x128xbf16>
    %c63 = arith.constant 63 : index
    %c0_33 = arith.constant 0 : index
    %36 = vector.load %arg11[%c63, %c0_33] : memref<376x128xbf16, #tpu.memory_space<vmem>>, vector<16x128xbf16>
    tpu.vector_store %arg11[%c63, %c0_33], %35 {strides = array<i32>} : memref<376x128xbf16, #tpu.memory_space<vmem>>, vector<16x128xbf16>,
    %37 = vector.extract_strided_slice %32 {offsets = [32, 0], sizes = [16, 128], strides = [1, 1]} : vector<256x128xbf16> to vector<16x128xbf16>
    %c81 = arith.constant 81 : index
    %c0_34 = arith.constant 0 : index
    %38 = vector.load %arg11[%c81, %c0_34] : memref<376x128xbf16, #tpu.memory_space<vmem>>, vector<16x128xbf16>
    tpu.vector_store %arg11[%c81, %c0_34], %37 {strides = array<i32>} : memref<376x128xbf16, #tpu.memory_space<vmem>>, vector<16x128xbf16>,
    %39 = vector.extract_strided_slice %32 {offsets = [48, 0], sizes = [16, 128], strides = [1, 1]} : vector<256x128xbf16> to vector<16x128xbf16>
    %c99 = arith.constant 99 : index
    %c0_35 = arith.constant 0 : index
    %40 = vector.load %arg11[%c99, %c0_35] : memref<376x128xbf16, #tpu.memory_space<vmem>>, vector<16x128xbf16>
    tpu.vector_store %arg11[%c99, %c0_35], %39 {strides = array<i32>} : memref<376x128xbf16, #tpu.memory_space<vmem>>, vector<16x128xbf16>,
    %41 = vector.extract_strided_slice %32 {offsets = [64, 0], sizes = [16, 128], strides = [1, 1]} : vector<256x128xbf16> to vector<16x128xbf16>
    %c117 = arith.constant 117 : index
    %c0_36 = arith.constant 0 : index
    %42 = vector.load %arg11[%c117, %c0_36] : memref<376x128xbf16, #tpu.memory_space<vmem>>, vector<16x128xbf16>
    tpu.vector_store %arg11[%c117, %c0_36], %41 {strides = array<i32>} : memref<376x128xbf16, #tpu.memory_space<vmem>>, vector<16x128xbf16>,
    %43 = vector.extract_strided_slice %32 {offsets = [80, 0], sizes = [16, 128], strides = [1, 1]} : vector<256x128xbf16> to vector<16x128xbf16>
    %c135 = arith.constant 135 : index
    %c0_37 = arith.constant 0 : index
    %44 = vector.load %arg11[%c135, %c0_37] : memref<376x128xbf16, #tpu.memory_space<vmem>>, vector<16x128xbf16>
    tpu.vector_store %arg11[%c135, %c0_37], %43 {strides = array<i32>} : memref<376x128xbf16, #tpu.memory_space<vmem>>, vector<16x128xbf16>,
    %45 = vector.extract_strided_slice %32 {offsets = [96, 0], sizes = [16, 128], strides = [1, 1]} : vector<256x128xbf16> to vector<16x128xbf16>
    %c153 = arith.constant 153 : index
    %c0_38 = arith.constant 0 : index
    %46 = vector.load %arg11[%c153, %c0_38] : memref<376x128xbf16, #tpu.memory_space<vmem>>, vector<16x128xbf16>
    tpu.vector_store %arg11[%c153, %c0_38], %45 {strides = array<i32>} : memref<376x128xbf16, #tpu.memory_space<vmem>>, vector<16x128xbf16>,
    %47 = vector.extract_strided_slice %32 {offsets = [112, 0], sizes = [16, 128], strides = [1, 1]} : vector<256x128xbf16> to vector<16x128xbf16>
    %c171 = arith.constant 171 : index
    %c0_39 = arith.constant 0 : index
    %48 = vector.load %arg11[%c171, %c0_39] : memref<376x128xbf16, #tpu.memory_space<vmem>>, vector<16x128xbf16>
    tpu.vector_store %arg11[%c171, %c0_39], %47 {strides = array<i32>} : memref<376x128xbf16, #tpu.memory_space<vmem>>, vector<16x128xbf16>,
    %49 = vector.extract_strided_slice %32 {offsets = [128, 0], sizes = [16, 128], strides = [1, 1]} : vector<256x128xbf16> to vector<16x128xbf16>
    %c189 = arith.constant 189 : index
    %c0_40 = arith.constant 0 : index
    %50 = vector.load %arg11[%c189, %c0_40] : memref<376x128xbf16, #tpu.memory_space<vmem>>, vector<16x128xbf16>
    tpu.vector_store %arg11[%c189, %c0_40], %49 {strides = array<i32>} : memref<376x128xbf16, #tpu.memory_space<vmem>>, vector<16x128xbf16>,
    %51 = vector.extract_strided_slice %32 {offsets = [144, 0], sizes = [16, 128], strides = [1, 1]} : vector<256x128xbf16> to vector<16x128xbf16>
    %c207 = arith.constant 207 : index
    %c0_41 = arith.constant 0 : index
    %52 = vector.load %arg11[%c207, %c0_41] : memref<376x128xbf16, #tpu.memory_space<vmem>>, vector<16x128xbf16>
    tpu.vector_store %arg11[%c207, %c0_41], %51 {strides = array<i32>} : memref<376x128xbf16, #tpu.memory_space<vmem>>, vector<16x128xbf16>,
    %53 = vector.extract_strided_slice %32 {offsets = [160, 0], sizes = [16, 128], strides = [1, 1]} : vector<256x128xbf16> to vector<16x128xbf16>
    %c225 = arith.constant 225 : index
    %c0_42 = arith.constant 0 : index
    %54 = vector.load %arg11[%c225, %c0_42] : memref<376x128xbf16, #tpu.memory_space<vmem>>, vector<16x128xbf16>
    tpu.vector_store %arg11[%c225, %c0_42], %53 {strides = array<i32>} : memref<376x128xbf16, #tpu.memory_space<vmem>>, vector<16x128xbf16>,
    %55 = vector.extract_strided_slice %32 {offsets = [176, 0], sizes = [16, 128], strides = [1, 1]} : vector<256x128xbf16> to vector<16x128xbf16>
    %c243 = arith.constant 243 : index
    %c0_43 = arith.constant 0 : index
    %56 = vector.load %arg11[%c243, %c0_43] : memref<376x128xbf16, #tpu.memory_space<vmem>>, vector<16x128xbf16>
    tpu.vector_store %arg11[%c243, %c0_43], %55 {strides = array<i32>} : memref<376x128xbf16, #tpu.memory_space<vmem>>, vector<16x128xbf16>,
    %57 = vector.extract_strided_slice %32 {offsets = [192, 0], sizes = [16, 128], strides = [1, 1]} : vector<256x128xbf16> to vector<16x128xbf16>
    %c261 = arith.constant 261 : index
    %c0_44 = arith.constant 0 : index
    %58 = vector.load %arg11[%c261, %c0_44] : memref<376x128xbf16, #tpu.memory_space<vmem>>, vector<16x128xbf16>
    tpu.vector_store %arg11[%c261, %c0_44], %57 {strides = array<i32>} : memref<376x128xbf16, #tpu.memory_space<vmem>>, vector<16x128xbf16>,
    %59 = vector.extract_strided_slice %32 {offsets = [208, 0], sizes = [16, 128], strides = [1, 1]} : vector<256x128xbf16> to vector<16x128xbf16>
    %c279 = arith.constant 279 : index
    %c0_45 = arith.constant 0 : index
    %60 = vector.load %arg11[%c279, %c0_45] : memref<376x128xbf16, #tpu.memory_space<vmem>>, vector<16x128xbf16>
    tpu.vector_store %arg11[%c279, %c0_45], %59 {strides = array<i32>} : memref<376x128xbf16, #tpu.memory_space<vmem>>, vector<16x128xbf16>,
    %61 = vector.extract_strided_slice %32 {offsets = [224, 0], sizes = [16, 128], strides = [1, 1]} : vector<256x128xbf16> to vector<16x128xbf16>
    %c297 = arith.constant 297 : index
    %c0_46 = arith.constant 0 : index
    %62 = vector.load %arg11[%c297, %c0_46] : memref<376x128xbf16, #tpu.memory_space<vmem>>, vector<16x128xbf16>
    tpu.vector_store %arg11[%c297, %c0_46], %61 {strides = array<i32>} : memref<376x128xbf16, #tpu.memory_space<vmem>>, vector<16x128xbf16>,
    %63 = vector.extract_strided_slice %32 {offsets = [240, 0], sizes = [16, 128], strides = [1, 1]} : vector<256x128xbf16> to vector<16x128xbf16>
    %c315 = arith.constant 315 : index
    %c0_47 = arith.constant 0 : index
    %64 = vector.load %arg11[%c315, %c0_47] : memref<376x128xbf16, #tpu.memory_space<vmem>>, vector<16x128xbf16>
    tpu.vector_store %arg11[%c315, %c0_47], %63 {strides = array<i32>} : memref<376x128xbf16, #tpu.memory_space<vmem>>, vector<16x128xbf16>,
    %c7 = arith.constant 7 : index
    %c0_48 = arith.constant 0 : index
    %65 = vector.load %arg11[%c7, %c0_48] : memref<376x128xbf16, #tpu.memory_space<vmem>>, vector<324x128xbf16>
    %c0_49 = arith.constant 0 : index
    %c0_50 = arith.constant 0 : index
    %c0_51 = arith.constant 0 : index
    %66 = vector.load %arg4[%c0_49, %c0_50, %c0_51] : memref<9x128x128xbf16, #tpu.memory_space<vmem>>, vector<1x128x128xbf16>
    %67 = vector.shape_cast %66 : vector<1x128x128xbf16> to vector<128x128xbf16>
    %cst_52 = arith.constant dense<0.000000e+00> : vector<324x128xf32>
    %68 = tpu.matmul %65, %67, %cst_52 {dimension_numbers = #tpu.dot_dimension_numbers<[1], [0], [0], [1], [0, 0, 1, 1], [], []>} : vector<324x128xbf16>, vector<128x128xbf16>, vector<324x128xf32> -> vector<324x128xf32>
    %c8 = arith.constant 8 : index
    %c0_53 = arith.constant 0 : index
    %69 = vector.load %arg11[%c8, %c0_53] : memref<376x128xbf16, #tpu.memory_space<vmem>>, vector<324x128xbf16>
    %c1 = arith.constant 1 : index
    %c0_54 = arith.constant 0 : index
    %c0_55 = arith.constant 0 : index
    %70 = vector.load %arg4[%c1, %c0_54, %c0_55] : memref<9x128x128xbf16, #tpu.memory_space<vmem>>, vector<1x128x128xbf16>
    %71 = vector.shape_cast %70 : vector<1x128x128xbf16> to vector<128x128xbf16>
    %cst_56 = arith.constant dense<0.000000e+00> : vector<324x128xf32>
    %72 = tpu.matmul %69, %71, %cst_56 {dimension_numbers = #tpu.dot_dimension_numbers<[1], [0], [0], [1], [0, 0, 1, 1], [], []>} : vector<324x128xbf16>, vector<128x128xbf16>, vector<324x128xf32> -> vector<324x128xf32>
    %c9 = arith.constant 9 : index
    %c0_57 = arith.constant 0 : index
    %73 = vector.load %arg11[%c9, %c0_57] : memref<376x128xbf16, #tpu.memory_space<vmem>>, vector<324x128xbf16>
    %c2 = arith.constant 2 : index
    %c0_58 = arith.constant 0 : index
    %c0_59 = arith.constant 0 : index
    %74 = vector.load %arg4[%c2, %c0_58, %c0_59] : memref<9x128x128xbf16, #tpu.memory_space<vmem>>, vector<1x128x128xbf16>
    %75 = vector.shape_cast %74 : vector<1x128x128xbf16> to vector<128x128xbf16>
    %cst_60 = arith.constant dense<0.000000e+00> : vector<324x128xf32>
    %76 = tpu.matmul %73, %75, %cst_60 {dimension_numbers = #tpu.dot_dimension_numbers<[1], [0], [0], [1], [0, 0, 1, 1], [], []>} : vector<324x128xbf16>, vector<128x128xbf16>, vector<324x128xf32> -> vector<324x128xf32>
    %c25 = arith.constant 25 : index
    %c0_61 = arith.constant 0 : index
    %77 = vector.load %arg11[%c25, %c0_61] : memref<376x128xbf16, #tpu.memory_space<vmem>>, vector<324x128xbf16>
    %c3 = arith.constant 3 : index
    %c0_62 = arith.constant 0 : index
    %c0_63 = arith.constant 0 : index
    %78 = vector.load %arg4[%c3, %c0_62, %c0_63] : memref<9x128x128xbf16, #tpu.memory_space<vmem>>, vector<1x128x128xbf16>
    %79 = vector.shape_cast %78 : vector<1x128x128xbf16> to vector<128x128xbf16>
    %cst_64 = arith.constant dense<0.000000e+00> : vector<324x128xf32>
    %80 = tpu.matmul %77, %79, %cst_64 {dimension_numbers = #tpu.dot_dimension_numbers<[1], [0], [0], [1], [0, 0, 1, 1], [], []>} : vector<324x128xbf16>, vector<128x128xbf16>, vector<324x128xf32> -> vector<324x128xf32>
    %c26_65 = arith.constant 26 : index
    %c0_66 = arith.constant 0 : index
    %81 = vector.load %arg11[%c26_65, %c0_66] : memref<376x128xbf16, #tpu.memory_space<vmem>>, vector<324x128xbf16>
    %c4 = arith.constant 4 : index
    %c0_67 = arith.constant 0 : index
    %c0_68 = arith.constant 0 : index
    %82 = vector.load %arg4[%c4, %c0_67, %c0_68] : memref<9x128x128xbf16, #tpu.memory_space<vmem>>, vector<1x128x128xbf16>
    %83 = vector.shape_cast %82 : vector<1x128x128xbf16> to vector<128x128xbf16>
    %cst_69 = arith.constant dense<0.000000e+00> : vector<324x128xf32>
    %84 = tpu.matmul %81, %83, %cst_69 {dimension_numbers = #tpu.dot_dimension_numbers<[1], [0], [0], [1], [0, 0, 1, 1], [], []>} : vector<324x128xbf16>, vector<128x128xbf16>, vector<324x128xf32> -> vector<324x128xf32>
    %c27 = arith.constant 27 : index
    %c0_70 = arith.constant 0 : index
    %85 = vector.load %arg11[%c27, %c0_70] : memref<376x128xbf16, #tpu.memory_space<vmem>>, vector<324x128xbf16>
    %c5 = arith.constant 5 : index
    %c0_71 = arith.constant 0 : index
    %c0_72 = arith.constant 0 : index
    %86 = vector.load %arg4[%c5, %c0_71, %c0_72] : memref<9x128x128xbf16, #tpu.memory_space<vmem>>, vector<1x128x128xbf16>
    %87 = vector.shape_cast %86 : vector<1x128x128xbf16> to vector<128x128xbf16>
    %cst_73 = arith.constant dense<0.000000e+00> : vector<324x128xf32>
    %88 = tpu.matmul %85, %87, %cst_73 {dimension_numbers = #tpu.dot_dimension_numbers<[1], [0], [0], [1], [0, 0, 1, 1], [], []>} : vector<324x128xbf16>, vector<128x128xbf16>, vector<324x128xf32> -> vector<324x128xf32>
    %c43 = arith.constant 43 : index
    %c0_74 = arith.constant 0 : index
    %89 = vector.load %arg11[%c43, %c0_74] : memref<376x128xbf16, #tpu.memory_space<vmem>>, vector<324x128xbf16>
    %c6 = arith.constant 6 : index
    %c0_75 = arith.constant 0 : index
    %c0_76 = arith.constant 0 : index
    %90 = vector.load %arg4[%c6, %c0_75, %c0_76] : memref<9x128x128xbf16, #tpu.memory_space<vmem>>, vector<1x128x128xbf16>
    %91 = vector.shape_cast %90 : vector<1x128x128xbf16> to vector<128x128xbf16>
    %cst_77 = arith.constant dense<0.000000e+00> : vector<324x128xf32>
    %92 = tpu.matmul %89, %91, %cst_77 {dimension_numbers = #tpu.dot_dimension_numbers<[1], [0], [0], [1], [0, 0, 1, 1], [], []>} : vector<324x128xbf16>, vector<128x128xbf16>, vector<324x128xf32> -> vector<324x128xf32>
    %c44 = arith.constant 44 : index
    %c0_78 = arith.constant 0 : index
    %93 = vector.load %arg11[%c44, %c0_78] : memref<376x128xbf16, #tpu.memory_space<vmem>>, vector<324x128xbf16>
    %c7_79 = arith.constant 7 : index
    %c0_80 = arith.constant 0 : index
    %c0_81 = arith.constant 0 : index
    %94 = vector.load %arg4[%c7_79, %c0_80, %c0_81] : memref<9x128x128xbf16, #tpu.memory_space<vmem>>, vector<1x128x128xbf16>
    %95 = vector.shape_cast %94 : vector<1x128x128xbf16> to vector<128x128xbf16>
    %cst_82 = arith.constant dense<0.000000e+00> : vector<324x128xf32>
    %96 = tpu.matmul %93, %95, %cst_82 {dimension_numbers = #tpu.dot_dimension_numbers<[1], [0], [0], [1], [0, 0, 1, 1], [], []>} : vector<324x128xbf16>, vector<128x128xbf16>, vector<324x128xf32> -> vector<324x128xf32>
    %c45_83 = arith.constant 45 : index
    %c0_84 = arith.constant 0 : index
    %97 = vector.load %arg11[%c45_83, %c0_84] : memref<376x128xbf16, #tpu.memory_space<vmem>>, vector<324x128xbf16>
    %c8_85 = arith.constant 8 : index
    %c0_86 = arith.constant 0 : index
    %c0_87 = arith.constant 0 : index
    %98 = vector.load %arg4[%c8_85, %c0_86, %c0_87] : memref<9x128x128xbf16, #tpu.memory_space<vmem>>, vector<1x128x128xbf16>
    %99 = vector.shape_cast %98 : vector<1x128x128xbf16> to vector<128x128xbf16>
    %cst_88 = arith.constant dense<0.000000e+00> : vector<324x128xf32>
    %100 = tpu.matmul %97, %99, %cst_88 {dimension_numbers = #tpu.dot_dimension_numbers<[1], [0], [0], [1], [0, 0, 1, 1], [], []>} : vector<324x128xbf16>, vector<128x128xbf16>, vector<324x128xf32> -> vector<324x128xf32>
    %101 = arith.addf %68, %72 : vector<324x128xf32>
    %102 = arith.addf %76, %80 : vector<324x128xf32>
    %103 = arith.addf %84, %88 : vector<324x128xf32>
    %104 = arith.addf %92, %96 : vector<324x128xf32>
    %105 = arith.addf %101, %102 : vector<324x128xf32>
    %106 = arith.addf %103, %104 : vector<324x128xf32>
    %107 = arith.addf %105, %106 : vector<324x128xf32>
    %108 = arith.addf %107, %100 : vector<324x128xf32>
    %109 = vector.broadcast %22 : vector<1x128xf32> to vector<324x128xf32>
    %110 = arith.addf %108, %109 : vector<324x128xf32>
    %cst_89 = arith.constant 0.000000e+00 : f32
    %111 = vector.broadcast %cst_89 : f32 to vector<324x128xf32>
    %112 = arith.maximumf %110, %111 : vector<324x128xf32>
    %113 = arith.truncf %112 : vector<324x128xf32> to vector<324x128xbf16>
    %114 = vector.extract_strided_slice %113 {offsets = [19, 0], sizes = [16, 128], strides = [1, 1]} : vector<324x128xbf16> to vector<16x128xbf16>
    %115 = vector.extract_strided_slice %113 {offsets = [37, 0], sizes = [16, 128], strides = [1, 1]} : vector<324x128xbf16> to vector<16x128xbf16>
    %116 = vector.extract_strided_slice %113 {offsets = [55, 0], sizes = [16, 128], strides = [1, 1]} : vector<324x128xbf16> to vector<16x128xbf16>
    %117 = vector.extract_strided_slice %113 {offsets = [73, 0], sizes = [16, 128], strides = [1, 1]} : vector<324x128xbf16> to vector<16x128xbf16>
    %118 = vector.extract_strided_slice %113 {offsets = [91, 0], sizes = [16, 128], strides = [1, 1]} : vector<324x128xbf16> to vector<16x128xbf16>
    %119 = vector.extract_strided_slice %113 {offsets = [109, 0], sizes = [16, 128], strides = [1, 1]} : vector<324x128xbf16> to vector<16x128xbf16>
    %120 = vector.extract_strided_slice %113 {offsets = [127, 0], sizes = [16, 128], strides = [1, 1]} : vector<324x128xbf16> to vector<16x128xbf16>
    %121 = vector.extract_strided_slice %113 {offsets = [145, 0], sizes = [16, 128], strides = [1, 1]} : vector<324x128xbf16> to vector<16x128xbf16>
    %122 = vector.extract_strided_slice %113 {offsets = [163, 0], sizes = [16, 128], strides = [1, 1]} : vector<324x128xbf16> to vector<16x128xbf16>
    %123 = vector.extract_strided_slice %113 {offsets = [181, 0], sizes = [16, 128], strides = [1, 1]} : vector<324x128xbf16> to vector<16x128xbf16>
    %124 = vector.extract_strided_slice %113 {offsets = [199, 0], sizes = [16, 128], strides = [1, 1]} : vector<324x128xbf16> to vector<16x128xbf16>
    %125 = vector.extract_strided_slice %113 {offsets = [217, 0], sizes = [16, 128], strides = [1, 1]} : vector<324x128xbf16> to vector<16x128xbf16>
    %126 = vector.extract_strided_slice %113 {offsets = [235, 0], sizes = [16, 128], strides = [1, 1]} : vector<324x128xbf16> to vector<16x128xbf16>
    %127 = vector.extract_strided_slice %113 {offsets = [253, 0], sizes = [16, 128], strides = [1, 1]} : vector<324x128xbf16> to vector<16x128xbf16>
    %128 = vector.extract_strided_slice %113 {offsets = [271, 0], sizes = [16, 128], strides = [1, 1]} : vector<324x128xbf16> to vector<16x128xbf16>
    %129 = vector.extract_strided_slice %113 {offsets = [289, 0], sizes = [16, 128], strides = [1, 1]} : vector<324x128xbf16> to vector<16x128xbf16>
    %130 = tpu.concatenate %114, %115, %116, %117, %118, %119, %120, %121, %122, %123, %124, %125, %126, %127, %128, %129 in 0 : vector<16x128xbf16>, vector<16x128xbf16>, vector<16x128xbf16>, vector<16x128xbf16>, vector<16x128xbf16>, vector<16x128xbf16>, vector<16x128xbf16>, vector<16x128xbf16>, vector<16x128xbf16>, vector<16x128xbf16>, vector<16x128xbf16>, vector<16x128xbf16>, vector<16x128xbf16>, vector<16x128xbf16>, vector<16x128xbf16>, vector<16x128xbf16> -> vector<256x128xbf16>
    %cst_90 = arith.constant dense<0.000000e+00> : vector<256x128xf32>
    %131 = tpu.matmul %130, %20, %cst_90 {dimension_numbers = #tpu.dot_dimension_numbers<[1], [0], [0], [1], [0, 0, 1, 1], [], []>} : vector<256x128xbf16>, vector<128x128xbf16>, vector<256x128xf32> -> vector<256x128xf32>
    %132 = vector.broadcast %23 : vector<1x128xf32> to vector<256x128xf32>
    %133 = arith.addf %131, %132 : vector<256x128xf32>
    %c0_91 = arith.constant 0 : index
    %c0_92 = arith.constant 0 : index
    %134 = vector.load %arg8[%c0_91, %c0_92] : memref<128x128xbf16, #tpu.memory_space<vmem>>, vector<128x128xbf16>
    %cst_93 = arith.constant dense<0.000000e+00> : vector<256x128xf32>
    %135 = tpu.matmul %26, %134, %cst_93 {dimension_numbers = #tpu.dot_dimension_numbers<[1], [0], [0], [1], [0, 0, 1, 1], [], []>} : vector<256x128xbf16>, vector<128x128xbf16>, vector<256x128xf32> -> vector<256x128xf32>
    %c0_94 = arith.constant 0 : index
    %c0_95 = arith.constant 0 : index
    %136 = vector.load %arg9[%c0_94, %c0_95] : memref<1x128xf32, #tpu.memory_space<vmem>>, vector<1x128xf32>
    %137 = vector.broadcast %136 : vector<1x128xf32> to vector<256x128xf32>
    %138 = arith.addf %135, %137 : vector<256x128xf32>
    %139 = arith.addf %133, %138 : vector<256x128xf32>
    %cst_96 = arith.constant 0.000000e+00 : f32
    %140 = vector.broadcast %cst_96 : f32 to vector<256x128xf32>
    %141 = arith.maximumf %139, %140 : vector<256x128xf32>
    %c0_97 = arith.constant 0 : index
    %c0_98 = arith.constant 0 : index
    %c0_99 = arith.constant 0 : index
    %142 = vector.load %arg10[%c0_97, %c0_98, %c0_99] : memref<1x256x128xf32, #tpu.memory_space<vmem>>, vector<1x256x128xf32>
    %143 = vector.shape_cast %142 : vector<1x256x128xf32> to vector<256x128xf32>
    %144 = vector.shape_cast %141 : vector<256x128xf32> to vector<1x256x128xf32>
    tpu.vector_store %arg10[%c0_97, %c0_98, %c0_99], %144 {strides = array<i32>} : memref<1x256x128xf32, #tpu.memory_space<vmem>>, vector<1x256x128xf32>,
    return
  }
  func.func @transform_0(%arg0: i32) -> (i32, i32, i32) {
    %c0_i32 = arith.constant 0 : i32
    %c0_i32_0 = arith.constant 0 : i32
    %c0_i32_1 = arith.constant 0 : i32
    return %arg0, %c0_i32, %c0_i32_0 : i32, i32, i32
  }
  func.func @transform_1(%arg0: i32) -> (i32, i32) {
    %c0_i32 = arith.constant 0 : i32
    %c0_i32_0 = arith.constant 0 : i32
    %c0_i32_1 = arith.constant 0 : i32
    return %c0_i32, %c0_i32_0 : i32, i32
  }
  func.func @transform_2(%arg0: i32) -> (i32, i32) {
    %c0_i32 = arith.constant 0 : i32
    %c0_i32_0 = arith.constant 0 : i32
    %c0_i32_1 = arith.constant 0 : i32
    return %c0_i32, %c0_i32_0 : i32, i32
  }
  func.func @transform_3(%arg0: i32) -> (i32, i32, i32) {
    %c0_i32 = arith.constant 0 : i32
    %c0_i32_0 = arith.constant 0 : i32
    %c0_i32_1 = arith.constant 0 : i32
    %c0_i32_2 = arith.constant 0 : i32
    return %c0_i32, %c0_i32_0, %c0_i32_1 : i32, i32, i32
  }
  func.func @transform_4(%arg0: i32) -> (i32, i32) {
    %c0_i32 = arith.constant 0 : i32
    %c0_i32_0 = arith.constant 0 : i32
    %c0_i32_1 = arith.constant 0 : i32
    return %c0_i32, %c0_i32_0 : i32, i32
  }
  func.func @transform_5(%arg0: i32) -> (i32, i32) {
    %c0_i32 = arith.constant 0 : i32
    %c0_i32_0 = arith.constant 0 : i32
    %c0_i32_1 = arith.constant 0 : i32
    return %c0_i32, %c0_i32_0 : i32, i32
  }
  func.func @transform_6(%arg0: i32) -> (i32, i32) {
    %c0_i32 = arith.constant 0 : i32
    %c0_i32_0 = arith.constant 0 : i32
    %c0_i32_1 = arith.constant 0 : i32
    return %c0_i32, %c0_i32_0 : i32, i32
  }
  func.func @transform_7(%arg0: i32) -> (i32, i32) {
    %c0_i32 = arith.constant 0 : i32
    %c0_i32_0 = arith.constant 0 : i32
    %c0_i32_1 = arith.constant 0 : i32
    return %c0_i32, %c0_i32_0 : i32, i32
  }
  func.func @transform_8(%arg0: i32) -> (i32, i32) {
    %c0_i32 = arith.constant 0 : i32
    %c0_i32_0 = arith.constant 0 : i32
    %c0_i32_1 = arith.constant 0 : i32
    return %c0_i32, %c0_i32_0 : i32, i32
  }
  func.func @transform_9(%arg0: i32) -> (i32, i32, i32) {
    %c0_i32 = arith.constant 0 : i32
    %c0_i32_0 = arith.constant 0 : i32
    %c0_i32_1 = arith.constant 0 : i32
    return %arg0, %c0_i32, %c0_i32_0 : i32, i32, i32
  }
}

</mosaic_0001>

<bundles_post_ra>
// kernel: bottleneck_forward.1
= control target key start
LH: loop header
LB: loop body
LE: loop exit
PB: predicated region body
PF: predicated region fallthrough
CT: control target
= control target key end

     0   :  { %14 = vsyncpa [#allocation4], 0  ;;  %s12578_s0 = inlined_call_operand.vmem [shape: f32[2,256,128], index: 0, kind: input, shape index: {}]   ;;  %s12579_s1 = inlined_call_operand.vmem [shape: bf16[128,128], index: 1, kind: input, shape index: {}]   ;;  %s12580_s2 = inlined_call_operand.vmem [shape: f32[1,128], index: 2, kind: input, shape index: {}]   ;;  %s12581_s3 = inlined_call_operand.vmem [shape: bf16[9,128,128], index: 3, kind: input, shape index: {}]   ;;  %s12582_s4 = inlined_call_operand.vmem [shape: f32[1,128], index: 4, kind: input, shape index: {}]   ;;  %s12583_s5 = inlined_call_operand.vmem [shape: bf16[128,128], index: 5, kind: input, shape index: {}]   ;;  %s12584_s6 = inlined_call_operand.vmem [shape: f32[1,128], index: 6, kind: input, shape index: {}]   ;;  %s12585_s7 = inlined_call_operand.vmem [shape: bf16[128,128], index: 7, kind: input, shape index: {}]   ;;  %s12586_s8 = inlined_call_operand.vmem [shape: f32[1,128], index: 8, kind: input, shape index: {}]   ;;  %s12587_s9 = inlined_call_operand.hbm [shape: f32[2,256,128], index: 9, kind: output, shape index: {}]  }
   0x1   :  { %16 = vsyncpa [#allocation4 + $0x1], 0  ;;  %s8940_s30 = smov 0   ;;  %s8942_s10 = smov 0  }
   0x2   :  { %s8944_s11 = smov 0   ;;  %s8946_s12 = smov 0  }
   0x3 LB: > { %s8961_s13 = sadd.s32 4294967295, %s8882_s12   ;;  %s6644_s14 = sadd.s32 4294967294, %s8882_s12   ;;  %s8882_s12 = sphi %s8946_s12, %s13444_s12   ;;  %s8878_s11 = sphi %s8944_s11, %s13443_s11   ;;  %s8874_s10 = sphi %s8942_s10, %s13442_s10   ;;  %s8870_s30 = sphi %s8940_s30, %s13441_s30  }
   0x4   : > { %s8965_s15 = sadd.s32 1, %s8882_s12   ;;  %s223_s16 = sadd.s32 1, %s8878_s11 }
   0x5   : > { %s220_s17 = ssub.s32 %s8882_s12, %s8965_s15  ;;  %p233_p0 = scmp.ne.s32.totalorder %s8878_s11, %s8874_s10 }
   0x6   : > { %p221_p1 = scmp.eq.s32.totalorder %s220_s17, 0  ;;  %p234_p2 = scmp.eq.s32.totalorder %s8961_s13, 1 }
   0x7   : > { %p239_p3 = scmp.ne.s32.totalorder %s8874_s10, %s8870_s30  ;;  %p240_p4 = scmp.eq.s32.totalorder %s6644_s14, 1 }
   0x8   : > { %s8976_s18 = scalar_select %p221_p1, %s8878_s11, %s223_s16  }
   0x9   : > { %p8978_p5 = por %p234_p2, %p233_p0  ;;  %p8982_p6 = por %p240_p4, %p239_p3 }
   0xa   : > { %p6647_p7 = scmp.ge.s32.totalorder %s8882_s12, 1  ;;  %p290_p8 = scmp.lt.s32.totalorder %s8882_s12, 3 }
   0xc   : > { %p291_p9 = pnand %p6647_p7, %p290_p8 }
   0xe   : > { %294 = sbr.rel (%p291_p9) target bundleno = 1628 (0x65c), region = 56 }
  0x15   : > { %v8592_v0 = vld [vmem:[%s12579_s1] sm:$0xff]   ;;  %p326_p10 = scmp.lt.s32.totalorder %s8961_s13, 1  ;;  %v8593_v1 = vld [vmem:[%s12579_s1 + $0x8] sm:$0xff]   ;;  %v12593_v2 = vmov 0.0   ;;  %v8594_v3 = vld [vmem:[%s12579_s1 + $0x10] sm:$0xff]   ;;  %vm348_vm1 = vcmask 1043458  }
  0x16   : > { %7392 = vmatprep.subr.bf16.mxu0 %v8592_v0  ;;  %7440 = vmatprep.subr.bf16.mxu1 %v12593_v2  ;;  %v8595_v4 = vld [vmem:[%s12579_s1 + $0x18] sm:$0xff]   ;;  %v8596_v8 = vld [vmem:[%s12579_s1 + $0x20] sm:$0xff]   ;;  %v8597_v9 = vld [vmem:[%s12579_s1 + $0x28] sm:$0xff]   ;;  %vm349_vm0 = vsmask.f32 3338  ;;  %vm354_vm3 = vcmask 1043459  }
  0x17   : > { %s327_s25 = scalar_select %p326_p10, %s8961_s13, 1  ;;  %7393 = vmatpush3.bf16.msra.mxu0 %v8592_v0  ;;  %v8598_v10 = vld [vmem:[%s12579_s1 + $0x30] sm:$0xff]   ;;  %v8600_v11 = vld [vmem:[%s12581_s3 + $0x40] sm:$0xff]   ;;  %v8601_v12 = vld [vmem:[%s12581_s3 + $0x48] sm:$0xff]   ;;  %vm355_vm4 = vsmask.f32 7950 }
  0x18   : > { %7394 = vmatprep.subr.bf16.mxu0 %v8593_v1  ;;  %7441 = vmatpush3.bf16.msra.mxu1 %v8600_v11  ;;  %v8599_v13 = vld [vmem:[%s12579_s1 + $0x38] sm:$0xff]   ;;  %vm9033_vm2 = vmand %vm348_vm1, %vm349_vm0  ;;  %v8602_v17 = vld [vmem:[%s12581_s3 + $0x50] sm:$0xff]   ;;  %vm334_vm5 = vcmask 1042432   ;;  %vm12591_vm6 = vsmask.f32 2304  ;;  %vm12588_vm9 = vmmov 0  }
  0x19   : > { %s7025_s28 = sshll.u32 %s327_s25, 8  ;;  %7442 = vmatprep.subr.bf16.mxu1 %v12593_v2  ;;  %v351_v18 = vld [vmem:[#allocation2 + $0x1c] sm:$0xc]  ;;  %v8604_v25 = vld [vmem:[%s12581_s3 + $0x60] sm:$0xff]   ;;  %v8605_v30 = vld [vmem:[%s12581_s3 + $0x68] sm:$0xff]   ;;  %7456 = vmatprep.mubr.msk.bf16.mxu1 %vm12588_vm9, %v12593_v2  ;;  %vm360_vm10 = vcmask 1040384  }
  0x1a   : > { %s9003_s16 = scalar_lea.vmem %s12578_s0, %s7025_s28  ;;  %v352_v21 = vsel %vm9033_vm2, 0, %v351_v18  ;;  %v8603_v22 = vld [vmem:[%s12581_s3 + $0x58] sm:$0xff]   ;;  %vm9147_vm7 = vmand %vm334_vm5, %vm12591_vm6  ;;  %v8612_v18 = vld [vmem:[%s12581_s3 + $0xd0] sm:$0xff]   ;;  %vm12590_vm11 = vsmask.f32 256  ;;  %vm366_vm13 = vcmask 1041408  }
  0x1b   : > { %7395 = vmatpush3.bf16.msra.mxu0 %v8593_v1  ;;  %v455_v5 = vld [vmem:[%s9003_s16] sm:$0xff]  ;;  %v456_v6 = vld [vmem:[%s9003_s16 + $0x8] sm:$0xff]  ;;  %v457_v15 = vld [vmem:[%s9003_s16 + $0x10] sm:$0xff]  ;;  %353 = vst [vmem:[#allocation2 + $0x1c] sm:$0xc] %v352_v21  ;;  %vm372_vm0 = vcmask 1042433  }
  0x1c   : > { %7396 = vmatprep.subr.bf16.mxu0 %v8594_v3  ;;  %v9010_v7 = vpack.c.bf16 %v456_v6, %v455_v5  ;;  %v458_v16 = vld [vmem:[%s9003_s16 + $0x18] sm:$0xff]  ;;  %7443 = vmatpush3.bf16.msra.mxu1 %v8601_v12  ;;  %v459_v19 = vld [vmem:[%s9003_s16 + $0x20] sm:$0xff]  ;;  %v460_v20 = vld [vmem:[%s9003_s16 + $0x28] sm:$0xff]  ;;  %vm367_vm14 = vsmask.f32 1282  ;;  %vm340_vm5 = vcmask 1043457  }
  0x1d   : > { %7444 = vmatprep.subr.bf16.mxu1 %v12593_v2  ;;  %v9050_v23 = vpack.c.bf16 %v458_v16, %v457_v15  ;;  %v9053_v24 = vpack.c.bf16 %v460_v20, %v459_v19  ;;  %v461_v26 = vld [vmem:[%s9003_s16 + $0x30] sm:$0xff]  ;;  %v462_v27 = vld [vmem:[%s9003_s16 + $0x38] sm:$0xff]  ;;  %v463_v28 = vld [vmem:[%s9003_s16 + $0x40] sm:$0xff]  ;;  %v8886_v19 = vmov 0   ;;  %s323_s25 = sand.u32 1, %s8874_s10   ;;  %s7058_s28 = sshll.u32 %s8961_s13, 12 }
  0x1e   : > { %12685 = vst [vmem:[#allocation6_spill] sm:$0xff] %v9010_v7  ;;  %7408 = vmatprep.mubr.bf16.mxu0 %v9010_v7  ;;  %v464_v29 = vld [vmem:[%s9003_s16 + $0x48] sm:$0xff]  ;;  %v9069_v31 = vpack.c.bf16 %v462_v27, %v461_v26  ;;  %v465_v33 = vld [vmem:[%s9003_s16 + $0x50] sm:$0xff]  ;;  %v466_v34 = vld [vmem:[%s9003_s16 + $0x58] sm:$0xff]  ;;  %s6648_s26 = sshll.u32 %s323_s25, 8  ;;  %s12528_s21 = scalar_lea.hbm %s12587_s9, %s7058_s28 }
  0x1f   : > { %7397 = vmatpush3.bf16.msra.mxu0 %v8594_v3  ;;  %12688 = vst [vmem:[#allocation7_spill] sm:$0xff] %v9050_v23  ;;  %12689 = vst [vmem:[#allocation8_spill] sm:$0xff] %v9053_v24  ;;  %v9072_v32 = vpack.c.bf16 %v464_v29, %v463_v28  ;;  %v467_v35 = vld [vmem:[%s9003_s16 + $0x60] sm:$0xff]  ;;  %v468_v36 = vld [vmem:[%s9003_s16 + $0x68] sm:$0xff]  ;;  %v9081_v37 = vpack.c.bf16 %v466_v34, %v465_v33  ;;  %s12448_s27 = scalar_lea.vmem [#allocation3], %s6648_s26  ;;  %s12537_s13 = scalar_lea.sflag [#allocation4], %s323_s25 }
  0x20   : > { %7398 = vmatprep.subr.bf16.mxu0 %v8595_v4  ;;  %7445 = vmatpush3.bf16.msra.mxu1 %v8602_v17  ;;  %12690 = vst [vmem:[#allocation9_spill] sm:$0xff] %v9069_v31  ;;  %v9083_v38 = vpack.c.bf16 %v468_v36, %v467_v35  ;;  %v469_v39 = vld [vmem:[%s9003_s16 + $0x70] sm:$0xff]  ;;  %v470_v40 = vld [vmem:[%s9003_s16 + $0x78] sm:$0xff]  ;;  %v471_v41 = vld [vmem:[%s9003_s16 + $0x80] sm:$0xff]  ;;  %s6582_s29 = sshll.u32 %s12448_s27, 4  ;;  %s8887_s23 = smov [#allocation3]   ;;  %s12530_s29 = int_to_ptr.vmem [resolvable:$true] %s6582_s29 }
  0x21   : > { %7446 = vmatprep.subr.bf16.mxu1 %v12593_v2  ;;  %12691 = vst [vmem:[#allocation10_spill] sm:$0xff] %v9072_v32  ;;  %12692 = vst [vmem:[#allocation11_spill] sm:$0xff] %v9081_v37  ;;  %v472_v42 = vld [vmem:[%s9003_s16 + $0x88] sm:$0xff]  ;;  %v9091_v43 = vpack.c.bf16 %v470_v40, %v469_v39  ;;  %v473_v45 = vld [vmem:[%s9003_s16 + $0x90] sm:$0xff]  ;;  %s8820_s22 = scalar_lea.vmem %s12530_s29, 4096 }
  0x22   : > { %12693 = vst [vmem:[#allocation12_spill] sm:$0xff] %v9083_v38  ;;  %v9093_v44 = vpack.c.bf16 %v472_v42, %v471_v41  ;;  %v474_v46 = vld [vmem:[%s9003_s16 + $0x98] sm:$0xff]  ;;  %v475_v47 = vld [vmem:[%s9003_s16 + $0xa0] sm:$0xff]  ;;  %v476_v48 = vld [vmem:[%s9003_s16 + $0xa8] sm:$0xff]  ;;  %p8821_p11 = scmp.ne.s32.totalorder %s12530_s29, %s8820_s22 }
  0x23   : > { %7399 = vmatpush3.bf16.msra.mxu0 %v8595_v4  ;;  %12694 = vst [vmem:[#allocation13_spill] sm:$0xff] %v9091_v43  ;;  %v9101_v49 = vpack.c.bf16 %v474_v46, %v473_v45  ;;  %v9103_v50 = vpack.c.bf16 %v476_v48, %v475_v47  ;;  %v477_v51 = vld [vmem:[%s9003_s16 + $0xb0] sm:$0xff]  ;;  %v478_v52 = vld [vmem:[%s9003_s16 + $0xb8] sm:$0xff]  ;;  %v479_v53 = vld [vmem:[%s9003_s16 + $0xc0] sm:$0xff] }
  0x24   : > { %7400 = vmatprep.subr.bf16.mxu0 %v8596_v8  ;;  %7447 = vmatpush3.bf16.msra.mxu1 %v8603_v22  ;;  %12695 = vst [vmem:[#allocation14_spill] sm:$0xff] %v9093_v44  ;;  %v480_v54 = vld [vmem:[%s9003_s16 + $0xc8] sm:$0xff]  ;;  %v9111_v55 = vpack.c.bf16 %v478_v52, %v477_v51  ;;  %v481_v57 = vld [vmem:[%s9003_s16 + $0xd0] sm:$0xff]  ;;  %v482_v58 = vld [vmem:[%s9003_s16 + $0xd8] sm:$0xff]  ;;  %p8822_p12 = pnand %p8821_p11, %p8978_p5 }
  0x25   : > { %7448 = vmatprep.subr.bf16.mxu1 %v12593_v2  ;;  %12696 = vst [vmem:[#allocation15_spill] sm:$0xff] %v9101_v49  ;;  %12697 = vst [vmem:[#allocation16_spill] sm:$0xff] %v9103_v50  ;;  %v9113_v56 = vpack.c.bf16 %v480_v54, %v479_v53  ;;  %v483_v59 = vld [vmem:[%s9003_s16 + $0xe0] sm:$0xff]  ;;  %v484_v60 = vld [vmem:[%s9003_s16 + $0xe8] sm:$0xff]  ;;  %v9121_v61 = vpack.c.bf16 %v482_v58, %v481_v57 }
  0x26   : > { %12698 = vst [vmem:[#allocation17_spill] sm:$0xff] %v9111_v55  ;;  %v9123_v62 = vpack.c.bf16 %v484_v60, %v483_v59  ;;  %v485_v63 = vld [vmem:[%s9003_s16 + $0xf0] sm:$0xff]  ;;  %v486_v0 = vld [vmem:[%s9003_s16 + $0xf8] sm:$0xff]  ;;  %v8607_v3 = vld [vmem:[%s12581_s3 + $0xc0] sm:$0xff]   ;;  %p8823_p13 = pneg %p8822_p12  ;;  %s8824_s16 = sshll.u32 %s8887_s23, 4  ;;  %s8825_s16 = int_to_ptr.vmem [resolvable:$false] %s8824_s16 }
  0x27   : > { %7401 = vmatpush3.bf16.msra.mxu0 %v8596_v8  ;;  %12699 = vst [vmem:[#allocation18_spill] sm:$0xff] %v9113_v56  ;;  %12700 = vst [vmem:[#allocation19_spill] sm:$0xff] %v9121_v61  ;;  %v9129_v1 = vpack.c.bf16 %v486_v0, %v485_v63  ;;  %v8606_v4 = vld [vmem:[%s12581_s3 + $0x70] sm:$0xff]   ;;  %v8609_v5 = vld [vmem:[%s12581_s3 + $0xc8] sm:$0xff]   ;;  %s8826_s24 = scalar_lea.vmem %s8825_s16, 8192  ;;  %p8827_p0 = scmp.lt.s32.totalorder %s12530_s29, %s8825_s16 }
  0x28   : > { %7402 = vmatprep.subr.bf16.mxu0 %v8597_v9  ;;  %7449 = vmatpush3.bf16.msra.mxu1 %v8604_v25  ;;  %12701 = vst [vmem:[#allocation20_spill] sm:$0xff] %v9123_v62  ;;  %v8608_v6 = vld [vmem:[%s12581_s3 + $0x78] sm:$0xff]   ;;  %vm9151_vm8 = vmand %vm354_vm3, %vm355_vm4  ;;  %v1320_v12 = vld [vmem:[#allocation2 + $0x4] sm:$0xf]  ;;  %vm373_vm3 = vsmask.f32 2310  ;;  %p8828_p1 = scmp.lt.s32.totalorder %s8826_s24, %s8820_s22 }
  0x29   : > { %7450 = vmatprep.subr.bf16.mxu1 %v12593_v2  ;;  %12702 = vst [vmem:[#allocation21_spill] sm:$0xff] %v9129_v1  ;;  %v357_v16 = vld [vmem:[#allocation2 + $0x24] sm:$0x8]  ;;  %332 = vst [vmem:[#allocation2 + $0xc] sm:$0xe] %v8886_v19  ;;  %v8614_v26 = vld [vmem:[%s12581_s3 + $0xd8] sm:$0xff]  }
  0x2a   : > { %v358_v17 = vsel %vm9151_vm8, 0, %v357_v16  ;;  %333 = vst [vmem:[#allocation2 + $0x10] sm:$0xf] %v8886_v19  ;;  %346 = vst [vmem:[#allocation2 + $0xa8] sm:$0xf] %v8886_v19  ;;  %v8616_v33 = vld [vmem:[%s12581_s3 + $0xe0] sm:$0xff]   ;;  %p8829_p2 = por %p8828_p1, %p8827_p0 }
  0x2b   : > { %7403 = vmatpush3.bf16.msra.mxu0 %v8597_v9  ;;  %v337_v9 = vld [vmem:[#allocation2 + $0x14] sm:$0x7]  ;;  %359 = vst [vmem:[#allocation2 + $0x24] sm:$0x8] %v358_v17  ;;  %347 = vst [vmem:[#allocation2 + $0xac] sm:$0x7] %v8886_v19 }
  0x2c   : > { %7404 = vmatprep.subr.bf16.mxu0 %v8598_v10  ;;  %7451 = vmatpush3.bf16.msra.mxu1 %v8605_v30  ;;  %v338_v11 = vsel %vm9147_vm7, 0, %v337_v9  ;;  %vm9174_vm12 = vmand %vm360_vm10, %vm12590_vm11  ;;  %v363_v21 = vld [vmem:[#allocation2 + $0x28] sm:$0x1]  ;;  %v369_v25 = vld [vmem:[#allocation2 + $0x30] sm:$0x3]  ;;  %p8830_p3 = pnand %p8829_p2, %p8823_p13 }
  0x2d   : > { %7452 = vmatprep.subr.bf16.mxu1 %v12593_v2  ;;  %339 = vst [vmem:[#allocation2 + $0x14] sm:$0x7] %v338_v11  ;;  %v364_v22 = vsel %vm9174_vm12, 0, %v363_v21  ;;  %vm9185_vm15 = vmand %vm366_vm13, %vm367_vm14  ;;  %v375_v36 = vld [vmem:[#allocation2 + $0x38] sm:$0x6]  ;;  %v8617_v41 = vld [vmem:[%s12581_s3 + $0xe8] sm:$0xff]  }
  0x2e   : > { %365 = vst [vmem:[#allocation2 + $0x28] sm:$0x1] %v364_v22  ;;  %v370_v29 = vsel %vm9185_vm15, 0, %v369_v25  ;;  %vm9201_vm4 = vmand %vm372_vm0, %vm373_vm3  ;;  %v378_v42 = vld [vmem:[#allocation2 + $0x40] sm:$0xc]  ;;  %v8618_v47 = vld [vmem:[%s12581_s3 + $0xf0] sm:$0xff]  }
  0x2f   : > { %7405 = vmatpush3.bf16.msra.mxu0 %v8598_v10  ;;  %371 = vst [vmem:[#allocation2 + $0x30] sm:$0x3] %v370_v29  ;;  %v376_v39 = vsel %vm9201_vm4, 0, %v375_v36  ;;  %v8613_v45 = vld [vmem:[%s12581_s3 + $0x140] sm:$0xff]   ;;  %v379_v46 = vsel %vm9033_vm2, 0, %v378_v42  ;;  %v8621_v52 = vld [vmem:[%s12581_s3 + $0xf8] sm:$0xff]  }
  0x30   : > { %7406 = vmatprep.subr.bf16.mxu0 %v8599_v13  ;;  %7453 = vmatpush3.bf16.msra.mxu1 %v8606_v4  ;;  %v1322_v28 = vld [vmem:[#allocation2 + $0xc] sm:$0xf]  ;;  %377 = vst [vmem:[#allocation2 + $0x38] sm:$0x6] %v376_v39  ;;  %380 = vst [vmem:[#allocation2 + $0x40] sm:$0xc] %v379_v46 }
  0x31   : > { %7454 = vmatprep.subr.bf16.mxu1 %v12593_v2  ;;  %v1323_v30 = vld [vmem:[#allocation2 + $0x10] sm:$0xf]  ;;  %v381_v48 = vld [vmem:[#allocation2 + $0x48] sm:$0x8]  ;;  %v387_v53 = vld [vmem:[#allocation2 + $0x54] sm:$0x3] }
  0x32   : > { %v9195_v34 = vcombine.low %v1322_v28, %v1323_v30  ;;  %v382_v51 = vsel %vm9151_vm8, 0, %v381_v48  ;;  %v384_v54 = vld [vmem:[#allocation2 + $0x4c] sm:$0x1]  ;;  %v388_v57 = vsel %vm9185_vm15, 0, %v387_v53  ;;  %v390_v59 = vld [vmem:[#allocation2 + $0x5c] sm:$0x6] }
  0x33   : > { %7407 = vmatpush3.bf16.msra.mxu0 %v8599_v13  ;;  %v1321_v13 = vld [vmem:[#allocation2 + $0x8] sm:$0xf]  ;;  %383 = vst [vmem:[#allocation2 + $0x48] sm:$0x8] %v382_v51  ;;  %v385_v58 = vsel %vm9174_vm12, 0, %v384_v54  ;;  %v391_v60 = vsel %vm9201_vm4, 0, %v390_v59 }
  0x34   : > { %7540 = vmatprep.subr.bf16.mxu0 %v12593_v2  ;;  %7455 = vmatpush3.bf16.msra.mxu1 %v8608_v6  ;;  %v9158_v15 = vcombine.low %v1320_v12, %v1321_v13  ;;  %v9207_v40 = vcombine.low %v1321_v13, %v1322_v28  ;;  %389 = vst [vmem:[#allocation2 + $0x54] sm:$0x3] %v388_v57  ;;  %386 = vst [vmem:[#allocation2 + $0x4c] sm:$0x1] %v385_v58  ;;  %v8625_v63 = vld [vmem:[%s12581_s3 + $0x148] sm:$0xff]   ;;  %v8634_v6 = vld [vmem:[%s12581_s3 + $0x150] sm:$0xff]  }
  0x35   : > { %7640 = vmatprep.subr.bf16.mxu1 %v12593_v2  ;;  %392 = vst [vmem:[#allocation2 + $0x5c] sm:$0x6] %v391_v60  ;;  %v393_v0 = vld [vmem:[#allocation2 + $0x64] sm:$0xc]  ;;  %v396_v4 = vld [vmem:[#allocation2 + $0x6c] sm:$0x8] }
  0x36   : > { %7409 = vmatmul.mubr.bf16.vlgmr.msra.gmra.mrb[0].mxu0 %v9050_v23  ;;  %12707 = vst [vmem:[#allocation22_spill] sm:$0xff] %v9158_v15  ;;  %v402_v9 = vld [vmem:[#allocation2 + $0x78] sm:$0x3]  ;;  %v399_v12 = vld [vmem:[#allocation2 + $0x70] sm:$0x1] }
  0x37   : > { %7412 = vmatprep.mubr.bf16.mxu0 %v9053_v24  ;;  %7541 = vmatpush3.bf16.msra.mxu0 %v8607_v3  ;;  %v394_v3 = vsel %vm9033_vm2, 0, %v393_v0  ;;  %v403_v11 = vsel %vm9185_vm15, 0, %v402_v9  ;;  %v400_v13 = vsel %vm9174_vm12, 0, %v399_v12  ;;  %v405_v16 = vld [vmem:[#allocation2 + $0x80] sm:$0x6] }
  0x38   : > { %7542 = vmatprep.subr.bf16.mxu0 %v12593_v2  ;;  %7457 = vmatmul.mubr.bf16.vlgmr.msra.gmra.mrb[0].mxu1 %v9158_v15  ;;  %395 = vst [vmem:[#allocation2 + $0x64] sm:$0xc] %v394_v3  ;;  %404 = vst [vmem:[#allocation2 + $0x78] sm:$0x3] %v403_v11  ;;  %v406_v17 = vsel %vm9201_vm4, 0, %v405_v16  ;;  %vm838_vm4 = vcmask 1043456  }
  0x39   : > { %7460 = vmatprep.mubr.msk.bf16.mxu1 %vm12588_vm9, %v12593_v2  ;;  %7641 = vmatpush3.bf16.msra.mxu1 %v8613_v45  ;;  %401 = vst [vmem:[#allocation2 + $0x70] sm:$0x1] %v400_v13  ;;  %407 = vst [vmem:[#allocation2 + $0x80] sm:$0x6] %v406_v17  ;;  %v408_v19 = vld [vmem:[#allocation2 + $0x88] sm:$0xc] }
  0x3a   : > { %7642 = vmatprep.subr.bf16.mxu1 %v12593_v2  ;;  %v409_v21 = vsel %vm9033_vm2, 0, %v408_v19  ;;  %v411_v22 = vld [vmem:[#allocation2 + $0x90] sm:$0x8]  ;;  %v417_v28 = vld [vmem:[#allocation2 + $0x9c] sm:$0x3] }
  0x3b   : > { %7543 = vmatpush3.bf16.msra.mxu0 %v8609_v5  ;;  %v397_v5 = vsel %vm9151_vm8, 0, %v396_v4  ;;  %410 = vst [vmem:[#allocation2 + $0x88] sm:$0xc] %v409_v21  ;;  %v412_v25 = vsel %vm9151_vm8, 0, %v411_v22  ;;  %v418_v29 = vsel %vm9185_vm15, 0, %v417_v28 }
  0x3c   : > { %7544 = vmatprep.subr.bf16.mxu0 %v12593_v2  ;;  %398 = vst [vmem:[#allocation2 + $0x6c] sm:$0x8] %v397_v5  ;;  %413 = vst [vmem:[#allocation2 + $0x90] sm:$0x8] %v412_v25  ;;  %vm341_vm2 = vsmask.f32 7942 }
  0x3d   : > { %7643 = vmatpush3.bf16.msra.mxu1 %v8625_v63  ;;  %419 = vst [vmem:[#allocation2 + $0x9c] sm:$0x3] %v418_v29  ;;  %vm9267_vm10 = vmand %vm340_vm5, %vm341_vm2  ;;  %v414_v30 = vld [vmem:[#allocation2 + $0x94] sm:$0x1]  ;;  %v9278_v27 = vld [vmem:[%s12580_s2] ss:$0 sm:$0xff] }
  0x3e   : > { %7413 = vmatmul.mubr.bf16.gmra.mrb[4].mxu0 %v9069_v31  ;;  %7644 = vmatprep.subr.bf16.mxu1 %v12593_v2  ;;  %v415_v35 = vsel %vm9174_vm12, 0, %v414_v30  ;;  %vm795_vm14 = vsmask.f32 7946  ;;  %vm12592_vm15 = vsmask.f32 3328 }
  0x3f   : > { %7416 = vmatprep.mubr.bf16.mxu0 %v9072_v32  ;;  %7545 = vmatpush3.bf16.msra.mxu0 %v8612_v18  ;;  %v8642_v18 = vld [vmem:[%s12581_s3 + $0x158] sm:$0xff]   ;;  %416 = vst [vmem:[#allocation2 + $0x94] sm:$0x1] %v415_v35  ;;  %v1781_v59 = vld [vmem:[#allocation2 + $0xc] sm:$0xf]  ;;  %vm9294_vm5 = vmand %vm348_vm1, %vm795_vm14 }
  0x40   : > { %7546 = vmatprep.subr.bf16.mxu0 %v12593_v2  ;;  %7461 = vmatmul.mubr.bf16.gmra.mrb[4].mxu1 %v9195_v34  ;;  %v1782_v60 = vld [vmem:[#allocation2 + $0x10] sm:$0xf]  ;;  %vm810_vm0 = vsmask.f32 7440  ;;  %vm771_vm3 = vsmask.f32 6416 }
  0x41   : > { %7464 = vmatprep.mubr.msk.bf16.mxu1 %vm12588_vm9, %v12593_v2  ;;  %7645 = vmatpush3.bf16.msra.mxu1 %v8634_v6  ;;  %v834_v6 = vld [vmem:[#allocation2 + $0x1c] sm:$0x8]  ;;  %v9288_v16 = vcombine.low %v1781_v59, %v1782_v60  ;;  %vm870_vm2 = vsmask.f32 7938  ;;  %vm884_vm1 = vsmask.f32 1280  ;;  %vm9307_vm11 = vmor %vm12591_vm6, %vm771_vm3 }
  0x42   : > { %7646 = vmatprep.subr.bf16.mxu1 %v12593_v2  ;;  %vm885_vm14 = vsmask.f32 5392  ;;  %vm848_vm3 = vsmask.f32 4368  ;;  %vm9334_vm6 = vmand %vm838_vm4, %vm870_vm2  ;;  %vm12730_vm2 = vsmask.f32 256 }
  0x43   : > { %7547 = vmatpush3.bf16.msra.mxu0 %v8614_v26  ;;  %v8651_v26 = vld [vmem:[%s12581_s3 + $0x160] sm:$0xff]  }
  0x44   : > { %7548 = vmatprep.subr.bf16.mxu0 %v12593_v2 }
  0x45   : > { %7647 = vmatpush3.bf16.msra.mxu1 %v8642_v18 }
  0x46   : > { %7417 = vmatmul.mubr.bf16.gmra.mrb[8].mxu0 %v9081_v37  ;;  %7648 = vmatprep.subr.bf16.mxu1 %v12593_v2 }
  0x47   : > { %7420 = vmatprep.mubr.bf16.mxu0 %v9083_v38  ;;  %7549 = vmatpush3.bf16.msra.mxu0 %v8616_v33  ;;  %v343_v33 = vld [vmem:[#allocation2 + $0xa4] sm:$0xe] }
  0x48   : > { %7550 = vmatprep.subr.bf16.mxu0 %v12593_v2  ;;  %v344_v36 = vsel %vm9267_vm10, 0, %v343_v33 }
  0x49   : > { %7649 = vmatpush3.bf16.msra.mxu1 %v8651_v26  ;;  %345 = vst [vmem:[#allocation2 + $0xa4] sm:$0xe] %v344_v36 }
  0x4a   : > { %7650 = vmatprep.subr.bf16.mxu1 %v12593_v2 }
  0x4b   : > { %7551 = vmatpush3.bf16.msra.mxu0 %v8617_v41 }
  0x4c   : > { %7552 = vmatprep.subr.bf16.mxu0 %v12593_v2 }
  0x4e   : > { %7421 = vmatmul.mubr.bf16.gmra.mrb[12].mxu0 %v9091_v43 }
  0x4f   : > { %7424 = vmatprep.mubr.bf16.mxu0 %v9093_v44  ;;  %7553 = vmatpush3.bf16.msra.mxu0 %v8618_v47  ;;  %v8661_v47 = vld [vmem:[%s12581_s3 + $0x168] sm:$0xff]  }
  0x50   : > { %7554 = vmatprep.subr.bf16.mxu0 %v12593_v2  ;;  %7651 = vmatpush3.bf16.msra.mxu1 %v8661_v47  ;;  %v8686_v44 = vld [vmem:[%s12581_s3 + $0x1c8] sm:$0xff]  }
  0x51   : > { %7652 = vmatprep.subr.bf16.mxu1 %v12593_v2 }
  0x53   : > { %7555 = vmatpush3.bf16.msra.mxu0 %v8621_v52 }
  0x54   : > { %7740 = vmatprep.subr.bf16.mxu0 %v12593_v2 }
  0x56   : > { %7425 = vmatmul.mubr.bf16.gmra.mrb[16].mxu0 %v9101_v49 }
  0x57   : > { %7428 = vmatprep.mubr.bf16.mxu0 %v9103_v50 }
  0x5e   : > { %7429 = vmatmul.mubr.bf16.gmra.mrb[20].mxu0 %v9111_v55 }
  0x5f   : > { %7432 = vmatprep.mubr.bf16.mxu0 %v9113_v56 }
  0x66   : > { %7433 = vmatmul.mubr.bf16.gmra.mrb[24].mxu0 %v9121_v61 }
  0x67   : > { %7436 = vmatprep.mubr.bf16.mxu0 %v9123_v62 }
  0x6e   : > { %7437 = vmatmul.mubr.bf16.gmra.mrb[28].mxu0 %v9129_v1  ;;  %v1010_v1 = vld [vmem:[#allocation2 + $0x4c] sm:$0xf] }
  0x6f   : > { %7556 = vmatprep.mubr.msk.bf16.mxu0 %vm12588_vm9, %v12593_v2  ;;  %vm9300_vm9 = vmor %vm12592_vm15, %vm810_vm0 }
  0x70   : > { %vm9317_vm0 = vmand %vm838_vm4, %vm12592_vm15 }
  0x71   : > { %vm9340_vm15 = vmor %vm884_vm1, %vm885_vm14 }
  0x72   : > { %vm9348_vm4 = vmand %vm366_vm13, %vm884_vm1  ;;  %vm12733_vm13 = vmmov 0  }
  0x73   : > { %vm9356_vm14 = vmor %vm12730_vm2, %vm848_vm3  ;;  %vm1942_vm3 = vsmask.f32 7424 }
 0x109   : > { %v7410_v39 = vpop.f32.mrb[0].mxu0 }
 0x10a   : > { %v600_v41 = vadd.f32 %v7410_v39, %v9278_v27  ;;  %v591_v42 = vpop.f32.mrb[1].mxu0  ;;  %v797_v39 = vld [vmem:[#allocation2 + $0x14] sm:$0xc] }
 0x10b   : > { %v592_v45 = vadd.f32 %v9278_v27, %v591_v42  ;;  %v7411_v46 = vpop.f32.mrb[2].mxu0 }
 0x10c   : > { %v720_v48 = vmax.f32 %v600_v41, 0.0  ;;  %v603_v51 = vadd.f32 %v7411_v46, %v9278_v27  ;;  %v594_v52 = vpop.f32.mrb[3].mxu0 }
 0x10d   : > { %v718_v53 = vmax.f32 %v592_v45, 0.0  ;;  %v595_v54 = vadd.f32 %v9278_v27, %v594_v52 }
 0x10e   : > { %v7028_v57 = vpack.c.bf16 %v720_v48, %v720_v48  ;;  %v721_v58 = vmax.f32 %v603_v51, 0.0 }
 0x10f   : > { %v7026_v63 = vpack.c.bf16 %v718_v53, %v718_v53  ;;  %v719_v0 = vmax.f32 %v595_v54, 0.0 }
 0x110   : > { %v813_v3 = vshll.u32 %v7028_v57, 16  ;;  %v816_v4 = vshrl.u32 %v7028_v57, 16  ;;  %v7029_v5 = vpack.c.bf16 %v721_v58, %v721_v58 }
 0x111   : > { %v774_v9 = vshrl.u32 %v7026_v63, 16  ;;  %v777_v11 = vshll.u32 %v7026_v63, 16  ;;  %v7027_v12 = vpack.c.bf16 %v719_v0, %v719_v0  ;;  %v7414_v13 = vpop.f32.mrb[4].mxu0 }
 0x112   : > { %v815_v17 = vrot.slane %v813_v3, 5  ;;  %v818_v18 = vrot.slane %v816_v4, 4  ;;  %v822_v19 = vshll.u32 %v7029_v5, 16  ;;  %v826_v21 = vshrl.u32 %v7029_v5, 16  ;;  %v607_v22 = vpop.f32.mrb[5].mxu0 }
 0x113   : > { %v776_v25 = vrot.slane %v774_v9, 5  ;;  %v779_v26 = vrot.slane %v777_v11, 6  ;;  %v783_v28 = vshrl.u32 %v7027_v12, 16  ;;  %v786_v29 = vshll.u32 %v7027_v12, 16  ;;  %v7415_v30 = vpop.f32.mrb[6].mxu0 }
 0x114   : > { %v819_v33 = vor.u32 %v818_v18, %v815_v17  ;;  %v835_v35 = vsel %vm9151_vm8, %v815_v17, %v834_v6  ;;  %v824_v41 = vrot.slane %v822_v19, 5  ;;  %v828_v42 = vrot.slane %v826_v21, 4  ;;  %v610_v45 = vpop.f32.mrb[7].mxu0  ;;  %v840_v3 = vld [vmem:[#allocation2 + $0x24] sm:$0xf] }
 0x115   : > { %836 = vst [vmem:[#allocation2 + $0x1c] sm:$0x8] %v835_v35  ;;  %v780_v46 = vor.u32 %v779_v26, %v776_v25  ;;  %v785_v48 = vrot.slane %v783_v28, 5  ;;  %v788_v51 = vrot.slane %v786_v29, 6  ;;  %v616_v52 = vadd.f32 %v7414_v13, %v9278_v27  ;;  %v801_v11 = vld [vmem:[#allocation2 + $0x1c] sm:$0x7] }
 0x116   : > { %v820_v53 = vrot.slane %v819_v33, 4  ;;  %v829_v54 = vor.u32 %v828_v42, %v824_v41  ;;  %v608_v58 = vadd.f32 %v9278_v27, %v607_v22  ;;  %v619_v59 = vadd.f32 %v7415_v30, %v9278_v27 }
 0x117   : > { %v781_v60 = vrot.slane %v780_v46, 4  ;;  %v798_v63 = vsel %vm9294_vm5, %v780_v46, %v797_v39  ;;  %v789_v4 = vor.u32 %v788_v51, %v785_v48  ;;  %v724_v5 = vmax.f32 %v616_v52, 0.0 }
 0x118   : > { %799 = vst [vmem:[#allocation2 + $0x14] sm:$0xc] %v798_v63  ;;  %v825_v6 = vsel %vm9300_vm9, %v820_v53, %v824_v41  ;;  %v830_v9 = vrot.slane %v829_v54, 4  ;;  %v722_v12 = vmax.f32 %v608_v58, 0.0  ;;  %v725_v13 = vmax.f32 %v619_v59, 0.0 }
 0x119   : > { %837 = vst [vmem:[#allocation2 + $0x20] sm:$0xf] %v825_v6  ;;  %v790_v17 = vsel %vm9307_vm11, %v781_v60, %v789_v4  ;;  %v791_v18 = vrot.slane %v789_v4, 4  ;;  %v7032_v19 = vpack.c.bf16 %v724_v5, %v724_v5  ;;  %v611_v21 = vadd.f32 %v9278_v27, %v610_v45  ;;  %v7418_v22 = vpop.f32.mrb[8].mxu0  ;;  %v909_v60 = vld [vmem:[#allocation2 + $0x30] sm:$0xe] }
 0x11a   : > { %v841_v25 = vsel %vm9317_vm0, %v830_v9, %v840_v3  ;;  %800 = vst [vmem:[#allocation2 + $0x18] sm:$0xf] %v790_v17  ;;  %v7030_v26 = vpack.c.bf16 %v722_v12, %v722_v12  ;;  %v7033_v28 = vpack.c.bf16 %v725_v13, %v725_v13  ;;  %v632_v29 = vadd.f32 %v7418_v22, %v9278_v27  ;;  %v623_v30 = vpop.f32.mrb[9].mxu0 }
 0x11b   : > { %842 = vst [vmem:[#allocation2 + $0x24] sm:$0xf] %v841_v25  ;;  %v802_v33 = vsel %vm9147_vm7, %v791_v18, %v801_v11  ;;  %v888_v35 = vshrl.u32 %v7032_v19, 16  ;;  %v891_v39 = vshll.u32 %v7032_v19, 16  ;;  %v723_v41 = vmax.f32 %v611_v21, 0.0  ;;  %v7419_v42 = vpop.f32.mrb[10].mxu0 }
 0x11c   : > { %803 = vst [vmem:[#allocation2 + $0x1c] sm:$0x7] %v802_v33  ;;  %v851_v45 = vshrl.u32 %v7030_v26, 16  ;;  %v854_v46 = vshll.u32 %v7030_v26, 16  ;;  %v897_v48 = vshrl.u32 %v7033_v28, 16  ;;  %v900_v51 = vshll.u32 %v7033_v28, 16 }
 0x11d   : > { %v626_v52 = vpop.f32.mrb[11].mxu0  ;;  %v890_v53 = vrot.slane %v888_v35, 6  ;;  %v893_v54 = vrot.slane %v891_v39, 7  ;;  %v7031_v58 = vpack.c.bf16 %v723_v41, %v723_v41  ;;  %v728_v59 = vmax.f32 %v632_v29, 0.0  ;;  %v872_v11 = vld [vmem:[#allocation2 + $0x28] sm:$0xf] }
 0x11e   : > { %v853_v63 = vrot.slane %v851_v45, 7  ;;  %v899_v3 = vrot.slane %v897_v48, 6  ;;  %v902_v4 = vrot.slane %v900_v51, 7  ;;  %v624_v5 = vadd.f32 %v9278_v27, %v623_v30  ;;  %v914_v25 = vld [vmem:[#allocation2 + $0x38] sm:$0x3] }
 0x11f   : > { %v894_v6 = vor.u32 %v893_v54, %v890_v53  ;;  %v859_v12 = vshrl.u32 %v7031_v58, 16  ;;  %v862_v13 = vshll.u32 %v7031_v58, 16  ;;  %v7036_v17 = vpack.c.bf16 %v728_v59, %v728_v59  ;;  %v876_v26 = vld [vmem:[#allocation2 + $0x30] sm:$0x1]  ;;  %v978_v41 = vld [vmem:[#allocation2 + $0x40] sm:$0x8] }
 0x120   : > { %v856_v18 = vor.u32 %v854_v46, %v853_v63  ;;  %v857_v19 = vrot.slane %v853_v63, 4  ;;  %v903_v22 = vor.u32 %v902_v4, %v899_v3  ;;  %v726_v28 = vmax.f32 %v624_v5, 0.0  ;;  %v1327_v61 = vld [vmem:[#allocation2 + $0x20] sm:$0xf] }
 0x121   : > { %v895_v29 = vrot.slane %v894_v6, 4  ;;  %v910_v30 = vsel %vm9267_vm10, %v894_v6, %v909_v60  ;;  %v861_v35 = vrot.slane %v859_v12, 7  ;;  %v957_v39 = vshll.u32 %v7036_v17, 16  ;;  %v7422_v45 = vpop.f32.mrb[12].mxu0  ;;  %v9362_v4 = vld [vmem:[#allocation2 + $0x18] sm:$0xf] }
 0x122   : > { %911 = vst [vmem:[#allocation2 + $0x30] sm:$0xe] %v910_v30  ;;  %v873_v46 = vsel %vm9334_vm6, %v856_v18, %v872_v11  ;;  %v905_v48 = vrot.slane %v903_v22, 4  ;;  %v960_v53 = vshrl.u32 %v7036_v17, 16  ;;  %v7034_v54 = vpack.c.bf16 %v726_v28, %v726_v28  ;;  %v639_v58 = vpop.f32.mrb[13].mxu0 }
 0x123   : > { %874 = vst [vmem:[#allocation2 + $0x28] sm:$0xf] %v873_v46  ;;  %v904_v59 = vsel %vm9340_vm15, %v895_v29, %v903_v22  ;;  %v864_v60 = vor.u32 %v862_v13, %v861_v35  ;;  %v866_v63 = vrot.slane %v861_v35, 4  ;;  %v959_v3 = vrot.slane %v957_v39, 5  ;;  %v7423_v5 = vpop.f32.mrb[14].mxu0 }
 0x124   : > { %912 = vst [vmem:[#allocation2 + $0x34] sm:$0xf] %v904_v59  ;;  %v915_v6 = vsel %vm9348_vm4, %v905_v48, %v914_v25  ;;  %v962_v11 = vrot.slane %v960_v53, 4  ;;  %v923_v12 = vshrl.u32 %v7034_v54, 16  ;;  %v926_v18 = vshll.u32 %v7034_v54, 16  ;;  %v9366_v17 = vpop.f32.mrb[15].mxu0 }
 0x125   : > { %916 = vst [vmem:[#allocation2 + $0x38] sm:$0x3] %v915_v6  ;;  %v865_v28 = vsel %vm9356_vm14, %v857_v19, %v864_v60  ;;  %v877_v13 = vsel %vm9174_vm12, %v866_v63, %v876_v26  ;;  %v979_v22 = vsel %vm9151_vm8, %v959_v3, %v978_v41  ;;  %v944_v29 = vld [vmem:[#allocation2 + $0x38] sm:$0xc]  ;;  %v635_v30 = vadd.f32 %v7419_v42, %v9278_v27  ;;  %v8669_v25 = vld [vmem:[%s12581_s3 + $0x170] sm:$0xff]  }
 0x126   : > { %875 = vst [vmem:[#allocation2 + $0x2c] sm:$0xf] %v865_v28  ;;  %878 = vst [vmem:[#allocation2 + $0x30] sm:$0x1] %v877_v13  ;;  %v925_v35 = vrot.slane %v923_v12, 5  ;;  %v928_v39 = vrot.slane %v926_v18, 6  ;;  %v627_v19 = vadd.f32 %v9278_v27, %v626_v52  ;;  %v963_v48 = vor.u32 %v962_v11, %v959_v3  ;;  %7653 = vmatpush3.bf16.msra.mxu1 %v8669_v25 }
 0x127   : > { %980 = vst [vmem:[#allocation2 + $0x40] sm:$0x8] %v979_v22  ;;  %v1324_v46 = vld [vmem:[#allocation2 + $0x14] sm:$0xf]  ;;  %v1946_v26 = vshll.u32 %v9288_v16, 16  ;;  %v729_v53 = vmax.f32 %v635_v30, 0.0  ;;  %v648_v42 = vadd.f32 %v7422_v45, %v9278_v27  ;;  %v640_v60 = vadd.f32 %v9278_v27, %v639_v58  ;;  %7654 = vmatprep.subr.bf16.mxu1 %v12593_v2 }
 0x128   : > { %v9381_v41 = vcombine.low %v1324_v46, %v9362_v4  ;;  %v929_v54 = vor.u32 %v928_v39, %v925_v35  ;;  %v727_v59 = vmax.f32 %v627_v19, 0.0  ;;  %v964_v45 = vrot.slane %v963_v48, 4 }
 0x129   : > { %v7037_v63 = vpack.c.bf16 %v729_v53, %v729_v53  ;;  %v9387_v52 = vpop.f32.mrb[16].mxu0  ;;  %v9392_v12 = vrot.slane %v1946_v26, 1  ;;  %v732_v28 = vmax.f32 %v648_v42, 0.0  ;;  %v730_v25 = vmax.f32 %v640_v60, 0.0  ;;  %v948_v60 = vld [vmem:[#allocation2 + $0x40] sm:$0x7] }
 0x12a   : > { %7465 = vmatmul.mubr.bf16.gmra.mrb[8].mxu1 %v9381_v41  ;;  %v945_v3 = vsel %vm9294_vm5, %v929_v54, %v944_v29  ;;  %v7035_v6 = vpack.c.bf16 %v727_v59, %v727_v59  ;;  %v9396_v13 = vpop.f32.mrb[17].mxu0  ;;  %v651_v29 = vadd.f32 %v7423_v5, %v9278_v27  ;;  %v930_v39 = vrot.slane %v929_v54, 4 }
 0x12b   : > { %7468 = vmatprep.mubr.msk.bf16.mxu1 %vm12733_vm13, %v12593_v2  ;;  %946 = vst [vmem:[#allocation2 + $0x38] sm:$0xc] %v945_v3  ;;  %v966_v58 = vshll.u32 %v7037_v63, 16  ;;  %v970_v18 = vshrl.u32 %v7037_v63, 16  ;;  %v9399_v35 = vpop.f32.mrb[18].mxu0  ;;  %v7040_v26 = vpack.c.bf16 %v732_v28, %v732_v28  ;;  %v7038_v48 = vpack.c.bf16 %v730_v25, %v730_v25 }
 0x12c   : > { %v932_v22 = vshrl.u32 %v7035_v6, 16  ;;  %v935_v30 = vshll.u32 %v7035_v6, 16  ;;  %v733_v3 = vmax.f32 %v651_v29, 0.0  ;;  %v9401_v2 = vpop.f32.mrb[19].mxu0  ;;  %v982_v6 = vld [vmem:[#allocation2 + $0x48] sm:$0xf]  ;;  %v643_v62 = vadd.f32 %v9278_v27, %v9366_v17 }
 0x12d   : > { %v968_v19 = vrot.slane %v966_v58, 5  ;;  %v972_v46 = vrot.slane %v970_v18, 4  ;;  %v1023_v11 = vshrl.u32 %v7040_v26, 16  ;;  %v1026_v5 = vshll.u32 %v7040_v26, 16  ;;  %v1044_v58 = vld [vmem:[#allocation2 + $0x54] sm:$0xe] }
 0x12e   : > { %v934_v53 = vrot.slane %v932_v22, 5  ;;  %v937_v59 = vrot.slane %v935_v30, 6  ;;  %v991_v18 = vshrl.u32 %v7038_v48, 16  ;;  %v994_v28 = vshll.u32 %v7038_v48, 16  ;;  %v8678_v17 = vld [vmem:[%s12581_s3 + $0x178] sm:$0xff]  }
 0x12f   : > { %v969_v42 = vsel %vm9300_vm9, %v964_v45, %v968_v19  ;;  %v973_v63 = vor.u32 %v972_v46, %v968_v19  ;;  %v7041_v22 = vpack.c.bf16 %v733_v3, %v733_v3  ;;  %v1025_v25 = vrot.slane %v1023_v11, 6  ;;  %7655 = vmatpush3.bf16.msra.mxu1 %v8678_v17  ;;  %v9440_v17 = vld [vmem:[#allocation2 + $0x1c] sm:$0xff]  }
 0x130   : > { %981 = vst [vmem:[#allocation2 + $0x44] sm:$0xf] %v969_v42  ;;  %v938_v54 = vor.u32 %v937_v59, %v934_v53  ;;  %v1028_v29 = vrot.slane %v1026_v5, 7  ;;  %v993_v26 = vrot.slane %v991_v18, 7  ;;  %v9411_v53 = vld [vmem:[#allocation2 + $0x14] sm:$0xff]   ;;  %12736 = vst [vmem:[#allocation23_spill] sm:$0xff] %v9440_v17 }
 0x131   : > { %v974_v30 = vrot.slane %v973_v63, 4  ;;  %v9407_v45 = vpop.f32.mrb[20].mxu0  ;;  %v1032_v42 = vshrl.u32 %v7041_v22, 16  ;;  %v1326_v59 = vld [vmem:[#allocation2 + $0x1c] sm:$0xf]  ;;  %v1035_v3 = vshll.u32 %v7041_v22, 16 }
 0x132   : > { %v939_v19 = vsel %vm9307_vm11, %v930_v39, %v938_v54  ;;  %v940_v46 = vrot.slane %v938_v54, 4  ;;  %v1029_v11 = vor.u32 %v1028_v29, %v1025_v25  ;;  %v731_v63 = vmax.f32 %v643_v62, 0.0  ;;  %v9415_v5 = vpop.f32.mrb[21].mxu0 }
 0x133   : > { %v983_v48 = vsel %vm9317_vm0, %v974_v30, %v982_v6  ;;  %947 = vst [vmem:[#allocation2 + $0x3c] sm:$0xf] %v939_v19  ;;  %v996_v54 = vor.u32 %v994_v28, %v993_v26  ;;  %v1034_v18 = vrot.slane %v1032_v42, 6  ;;  %v9422_v56 = vpop.f32.mrb[22].mxu0  ;;  %v1037_v22 = vrot.slane %v1035_v3, 7 }
 0x134   : > { %984 = vst [vmem:[#allocation2 + $0x48] sm:$0xf] %v983_v48  ;;  %v949_v39 = vsel %vm9147_vm7, %v940_v46, %v948_v60  ;;  %v1030_v6 = vrot.slane %v1029_v11, 4  ;;  %v1045_v62 = vsel %vm9267_vm10, %v1029_v11, %v1044_v58  ;;  %v7039_v30 = vpack.c.bf16 %v731_v63, %v731_v63  ;;  %v9426_v25 = vpop.f32.mrb[23].mxu0  ;;  %v1048_v60 = vld [vmem:[#allocation2 + $0x5c] sm:$0x3] }
 0x135   : > { %950 = vst [vmem:[#allocation2 + $0x40] sm:$0x7] %v949_v39  ;;  %1046 = vst [vmem:[#allocation2 + $0x54] sm:$0xe] %v1045_v62  ;;  %v1011_v29 = vsel %vm9334_vm6, %v996_v54, %v1010_v1  ;;  %v12734_v28 = vshrl.u32 %v9288_v16, 16  ;;  %v12600_v46 = vshll.u32 %v9411_v53, 16  ;;  %v9434_v42 = vcombine.low %v1326_v59, %v1327_v61 }
 0x136   : > { %v12735_v48 = vmov 0.0   ;;  %1012 = vst [vmem:[#allocation2 + $0x4c] sm:$0xf] %v1011_v29  ;;  %v1038_v58 = vor.u32 %v1037_v22, %v1034_v18  ;;  %v999_v11 = vshrl.u32 %v7039_v30, 16  ;;  %v1002_v3 = vshll.u32 %v7039_v30, 16 }
 0x137   : > { %v1949_v19 = vor.u32 %v9392_v12, %v12734_v28  ;;  %7840 = vmatprep.subr.bf16.mxu1 %v12735_v48  ;;  %v9438_v63 = vcombine.low %v9362_v4, %v1326_v59  ;;  %v1953_v1 = vrot.slane %v12600_v46, 1  ;;  %7469 = vmatmul.mubr.bf16.gmra.mrb[12].mxu1 %v9434_v42  ;;  %v1328_v16 = vld [vmem:[#allocation2 + $0x24] sm:$0xf]  ;;  %v997_v12 = vrot.slane %v993_v26, 4  ;;  %v1014_v4 = vld [vmem:[#allocation2 + $0x54] sm:$0x1] }
 0x138   : > { %v1039_v39 = vsel %vm9340_vm15, %v1030_v6, %v1038_v58  ;;  %v1040_v54 = vrot.slane %v1038_v58, 4  ;;  %v1001_v62 = vrot.slane %v999_v11, 7  ;;  %7472 = vmatprep.mubr.msk.bf16.mxu1 %vm12733_vm13, %v12735_v48  ;;  %v1329_v22 = vld [vmem:[#allocation2 + $0x28] sm:$0xf]  ;;  %v12599_v6 = vshll.u32 %v9440_v17, 16 }
 0x139   : > { %v9449_v18 = vpop.f32.mrb[24].mxu0  ;;  %1047 = vst [vmem:[#allocation2 + $0x58] sm:$0xf] %v1039_v39  ;;  %v1954_v59 = vsel %vm1942_vm3, %v1949_v19, %v1953_v1  ;;  %v9455_v28 = vld [vmem:[#allocation2 + $0x24] sm:$0xff]   ;;  %v12602_v58 = vshrl.u32 %v9411_v53, 16  ;;  %v9460_v11 = vcombine.low %v1327_v61, %v1328_v16 }
 0x13a   : > { %v1049_v30 = vsel %vm9348_vm4, %v1040_v54, %v1048_v60  ;;  %v1004_v29 = vor.u32 %v1002_v3, %v1001_v62  ;;  %v1006_v26 = vrot.slane %v1001_v62, 4  ;;  %7557 = vmatmul.mubr.bf16.vlgmr.msra.gmra.mrb[32].mxu0 %v1954_v59  ;;  %12737 = vst [vmem:[#allocation24_spill] sm:$0xff] %v9455_v28  ;;  %v1330_v3 = vld [vmem:[#allocation2 + $0x2c] sm:$0xf]  ;;  %v9466_v39 = vpop.f32.mrb[25].mxu0  ;;  %v1961_v62 = vrot.slane %v12599_v6, 1 }
 0x13b   : > { %1050 = vst [vmem:[#allocation2 + $0x5c] sm:$0x3] %v1049_v30  ;;  %7560 = vmatprep.mubr.msk.bf16.mxu0 %vm12733_vm13, %v12735_v48  ;;  %v1957_v54 = vor.u32 %v12602_v58, %v1953_v1  ;;  %v9472_v59 = vcombine.low %v1328_v16, %v1329_v22  ;;  %v12601_v61 = vshll.u32 %v9455_v28, 16  ;;  %v9477_v30 = vpop.f32.mrb[26].mxu0  ;;  %v656_v1 = vadd.f32 %v9278_v27, %v9396_v13  ;;  %v9500_v6 = vld [vmem:[#allocation2 + $0x2c] sm:$0xff]  }
 0x13c   : > { %v1005_v19 = vsel %vm9356_vm14, %v997_v12, %v1004_v29  ;;  %v1015_v60 = vsel %vm9174_vm12, %v1006_v26, %v1014_v4  ;;  %v664_v12 = vadd.f32 %v9387_v52, %v9278_v27  ;;  %v12605_v4 = vshrl.u32 %v9440_v17, 16  ;;  %v9485_v26 = vpop.f32.mrb[27].mxu0  ;;  %12738 = vst [vmem:[#allocation25_spill] sm:$0xff] %v9500_v6  ;;  %v1082_v17 = vld [vmem:[#allocation2 + $0x64] sm:$0x7] }
 0x13d   : > { %1013 = vst [vmem:[#allocation2 + $0x50] sm:$0xf] %v1005_v19  ;;  %1016 = vst [vmem:[#allocation2 + $0x54] sm:$0x1] %v1015_v60  ;;  %v9481_v29 = vcombine.low %v1329_v22, %v1330_v3  ;;  %v9489_v16 = vrot.slane %v12601_v61, 1  ;;  %v667_v60 = vadd.f32 %v9399_v35, %v9278_v27  ;;  %v659_v22 = vadd.f32 %v9278_v27, %v9401_v2  ;;  %v8683_v35 = vld [vmem:[%s12581_s3 + $0x1c0] sm:$0xff]  }
 0x13e   : > { %v736_v52 = vmax.f32 %v664_v12, 0.0  ;;  %v9493_v19 = vld [vmem:[#allocation2 + $0x30] sm:$0xf]  ;;  %v1962_v13 = vsel %vm1942_vm3, %v1957_v54, %v1961_v62  ;;  %v1965_v61 = vor.u32 %v12605_v4, %v1961_v62  ;;  %v734_v12 = vmax.f32 %v656_v1, 0.0  ;;  %v1112_v4 = vld [vmem:[#allocation2 + $0x64] sm:$0x8]  ;;  %7741 = vmatpush3.bf16.msra.mxu0 %v8683_v35 }
 0x13f   : > { %7473 = vmatmul.mubr.bf16.gmra.mrb[16].mxu1 %v9472_v59  ;;  %v9514_v2 = vcombine.low %v1330_v3, %v9493_v19  ;;  %v737_v54 = vmax.f32 %v667_v60, 0.0  ;;  %v735_v50 = vmax.f32 %v659_v22, 0.0  ;;  %7742 = vmatprep.subr.bf16.mxu0 %v12735_v48 }
 0x140   : > { %7476 = vmatprep.mubr.msk.bf16.mxu1 %vm12733_vm13, %v12735_v48  ;;  %v7044_v58 = vpack.c.bf16 %v736_v52, %v736_v52  ;;  %v1970_v62 = vsel %vm1942_vm3, %v1965_v61, %v9489_v16  ;;  %v7042_v49 = vpack.c.bf16 %v734_v12, %v734_v12  ;;  %v1078_v12 = vld [vmem:[#allocation2 + $0x5c] sm:$0xc] }
 0x141   : > { %v9502_v46 = vpop.f32.mrb[28].mxu0  ;;  %v7045_v43 = vpack.c.bf16 %v737_v54, %v737_v54  ;;  %v7043_v38 = vpack.c.bf16 %v735_v50, %v735_v50 }
 0x142   : > { %7561 = vmatmul.mubr.bf16.gmra.mrb[36].mxu0 %v1962_v13  ;;  %v9506_v55 = vpop.f32.mrb[29].mxu0  ;;  %v1091_v1 = vshll.u32 %v7044_v58, 16  ;;  %v1094_v52 = vshrl.u32 %v7044_v58, 16  ;;  %v1057_v61 = vshrl.u32 %v7042_v49, 16  ;;  %v1060_v32 = vshll.u32 %v7042_v49, 16 }
 0x143   : > { %7564 = vmatprep.mubr.msk.bf16.mxu0 %vm12733_vm13, %v12735_v48  ;;  %v9516_v13 = vpop.f32.mrb[30].mxu0  ;;  %v1100_v35 = vshll.u32 %v7045_v43, 16  ;;  %v1104_v31 = vshrl.u32 %v7045_v43, 16  ;;  %v1066_v24 = vshrl.u32 %v7043_v38, 16  ;;  %v1069_v54 = vshll.u32 %v7043_v38, 16  ;;  %7743 = vmatpush3.bf16.msra.mxu0 %v8686_v44 }
 0x144   : > { %v1093_v22 = vrot.slane %v1091_v1, 5  ;;  %v1096_v37 = vrot.slane %v1094_v52, 4  ;;  %v9526_v58 = vpop.f32.mrb[31].mxu0  ;;  %v1059_v60 = vrot.slane %v1057_v61, 5  ;;  %v1062_v23 = vrot.slane %v1060_v32, 6  ;;  %7744 = vmatprep.subr.bf16.mxu0 %v12735_v48  ;;  %v8688_v32 = vld [vmem:[%s12581_s3 + $0x1d0] sm:$0xff]  }
 0x145   : > { %v1332_v1 = vld [vmem:[#allocation2 + $0x34] sm:$0xf]  ;;  %v1102_v49 = vrot.slane %v1100_v35, 5  ;;  %v1106_v52 = vrot.slane %v1104_v31, 4  ;;  %v1068_v7 = vrot.slane %v1066_v24, 5  ;;  %v1071_v15 = vrot.slane %v1069_v54, 6 }
 0x146   : > { %v1097_v50 = vor.u32 %v1096_v37, %v1093_v22  ;;  %v1113_v3 = vsel %vm9151_vm8, %v1093_v22, %v1112_v4  ;;  %v1063_v37 = vor.u32 %v1062_v23, %v1059_v60  ;;  %v1333_v43 = vld [vmem:[#allocation2 + $0x38] sm:$0xf]  ;;  %v1116_v22 = vld [vmem:[#allocation2 + $0x6c] sm:$0xf]  ;;  %v12739_v24 = vshrl.u32 %v9455_v28, 16 }
 0x147   : > { %7477 = vmatmul.mubr.bf16.gmra.mrb[20].mxu1 %v9514_v2  ;;  %1114 = vst [vmem:[#allocation2 + $0x64] sm:$0x8] %v1113_v3  ;;  %v1107_v4 = vor.u32 %v1106_v52, %v1102_v49  ;;  %v1072_v61 = vor.u32 %v1071_v15, %v1068_v7  ;;  %v9543_v44 = vcombine.low %v9493_v19, %v1332_v1  ;;  %v12740_v7 = vshll.u32 %v9500_v6, 16  ;;  %v9551_v60 = vld [vmem:[#allocation2 + $0x34] sm:$0xff]  }
 0x148   : > { %7480 = vmatprep.mubr.msk.bf16.mxu1 %vm12733_vm13, %v12735_v48  ;;  %v1098_v38 = vrot.slane %v1097_v50, 4  ;;  %v1973_v31 = vor.u32 %v12739_v24, %v9489_v16  ;;  %v1064_v23 = vrot.slane %v1063_v37, 4  ;;  %12741 = vst [vmem:[#allocation26_spill] sm:$0xff] %v9551_v60  ;;  %7745 = vmatpush3.bf16.msra.mxu0 %v8688_v32  ;;  %v8690_v16 = vld [vmem:[%s12581_s3 + $0x1d8] sm:$0xff]   ;;  %v9556_v54 = vcombine.low %v1332_v1, %v1333_v43 }
 0x149   : > { %v1977_v15 = vrot.slane %v12740_v7, 1  ;;  %v1108_v19 = vrot.slane %v1107_v4, 4  ;;  %v1074_v35 = vrot.slane %v1072_v61, 4  ;;  %7746 = vmatprep.subr.bf16.mxu0 %v12735_v48  ;;  %v672_v4 = vadd.f32 %v9278_v27, %v9415_v5 }
 0x14a   : > { %7565 = vmatmul.mubr.bf16.gmra.mrb[40].mxu0 %v1970_v62  ;;  %v1079_v62 = vsel %vm9294_vm5, %v1063_v37, %v1078_v12  ;;  %v1103_v3 = vsel %vm9300_vm9, %v1098_v38, %v1102_v49  ;;  %v1334_v12 = vld [vmem:[#allocation2 + $0x3c] sm:$0xf]  ;;  %v1073_v50 = vsel %vm9307_vm11, %v1064_v23, %v1072_v61  ;;  %v680_v38 = vadd.f32 %v9407_v45, %v9278_v27  ;;  %v1335_v37 = vld [vmem:[#allocation2 + $0x40] sm:$0xf] }
 0x14b   : > { %7568 = vmatprep.mubr.msk.bf16.mxu0 %vm12733_vm13, %v12735_v48  ;;  %1080 = vst [vmem:[#allocation2 + $0x5c] sm:$0xc] %v1079_v62  ;;  %1115 = vst [vmem:[#allocation2 + $0x68] sm:$0xf] %v1103_v3  ;;  %v1117_v49 = vsel %vm9317_vm0, %v1108_v19, %v1116_v22  ;;  %v1083_v52 = vsel %vm9147_vm7, %v1074_v35, %v1082_v17  ;;  %v1978_v1 = vsel %vm1942_vm3, %v1973_v31, %v1977_v15  ;;  %v8693_v62 = vld [vmem:[%s12581_s3 + $0x1e8] sm:$0xff]   ;;  %v9596_v35 = vld [vmem:[#allocation2 + $0x3c] sm:$0xff]  }
 0x14c   : > { %1081 = vst [vmem:[#allocation2 + $0x60] sm:$0xf] %v1073_v50  ;;  %1118 = vst [vmem:[#allocation2 + $0x6c] sm:$0xf] %v1117_v49  ;;  %v9571_v32 = vcombine.low %v1333_v43, %v1334_v12  ;;  %7747 = vmatpush3.bf16.msra.mxu0 %v8690_v16  ;;  %v12620_v17 = vshll.u32 %v9551_v60, 16  ;;  %v740_v22 = vmax.f32 %v680_v38, 0.0  ;;  %v683_v45 = vadd.f32 %v9422_v56, %v9278_v27 }
 0x14d   : > { %1084 = vst [vmem:[#allocation2 + $0x64] sm:$0x7] %v1083_v52  ;;  %v675_v61 = vadd.f32 %v9278_v27, %v9426_v25  ;;  %7748 = vmatprep.subr.bf16.mxu0 %v12735_v48  ;;  %v12621_v24 = vshrl.u32 %v9500_v6, 16  ;;  %v8692_v43 = vld [vmem:[%s12581_s3 + $0x1e0] sm:$0xff]   ;;  %v738_v31 = vmax.f32 %v672_v4, 0.0  ;;  %v9589_v23 = vcombine.low %v1334_v12, %v1335_v37  ;;  %12742 = vst [vmem:[#allocation27_spill] sm:$0xff] %v9596_v35 }
 0x14e   : > { %v7048_v5 = vpack.c.bf16 %v740_v22, %v740_v22  ;;  %v741_v27 = vmax.f32 %v683_v45, 0.0  ;;  %v1985_v3 = vrot.slane %v12620_v17, 1  ;;  %v1336_v4 = vld [vmem:[#allocation2 + $0x44] sm:$0xf]  ;;  %v1144_v22 = vld [vmem:[#allocation2 + $0x70] sm:$0xf] }
 0x14f   : > { %7481 = vmatmul.mubr.bf16.gmra.mrb[24].mxu1 %v9556_v54  ;;  %v1981_v56 = vor.u32 %v12621_v24, %v1977_v15  ;;  %v739_v25 = vmax.f32 %v675_v61, 0.0  ;;  %v7046_v19 = vpack.c.bf16 %v738_v31, %v738_v31  ;;  %v1178_v15 = vld [vmem:[#allocation2 + $0x78] sm:$0xe]  ;;  %v9605_v6 = vcombine.low %v1335_v37, %v1336_v4 }
 0x150   : > { %7484 = vmatprep.mubr.msk.bf16.mxu1 %vm12733_vm13, %v12735_v48  ;;  %7749 = vmatpush3.bf16.msra.mxu0 %v8692_v43  ;;  %v1157_v7 = vshrl.u32 %v7048_v5, 16  ;;  %v1160_v16 = vshll.u32 %v7048_v5, 16  ;;  %v7049_v12 = vpack.c.bf16 %v741_v27, %v741_v27 }
 0x151   : > { %7750 = vmatprep.subr.bf16.mxu0 %v12735_v48  ;;  %v7047_v50 = vpack.c.bf16 %v739_v25, %v739_v25  ;;  %v1125_v38 = vshrl.u32 %v7046_v19, 16  ;;  %v1986_v31 = vsel %vm1942_vm3, %v1981_v56, %v1985_v3  ;;  %12743 = vst [vmem:[#allocation28_spill] sm:$0xff] %v9605_v6 }
 0x152   : > { %7569 = vmatmul.mubr.bf16.gmra.mrb[44].mxu0 %v1978_v1  ;;  %v1159_v49 = vrot.slane %v1157_v7, 6  ;;  %v1162_v52 = vrot.slane %v1160_v16, 7  ;;  %v1128_v1 = vshll.u32 %v7046_v19, 16  ;;  %v1166_v45 = vshrl.u32 %v7049_v12, 16  ;;  %v1148_v7 = vld [vmem:[#allocation2 + $0x78] sm:$0x1] }
 0x153   : > { %7572 = vmatprep.mubr.msk.bf16.mxu0 %vm12733_vm13, %v12735_v48  ;;  %v1169_v61 = vshll.u32 %v7049_v12, 16  ;;  %v1133_v43 = vshrl.u32 %v7047_v50, 16  ;;  %v1136_v5 = vshll.u32 %v7047_v50, 16  ;;  %v1127_v25 = vrot.slane %v1125_v38, 7  ;;  %v1337_v12 = vld [vmem:[#allocation2 + $0x48] sm:$0xf] }
 0x154   : > { %7751 = vmatpush3.bf16.msra.mxu0 %v8693_v62  ;;  %v1163_v27 = vor.u32 %v1162_v52, %v1159_v49  ;;  %v12627_v16 = vshll.u32 %v9596_v35, 16  ;;  %v1168_v19 = vrot.slane %v1166_v45, 6  ;;  %v1182_v49 = vld [vmem:[#allocation2 + $0x80] sm:$0x3]  ;;  %v9611_v52 = vld [vmem:[#allocation2 + $0x44] sm:$0xff]   ;;  %v8694_v45 = vld [vmem:[%s12581_s3 + $0x1f0] sm:$0xff]  }
 0x155   : > { %7752 = vmatprep.subr.bf16.mxu0 %v12735_v48  ;;  %v1171_v17 = vrot.slane %v1169_v61, 7  ;;  %v1135_v24 = vrot.slane %v1133_v43, 7  ;;  %v1130_v28 = vor.u32 %v1128_v1, %v1127_v25  ;;  %v1131_v56 = vrot.slane %v1127_v25, 4  ;;  %12744 = vst [vmem:[#allocation29_spill] sm:$0xff] %v9611_v52  ;;  %v1338_v38 = vld [vmem:[#allocation2 + $0x4c] sm:$0xf] }
 0x156   : > { %v1164_v50 = vrot.slane %v1163_v27, 4  ;;  %v1179_v62 = vsel %vm9267_vm10, %v1163_v27, %v1178_v15  ;;  %v12629_v1 = vshrl.u32 %v9551_v60, 16  ;;  %v9621_v27 = vcombine.low %v1336_v4, %v1337_v12  ;;  %v8695_v25 = vld [vmem:[%s12581_s3 + $0x1f8] sm:$0xff]   ;;  %v1343_v57 = vld [vmem:[#allocation2 + $0x60] sm:$0xf] }
 0x157   : > { %7485 = vmatmul.mubr.bf16.gmra.mrb[28].mxu1 %v9589_v23  ;;  %1180 = vst [vmem:[#allocation2 + $0x78] sm:$0xe] %v1179_v62  ;;  %v1172_v37 = vor.u32 %v1171_v17, %v1168_v19  ;;  %v1138_v61 = vor.u32 %v1136_v5, %v1135_v24  ;;  %v1140_v43 = vrot.slane %v1135_v24, 4  ;;  %v1145_v15 = vsel %vm9334_vm6, %v1130_v28, %v1144_v22  ;;  %v9647_v62 = vld [vmem:[%s12580_s2] ss:$0 sm:$0xff] }
 0x158   : > { %7488 = vmatprep.mubr.msk.bf16.mxu1 %vm12733_vm13, %v12735_v48  ;;  %7753 = vmatpush3.bf16.msra.mxu0 %v8694_v45  ;;  %1146 = vst [vmem:[#allocation2 + $0x70] sm:$0xf] %v1145_v15  ;;  %v1989_v4 = vor.u32 %v12629_v1, %v1985_v3  ;;  %v12628_v5 = vshrl.u32 %v9596_v35, 16  ;;  %v12626_v19 = vshll.u32 %v9611_v52, 16  ;;  %v696_v3 = vadd.f32 %v9647_v62, %v9449_v18  ;;  %v1600_v15 = vpop.f32.mrb[0].mxu1 }
 0x159   : > { %v1173_v17 = vsel %vm9340_vm15, %v1164_v50, %v1172_v37  ;;  %v1174_v24 = vrot.slane %v1172_v37, 4  ;;  %v1139_v28 = vsel %vm9356_vm14, %v1131_v56, %v1138_v61  ;;  %v1149_v22 = vsel %vm9174_vm12, %v1140_v43, %v1148_v7  ;;  %7754 = vmatprep.subr.bf16.mxu0 %v12735_v48  ;;  %v9656_v37 = vld [vmem:[#allocation2 + $0x4c] sm:$0xff]  }
 0x15a   : > { %7573 = vmatmul.mubr.bf16.gmra.mrb[48].mxu0 %v1986_v31  ;;  %v1993_v31 = vrot.slane %v12627_v16, 1  ;;  %1181 = vst [vmem:[#allocation2 + $0x7c] sm:$0xf] %v1173_v17  ;;  %1147 = vst [vmem:[#allocation2 + $0x74] sm:$0xf] %v1139_v28  ;;  %v9642_v7 = vcombine.low %v1337_v12, %v1338_v38  ;;  %v688_v45 = vadd.f32 %v9647_v62, %v9466_v39  ;;  %v744_v18 = vmax.f32 %v696_v3, 0.0 }
 0x15b   : > { %7576 = vmatprep.mubr.msk.bf16.mxu0 %vm12733_vm13, %v12735_v48  ;;  %1150 = vst [vmem:[#allocation2 + $0x78] sm:$0x1] %v1149_v22  ;;  %v1183_v50 = vsel %vm9348_vm4, %v1174_v24, %v1182_v49  ;;  %v1339_v49 = vld [vmem:[#allocation2 + $0x50] sm:$0xf]  ;;  %v699_v43 = vadd.f32 %v9647_v62, %v9477_v30  ;;  %v2001_v39 = vrot.slane %v12626_v19, 1  ;;  %v7458_v17 = vpop.f32.mrb[1].mxu1  ;;  %v715_v0 = vadd.f32 %v9647_v62, %v9516_v13 }
 0x15c   : > { %12745 = vst [vmem:[#allocation30_spill] sm:$0xff] %v9642_v7  ;;  %1184 = vst [vmem:[#allocation2 + $0x80] sm:$0x3] %v1183_v50  ;;  %v1994_v56 = vsel %vm1942_vm3, %v1989_v4, %v1993_v31  ;;  %7755 = vmatpush3.bf16.msra.mxu0 %v8695_v25  ;;  %v1997_v12 = vor.u32 %v12628_v5, %v1993_v31  ;;  %v742_v61 = vmax.f32 %v688_v45, 0.0  ;;  %v9667_v25 = vld [vmem:[#allocation2 + $0x58] sm:$0xf] }
 0x15d   : > { %7940 = vmatprep.subr.bf16.mxu0 %v12735_v48  ;;  %v691_v31 = vadd.f32 %v9647_v62, %v9485_v26  ;;  %v9669_v24 = vcombine.low %v1338_v38, %v1339_v49  ;;  %v7052_v28 = vpack.c.bf16 %v744_v18, %v744_v18  ;;  %v745_v4 = vmax.f32 %v699_v43, 0.0  ;;  %v1340_v50 = vld [vmem:[#allocation2 + $0x54] sm:$0xf]  ;;  %v1246_v17 = vld [vmem:[#allocation2 + $0x88] sm:$0x8]  ;;  %v1602_v43 = vpop.f32.mrb[2].mxu1 }
 0x15e   : > { %v7050_v22 = vpack.c.bf16 %v742_v61, %v742_v61  ;;  %v2002_v3 = vsel %vm1942_vm3, %v1997_v12, %v2001_v39  ;;  %v1212_v38 = vld [vmem:[#allocation2 + $0x80] sm:$0xc]  ;;  %v9678_v12 = vcombine.low %v1340_v50, %v9667_v25  ;;  %v9680_v61 = vcombine.low %v1339_v49, %v1340_v50 }
 0x15f   : > { %7489 = vmatmul.mubr.bf16.gmra.mrb[32].mxu1 %v9621_v27  ;;  %v1225_v15 = vshll.u32 %v7052_v28, 16  ;;  %v1228_v26 = vshrl.u32 %v7052_v28, 16  ;;  %v7053_v5 = vpack.c.bf16 %v745_v4, %v745_v4  ;;  %v7459_v4 = vpop.f32.mrb[3].mxu1  ;;  %v12746_v49 = vshrl.u32 %v9611_v52, 16 }
 0x160   : > { %7492 = vmatprep.mubr.msk.bf16.mxu1 %vm12733_vm13, %v12735_v48  ;;  %v1191_v19 = vshrl.u32 %v7050_v22, 16  ;;  %v1194_v16 = vshll.u32 %v7050_v22, 16  ;;  %v12747_v10 = vshll.u32 %v9656_v37, 16  ;;  %v12645_v4 = vshrl.u32 %v9656_v37, 16 }
 0x161   : > { %v1230_v1 = vrot.slane %v1228_v26, 4  ;;  %v1234_v28 = vshll.u32 %v7053_v5, 16  ;;  %v1238_v22 = vshrl.u32 %v7053_v5, 16  ;;  %v2005_v50 = vor.u32 %v12746_v49, %v2001_v39  ;;  %v1342_v39 = vld [vmem:[#allocation2 + $0x5c] sm:$0xf] }
 0x162   : > { %7577 = vmatmul.mubr.bf16.gmra.mrb[52].mxu0 %v1994_v56  ;;  %v743_v56 = vmax.f32 %v691_v31, 0.0  ;;  %v1227_v31 = vrot.slane %v1225_v15, 5  ;;  %v1193_v45 = vrot.slane %v1191_v19, 5  ;;  %v1196_v30 = vrot.slane %v1194_v16, 6  ;;  %v1344_v49 = vld [vmem:[#allocation2 + $0x64] sm:$0xf] }
 0x163   : > { %7580 = vmatprep.mubr.msk.bf16.mxu0 %vm12733_vm13, %v12735_v48  ;;  %v1236_v19 = vrot.slane %v1234_v28, 5  ;;  %v1240_v16 = vrot.slane %v1238_v22, 4  ;;  %v9704_v47 = vcombine.low %v9667_v25, %v1342_v39  ;;  %v704_v25 = vadd.f32 %v9647_v62, %v9506_v55 }
 0x164   : > { %v7051_v18 = vpack.c.bf16 %v743_v56, %v743_v56  ;;  %v1231_v56 = vor.u32 %v1230_v1, %v1227_v31  ;;  %v1247_v7 = vsel %vm9151_vm8, %v1227_v31, %v1246_v17  ;;  %v1197_v6 = vor.u32 %v1196_v30, %v1193_v45  ;;  %v9692_v45 = vld [vmem:[#allocation2 + $0x54] sm:$0xff]  }
 0x165   : > { %1248 = vst [vmem:[#allocation2 + $0x88] sm:$0x8] %v1247_v7  ;;  %v2009_v30 = vrot.slane %v12747_v10, 1  ;;  %v1241_v17 = vor.u32 %v1240_v16, %v1236_v19  ;;  %v12636_v31 = vshll.u32 %v9692_v45, 16  ;;  %v707_v8 = vadd.f32 %v9647_v62, %v9526_v58 }
 0x166   : > { %v1200_v35 = vshrl.u32 %v7051_v18, 16  ;;  %v1203_v60 = vshll.u32 %v7051_v18, 16  ;;  %v1232_v5 = vrot.slane %v1231_v56, 4  ;;  %v1198_v26 = vrot.slane %v1197_v6, 4  ;;  %v1216_v18 = vld [vmem:[#allocation2 + $0x88] sm:$0x7] }
 0x167   : > { %7493 = vmatmul.mubr.bf16.gmra.mrb[36].mxu1 %v9669_v24  ;;  %v1213_v1 = vsel %vm9294_vm5, %v1197_v6, %v1212_v38  ;;  %v2010_v38 = vsel %vm1942_vm3, %v2005_v50, %v2009_v30  ;;  %v712_v56 = vadd.f32 %v9647_v62, %v9502_v46  ;;  %v2013_v50 = vor.u32 %v12645_v4, %v2009_v30 }
 0x168   : > { %7496 = vmatprep.mubr.msk.bf16.mxu1 %vm12733_vm13, %v12735_v48  ;;  %v1205_v15 = vrot.slane %v1203_v60, 6  ;;  %1214 = vst [vmem:[#allocation2 + $0x80] sm:$0xc] %v1213_v1  ;;  %v1237_v7 = vsel %vm9300_vm9, %v1232_v5, %v1236_v19  ;;  %v1242_v60 = vrot.slane %v1241_v17, 4  ;;  %v2017_v19 = vrot.slane %v12636_v31, 1 }
 0x169   : > { %1249 = vst [vmem:[#allocation2 + $0x8c] sm:$0xf] %v1237_v7  ;;  %v9725_v16 = vcombine.low %v1342_v39, %v1343_v57  ;;  %v748_v46 = vmax.f32 %v712_v56, 0.0  ;;  %v749_v55 = vmax.f32 %v715_v0, 0.0  ;;  %v747_v5 = vmax.f32 %v707_v8, 0.0 }
 0x16a   : > { %7581 = vmatmul.mubr.bf16.gmra.mrb[56].mxu0 %v2002_v3  ;;  %v1202_v3 = vrot.slane %v1200_v35, 5  ;;  %v1250_v35 = vld [vmem:[#allocation2 + $0x90] sm:$0xf]  ;;  %v9732_v13 = vcombine.low %v1343_v57, %v1344_v49  ;;  %v2018_v10 = vsel %vm1942_vm3, %v2013_v50, %v2017_v19  ;;  %v12637_v30 = vshrl.u32 %v9692_v45, 16  ;;  %v1282_v0 = vld [vmem:[#allocation2 + $0x9c] sm:$0x1] }
 0x16b   : > { %7584 = vmatprep.mubr.msk.bf16.mxu0 %vm12733_vm13, %v12735_v48  ;;  %v1251_v28 = vsel %vm9317_vm0, %v1242_v60, %v1250_v35  ;;  %v7056_v58 = vpack.c.bf16 %v748_v46, %v748_v46  ;;  %v7057_v1 = vpack.c.bf16 %v749_v55, %v749_v55  ;;  %v1278_v50 = vld [vmem:[#allocation2 + $0x94] sm:$0xf]  ;;  %vm3907_vm8 = vsmask.f32 4352 }
 0x16c   : > { %v1206_v43 = vor.u32 %v1205_v15, %v1202_v3  ;;  %1252 = vst [vmem:[#allocation2 + $0x90] sm:$0xf] %v1251_v28  ;;  %v9727_v3 = vld [vmem:[#allocation2 + $0x5c] sm:$0xff]   ;;  %v746_v15 = vmax.f32 %v704_v25, 0.0  ;;  %v2021_v8 = vor.u32 %v12637_v30, %v2017_v19  ;;  %v1346_v19 = vld [vmem:[#allocation2 + $0x6c] sm:$0xf] }
 0x16d   : > { %v12642_v17 = vshll.u32 %v9727_v3, 16  ;;  %v1291_v39 = vshrl.u32 %v7056_v58, 16  ;;  %v1294_v7 = vshll.u32 %v7056_v58, 16  ;;  %v12644_v20 = vshrl.u32 %v9727_v3, 16 }
 0x16e   : > { %v1207_v36 = vsel %vm9307_vm11, %v1198_v26, %v1206_v43  ;;  %v1208_v6 = vrot.slane %v1206_v43, 4  ;;  %v9729_v26 = vld [vmem:[#allocation2 + $0x68] sm:$0xf]  ;;  %v7054_v62 = vpack.c.bf16 %v746_v15, %v746_v15  ;;  %vm4798_vm9 = vcmask 1046528  }
 0x16f   : > { %7497 = vmatmul.mubr.bf16.gmra.mrb[40].mxu1 %v9678_v12  ;;  %1215 = vst [vmem:[#allocation2 + $0x84] sm:$0xf] %v1207_v36  ;;  %v9740_v43 = vcombine.low %v1344_v49, %v9729_v26  ;;  %v1312_v36 = vld [vmem:[#allocation2 + $0x9c] sm:$0xe]  ;;  %v1293_v57 = vrot.slane %v1291_v39, 6  ;;  %v1296_v56 = vrot.slane %v1294_v7, 7 }
 0x170   : > { %7500 = vmatprep.mubr.msk.bf16.mxu1 %vm12733_vm13, %v12735_v48  ;;  %v1217_v22 = vsel %vm9147_vm7, %v1208_v6, %v1216_v18  ;;  %v7055_v18 = vpack.c.bf16 %v747_v5, %v747_v5  ;;  %v1259_v35 = vshrl.u32 %v7054_v62, 16  ;;  %v1262_v60 = vshll.u32 %v7054_v62, 16  ;;  %v9746_v49 = vld [vmem:[#allocation2 + $0x64] sm:$0xff]  }
 0x171   : > { %1218 = vst [vmem:[#allocation2 + $0x88] sm:$0x7] %v1217_v22  ;;  %v1300_v6 = vshrl.u32 %v7057_v1, 16  ;;  %v2025_v5 = vrot.slane %v12642_v17, 1  ;;  %v1297_v58 = vor.u32 %v1296_v56, %v1293_v57  ;;  %vm2957_vm7 = vcmask 1045504  }
 0x172   : > { %7585 = vmatmul.mubr.bf16.gmra.mrb[60].mxu0 %v2010_v38  ;;  %v1303_v38 = vshll.u32 %v7057_v1, 16  ;;  %v1267_v28 = vshrl.u32 %v7055_v18, 16  ;;  %v1270_v22 = vshll.u32 %v7055_v18, 16  ;;  %v1261_v25 = vrot.slane %v1259_v35, 7  ;;  %v1316_v18 = vld [vmem:[#allocation2 + $0xa4] sm:$0x3] }
 0x173   : > { %7588 = vmatprep.mubr.msk.bf16.mxu0 %vm12733_vm13, %v12735_v48  ;;  %v1302_v46 = vrot.slane %v1300_v6, 6  ;;  %v1298_v30 = vrot.slane %v1297_v58, 4  ;;  %v1313_v6 = vsel %vm9267_vm10, %v1297_v58, %v1312_v36  ;;  %v2026_v9 = vsel %vm1942_vm3, %v2021_v8, %v2025_v5  ;;  %v9783_v8 = vld [vmem:[#allocation2 + $0x6c] sm:$0xff]  }
 0x174   : > { %v1305_v15 = vrot.slane %v1303_v38, 7  ;;  %v1269_v55 = vrot.slane %v1267_v28, 7  ;;  %v1264_v62 = vor.u32 %v1262_v60, %v1261_v25  ;;  %v1265_v1 = vrot.slane %v1261_v25, 4  ;;  %v1347_v28 = vld [vmem:[#allocation2 + $0x70] sm:$0xf] }
 0x175   : > { %v12640_v60 = vshll.u32 %v9746_v49, 16  ;;  %1314 = vst [vmem:[#allocation2 + $0x9c] sm:$0xe] %v1313_v6  ;;  %v9770_v25 = vcombine.low %v9729_v26, %v1346_v19  ;;  %v2029_v21 = vor.u32 %v12644_v20, %v2025_v5  ;;  %v9781_v26 = vcombine.low %v1346_v19, %v1347_v28 }
 0x176   : > { %v1306_v39 = vor.u32 %v1305_v15, %v1302_v46  ;;  %v1272_v7 = vor.u32 %v1270_v22, %v1269_v55  ;;  %v1274_v35 = vrot.slane %v1269_v55, 4  ;;  %v1279_v38 = vsel %vm9334_vm6, %v1264_v62, %v1278_v50  ;;  %v1348_v50 = vld [vmem:[#allocation2 + $0x74] sm:$0xf]  ;;  %v1349_v46 = vld [vmem:[#allocation2 + $0x78] sm:$0xf] }
 0x177   : > { %7501 = vmatmul.mubr.bf16.gmra.mrb[44].mxu1 %v9725_v16  ;;  %1280 = vst [vmem:[#allocation2 + $0x94] sm:$0xf] %v1279_v38  ;;  %v9785_v33 = vcombine.low %v1347_v28, %v1348_v50  ;;  %v12638_v5 = vshll.u32 %v9783_v8, 16  ;;  %v1352_v58 = vld [vmem:[#allocation2 + $0x84] sm:$0xf]  ;;  %v9805_v38 = vcombine.low %v1348_v50, %v1349_v46 }
 0x178   : > { %7504 = vmatprep.mubr.msk.bf16.mxu1 %vm12733_vm13, %v12735_v48  ;;  %v1308_v22 = vrot.slane %v1306_v39, 4  ;;  %v1283_v14 = vsel %vm9174_vm12, %v1274_v35, %v1282_v0  ;;  %v1307_v56 = vsel %vm9340_vm15, %v1298_v30, %v1306_v39  ;;  %v1350_v0 = vld [vmem:[#allocation2 + $0x7c] sm:$0xf]  ;;  %v2033_v30 = vrot.slane %v12640_v60, 1  ;;  %v2376_v62 = vld [vmem:[#allocation2 + $0xc] sm:$0xe]  ;;  %vm13360_vm15 = vmmov %vm12730_vm2 }
 0x179   : > { %1284 = vst [vmem:[#allocation2 + $0x9c] sm:$0x1] %v1283_v14  ;;  %1315 = vst [vmem:[#allocation2 + $0xa0] sm:$0xf] %v1307_v56  ;;  %v9787_v15 = vcombine.low %v1349_v46, %v1350_v0  ;;  %v9797_v39 = vld [vmem:[#allocation2 + $0x74] sm:$0xff]   ;;  %v2041_v6 = vrot.slane %v12638_v5, 1 }
 0x17a   : > { %7589 = vmatmul.mubr.bf16.gmra.mrb[64].mxu0 %v2018_v10  ;;  %v9750_v10 = vpop.f32.mrb[4].mxu1  ;;  %v1317_v51 = vsel %vm9348_vm4, %v1308_v22, %v1316_v18  ;;  %12750 = vst [vmem:[#allocation33_spill] sm:$0xff] %v9785_v33  ;;  %v2034_v55 = vsel %vm1942_vm3, %v2029_v21, %v2033_v30  ;;  %v1351_v18 = vld [vmem:[#allocation2 + $0x80] sm:$0xf]  ;;  %v1354_v35 = vld [vmem:[#allocation2 + $0x8c] sm:$0xf] }
 0x17b   : > { %7592 = vmatprep.mubr.msk.bf16.mxu0 %vm12733_vm13, %v12735_v48  ;;  %12748 = vst [vmem:[#allocation31_spill] sm:$0xff] %v9750_v10  ;;  %v7462_v31 = vpop.f32.mrb[5].mxu1  ;;  %1318 = vst [vmem:[#allocation2 + $0xa4] sm:$0x3] %v1317_v51  ;;  %v8797_v28 = vld [vmem:[#allocation2 + $0x10] sm:$0xf] }
 0x17c   : > { %v9760_v57 = vpop.f32.mrb[6].mxu1  ;;  %v1273_v31 = vsel %vm9356_vm14, %v1265_v1, %v1272_v7  ;;  %v12641_v1 = vshrl.u32 %v9746_v49, 16  ;;  %v9799_v7 = vcombine.low %v1351_v18, %v1352_v58  ;;  %v9807_v22 = vcombine.low %v2376_v62, %v8797_v28  ;;  %v1355_v50 = vld [vmem:[#allocation2 + $0x90] sm:$0xf]  ;;  %v9866_v10 = vld [vmem:[#allocation2 + $0x84] sm:$0xff]  }
 0x17d   : > { %12749 = vst [vmem:[#allocation32_spill] sm:$0xff] %v9760_v57  ;;  %v7463_v36 = vpop.f32.mrb[7].mxu1  ;;  %1281 = vst [vmem:[#allocation2 + $0x98] sm:$0xf] %v1273_v31  ;;  %v1353_v31 = vld [vmem:[#allocation2 + $0x88] sm:$0xf]  ;;  %v9832_v28 = vcombine.low %v1350_v0, %v1351_v18 }
 0x17e   : > { %v2037_v19 = vor.u32 %v12641_v1, %v2033_v30  ;;  %v9810_v14 = vcombine.low %v1353_v31, %v1354_v35  ;;  %v9816_v56 = vld [vmem:[#allocation2 + $0x94] sm:$0xf]  ;;  %v2420_v51 = vshrl.u32 %v9807_v22, 16  ;;  %v12643_v21 = vshrl.u32 %v9783_v8, 16 }
 0x17f   : > { %7505 = vmatmul.mubr.bf16.gmra.mrb[48].mxu1 %v9740_v43  ;;  %v2423_v30 = vshll.u32 %v9807_v22, 16  ;;  %v9828_v62 = vcombine.low %v1355_v50, %v9816_v56  ;;  %v12650_v4 = vshrl.u32 %v9797_v39, 16  ;;  %vm2418_vm6 = vsmask.f32 6400 }
 0x180   : > { %7508 = vmatprep.mubr.msk.bf16.mxu1 %vm12733_vm13, %v12735_v48  ;;  %12751 = vst [vmem:[#allocation34_spill] sm:$0xff] %v9810_v14  ;;  %v2042_v36 = vsel %vm1942_vm3, %v2037_v19, %v2041_v6  ;;  %v2045_v19 = vor.u32 %v12643_v21, %v2041_v6  ;;  %v2422_v60 = vrot.slane %v2420_v51, 1  ;;  %v9847_v18 = vld [vmem:[#allocation2 + $0xa0] sm:$0xf]  ;;  %v12754_v21 = vshrl.u32 %v9411_v53, 16 }
 0x181   : > { %12752 = vst [vmem:[#allocation35_spill] sm:$0xff] %v9828_v62  ;;  %v2425_v1 = vrot.slane %v2423_v30, 2  ;;  %v4385_v14 = vshrl.u32 %v9381_v41, 16  ;;  %vm3429_vm11 = vsmask.f32 5376 }
 0x182   : > { %7593 = vmatmul.mubr.bf16.gmra.mrb[68].mxu0 %v2026_v9  ;;  %v12639_v9 = vshll.u32 %v9797_v39, 16  ;;  %v9849_v6 = vld [vmem:[#allocation2 + $0xa4] sm:$0x3]  ;;  %v2427_v20 = vrot.slane %v12754_v21, 1  ;;  %v12757_v21 = vshll.u32 %v9411_v53, 16 }
 0x183   : > { %7596 = vmatprep.mubr.msk.bf16.mxu0 %vm12733_vm13, %v12735_v48  ;;  %v9858_v51 = vcombine.low %v9847_v18, %v9849_v6  ;;  %v2426_v30 = vor.u32 %v2425_v1, %v2422_v60  ;;  %v1319_v60 = vld [vmem:[#allocation2] sm:$0x8]  ;;  %vm13340_vm12 = vsmask.f32 3328  ;;  %vm13347_vm10 = vsmask.f32 2304 }
 0x184   : > { %v2049_v46 = vrot.slane %v12639_v9, 1  ;;  %v9837_v5 = vld [vmem:[#allocation2 + $0x98] sm:$0xf]  ;;  %v2428_v52 = vrot.slane %v12757_v21, 2  ;;  %vm13396_vm5 = vmmov %vm13340_vm12 }
 0x185   : > { %12755 = vst [vmem:[#allocation37_spill] sm:$0xff] %v9858_v51  ;;  %vm13407_vm0 = vmmov %vm13347_vm10 }
 0x186   : > { %v2050_v17 = vsel %vm1942_vm3, %v2045_v19, %v2049_v46  ;;  %v2053_v19 = vor.u32 %v12650_v4, %v2049_v46  ;;  %v12652_v46 = vshll.u32 %v9866_v10, 16 }
 0x187   : > { %7509 = vmatmul.mubr.bf16.gmra.mrb[52].mxu1 %v9781_v26 }
 0x188   : > { %7512 = vmatprep.mubr.msk.bf16.mxu1 %vm12733_vm13, %v12735_v48 }
 0x18a   : > { %7597 = vmatmul.mubr.bf16.gmra.mrb[72].mxu0 %v2034_v55  ;;  %v9825_v55 = vld [vmem:[#allocation2 + $0x7c] sm:$0xff]  }
 0x18b   : > { %7600 = vmatprep.mubr.msk.bf16.mxu0 %vm12733_vm13, %v12735_v48  ;;  %v12649_v0 = vshll.u32 %v9825_v55, 16  ;;  %v12653_v53 = vshrl.u32 %v9825_v55, 16 }
 0x18d   : > { %v2057_v57 = vrot.slane %v12649_v0, 1  ;;  %v9889_v0 = vcombine.low %v1354_v35, %v1355_v50  ;;  %v4377_v35 = vshrl.u32 %v9195_v34, 16 }
 0x18f   : > { %7513 = vmatmul.mubr.bf16.gmra.mrb[56].mxu1 %v9805_v38  ;;  %v2058_v1 = vsel %vm1942_vm3, %v2053_v19, %v2057_v57  ;;  %v2061_v21 = vor.u32 %v12653_v53, %v2057_v57  ;;  %v2065_v19 = vrot.slane %v12652_v46, 1  ;;  %12758 = vst [vmem:[#allocation39_spill] sm:$0xff] %v9889_v0  ;;  %v8799_v46 = vld [vmem:[#allocation2 + $0x10] sm:$0xf]  ;;  %v8800_v53 = vld [vmem:[#allocation2 + $0x14] sm:$0xf] }
 0x190   : > { %7516 = vmatprep.mubr.msk.bf16.mxu1 %vm12733_vm13, %v12735_v48  ;;  %v9903_v62 = vcombine.low %v8799_v46, %v8800_v53 }
 0x191   : > { %v2066_v50 = vsel %vm1942_vm3, %v2061_v21, %v2065_v19 }
 0x192   : > { %7601 = vmatmul.mubr.bf16.gmra.mrb[76].mxu0 %v2042_v36  ;;  %v9834_v36 = vld [vmem:[#allocation2 + $0x9c] sm:$0xf] }
 0x193   : > { %7604 = vmatprep.mubr.msk.bf16.mxu0 %vm12733_vm13, %v12735_v48  ;;  %v9843_v9 = vcombine.low %v9837_v5, %v9834_v36 }
 0x195   : > { %12753 = vst [vmem:[#allocation36_spill] sm:$0xff] %v9843_v9  ;;  %v9871_v9 = vor.u32 %v2428_v52, %v2427_v20  ;;  %v8798_v52 = vld [vmem:[#allocation2 + $0x4] sm:$0xf] }
 0x196   : > { %v6946_v20 = vcombine.low %v1319_v60, %v8798_v52  ;;  %v3917_v60 = vshrl.u32 %v9207_v40, 16  ;;  %v3920_v52 = vshll.u32 %v9207_v40, 16  ;;  %v4397_v40 = vshll.u32 %v9472_v59, 16 }
 0x197   : > { %7517 = vmatmul.mubr.bf16.gmra.mrb[60].mxu1 %v9832_v28 }
 0x198   : > { %7520 = vmatprep.mubr.msk.bf16.mxu1 %vm12733_vm13, %v12735_v48  ;;  %v3909_v4 = vshrl.u32 %v6946_v20, 16  ;;  %v3912_v51 = vshll.u32 %v6946_v20, 16  ;;  %v9917_v46 = vrot.slane %v3917_v60, 3  ;;  %v9919_v53 = vrot.slane %v3920_v52, 4 }
 0x199   : > { %v4393_v60 = vshrl.u32 %v9434_v42, 16  ;;  %v4405_v52 = vshll.u32 %v9514_v2, 16 }
 0x19a   : > { %7605 = vmatmul.mubr.bf16.gmra.mrb[80].mxu0 %v2050_v17  ;;  %v9864_v17 = vcombine.low %v1352_v58, %v1353_v31  ;;  %v9879_v58 = vsel %vm2418_vm6, %v2426_v30, %v9871_v9  ;;  %v4373_v31 = vshll.u32 %v9195_v34, 16  ;;  %v4381_v30 = vshll.u32 %v9381_v41, 16 }
 0x19b   : > { %7608 = vmatprep.mubr.msk.bf16.mxu0 %vm12733_vm13, %v12735_v48  ;;  %v9913_v33 = vrot.slane %v3909_v4, 3  ;;  %v9915_v21 = vrot.slane %v3912_v51, 4  ;;  %v9931_v4 = vcombine.low %v9816_v56, %v9837_v5  ;;  %v4401_v51 = vshrl.u32 %v9472_v59, 16 }
 0x19c   : > { %12756 = vst [vmem:[#allocation38_spill] sm:$0xff] %v9864_v17  ;;  %v9899_v57 = vrot.slane %v4373_v31, 1  ;;  %v9906_v20 = vrot.slane %v4381_v30, 1  ;;  %v12662_v31 = vshrl.u32 %v9866_v10, 16  ;;  %v12767_v59 = vshrl.u32 %v9656_v37, 16 }
 0x19d   : > { %12760 = vst [vmem:[#allocation41_spill] sm:$0xff] %v9913_v33  ;;  %12761 = vst [vmem:[#allocation42_spill] sm:$0xff] %v9915_v21 }
 0x19e   : > { %12759 = vst [vmem:[#allocation40_spill] sm:$0xff] %v9899_v57  ;;  %v9924_v30 = vor.u32 %v4377_v35, %v9899_v57  ;;  %v9939_v35 = vor.u32 %v4385_v14, %v9906_v20  ;;  %v9941_v57 = vld [vmem:[#allocation2 + $0x14] sm:$0xff]   ;;  %v4413_v14 = vshll.u32 %v9556_v54, 16 }
 0x19f   : > { %7521 = vmatmul.mubr.bf16.gmra.mrb[64].mxu1 %v9864_v17  ;;  %v2069_v17 = vor.u32 %v12662_v31, %v2065_v19  ;;  %12762 = vst [vmem:[#allocation43_spill] sm:$0xff] %v9941_v57  ;;  %v9944_v19 = vrot.slane %v4397_v40, 1 }
 0x1a0   : > { %7524 = vmatprep.mubr.msk.bf16.mxu1 %vm12733_vm13, %v12735_v48 }
 0x1a1   : > { %12763 = vst [vmem:[#allocation44_spill] sm:$0xff] %v9944_v19  ;;  %v9967_v41 = vor.u32 %v4401_v51, %v9944_v19  ;;  %v12772_v51 = vshrl.u32 %v9692_v45, 16 }
 0x1a2   : > { %7609 = vmatmul.mubr.bf16.gmra.mrb[84].mxu0 %v2058_v1  ;;  %v9893_v1 = vld [vmem:[#allocation2 + $0x8c] sm:$0xff]  }
 0x1a3   : > { %7612 = vmatprep.mubr.msk.bf16.mxu0 %vm12733_vm13, %v12735_v48  ;;  %v12764_v5 = vshll.u32 %v9893_v1, 16  ;;  %12766 = vst [vmem:[#allocation46_spill] sm:$0xff] %v9967_v41  ;;  %v2459_v41 = vrot.slane %v12772_v51, 1  ;;  %v12777_v51 = vshrl.u32 %v9727_v3, 16 }
 0x1a5   : > { %v2073_v56 = vrot.slane %v12764_v5, 1 }
 0x1a7   : > { %7525 = vmatmul.mubr.bf16.gmra.mrb[68].mxu1 %v9889_v0  ;;  %v4389_v0 = vshll.u32 %v9434_v42, 16  ;;  %v2074_v5 = vsel %vm1942_vm3, %v2069_v17, %v2073_v56  ;;  %v2455_v17 = vrot.slane %v12767_v59, 1  ;;  %v9975_v42 = vrot.slane %v4405_v52, 1 }
 0x1a8   : > { %7528 = vmatprep.mubr.msk.bf16.mxu1 %vm12733_vm13, %v12735_v48  ;;  %v9987_v59 = vcombine.low %v9834_v36, %v9847_v18  ;;  %v12774_v52 = vshll.u32 %v9692_v45, 16  ;;  %v12778_v45 = vshll.u32 %v9727_v3, 16  ;;  %v12780_v3 = vshrl.u32 %v9746_v49, 16 }
 0x1a9   : > { %v9936_v34 = vrot.slane %v4389_v0, 1  ;;  %v4409_v0 = vshrl.u32 %v9514_v2, 16  ;;  %12769 = vst [vmem:[#allocation47_spill] sm:$0xff] %v9975_v42  ;;  %v12770_v2 = vshrl.u32 %v9893_v1, 16 }
 0x1aa   : > { %7613 = vmatmul.mubr.bf16.gmra.mrb[88].mxu0 %v2066_v50  ;;  %v9921_v50 = vld [vmem:[#allocation2 + $0x94] sm:$0xff]   ;;  %12773 = vst [vmem:[#allocation48_spill] sm:$0xff] %v9987_v59 }
 0x1ab   : > { %7616 = vmatprep.mubr.msk.bf16.mxu0 %vm12733_vm13, %v12735_v48  ;;  %v9960_v31 = vor.u32 %v4393_v60, %v9936_v34  ;;  %v12768_v60 = vshll.u32 %v9656_v37, 16  ;;  %v2077_v33 = vor.u32 %v12770_v2, %v2073_v56  ;;  %v9989_v37 = vld [vmem:[#allocation2 + $0x9c] sm:$0xff]   ;;  %v9994_v56 = vor.u32 %v4409_v0, %v9975_v42 }
 0x1ac   : > { %v9996_v2 = vrot.slane %v4413_v14, 1  ;;  %v4421_v14 = vshll.u32 %v9589_v23, 16  ;;  %v12782_v0 = vshll.u32 %v9746_v49, 16  ;;  %v12786_v49 = vshll.u32 %v9783_v8, 16 }
 0x1ad   : > { %12765 = vst [vmem:[#allocation45_spill] sm:$0xff] %v9960_v31  ;;  %v2456_v40 = vrot.slane %v12768_v60, 2  ;;  %v2460_v60 = vrot.slane %v12774_v52, 2  ;;  %12775 = vst [vmem:[#allocation49_spill] sm:$0xff] %v9994_v56  ;;  %v2463_v31 = vrot.slane %v12777_v51, 1  ;;  %v2464_v52 = vrot.slane %v12778_v45, 2 }
 0x1ae   : > { %12776 = vst [vmem:[#allocation50_spill] sm:$0xff] %v9996_v2  ;;  %v4429_v56 = vshll.u32 %v9621_v27, 16  ;;  %v2468_v19 = vrot.slane %v12782_v0, 2  ;;  %v4425_v51 = vshrl.u32 %v9589_v23, 16  ;;  %v2472_v0 = vrot.slane %v12786_v49, 2 }
 0x1af   : > { %7529 = vmatmul.mubr.bf16.gmra.mrb[72].mxu1 %v9931_v4  ;;  %v10003_v36 = vor.u32 %v2456_v40, %v2455_v17  ;;  %v2461_v18 = vor.u32 %v2460_v60, %v2459_v41  ;;  %v2465_v41 = vor.u32 %v2464_v52, %v2463_v31  ;;  %v2467_v17 = vrot.slane %v12780_v3, 1 }
 0x1b0   : > { %7532 = vmatprep.mubr.msk.bf16.mxu1 %vm12733_vm13, %v12735_v48  ;;  %v12664_v31 = vshrl.u32 %v9921_v50, 16  ;;  %v10036_v45 = vrot.slane %v4429_v56, 1  ;;  %v10041_v23 = vrot.slane %v4421_v14, 1  ;;  %v4437_v56 = vshll.u32 %v9669_v24, 16 }
 0x1b1   : > { %v10016_v40 = vsel %vm2418_vm6, %v10003_v36, %v2461_v18  ;;  %v10032_v52 = vsel %vm2418_vm6, %v2461_v18, %v2465_v41 }
 0x1b2   : > { %7617 = vmatmul.mubr.bf16.gmra.mrb[92].mxu0 %v2074_v5  ;;  %v12771_v5 = vshll.u32 %v9921_v50, 16  ;;  %12779 = vst [vmem:[#allocation51_spill] sm:$0xff] %v10016_v40  ;;  %12783 = vst [vmem:[#allocation53_spill] sm:$0xff] %v10032_v52  ;;  %v6728_v52 = vcombine.low %v9849_v6, %v9849_v6  ;;  %v12794_v6 = vshll.u32 %v9797_v39, 16 }
 0x1b3   : > { %7620 = vmatprep.mubr.msk.bf16.mxu0 %vm12733_vm13, %v12735_v48  ;;  %12785 = vst [vmem:[#allocation54_spill] sm:$0xff] %v10036_v45  ;;  %12787 = vst [vmem:[#allocation55_spill] sm:$0xff] %v10041_v23 }
 0x1b4   : > { %v2081_v21 = vrot.slane %v12771_v5, 1  ;;  %v4417_v5 = vshrl.u32 %v9556_v54, 16 }
 0x1b6   : > { %v2082_v54 = vsel %vm1942_vm3, %v2077_v33, %v2081_v21  ;;  %v10021_v60 = vor.u32 %v4417_v5, %v9996_v2  ;;  %v12784_v5 = vshrl.u32 %v9783_v8, 16  ;;  %v2469_v33 = vor.u32 %v2468_v19, %v2467_v17 }
 0x1b7   : > { %7533 = vmatmul.mubr.bf16.gmra.mrb[76].mxu1 %v9987_v59  ;;  %v2085_v40 = vor.u32 %v12664_v31, %v2081_v21  ;;  %v12791_v19 = vshrl.u32 %v9797_v39, 16  ;;  %v10058_v17 = vor.u32 %v4425_v51, %v10041_v23  ;;  %v12793_v21 = vld [vmem:[#allocation28_spill] sm:$0xff]  ;;  %v2476_v31 = vrot.slane %v12794_v6, 2 }
 0x1b8   : > { %7536 = vmatprep.mubr.msk.bf16.mxu1 %vm12733_vm13, %v12735_v48  ;;  %12781 = vst [vmem:[#allocation52_spill] sm:$0xff] %v10021_v60  ;;  %v2471_v3 = vrot.slane %v12784_v5, 1  ;;  %v12788_v60 = vshll.u32 %v9989_v37, 16  ;;  %v10049_v5 = vld [vmem:[#allocation2 + $0xa4] sm:$0xff]   ;;  %v12797_v51 = vshrl.u32 %v9825_v55, 16  ;;  %v12798_v6 = vshll.u32 %v9825_v55, 16 }
 0x1b9   : > { %12789 = vst [vmem:[#allocation56_spill] sm:$0xff] %v10049_v5  ;;  %v2475_v14 = vrot.slane %v12791_v19, 1  ;;  %12792 = vst [vmem:[#allocation58_spill] sm:$0xff] %v10058_v17  ;;  %v12801_v55 = vshrl.u32 %v9866_v10, 16 }
 0x1ba   : > { %7621 = vmatmul.mubr.bf16.gmra.mrb[96].mxu0 %v2082_v54  ;;  %v4433_v54 = vshrl.u32 %v9621_v27, 16  ;;  %v2089_v18 = vrot.slane %v12788_v60, 1  ;;  %v10053_v27 = vsel %vm2418_vm6, %v2465_v41, %v2469_v33  ;;  %v2473_v8 = vor.u32 %v2472_v0, %v2471_v3  ;;  %v12799_v60 = vld [vmem:[#allocation30_spill] sm:$0xff] }
 0x1bb   : > { %7624 = vmatprep.mubr.msk.bf16.mxu0 %vm12733_vm13, %v12735_v48  ;;  %12790 = vst [vmem:[#allocation57_spill] sm:$0xff] %v10053_v27  ;;  %v4445_v41 = vshll.u32 %v9678_v12, 16  ;;  %v2479_v0 = vrot.slane %v12797_v51, 1  ;;  %v2477_v39 = vor.u32 %v2476_v31, %v2475_v14  ;;  %v2483_v14 = vrot.slane %v12801_v55, 1 }
 0x1bc   : > { %v10065_v2 = vor.u32 %v4433_v54, %v10036_v45  ;;  %v10071_v3 = vsel %vm2418_vm6, %v2469_v33, %v2473_v8  ;;  %v2090_v19 = vsel %vm1942_vm3, %v2085_v40, %v2089_v18  ;;  %v2480_v54 = vrot.slane %v12798_v6, 2 }
 0x1bd   : > { %12796 = vst [vmem:[#allocation59_spill] sm:$0xff] %v10071_v3  ;;  %v4441_v33 = vshrl.u32 %v9669_v24, 16  ;;  %v2091_v40 = vshrl.u32 %v9989_v37, 16  ;;  %v10088_v51 = vsel %vm2418_vm6, %v2473_v8, %v2477_v39  ;;  %v10092_v6 = vrot.slane %v4445_v41, 1  ;;  %v8689_v24 = vld [vmem:[%s12581_s3 + $0x200] sm:$0xff]  }
 0x1be   : > { %12795 = vst [vmem:[#allocation28_spill] sm:$0xff] %v10065_v2  ;;  %v10081_v2 = vrot.slane %v4437_v56, 1  ;;  %12800 = vst [vmem:[#allocation30_spill] sm:$0xff] %v10088_v51  ;;  %v2481_v31 = vor.u32 %v2480_v54, %v2479_v0  ;;  %v4449_v56 = vshrl.u32 %v9678_v12, 16  ;;  %v4453_v27 = vshll.u32 %v9725_v16, 16  ;;  %v12807_v51 = vld [vmem:[#allocation23_spill] sm:$0xff] }
 0x1bf   : > { %7537 = vmatmul.mubr.bf16.gmra.mrb[80].mxu1 %v6728_v52  ;;  %v2093_v52 = vor.u32 %v2091_v40, %v2089_v18  ;;  %v12803_v8 = vshll.u32 %v10049_v5, 16  ;;  %v10103_v54 = vld [vmem:[#allocation2 + $0xac] ss:$0 sps:$4 sm:$0x77]   ;;  %v12806_v12 = vshrl.u32 %v9893_v1, 16  ;;  %v12808_v3 = vshrl.u32 %v12807_v51, 16 }
 0x1c0   : > { %7656 = vmatprep.mubr.msk.bf16.mxu1 %vm12733_vm13, %v12735_v48  ;;  %12804 = vst [vmem:[#allocation60_spill] sm:$0xff] %v10103_v54  ;;  %v10106_v41 = vsel %vm2418_vm6, %v2477_v39, %v2481_v31  ;;  %v12809_v45 = vshll.u32 %v12807_v51, 16  ;;  %v12810_v18 = vshll.u32 %v9893_v1, 16  ;;  %v8699_v1 = vld [vmem:[%s12581_s3 + $0x208] sm:$0xff]   ;;  %v12813_v51 = vshll.u32 %v9921_v50, 16 }
 0x1c1   : > { %v2097_v0 = vrot.slane %v12803_v8, 1  ;;  %12805 = vst [vmem:[#allocation61_spill] sm:$0xff] %v10106_v41  ;;  %v2487_v55 = vrot.slane %v12806_v12, 1  ;;  %v2431_v17 = vrot.slane %v12808_v3, 1  ;;  %v10117_v8 = vor.u32 %v4441_v33, %v10081_v2 }
 0x1c2   : > { %7625 = vmatmul.mubr.bf16.gmra.mrb[100].mxu0 %v2090_v19  ;;  %v12802_v19 = vshll.u32 %v9866_v10, 16  ;;  %v2432_v23 = vrot.slane %v12809_v45, 2  ;;  %v4457_v41 = vshrl.u32 %v9725_v16, 16  ;;  %v10123_v12 = vrot.slane %v4453_v27, 1 }
 0x1c3   : > { %7628 = vmatprep.mubr.msk.bf16.mxu0 %vm12733_vm13, %v12735_v48  ;;  %v12812_v3 = vshrl.u32 %v9921_v50, 16  ;;  %v2098_v16 = vsel %vm1942_vm3, %v2093_v52, %v2097_v0  ;;  %v2103_v27 = vshll.u32 %v10103_v54, 16  ;;  %v12815_v50 = vshll.u32 %v9989_v37, 16 }
 0x1c4   : > { %v2484_v49 = vrot.slane %v12802_v19, 2  ;;  %v2488_v19 = vrot.slane %v12810_v18, 2  ;;  %v2495_v18 = vrot.slane %v2091_v40, 1  ;;  %v8702_v40 = vld [vmem:[%s12581_s3 + $0x210] sm:$0xff]   ;;  %v12820_v52 = vshll.u32 %v10049_v5, 16 }
 0x1c5   : > { %v2491_v33 = vrot.slane %v12812_v3, 1 }
 0x1c6   : > { %v2485_v10 = vor.u32 %v2484_v49, %v2483_v14  ;;  %v2489_v49 = vor.u32 %v2488_v19, %v2487_v55  ;;  %v2492_v14 = vrot.slane %v12813_v51, 2  ;;  %v4461_v19 = vshll.u32 %v9740_v43, 16 }
 0x1c7   : > { %7657 = vmatmul.mubr.bf16.vlgmr.msra.gmra.mrb[84].mxu1 %v9879_v58  ;;  %v2099_v58 = vshrl.u32 %v10049_v5, 16  ;;  %v2496_v51 = vrot.slane %v12815_v50, 2  ;;  %v12817_v50 = vld [vmem:[#allocation24_spill] sm:$0xff] }
 0x1c8   : > { %7841 = vmatpush3.bf16.msra.mxu1 %v8689_v24  ;;  %7660 = vmatprep.mubr.msk.bf16.mxu1 %vm12733_vm13, %v12735_v48  ;;  %v10131_v45 = vsel %vm2418_vm6, %v2481_v31, %v2485_v10  ;;  %v10142_v24 = vor.u32 %v4449_v56, %v10092_v6  ;;  %v10144_v31 = vor.u32 %v2432_v23, %v2431_v17  ;;  %v4465_v17 = vshrl.u32 %v9740_v43, 16 }
 0x1c9   : > { %12811 = vst [vmem:[#allocation23_spill] sm:$0xff] %v10131_v45  ;;  %7842 = vmatprep.subr.bf16.mxu1 %v12735_v48  ;;  %v10147_v55 = vsel %vm2418_vm6, %v2485_v10, %v2489_v49  ;;  %v2493_v3 = vor.u32 %v2492_v14, %v2491_v33  ;;  %v10157_v23 = vor.u32 %v4457_v41, %v10123_v12  ;;  %v2499_v14 = vrot.slane %v2099_v58, 1 }
 0x1ca   : > { %7629 = vmatmul.mubr.bf16.gmra.mrb[104].mxu0 %v2098_v16  ;;  %12814 = vst [vmem:[#allocation62_spill] sm:$0xff] %v10147_v55  ;;  %v2101_v10 = vor.u32 %v2099_v58, %v2097_v0  ;;  %v2105_v16 = vrot.slane %v2103_v27, 1  ;;  %v2497_v37 = vor.u32 %v2496_v51, %v2495_v18  ;;  %v2434_v41 = vsel %vm2418_vm6, %v9871_v9, %v10144_v31 }
 0x1cb   : > { %7632 = vmatprep.mubr.msk.bf16.mxu0 %vm12733_vm13, %v12735_v48  ;;  %v10165_v33 = vsel %vm2418_vm6, %v2489_v49, %v2493_v3  ;;  %v12818_v43 = vshrl.u32 %v12817_v50, 16  ;;  %v2500_v27 = vrot.slane %v12820_v52, 2  ;;  %v10176_v39 = vrot.slane %v4461_v19, 1  ;;  %v8706_v52 = vld [vmem:[%s12581_s3 + $0x218] sm:$0xff]  }
 0x1cc   : > { %7843 = vmatpush3.bf16.msra.mxu1 %v8699_v1  ;;  %12816 = vst [vmem:[#allocation63_spill] sm:$0xff] %v10165_v33  ;;  %v12819_v1 = vshll.u32 %v12817_v50, 16  ;;  %v4469_v49 = vshll.u32 %v9781_v26, 16  ;;  %v4477_v18 = vshll.u32 %v9805_v38, 16  ;;  %v10181_v58 = vsel %vm2418_vm6, %v2493_v3, %v2497_v37  ;;  %v10231_v33 = vld [vmem:[#allocation2 + $0x18] sm:$0xf] }
 0x1cd   : > { %7844 = vmatprep.subr.bf16.mxu1 %v12735_v48  ;;  %v2435_v0 = vrot.slane %v12818_v43, 1  ;;  %12821 = vst [vmem:[#allocation24_spill] sm:$0xff] %v10181_v58  ;;  %v4043_v9 = vshrl.u32 %v9787_v15, 16  ;;  %v4046_v51 = vshll.u32 %v9787_v15, 16  ;;  %v4485_v50 = vshll.u32 %v9832_v28, 16 }
 0x1ce   : > { %v2436_v56 = vrot.slane %v12819_v1, 2  ;;  %v10191_v19 = vor.u32 %v2500_v27, %v2499_v14  ;;  %v10196_v43 = vor.u32 %v4465_v17, %v10176_v39  ;;  %v2106_v15 = vsel %vm1942_vm3, %v2101_v10, %v2105_v16  ;;  %v12828_v27 = vld [vmem:[#allocation25_spill] sm:$0xff] }
 0x1cf   : > { %7661 = vmatmul.mubr.bf16.gmra.mrb[88].mxu1 %v2434_v41  ;;  %v4473_v1 = vshrl.u32 %v9781_v26, 16  ;;  %v10207_v3 = vrot.slane %v4469_v49, 1  ;;  %v4481_v17 = vshrl.u32 %v9805_v38, 16  ;;  %v4489_v10 = vshrl.u32 %v9832_v28, 16  ;;  %v12827_v49 = vld [vmem:[#allocation38_spill] sm:$0xff] }
 0x1d0   : > { %7664 = vmatprep.mubr.msk.bf16.mxu1 %vm12733_vm13, %v12735_v48  ;;  %7845 = vmatpush3.bf16.msra.mxu1 %v8702_v40  ;;  %12822 = vst [vmem:[#allocation64_spill] sm:$0xff] %v10191_v19  ;;  %12823 = vst [vmem:[#allocation65_spill] sm:$0xff] %v10196_v43  ;;  %v2107_v40 = vshrl.u32 %v10103_v54, 16  ;;  %v2437_v42 = vor.u32 %v2436_v56, %v2435_v0  ;;  %v10204_v14 = vsel %vm2418_vm6, %v2497_v37, %v10191_v19  ;;  %v8709_v37 = vld [vmem:[%s12581_s3 + $0x220] sm:$0xff]  }
 0x1d1   : > { %7846 = vmatprep.subr.bf16.mxu1 %v12735_v48  ;;  %12824 = vst [vmem:[#allocation66_spill] sm:$0xff] %v10204_v14  ;;  %v10213_v26 = vrot.slane %v4477_v18, 1  ;;  %v4048_v41 = vrot.slane %v4046_v51, 4  ;;  %v10215_v56 = vrot.slane %v4485_v50, 1  ;;  %v4052_v0 = vshrl.u32 %v9799_v7, 16  ;;  %v12831_v51 = vld [vmem:[#allocation34_spill] sm:$0xff] }
 0x1d2   : > { %7633 = vmatmul.mubr.bf16.gmra.mrb[108].mxu0 %v2106_v15  ;;  %v4045_v15 = vrot.slane %v4043_v9, 3  ;;  %v4493_v38 = vshll.u32 %v12827_v49, 16  ;;  %v12829_v28 = vshrl.u32 %v12828_v27, 16  ;;  %v12830_v14 = vshll.u32 %v12828_v27, 16 }
 0x1d3   : > { %7636 = vmatprep.mubr.msk.bf16.mxu0 %vm12733_vm13, %v12735_v48  ;;  %12825 = vst [vmem:[#allocation67_spill] sm:$0xff] %v10213_v26  ;;  %12826 = vst [vmem:[#allocation68_spill] sm:$0xff] %v10215_v56  ;;  %v4055_v9 = vshll.u32 %v9799_v7, 16  ;;  %v4061_v50 = vshrl.u32 %v12831_v51, 16  ;;  %v2438_v58 = vsel %vm2418_vm6, %v10144_v31, %v2437_v42  ;;  %v10235_v45 = vor.u32 %v4473_v1, %v10207_v3  ;;  %v8713_v1 = vld [vmem:[%s12581_s3 + $0x228] sm:$0xff]  }
 0x1d4   : > { %7847 = vmatpush3.bf16.msra.mxu1 %v8706_v52  ;;  %v2439_v19 = vrot.slane %v12829_v28, 1  ;;  %v2440_v18 = vrot.slane %v12830_v14, 2  ;;  %v2109_v52 = vor.u32 %v2107_v40, %v2105_v16  ;;  %v12833_v28 = vld [vmem:[#allocation33_spill] sm:$0xff]  ;;  %v4064_v14 = vshll.u32 %v12831_v51, 16 }
 0x1d5   : > { %7848 = vmatprep.subr.bf16.mxu1 %v12735_v48  ;;  %12832 = vst [vmem:[#allocation38_spill] sm:$0xff] %v10235_v45  ;;  %v10241_v5 = vor.u32 %v4481_v17, %v10213_v26  ;;  %v10243_v16 = vor.u32 %v4048_v41, %v4045_v15  ;;  %v10246_v31 = vor.u32 %v4489_v10, %v10215_v56  ;;  %v2836_v40 = vld [vmem:[#allocation2 + $0x14] sm:$0xc]  ;;  %v4497_v51 = vshrl.u32 %v12827_v49, 16  ;;  %v10257_v41 = vld [vmem:[#allocation2 + $0x1c] sm:$0xff]  }
 0x1d6   : > { %v6872_v17 = vcombine.low %v2836_v40, %v10231_v33  ;;  %v10259_v15 = vor.u32 %v2440_v18, %v2439_v19  ;;  %v4054_v10 = vrot.slane %v4052_v0, 3  ;;  %v4057_v7 = vrot.slane %v4055_v9, 4  ;;  %v12839_v0 = vld [vmem:[#allocation35_spill] sm:$0xff] }
 0x1d7   : > { %7665 = vmatmul.mubr.bf16.gmra.mrb[92].mxu1 %v2438_v58  ;;  %12834 = vst [vmem:[#allocation25_spill] sm:$0xff] %v10241_v5  ;;  %12835 = vst [vmem:[#allocation34_spill] sm:$0xff] %v10246_v31  ;;  %v10253_v58 = vrot.slane %v4493_v38, 1  ;;  %v4063_v27 = vrot.slane %v4061_v50, 3  ;;  %v4066_v31 = vrot.slane %v4064_v14, 4  ;;  %v10267_v49 = vor.u32 %v9919_v53, %v9917_v46 }
 0x1d8   : > { %7668 = vmatprep.mubr.msk.bf16.mxu1 %vm12733_vm13, %v12735_v48  ;;  %7849 = vmatpush3.bf16.msra.mxu1 %v8709_v37  ;;  %v12836_v37 = vld [vmem:[#allocation39_spill] sm:$0xff]  ;;  %v12837_v38 = vshrl.u32 %v9903_v62, 16  ;;  %v12838_v18 = vshll.u32 %v9903_v62, 16  ;;  %v4070_v9 = vshrl.u32 %v12839_v0, 16  ;;  %v4073_v50 = vshll.u32 %v12839_v0, 16 }
 0x1d9   : > { %7850 = vmatprep.subr.bf16.mxu1 %v12735_v48  ;;  %v4501_v55 = vshll.u32 %v12836_v37, 16  ;;  %v2958_v14 = vrot.slane %v6872_v17, 2  ;;  %v2442_v53 = vsel %vm2418_vm6, %v2437_v42, %v10259_v15  ;;  %v12843_v56 = vshrl.u32 %v9438_v63, 16 }
 0x1da   : > { %7637 = vmatmul.mubr.bf16.gmra.mrb[112].mxu0 %v2109_v52  ;;  %v3928_v19 = vrot.slane %v12837_v38, 3  ;;  %v3931_v40 = vrot.slane %v12838_v18, 4  ;;  %v8717_v52 = vld [vmem:[%s12581_s3 + $0x230] sm:$0xff]   ;;  %v12840_v38 = vld [vmem:[#allocation26_spill] sm:$0xff]  ;;  %v12844_v26 = vshll.u32 %v9438_v63, 16  ;;  %v10291_v46 = vor.u32 %v4497_v51, %v10253_v58 }
 0x1db   : > { %7756 = vmatprep.mubr.msk.bf16.mxu0 %vm12733_vm13, %v12735_v48  ;;  %v12841_v18 = vshrl.u32 %v12840_v38, 16  ;;  %v12842_v0 = vshll.u32 %v12840_v38, 16  ;;  %v3937_v45 = vrot.slane %v12843_v56, 3  ;;  %v10293_v43 = vrot.slane %v4501_v55, 1  ;;  %v8720_v63 = vld [vmem:[%s12581_s3 + $0x238] sm:$0xff]  }
 0x1dc   : > { %7851 = vmatpush3.bf16.msra.mxu1 %v8713_v1  ;;  %v3932_v62 = vor.u32 %v3931_v40, %v3928_v19  ;;  %v3940_v17 = vrot.slane %v12844_v26, 4  ;;  %v4505_v42 = vshrl.u32 %v12836_v37, 16  ;;  %v4509_v40 = vshll.u32 %v9931_v4, 16 }
 0x1dd   : > { %7852 = vmatprep.subr.bf16.mxu1 %v12735_v48  ;;  %v2443_v5 = vrot.slane %v12841_v18, 1  ;;  %v2444_v1 = vrot.slane %v12842_v0, 2  ;;  %v12846_v55 = vshrl.u32 %v9460_v11, 16  ;;  %v12847_v51 = vshll.u32 %v9460_v11, 16 }
 0x1de   : > { %v10298_v19 = vsel %vm3907_vm8, %v10267_v49, %v3932_v62  ;;  %v3941_v26 = vor.u32 %v3940_v17, %v3937_v45  ;;  %v10312_v38 = vor.u32 %v4066_v31, %v4063_v27  ;;  %v4072_v18 = vrot.slane %v4070_v9, 3 }
 0x1df   : > { %7669 = vmatmul.mubr.bf16.gmra.mrb[96].mxu1 %v2442_v53  ;;  %12845 = vst [vmem:[#allocation33_spill] sm:$0xff] %v10298_v19  ;;  %v3946_v56 = vrot.slane %v12846_v55, 3  ;;  %v3949_v37 = vrot.slane %v12847_v51, 4  ;;  %v10310_v53 = vor.u32 %v4057_v7, %v4054_v10  ;;  %v12848_v0 = vrot.slane %v10257_v41, 2  ;;  %v10317_v19 = vld [vmem:[#allocation2 + $0x24] sm:$0xff]  }
 0x1e0   : > { %7672 = vmatprep.mubr.msk.bf16.mxu1 %vm12733_vm13, %v12735_v48  ;;  %7853 = vmatpush3.bf16.msra.mxu1 %v8717_v52  ;;  %v4075_v45 = vrot.slane %v4073_v50, 4  ;;  %v2445_v17 = vor.u32 %v2444_v1, %v2443_v5  ;;  %v10321_v55 = vsel %vm3907_vm8, %v3932_v62, %v3941_v26  ;;  %v10324_v7 = vor.u32 %v4505_v42, %v10293_v43  ;;  %v12852_v5 = vld [vmem:[#allocation36_spill] sm:$0xff] }
 0x1e1   : > { %v2960_v52 = vsel %vm2957_vm7, %v2958_v14, %v12848_v0  ;;  %7854 = vmatprep.subr.bf16.mxu1 %v12735_v48  ;;  %12849 = vst [vmem:[#allocation39_spill] sm:$0xff] %v10321_v55  ;;  %v3950_v11 = vor.u32 %v3949_v37, %v3946_v56  ;;  %v4513_v27 = vshrl.u32 %v9931_v4, 16  ;;  %v12850_v31 = vshrl.u32 %v9481_v29, 16 }
 0x1e2   : > { %7757 = vmatmul.mubr.bf16.vlgmr.msra.gmra.mrb[116].mxu0 %v2960_v52  ;;  %v12851_v9 = vshll.u32 %v9481_v29, 16  ;;  %v10333_v14 = vrot.slane %v4509_v40, 1  ;;  %v4079_v62 = vshrl.u32 %v12852_v5, 16  ;;  %v4517_v1 = vshll.u32 %v9987_v59, 16 }
 0x1e3   : > { %7760 = vmatprep.mubr.msk.bf16.mxu0 %vm12733_vm13, %v12735_v48  ;;  %v3955_v10 = vrot.slane %v12850_v31, 3  ;;  %v10338_v42 = vsel %vm3907_vm8, %v3941_v26, %v3950_v11  ;;  %v12854_v51 = vshrl.u32 %v9543_v44, 16  ;;  %v12855_v29 = vshll.u32 %v9543_v44, 16 }
 0x1e4   : > { %v3958_v50 = vrot.slane %v12851_v9, 4  ;;  %7855 = vmatpush3.bf16.msra.mxu1 %v8720_v63  ;;  %12853 = vst [vmem:[#allocation35_spill] sm:$0xff] %v10338_v42  ;;  %v10346_v0 = vor.u32 %v4075_v45, %v4072_v18  ;;  %v2446_v52 = vsel %vm2418_vm6, %v10259_v15, %v2445_v17  ;;  %v12856_v63 = vld [vmem:[#allocation27_spill] sm:$0xff]  ;;  %v4082_v59 = vshll.u32 %v12852_v5, 16  ;;  %v2778_v42 = vld [vmem:[#allocation2 + $0x14] sm:$0xe] }
 0x1e5   : > { %8040 = vmatprep.subr.bf16.mxu1 %v12735_v48  ;;  %v3964_v37 = vrot.slane %v12854_v51, 3  ;;  %v3967_v40 = vrot.slane %v12855_v29, 4  ;;  %v12857_v31 = vshrl.u32 %v12856_v63, 16  ;;  %v12858_v9 = vshll.u32 %v12856_v63, 16 }
 0x1e6   : > { %v3959_v56 = vor.u32 %v3958_v50, %v3955_v10  ;;  %v12859_v10 = vld [vmem:[#allocation37_spill] sm:$0xff]  ;;  %v10359_v45 = vrot.slane %v4517_v1, 1  ;;  %v6992_v15 = vcombine.low %v2778_v42, %v10231_v33  ;;  %v12862_v51 = vshrl.u32 %v9571_v32, 16  ;;  %v10376_v33 = vld [vmem:[#allocation2 + $0x2c] sm:$0xff]  }
 0x1e7   : > { %v2447_v26 = vrot.slane %v12857_v31, 1  ;;  %v2448_v4 = vrot.slane %v12858_v9, 2  ;;  %v4088_v50 = vshrl.u32 %v12859_v10, 16  ;;  %7673 = vmatmul.mubr.bf16.gmra.mrb[100].mxu1 %v2446_v52  ;;  %v3968_v18 = vor.u32 %v3967_v40, %v3964_v37 }
 0x1e8   : > { %v10357_v44 = vsel %vm3907_vm8, %v3950_v11, %v3959_v56  ;;  %12861 = vst [vmem:[#allocation36_spill] sm:$0xff] %v10359_v45  ;;  %7676 = vmatprep.mubr.msk.bf16.mxu1 %vm12733_vm13, %v12735_v48  ;;  %v3973_v29 = vrot.slane %v12862_v51, 3  ;;  %v12863_v5 = vshll.u32 %v9571_v32, 16  ;;  %v10369_v31 = vor.u32 %v4513_v27, %v10333_v14  ;;  %v8724_v32 = vld [vmem:[%s12581_s3] sm:$0xff]  }
 0x1e9   : > { %12860 = vst [vmem:[#allocation26_spill] sm:$0xff] %v10357_v44  ;;  %v4081_v52 = vrot.slane %v4079_v62, 3  ;;  %v12864_v11 = vrot.slane %v10317_v19, 2  ;;  %v12865_v1 = vrot.slane %v10257_v41, 2  ;;  %v10379_v42 = vsel %vm3907_vm8, %v3959_v56, %v3968_v18  ;;  %7941 = vmatpush3.bf16.msra.mxu0 %v8724_v32 }
 0x1ea   : > { %v3976_v63 = vrot.slane %v12863_v5, 4  ;;  %12866 = vst [vmem:[#allocation27_spill] sm:$0xff] %v10379_v42  ;;  %v10381_v40 = vor.u32 %v2448_v4, %v2447_v26  ;;  %v12867_v62 = vshrl.u32 %v12793_v21, 16  ;;  %v12868_v51 = vshll.u32 %v12793_v21, 16  ;;  %7942 = vmatprep.subr.bf16.mxu0 %v12735_v48 }
 0x1eb   : > { %v2962_v37 = vsel %vm2957_vm7, %v12865_v1, %v12864_v11  ;;  %v4084_v11 = vrot.slane %v4082_v59, 4  ;;  %v4090_v1 = vrot.slane %v4088_v50, 3  ;;  %v4091_v44 = vshll.u32 %v12859_v10, 16 }
 0x1ec   : > { %7761 = vmatmul.mubr.bf16.gmra.mrb[120].mxu0 %v2962_v37  ;;  %v3977_v27 = vor.u32 %v3976_v63, %v3973_v29  ;;  %v3982_v9 = vrot.slane %v12867_v62, 3  ;;  %v3985_v5 = vrot.slane %v12868_v51, 4  ;;  %v5118_v56 = vshrl.u32 %v10257_v41, 16 }
 0x1ed   : > { %7764 = vmatprep.mubr.msk.bf16.mxu0 %vm12733_vm13, %v12735_v48  ;;  %v5110_v4 = vshrl.u32 %v6992_v15, 16  ;;  %v5121_v26 = vshll.u32 %v10257_v41, 16  ;;  %v5113_v37 = vshll.u32 %v6992_v15, 16  ;;  %v2963_v21 = vrot.slane %v10376_v33, 2  ;;  %v12872_v41 = vld [vmem:[#allocation29_spill] sm:$0xff] }
 0x1ee   : > { %v10396_v29 = vsel %vm3907_vm8, %v3968_v18, %v3977_v27  ;;  %v3986_v63 = vor.u32 %v3985_v5, %v3982_v9  ;;  %v12870_v59 = vshrl.u32 %v12799_v60, 16  ;;  %v12871_v50 = vshll.u32 %v12799_v60, 16 }
 0x1ef   : > { %12869 = vst [vmem:[#allocation37_spill] sm:$0xff] %v10396_v29  ;;  %v2450_v51 = vsel %vm2418_vm6, %v2445_v17, %v10381_v40  ;;  %v12873_v32 = vshrl.u32 %v12872_v41, 16  ;;  %v12874_v18 = vshll.u32 %v12872_v41, 16  ;;  %v4093_v5 = vrot.slane %v4091_v44, 4 }
 0x1f0   : > { %v3991_v10 = vrot.slane %v12870_v59, 3  ;;  %v3994_v62 = vrot.slane %v12871_v50, 4  ;;  %v10411_v15 = vsel %vm3907_vm8, %v3977_v27, %v3986_v63  ;;  %7677 = vmatmul.mubr.bf16.gmra.mrb[104].mxu1 %v2450_v51  ;;  %v8725_v59 = vld [vmem:[%s12581_s3 + $0x8] sm:$0xff]   ;;  %v12876_v50 = vshrl.u32 %v9680_v61, 16 }
 0x1f1   : > { %v2451_v42 = vrot.slane %v12873_v32, 1  ;;  %v2452_v9 = vrot.slane %v12874_v18, 2  ;;  %12875 = vst [vmem:[#allocation29_spill] sm:$0xff] %v10411_v15  ;;  %v12877_v17 = vshll.u32 %v9680_v61, 16  ;;  %v10420_v32 = vor.u32 %v4084_v11, %v4081_v52  ;;  %v10424_v15 = vld [vmem:[#allocation2 + $0x34] sm:$0xff]   ;;  %7680 = vmatprep.mubr.msk.bf16.mxu1 %vm12733_vm13, %v12735_v48  ;;  %7943 = vmatpush3.bf16.msra.mxu0 %v8725_v59 }
 0x1f2   : > { %v3995_v60 = vor.u32 %v3994_v62, %v3991_v10  ;;  %v4000_v29 = vrot.slane %v12876_v50, 3  ;;  %v10422_v41 = vrot.slane %v5110_v4, 1  ;;  %v5120_v18 = vrot.slane %v5118_v56, 1  ;;  %7944 = vmatprep.subr.bf16.mxu0 %v12735_v48  ;;  %v8727_v4 = vld [vmem:[%s12581_s3 + $0x10] sm:$0xff]   ;;  %v10457_v50 = vld [vmem:[#allocation2 + $0x3c] sm:$0xff]  }
 0x1f3   : > { %v4003_v55 = vrot.slane %v12877_v17, 4  ;;  %v5123_v27 = vrot.slane %v5121_v26, 2  ;;  %v10428_v44 = vrot.slane %v5113_v37, 2  ;;  %v12878_v10 = vrot.slane %v10317_v19, 2 }
 0x1f4   : > { %v10434_v61 = vsel %vm3907_vm8, %v3986_v63, %v3995_v60  ;;  %v10437_v56 = vor.u32 %v2452_v9, %v2451_v42  ;;  %v12880_v26 = vshrl.u32 %v9704_v47, 16  ;;  %v12881_v51 = vshll.u32 %v9704_v47, 16 }
 0x1f5   : > { %v2964_v62 = vsel %vm2957_vm7, %v12878_v10, %v2963_v21  ;;  %12879 = vst [vmem:[#allocation69_spill] sm:$0xff] %v10434_v61  ;;  %v4004_v52 = vor.u32 %v4003_v55, %v4000_v29  ;;  %v10447_v63 = vor.u32 %v4093_v5, %v4090_v1  ;;  %v5127_v55 = vshrl.u32 %v10317_v19, 16  ;;  %7945 = vmatpush3.bf16.msra.mxu0 %v8727_v4 }
 0x1f6   : > { %7765 = vmatmul.mubr.bf16.gmra.mrb[124].mxu0 %v2964_v62  ;;  %v4009_v37 = vrot.slane %v12880_v26, 3  ;;  %v4012_v59 = vrot.slane %v12881_v51, 4  ;;  %v5130_v29 = vshll.u32 %v10317_v19, 16  ;;  %v2965_v9 = vrot.slane %v10424_v15, 2  ;;  %7946 = vmatprep.subr.bf16.mxu0 %v12735_v48 }
 0x1f7   : > { %12882 = vst [vmem:[#allocation70_spill] sm:$0xff] %v10447_v63  ;;  %7768 = vmatprep.mubr.msk.bf16.mxu0 %vm12733_vm13, %v12735_v48  ;;  %v10454_v42 = vsel %vm3907_vm8, %v3995_v60, %v4004_v52  ;;  %v12884_v47 = vshrl.u32 %v9732_v13, 16  ;;  %v12885_v1 = vshll.u32 %v9732_v13, 16  ;;  %v10465_v62 = vor.u32 %v5123_v27, %v5120_v18  ;;  %v8705_v27 = vld [vmem:[#allocation2 + $0x44] sm:$0xff]  }
 0x1f8   : > { %12883 = vst [vmem:[#allocation71_spill] sm:$0xff] %v10454_v42  ;;  %v4013_v17 = vor.u32 %v4012_v59, %v4009_v37  ;;  %v5136_v26 = vshrl.u32 %v10376_v33, 16  ;;  %v5139_v60 = vshll.u32 %v10376_v33, 16  ;;  %v5145_v51 = vshrl.u32 %v10424_v15, 16  ;;  %v8731_v33 = vld [vmem:[%s12581_s3 + $0x18] sm:$0xff]  }
 0x1f9   : > { %v4018_v10 = vrot.slane %v12884_v47, 3  ;;  %v4021_v5 = vrot.slane %v12885_v1, 4  ;;  %v2454_v37 = vsel %vm2418_vm6, %v10381_v40, %v10437_v56  ;;  %v10477_v47 = vrot.slane %v5127_v55, 1  ;;  %7947 = vmatpush3.bf16.msra.mxu0 %v8731_v33 }
 0x1fa   : > { %v10475_v13 = vsel %vm3907_vm8, %v4004_v52, %v4013_v17  ;;  %v5148_v18 = vshll.u32 %v10424_v15, 16  ;;  %7681 = vmatmul.mubr.bf16.gmra.mrb[108].mxu1 %v2454_v37  ;;  %v12887_v4 = vshrl.u32 %v9770_v25, 16  ;;  %v12888_v40 = vshll.u32 %v9770_v25, 16  ;;  %v8707_v15 = vld [vmem:[#allocation2 + $0x4c] sm:$0xff]   ;;  %7948 = vmatprep.subr.bf16.mxu0 %v12735_v48 }
 0x1fb   : > { %12886 = vst [vmem:[#allocation72_spill] sm:$0xff] %v10475_v13  ;;  %v4022_v59 = vor.u32 %v4021_v5, %v4018_v10  ;;  %v2966_v52 = vsel %vm2957_vm7, %v2963_v21, %v2965_v9  ;;  %v2967_v10 = vrot.slane %v10457_v50, 2  ;;  %v5154_v55 = vshrl.u32 %v10457_v50, 16  ;;  %7684 = vmatprep.mubr.msk.bf16.mxu1 %vm12733_vm13, %v12735_v48 }
 0x1fc   : > { %v4027_v1 = vrot.slane %v12887_v4, 3  ;;  %v4030_v11 = vrot.slane %v12888_v40, 4  ;;  %v5157_v37 = vshll.u32 %v10457_v50, 16  ;;  %v12890_v25 = vshrl.u32 %v12833_v28, 16 }
 0x1fd   : > { %v10493_v5 = vsel %vm3907_vm8, %v4013_v17, %v4022_v59  ;;  %v12891_v21 = vshll.u32 %v12833_v28, 16  ;;  %v10500_v13 = vrot.slane %v5130_v29, 2  ;;  %v10502_v42 = vrot.slane %v5136_v26, 1  ;;  %v10508_v17 = vld [vmem:[#allocation2 + $0x54] sm:$0xff]   ;;  %v10516_v28 = vpop.f32.mrb[8].mxu1 }
 0x1fe   : > { %12889 = vst [vmem:[#allocation73_spill] sm:$0xff] %v10493_v5  ;;  %v4031_v4 = vor.u32 %v4030_v11, %v4027_v1  ;;  %v4036_v40 = vrot.slane %v12890_v25, 3  ;;  %v10504_v61 = vrot.slane %v5139_v60, 2  ;;  %7769 = vmatmul.mubr.bf16.gmra.mrb[128].mxu0 %v2966_v52  ;;  %v10506_v54 = vrot.slane %v5145_v51, 1  ;;  %v8733_v11 = vld [vmem:[%s12581_s3 + $0x20] sm:$0xff]   ;;  %12894 = vst [vmem:[#allocation76_spill] sm:$0xff] %v10516_v28 }
 0x1ff   : > { %v4039_v19 = vrot.slane %v12891_v21, 4  ;;  %7772 = vmatprep.mubr.msk.bf16.mxu0 %vm12733_vm13, %v12735_v48  ;;  %v2969_v29 = vrot.slane %v8705_v27, 2  ;;  %v5163_v50 = vshrl.u32 %v8705_v27, 16  ;;  %v5166_v26 = vshll.u32 %v8705_v27, 16  ;;  %v7466_v51 = vpop.f32.mrb[9].mxu1  ;;  %7949 = vmatpush3.bf16.msra.mxu0 %v8733_v11 }
 0x200   : > { %12892 = vst [vmem:[#allocation74_spill] sm:$0xff] %v10504_v61  ;;  %12893 = vst [vmem:[#allocation75_spill] sm:$0xff] %v10506_v54  ;;  %v10519_v60 = vsel %vm3907_vm8, %v4022_v59, %v4031_v4  ;;  %v2971_v33 = vrot.slane %v8707_v15, 2  ;;  %v5172_v1 = vshrl.u32 %v8707_v15, 16  ;;  %v5175_v52 = vshll.u32 %v8707_v15, 16  ;;  %v10528_v28 = vpop.f32.mrb[10].mxu1  ;;  %7950 = vmatprep.subr.bf16.mxu0 %v12735_v48 }
 0x201   : > { %12895 = vst [vmem:[#allocation77_spill] sm:$0xff] %v10519_v60  ;;  %v4040_v25 = vor.u32 %v4039_v19, %v4036_v40  ;;  %v10521_v21 = vrot.slane %v5148_v18, 2  ;;  %v2968_v5 = vsel %vm2957_vm7, %v2965_v9, %v2967_v10  ;;  %v10524_v54 = vrot.slane %v5154_v55, 1  ;;  %12896 = vst [vmem:[#allocation78_spill] sm:$0xff] %v10528_v28  ;;  %v7467_v27 = vpop.f32.mrb[11].mxu1  ;;  %v10534_v15 = vld [vmem:[#allocation2 + $0x5c] sm:$0xff]  }
 0x202   : > { %v10526_v61 = vrot.slane %v5157_v37, 2  ;;  %v2458_v59 = vsel %vm2418_vm6, %v10437_v56, %v10003_v36  ;;  %v12677_v51 = vrot.slane %v10508_v17, 2  ;;  %v10545_v18 = vsel %vm2957_vm7, %v2967_v10, %v2969_v29  ;;  %v10551_v56 = vld [vmem:[#allocation2 + $0x64] sm:$0xff]   ;;  %v10622_v28 = vld [vmem:[#allocation2 + $0x7c] sm:$0xff]  }
 0x203   : > { %v10538_v9 = vsel %vm3907_vm8, %v4031_v4, %v4040_v25  ;;  %v10542_v19 = vsel %vm3907_vm8, %v4040_v25, %v10243_v16  ;;  %7685 = vmatmul.mubr.bf16.gmra.mrb[112].mxu1 %v2458_v59  ;;  %v10547_v55 = vrot.slane %v5163_v50, 1  ;;  %v10549_v36 = vrot.slane %v5166_v26, 2  ;;  %v8735_v37 = vld [vmem:[%s12581_s3 + $0x28] sm:$0xff]   ;;  %v10574_v59 = vld [vmem:[#allocation2 + $0x74] sm:$0xff]  }
 0x204   : > { %12897 = vst [vmem:[#allocation79_spill] sm:$0xff] %v10538_v9  ;;  %12898 = vst [vmem:[#allocation80_spill] sm:$0xff] %v10542_v19  ;;  %v10559_v4 = vsel %vm3907_vm8, %v10243_v16, %v10310_v53  ;;  %7688 = vmatprep.mubr.msk.bf16.mxu1 %vm12733_vm13, %v12735_v48  ;;  %v10564_v10 = vsel %vm2957_vm7, %v2969_v29, %v2971_v33  ;;  %v10566_v40 = vrot.slane %v5172_v1, 1  ;;  %v10568_v11 = vrot.slane %v5175_v52, 2  ;;  %v10571_v26 = vld [vmem:[#allocation2 + $0x6c] sm:$0xff]  }
 0x205   : > { %12899 = vst [vmem:[#allocation81_spill] sm:$0xff] %v10559_v4  ;;  %v5181_v50 = vshrl.u32 %v10508_v17, 16  ;;  %v5184_v25 = vshll.u32 %v10508_v17, 16  ;;  %7951 = vmatpush3.bf16.msra.mxu0 %v8735_v37  ;;  %v10579_v16 = vsel %vm3907_vm8, %v10310_v53, %v10312_v38  ;;  %v10584_v29 = vsel %vm3907_vm8, %v10312_v38, %v10346_v0  ;;  %v8736_v38 = vld [vmem:[%s12581_s3 + $0x30] sm:$0xff]  }
 0x206   : > { %12900 = vst [vmem:[#allocation82_spill] sm:$0xff] %v10579_v16  ;;  %12901 = vst [vmem:[#allocation83_spill] sm:$0xff] %v10584_v29  ;;  %v10589_v1 = vsel %vm3907_vm8, %v10346_v0, %v10420_v32  ;;  %7773 = vmatmul.mubr.bf16.gmra.mrb[132].mxu0 %v2968_v5  ;;  %v10594_v52 = vsel %vm2957_vm7, %v2971_v33, %v12677_v51  ;;  %v5190_v27 = vshrl.u32 %v10534_v15, 16  ;;  %v5193_v53 = vshll.u32 %v10534_v15, 16  ;;  %v12913_v29 = vld [vmem:[#allocation46_spill] sm:$0xff]  ;;  %v12928_v4 = vld [vmem:[#allocation28_spill] sm:$0xff] }
 0x207   : > { %12902 = vst [vmem:[#allocation84_spill] sm:$0xff] %v10589_v1  ;;  %7952 = vmatprep.subr.bf16.mxu0 %v12735_v48  ;;  %v10605_v0 = vsel %vm3907_vm8, %v10420_v32, %v10447_v63  ;;  %7776 = vmatprep.mubr.msk.bf16.mxu0 %vm12733_vm13, %v12735_v48  ;;  %v5199_v5 = vshrl.u32 %v10551_v56, 16  ;;  %v10613_v33 = vsel %vm1942_vm3, %v9924_v30, %v9906_v20  ;;  %v5202_v51 = vshll.u32 %v10551_v56, 16  ;;  %v12909_v20 = vld [vmem:[#allocation44_spill] sm:$0xff]  ;;  %v12910_v30 = vld [vmem:[#allocation45_spill] sm:$0xff] }
 0x208   : > { %12903 = vst [vmem:[#allocation85_spill] sm:$0xff] %v10605_v0  ;;  %12904 = vst [vmem:[#allocation86_spill] sm:$0xff] %v10613_v33  ;;  %v10618_v37 = vsel %vm1942_vm3, %v9939_v35, %v9936_v34  ;;  %v5208_v32 = vshrl.u32 %v10571_v26, 16  ;;  %v12906_v63 = vrot.slane %v9941_v57, 1  ;;  %v12907_v0 = vrot.slane %v9807_v22, 1  ;;  %v12915_v57 = vld [vmem:[#allocation50_spill] sm:$0xff] }
 0x209   : > { %12905 = vst [vmem:[#allocation87_spill] sm:$0xff] %v10618_v37  ;;  %v10634_v33 = vsel %vm1942_vm3, %v12910_v30, %v12909_v20  ;;  %v5211_v34 = vshll.u32 %v10571_v26, 16  ;;  %v5217_v35 = vshrl.u32 %v10574_v59, 16  ;;  %7953 = vmatpush3.bf16.msra.mxu0 %v8736_v38  ;;  %v12912_v37 = vld [vmem:[#allocation47_spill] sm:$0xff]  ;;  %v12916_v22 = vld [vmem:[#allocation49_spill] sm:$0xff]  ;;  %v10652_v20 = vrot.slane %v5190_v27, 1 }
 0x20a   : > { %v10629_v1 = vsel %vm4798_vm9, %v12907_v0, %v12906_v63  ;;  %12911 = vst [vmem:[#allocation44_spill] sm:$0xff] %v10634_v33  ;;  %v10641_v16 = vsel %vm1942_vm3, %v12913_v29, %v12912_v37  ;;  %v10646_v63 = vsel %vm1942_vm3, %v12916_v22, %v12915_v57  ;;  %v10648_v0 = vrot.slane %v5181_v50, 1  ;;  %7954 = vmatprep.subr.bf16.mxu0 %v12735_v48  ;;  %v12918_v30 = vld [vmem:[#allocation55_spill] sm:$0xff]  ;;  %v12919_v38 = vld [vmem:[#allocation52_spill] sm:$0xff]  ;;  %v12922_v27 = vld [vmem:[#allocation54_spill] sm:$0xff] }
 0x20b   : > { %12908 = vst [vmem:[#allocation88_spill] sm:$0xff] %v10629_v1  ;;  %12914 = vst [vmem:[#allocation45_spill] sm:$0xff] %v10641_v16  ;;  %v10650_v1 = vrot.slane %v5184_v25, 2  ;;  %v10658_v33 = vsel %vm1942_vm3, %v12919_v38, %v12918_v30  ;;  %v12921_v29 = vld [vmem:[#allocation51_spill] sm:$0xff]  ;;  %v10661_v37 = vrot.slane %v5193_v53, 2  ;;  %v10663_v16 = vrot.slane %v5199_v5, 1 }
 0x20c   : > { %12917 = vst [vmem:[#allocation47_spill] sm:$0xff] %v10646_v63  ;;  %12920 = vst [vmem:[#allocation46_spill] sm:$0xff] %v10658_v33  ;;  %7689 = vmatmul.mubr.bf16.gmra.mrb[116].mxu1 %v12921_v29  ;;  %v5220_v57 = vshll.u32 %v10574_v59, 16  ;;  %v10666_v50 = vld [vmem:[#allocation2 + $0x84] sm:$0xff]   ;;  %v8738_v25 = vld [vmem:[%s12581_s3 + $0x38] sm:$0xff]   ;;  %v10678_v53 = vrot.slane %v5202_v51, 2  ;;  %v10688_v19 = vsel %vm1942_vm3, %v12928_v4, %v10081_v2 }
 0x20d   : > { %v12923_v22 = vld [vmem:[#allocation58_spill] sm:$0xff]  ;;  %7692 = vmatprep.mubr.msk.bf16.mxu1 %vm12733_vm13, %v12735_v48  ;;  %v5226_v5 = vshrl.u32 %v10622_v28, 16  ;;  %v10681_v30 = vld [vmem:[#allocation2 + $0x8c] sm:$0xff]   ;;  %v12926_v38 = vld [vmem:[#allocation41_spill] sm:$0xff]  ;;  %12929 = vst [vmem:[#allocation55_spill] sm:$0xff] %v10688_v19  ;;  %v10690_v9 = vrot.slane %v5208_v32, 1  ;;  %7955 = vmatpush3.bf16.msra.mxu0 %v8738_v25 }
 0x20e   : > { %v10674_v63 = vsel %vm1942_vm3, %v12923_v22, %v12922_v27  ;;  %12925 = vst [vmem:[#allocation49_spill] sm:$0xff] %v10681_v30  ;;  %v12927_v29 = vld [vmem:[#allocation42_spill] sm:$0xff]  ;;  %v10692_v27 = vrot.slane %v5211_v34, 2  ;;  %v10694_v22 = vrot.slane %v5217_v35, 1  ;;  %v10696_v51 = vld [vmem:[#allocation2 + $0x94] sm:$0xff]   ;;  %7777 = vmatmul.mubr.bf16.gmra.mrb[136].mxu0 %v10545_v18  ;;  %v5229_v2 = vshll.u32 %v10622_v28, 16  ;;  %8140 = vmatprep.subr.bf16.mxu0 %v12735_v48 }
 0x20f   : > { %12924 = vst [vmem:[#allocation50_spill] sm:$0xff] %v10674_v63  ;;  %v3915_v33 = vor.u32 %v12927_v29, %v12926_v38  ;;  %v10701_v63 = vsel %vm1942_vm3, %v10117_v8, %v10092_v6  ;;  %v10704_v38 = vpop.f32.mrb[12].mxu1  ;;  %v10707_v4 = vld [vmem:[#allocation2 + $0x9c] sm:$0xff]   ;;  %v10717_v34 = vsel %vm1942_vm3, %v10142_v24, %v10123_v12  ;;  %v10722_v6 = vsel %vm1942_vm3, %v10157_v23, %v10176_v39  ;;  %v10730_v35 = vld [vmem:[#allocation2 + $0xa4] sm:$0xff]   ;;  %v12935_v12 = vld [vmem:[#allocation65_spill] sm:$0xff] }
 0x210   : > { %12930 = vst [vmem:[#allocation52_spill] sm:$0xff] %v10701_v63  ;;  %12931 = vst [vmem:[#allocation51_spill] sm:$0xff] %v10704_v38  ;;  %v7470_v8 = vpop.f32.mrb[13].mxu1  ;;  %7780 = vmatprep.mubr.msk.bf16.mxu0 %vm12733_vm13, %v12735_v48  ;;  %v10726_v18 = vrot.slane %v5220_v57, 2  ;;  %v10735_v24 = vsel %vm1942_vm3, %v12935_v12, %v10207_v3  ;;  %v10739_v39 = vrot.slane %v5226_v5, 1  ;;  %v5244_v23 = vshrl.u32 %v10681_v30, 16 }
 0x211   : > { %v10711_v32 = vsel %vm3907_vm8, %v3915_v33, %v10267_v49  ;;  %12933 = vst [vmem:[#allocation58_spill] sm:$0xff] %v10717_v34  ;;  %12934 = vst [vmem:[#allocation41_spill] sm:$0xff] %v10722_v6  ;;  %v5235_v49 = vshrl.u32 %v10666_v50, 16  ;;  %v5238_v33 = vshll.u32 %v10666_v50, 16  ;;  %v10737_v25 = vpop.f32.mrb[14].mxu1  ;;  %v5247_v57 = vshll.u32 %v10681_v30, 16 }
 0x212   : > { %12932 = vst [vmem:[#allocation54_spill] sm:$0xff] %v10711_v32  ;;  %12936 = vst [vmem:[#allocation42_spill] sm:$0xff] %v10735_v24  ;;  %v10743_v29 = vld [vmem:[#allocation2 + $0xac] sm:$0xff]   ;;  %v12939_v8 = vld [vmem:[#allocation67_spill] sm:$0xff]  ;;  %v2213_v34 = vpop.f32.mrb[32].mxu0  ;;  %v7471_v63 = vpop.f32.mrb[15].mxu1 }
 0x213   : > { %12937 = vst [vmem:[#allocation28_spill] sm:$0xff] %v10737_v25  ;;  %12938 = vst [vmem:[#allocation65_spill] sm:$0xff] %v10743_v29  ;;  %v12940_v38 = vld [vmem:[#allocation38_spill] sm:$0xff]  ;;  %v5253_v3 = vshrl.u32 %v10696_v51, 16  ;;  %v5256_v12 = vshll.u32 %v10696_v51, 16  ;;  %v12942_v25 = vld [vmem:[#allocation68_spill] sm:$0xff]  ;;  %v10769_v34 = vsel %vm1942_vm3, %v10291_v46, %v10293_v43 }
 0x214   : > { %v10748_v6 = vsel %vm1942_vm3, %v12940_v38, %v12939_v8  ;;  %v12943_v5 = vld [vmem:[#allocation25_spill] sm:$0xff]  ;;  %v12945_v19 = vld [vmem:[#allocation34_spill] sm:$0xff]  ;;  %v7558_v32 = vpop.f32.mrb[33].mxu0  ;;  %v10762_v30 = vrot.slane %v5229_v2, 2  ;;  %v5262_v38 = vshrl.u32 %v10707_v4, 16  ;;  %v5265_v63 = vshll.u32 %v10707_v4, 16 }
 0x215   : > { %12941 = vst [vmem:[#allocation67_spill] sm:$0xff] %v10748_v6  ;;  %v10755_v24 = vsel %vm1942_vm3, %v12943_v5, %v12942_v25  ;;  %v10760_v60 = vsel %vm1942_vm3, %v12945_v19, %v10253_v58  ;;  %12947 = vst [vmem:[#allocation25_spill] sm:$0xff] %v10769_v34  ;;  %v2215_v8 = vpop.f32.mrb[34].mxu0  ;;  %v12948_v25 = vld [vmem:[#allocation53_spill] sm:$0xff]  ;;  %v5237_v5 = vrot.slane %v5235_v49, 1  ;;  %v5271_v58 = vshrl.u32 %v10730_v35, 16 }
 0x216   : > { %12944 = vst [vmem:[#allocation38_spill] sm:$0xff] %v10755_v24  ;;  %12946 = vst [vmem:[#allocation68_spill] sm:$0xff] %v10760_v60  ;;  %7693 = vmatmul.mubr.bf16.gmra.mrb[120].mxu1 %v12948_v25  ;;  %v5240_v24 = vrot.slane %v5238_v33, 2  ;;  %v10776_v19 = vsel %vm1942_vm3, %v10324_v7, %v10333_v14  ;;  %v7559_v2 = vpop.f32.mrb[35].mxu0  ;;  %v5274_v32 = vshll.u32 %v10730_v35, 16  ;;  %v5280_v43 = vshrl.u32 %v10743_v29, 16  ;;  %7781 = vmatmul.mubr.bf16.gmra.mrb[140].mxu0 %v10564_v10 }
 0x217   : > { %12949 = vst [vmem:[#allocation34_spill] sm:$0xff] %v10776_v19  ;;  %7696 = vmatprep.mubr.msk.bf16.mxu1 %vm12733_vm13, %v12735_v48  ;;  %v5283_v46 = vshll.u32 %v10743_v29, 16  ;;  %v10786_v49 = vsel %vm1942_vm3, %v10369_v31, %v10359_v45  ;;  %v5246_v33 = vrot.slane %v5244_v23, 1  ;;  %v5249_v8 = vrot.slane %v5247_v57, 2  ;;  %v10789_v14 = vpop.f32.mrb[16].mxu1  ;;  %v12950_v34 = vld [vmem:[#allocation56_spill] sm:$0xff]  ;;  %7784 = vmatprep.mubr.msk.bf16.mxu0 %vm12733_vm13, %v12735_v48 }
 0x218   : > { %v5255_v25 = vrot.slane %v5253_v3, 1  ;;  %v5258_v7 = vrot.slane %v5256_v12, 2  ;;  %v5264_v2 = vrot.slane %v5262_v38, 1  ;;  %v5267_v19 = vrot.slane %v5265_v63, 2  ;;  %v7474_v31 = vpop.f32.mrb[17].mxu1  ;;  %v12953_v57 = vld [vmem:[#allocation74_spill] sm:$0xff] }
 0x219   : > { %v12951_v6 = vor.u32 %v10428_v44, %v10422_v41  ;;  %v5273_v23 = vrot.slane %v5271_v58, 1  ;;  %v5133_v10 = vor.u32 %v10500_v13, %v10477_v47  ;;  %v5142_v3 = vor.u32 %v12953_v57, %v10502_v42  ;;  %v12954_v12 = vld [vmem:[#allocation75_spill] sm:$0xff]  ;;  %v10807_v63 = vpop.f32.mrb[18].mxu1  ;;  %v12955_v60 = vld [vmem:[#allocation60_spill] sm:$0xff]  ;;  %v10816_v45 = vpop.f32.mrb[36].mxu0 }
 0x21a   : > { %v5151_v38 = vor.u32 %v10521_v21, %v12954_v12  ;;  %v5276_v41 = vrot.slane %v5274_v32, 2  ;;  %v5282_v44 = vrot.slane %v5280_v43, 1  ;;  %v12956_v31 = vrot.slane %v12955_v60, 1  ;;  %v7475_v13 = vpop.f32.mrb[19].mxu1  ;;  %v7562_v43 = vpop.f32.mrb[37].mxu0 }
 0x21b   : > { %v10797_v29 = vsel %vm2418_vm6, %v12951_v6, %v10465_v62  ;;  %v5285_v6 = vrot.slane %v5283_v46, 2  ;;  %v10820_v42 = vsel %vm2418_vm6, %v10465_v62, %v5133_v10  ;;  %v10823_v47 = vsel %vm2418_vm6, %v5133_v10, %v5142_v3  ;;  %v10838_v57 = vpop.f32.mrb[38].mxu0 }
 0x21c   : > { %12952 = vst [vmem:[#allocation53_spill] sm:$0xff] %v10797_v29  ;;  %v12957_v29 = vrot.slane %v12950_v34, 1  ;;  %v10826_v21 = vsel %vm2418_vm6, %v5142_v3, %v5151_v38  ;;  %v5160_v32 = vor.u32 %v10526_v61, %v10524_v54  ;;  %v5178_v46 = vor.u32 %v10568_v11, %v10566_v40  ;;  %v12958_v3 = vld [vmem:[#allocation57_spill] sm:$0xff] }
 0x21d   : > { %v5187_v62 = vor.u32 %v10650_v1, %v10648_v0  ;;  %v5196_v10 = vor.u32 %v10661_v37, %v10652_v20  ;;  %v5205_v54 = vor.u32 %v10678_v53, %v10663_v16  ;;  %v5214_v61 = vor.u32 %v10692_v27, %v10690_v9  ;;  %v10876_v53 = vpop.f32.mrb[20].mxu1 }
 0x21e   : > { %v10814_v58 = vsel %vm4798_vm9, %v12957_v29, %v12956_v31  ;;  %v5169_v29 = vor.u32 %v10549_v36, %v10547_v55  ;;  %7697 = vmatmul.mubr.bf16.gmra.mrb[124].mxu1 %v12958_v3  ;;  %v10842_v12 = vsel %vm2418_vm6, %v5151_v38, %v5160_v32  ;;  %v5223_v55 = vor.u32 %v10726_v18, %v10694_v22  ;;  %v7563_v36 = vpop.f32.mrb[39].mxu0  ;;  %v7478_v31 = vpop.f32.mrb[21].mxu1 }
 0x21f   : > { %7700 = vmatprep.mubr.msk.bf16.mxu1 %vm12733_vm13, %v12735_v48  ;;  %v10859_v1 = vsel %vm2418_vm6, %v5178_v46, %v5187_v62  ;;  %v10862_v16 = vsel %vm2418_vm6, %v5187_v62, %v5196_v10  ;;  %v10865_v9 = vsel %vm2418_vm6, %v5196_v10, %v5205_v54  ;;  %v10868_v0 = vsel %vm2418_vm6, %v5205_v54, %v5214_v61 }
 0x220   : > { %v10853_v40 = vsel %vm2418_vm6, %v5160_v32, %v5169_v29  ;;  %v10856_v11 = vsel %vm2418_vm6, %v5169_v29, %v5178_v46  ;;  %12959 = vst [vmem:[#allocation56_spill] sm:$0xff] %v10859_v1  ;;  %12960 = vst [vmem:[#allocation74_spill] sm:$0xff] %v10862_v16  ;;  %v10871_v20 = vsel %vm2418_vm6, %v5214_v61, %v5223_v55  ;;  %7785 = vmatmul.mubr.bf16.gmra.mrb[144].mxu0 %v10594_v52  ;;  %v10885_v29 = vpop.f32.mrb[22].mxu1 }
 0x221   : > { %12961 = vst [vmem:[#allocation75_spill] sm:$0xff] %v10865_v9  ;;  %12962 = vst [vmem:[#allocation60_spill] sm:$0xff] %v10868_v0  ;;  %v5232_v37 = vor.u32 %v10762_v30, %v10739_v39  ;;  %v5241_v27 = vor.u32 %v5240_v24, %v5237_v5  ;;  %v5250_v22 = vor.u32 %v5249_v8, %v5246_v33  ;;  %7788 = vmatprep.mubr.msk.bf16.mxu0 %vm12733_vm13, %v12735_v48  ;;  %v10899_v5 = vpop.f32.mrb[40].mxu0  ;;  %v7479_v33 = vpop.f32.mrb[23].mxu1 }
 0x222   : > { %12963 = vst [vmem:[#allocation57_spill] sm:$0xff] %v10871_v20  ;;  %v5259_v18 = vor.u32 %v5258_v7, %v5255_v25  ;;  %v5268_v38 = vor.u32 %v5267_v19, %v5264_v2  ;;  %v5277_v32 = vor.u32 %v5276_v41, %v5273_v23  ;;  %v10883_v43 = vor.u32 %v5285_v6, %v5282_v44  ;;  %v7566_v7 = vpop.f32.mrb[41].mxu0  ;;  %v12973_v23 = vld [vmem:[#allocation59_spill] sm:$0xff]  ;;  %v10917_v6 = vpop.f32.mrb[24].mxu1 }
 0x223   : > { %v10881_v13 = vsel %vm2418_vm6, %v5223_v55, %v5232_v37  ;;  %v10888_v52 = vsel %vm2418_vm6, %v5232_v37, %v5241_v27  ;;  %v10891_v30 = vsel %vm2418_vm6, %v5241_v27, %v5250_v22  ;;  %12969 = vst [vmem:[#allocation94_spill] sm:$0xff] %v10899_v5  ;;  %v2975_v19 = vrot.slane %v10534_v15, 2  ;;  %v10909_v2 = vpop.f32.mrb[42].mxu0  ;;  %v7482_v46 = vpop.f32.mrb[25].mxu1  ;;  %v12980_v7 = vld [vmem:[#allocation61_spill] sm:$0xff] }
 0x224   : > { %12964 = vst [vmem:[#allocation89_spill] sm:$0xff] %v10881_v13  ;;  %12965 = vst [vmem:[#allocation90_spill] sm:$0xff] %v10888_v52  ;;  %v10894_v24 = vsel %vm2418_vm6, %v5250_v22, %v5259_v18  ;;  %v10897_v39 = vsel %vm2418_vm6, %v5259_v18, %v5268_v38  ;;  %v10903_v8 = vsel %vm2418_vm6, %v5268_v38, %v5277_v32  ;;  %v7567_v41 = vpop.f32.mrb[43].mxu0  ;;  %v12974_v44 = vrot.slane %v10508_v17, 2  ;;  %v10921_v62 = vpop.f32.mrb[26].mxu1  ;;  %v12977_v17 = vld [vmem:[#allocation30_spill] sm:$0xff] }
 0x225   : > { %12966 = vst [vmem:[#allocation91_spill] sm:$0xff] %v10891_v30  ;;  %12967 = vst [vmem:[#allocation92_spill] sm:$0xff] %v10894_v24  ;;  %v10907_v25 = vsel %vm2418_vm6, %v5277_v32, %v10883_v43  ;;  %v10923_v10 = vpop.f32.mrb[44].mxu0  ;;  %v2977_v3 = vrot.slane %v10551_v56, 2  ;;  %v7483_v54 = vpop.f32.mrb[27].mxu1  ;;  %v2979_v38 = vrot.slane %v10571_v26, 2 }
 0x226   : > { %12968 = vst [vmem:[#allocation93_spill] sm:$0xff] %v10897_v39  ;;  %12970 = vst [vmem:[#allocation95_spill] sm:$0xff] %v10903_v8  ;;  %7701 = vmatmul.mubr.bf16.gmra.mrb[128].mxu1 %v12973_v23  ;;  %v2976_v15 = vsel %vm2957_vm7, %v12974_v44, %v2975_v19  ;;  %v7570_v61 = vpop.f32.mrb[45].mxu0  ;;  %v2981_v46 = vrot.slane %v10574_v59, 2  ;;  %v8722_v39 = vld [vmem:[#allocation2 + $0xac] ss:$0 sps:$4 sm:$0xff]  }
 0x227   : > { %12971 = vst [vmem:[#allocation96_spill] sm:$0xff] %v10907_v25  ;;  %12972 = vst [vmem:[#allocation97_spill] sm:$0xff] %v10909_v2  ;;  %7704 = vmatprep.mubr.msk.bf16.mxu1 %vm12733_vm13, %v12735_v48  ;;  %v10926_v55 = vpop.f32.mrb[46].mxu0  ;;  %v2978_v37 = vsel %vm2957_vm7, %v2975_v19, %v2977_v3  ;;  %v2980_v23 = vsel %vm2957_vm7, %v2977_v3, %v2979_v38  ;;  %v12993_v30 = vld [vmem:[#allocation24_spill] sm:$0xff]  ;;  %v2504_v52 = vshrl.u32 %v8722_v39, 16 }
 0x228   : > { %7789 = vmatmul.mubr.bf16.gmra.mrb[148].mxu0 %v2976_v15  ;;  %12975 = vst [vmem:[#allocation59_spill] sm:$0xff] %v10923_v10  ;;  %12976 = vst [vmem:[#allocation98_spill] sm:$0xff] %v10926_v55  ;;  %v7571_v36 = vpop.f32.mrb[47].mxu0 }
 0x229   : > { %7792 = vmatprep.mubr.msk.bf16.mxu0 %vm12733_vm13, %v12735_v48  ;;  %v12983_v36 = vld [vmem:[#allocation23_spill] sm:$0xff] }
 0x22a   : > { %v10932_v27 = vpop.f32.mrb[28].mxu1 }
 0x22b   : > { %v7486_v22 = vpop.f32.mrb[29].mxu1 }
 0x22c   : > { %v10936_v56 = vpop.f32.mrb[30].mxu1 }
 0x22d   : > { %v10938_v18 = vpop.f32.mrb[48].mxu0  ;;  %v7487_v31 = vpop.f32.mrb[31].mxu1 }
 0x22e   : > { %7705 = vmatmul.mubr.bf16.gmra.mrb[132].mxu1 %v12977_v17  ;;  %12978 = vst [vmem:[#allocation30_spill] sm:$0xff] %v10938_v18  ;;  %v7574_v32 = vpop.f32.mrb[49].mxu0  ;;  %v8732_v18 = vld [vmem:[#allocation2 + $0xb4] ss:$0 sps:$4 sm:$0xff]  }
 0x22f   : > { %7708 = vmatprep.mubr.msk.bf16.mxu1 %vm12733_vm13, %v12735_v48  ;;  %v10941_v33 = vpop.f32.mrb[50].mxu0 }
 0x230   : > { %7793 = vmatmul.mubr.bf16.gmra.mrb[152].mxu0 %v2978_v37  ;;  %12979 = vst [vmem:[#allocation99_spill] sm:$0xff] %v10941_v33  ;;  %v7575_v19 = vpop.f32.mrb[51].mxu0  ;;  %v2982_v37 = vsel %vm2957_vm7, %v2979_v38, %v2981_v46 }
 0x231   : > { %7796 = vmatprep.mubr.msk.bf16.mxu0 %vm12733_vm13, %v12735_v48 }
 0x232   : > { %v10947_v41 = vpop.f32.mrb[32].mxu1 }
 0x233   : > { %v7490_v44 = vpop.f32.mrb[33].mxu1 }
 0x234   : > { %v10951_v26 = vpop.f32.mrb[34].mxu1 }
 0x235   : > { %v10953_v15 = vpop.f32.mrb[52].mxu0  ;;  %v7491_v54 = vpop.f32.mrb[35].mxu1 }
 0x236   : > { %7709 = vmatmul.mubr.bf16.gmra.mrb[136].mxu1 %v12980_v7  ;;  %12981 = vst [vmem:[#allocation61_spill] sm:$0xff] %v10953_v15  ;;  %v7578_v61 = vpop.f32.mrb[53].mxu0  ;;  %v2983_v7 = vrot.slane %v10622_v28, 2  ;;  %v12986_v54 = vld [vmem:[#allocation62_spill] sm:$0xff] }
 0x237   : > { %7712 = vmatprep.mubr.msk.bf16.mxu1 %vm12733_vm13, %v12735_v48  ;;  %v10956_v17 = vpop.f32.mrb[54].mxu0 }
 0x238   : > { %7797 = vmatmul.mubr.bf16.gmra.mrb[156].mxu0 %v2980_v23  ;;  %12982 = vst [vmem:[#allocation100_spill] sm:$0xff] %v10956_v17  ;;  %v7579_v3 = vpop.f32.mrb[55].mxu0  ;;  %v2984_v61 = vsel %vm2957_vm7, %v2981_v46, %v2983_v7  ;;  %v8734_v17 = vld [vmem:[#allocation2 + $0x24] sm:$0xff]  }
 0x239   : > { %7800 = vmatprep.mubr.msk.bf16.mxu0 %vm12733_vm13, %v12735_v48 }
 0x23a   : > { %v10962_v22 = vpop.f32.mrb[36].mxu1 }
 0x23b   : > { %v7494_v31 = vpop.f32.mrb[37].mxu1 }
 0x23c   : > { %v10966_v59 = vpop.f32.mrb[38].mxu1  ;;  %v2985_v31 = vrot.slane %v10666_v50, 2 }
 0x23d   : > { %v10968_v32 = vpop.f32.mrb[56].mxu0  ;;  %v7495_v19 = vpop.f32.mrb[39].mxu1 }
 0x23e   : > { %7713 = vmatmul.mubr.bf16.gmra.mrb[140].mxu1 %v12983_v36  ;;  %12984 = vst [vmem:[#allocation23_spill] sm:$0xff] %v10968_v32  ;;  %v7582_v23 = vpop.f32.mrb[57].mxu0 }
 0x23f   : > { %7716 = vmatprep.mubr.msk.bf16.mxu1 %vm12733_vm13, %v12735_v48  ;;  %v10971_v44 = vpop.f32.mrb[58].mxu0 }
 0x240   : > { %7801 = vmatmul.mubr.bf16.gmra.mrb[160].mxu0 %v2982_v37  ;;  %12985 = vst [vmem:[#allocation101_spill] sm:$0xff] %v10971_v44  ;;  %v7583_v38 = vpop.f32.mrb[59].mxu0 }
 0x241   : > { %7804 = vmatprep.mubr.msk.bf16.mxu0 %vm12733_vm13, %v12735_v48  ;;  %v12989_v38 = vld [vmem:[#allocation63_spill] sm:$0xff] }
 0x242   : > { %v10977_v36 = vpop.f32.mrb[40].mxu1 }
 0x243   : > { %v7498_v3 = vpop.f32.mrb[41].mxu1 }
 0x244   : > { %v10981_v28 = vpop.f32.mrb[42].mxu1 }
 0x245   : > { %v10983_v37 = vpop.f32.mrb[60].mxu0  ;;  %v7499_v19 = vpop.f32.mrb[43].mxu1 }
 0x246   : > { %7717 = vmatmul.mubr.bf16.gmra.mrb[144].mxu1 %v12986_v54  ;;  %12987 = vst [vmem:[#allocation62_spill] sm:$0xff] %v10983_v37  ;;  %v7586_v23 = vpop.f32.mrb[61].mxu0 }
 0x247   : > { %7720 = vmatprep.mubr.msk.bf16.mxu1 %vm12733_vm13, %v12735_v48  ;;  %v10986_v54 = vpop.f32.mrb[62].mxu0  ;;  %v12991_v23 = vld [vmem:[#allocation49_spill] sm:$0xff] }
 0x248   : > { %7805 = vmatmul.mubr.bf16.gmra.mrb[164].mxu0 %v2984_v61  ;;  %12988 = vst [vmem:[#allocation102_spill] sm:$0xff] %v10986_v54  ;;  %v7587_v46 = vpop.f32.mrb[63].mxu0  ;;  %v2986_v61 = vsel %vm2957_vm7, %v2983_v7, %v2985_v31  ;;  %v2987_v8 = vrot.slane %v12991_v23, 2 }
 0x249   : > { %7808 = vmatprep.mubr.msk.bf16.mxu0 %vm12733_vm13, %v12735_v48 }
 0x24a   : > { %v10992_v3 = vpop.f32.mrb[44].mxu1 }
 0x24b   : > { %v7502_v25 = vpop.f32.mrb[45].mxu1 }
 0x24c   : > { %v10996_v50 = vpop.f32.mrb[46].mxu1  ;;  %v2988_v25 = vsel %vm2957_vm7, %v2985_v31, %v2987_v8 }
 0x24d   : > { %v10998_v19 = vpop.f32.mrb[64].mxu0 }
 0x24e   : > { %7721 = vmatmul.mubr.bf16.gmra.mrb[148].mxu1 %v12989_v38  ;;  %12990 = vst [vmem:[#allocation63_spill] sm:$0xff] %v10998_v19  ;;  %v7503_v38 = vpop.f32.mrb[47].mxu1  ;;  %v7590_v46 = vpop.f32.mrb[65].mxu0  ;;  %v2507_v19 = vshll.u32 %v8722_v39, 16 }
 0x24f   : > { %7724 = vmatprep.mubr.msk.bf16.mxu1 %vm12733_vm13, %v12735_v48  ;;  %v11001_v24 = vpop.f32.mrb[66].mxu0 }
 0x250   : > { %7809 = vmatmul.mubr.bf16.gmra.mrb[168].mxu0 %v2986_v61  ;;  %12992 = vst [vmem:[#allocation49_spill] sm:$0xff] %v11001_v24  ;;  %v7591_v7 = vpop.f32.mrb[67].mxu0  ;;  %v2506_v24 = vrot.slane %v2504_v52, 1  ;;  %v2509_v37 = vrot.slane %v2507_v19, 2  ;;  %v2991_v19 = vrot.slane %v10707_v4, 2 }
 0x251   : > { %7812 = vmatprep.mubr.msk.bf16.mxu0 %vm12733_vm13, %v12735_v48 }
 0x252   : > { %v11007_v61 = vpop.f32.mrb[48].mxu1 }
 0x253   : > { %v7506_v54 = vpop.f32.mrb[49].mxu1 }
 0x254   : > { %v11011_v23 = vpop.f32.mrb[50].mxu1 }
 0x255   : > { %v11013_v38 = vpop.f32.mrb[68].mxu0  ;;  %v7507_v46 = vpop.f32.mrb[51].mxu1 }
 0x256   : > { %7725 = vmatmul.mubr.bf16.gmra.mrb[152].mxu1 %v12993_v30  ;;  %12994 = vst [vmem:[#allocation24_spill] sm:$0xff] %v11013_v38  ;;  %v2989_v30 = vrot.slane %v10696_v51, 2  ;;  %v7594_v7 = vpop.f32.mrb[69].mxu0  ;;  %v2510_v38 = vor.u32 %v2509_v37, %v2506_v24 }
 0x257   : > { %7728 = vmatprep.mubr.msk.bf16.mxu1 %vm12733_vm13, %v12735_v48  ;;  %v11016_v31 = vpop.f32.mrb[70].mxu0  ;;  %v12998_v7 = vld [vmem:[#allocation64_spill] sm:$0xff] }
 0x258   : > { %7813 = vmatmul.mubr.bf16.gmra.mrb[172].mxu0 %v2988_v25  ;;  %12995 = vst [vmem:[#allocation103_spill] sm:$0xff] %v11016_v31  ;;  %v12996_v25 = vld [vmem:[#allocation66_spill] sm:$0xff]  ;;  %v7595_v13 = vpop.f32.mrb[71].mxu0  ;;  %v2990_v39 = vsel %vm2957_vm7, %v2987_v8, %v2989_v30  ;;  %v2992_v37 = vsel %vm2957_vm7, %v2989_v30, %v2991_v19  ;;  %v2993_v31 = vrot.slane %v10730_v35, 2 }
 0x259   : > { %7816 = vmatprep.mubr.msk.bf16.mxu0 %vm12733_vm13, %v12735_v48  ;;  %v8729_v8 = vld [vmem:[#allocation2 + $0x1c] sm:$0xff]  }
 0x25a   : > { %v11022_v54 = vpop.f32.mrb[52].mxu1  ;;  %v3439_v4 = vshrl.u32 %v8729_v8, 16 }
 0x25b   : > { %v7510_v44 = vpop.f32.mrb[53].mxu1 }
 0x25c   : > { %v11026_v51 = vpop.f32.mrb[54].mxu1  ;;  %v8728_v44 = vld [vmem:[#allocation2 + $0x14] sm:$0xfc]   ;;  %v3441_v30 = vrot.slane %v3439_v4, 2 }
 0x25d   : > { %v11028_v52 = vpop.f32.mrb[72].mxu0  ;;  %v7511_v13 = vpop.f32.mrb[55].mxu1 }
 0x25e   : > { %7729 = vmatmul.mubr.bf16.gmra.mrb[156].mxu1 %v12996_v25  ;;  %12997 = vst [vmem:[#allocation66_spill] sm:$0xff] %v11028_v52  ;;  %v7598_v46 = vpop.f32.mrb[73].mxu0  ;;  %v2511_v25 = vsel %vm2418_vm6, %v12998_v7, %v2510_v38  ;;  %v3442_v13 = vshll.u32 %v8729_v8, 16 }
 0x25f   : > { %7732 = vmatprep.mubr.msk.bf16.mxu1 %vm12733_vm13, %v12735_v48 }
 0x260   : > { %7817 = vmatmul.mubr.bf16.gmra.mrb[176].mxu0 %v2990_v39  ;;  %v11033_v39 = vpop.f32.mrb[74].mxu0 }
 0x261   : > { %7820 = vmatprep.mubr.msk.bf16.mxu0 %vm12733_vm13, %v12735_v48  ;;  %12999 = vst [vmem:[#allocation64_spill] sm:$0xff] %v11033_v39  ;;  %v7599_v24 = vpop.f32.mrb[75].mxu0  ;;  %v3431_v39 = vshrl.u32 %v8728_v44, 16 }
 0x262   : > { %v11038_v52 = vpop.f32.mrb[56].mxu1 }
 0x263   : > { %v7514_v46 = vpop.f32.mrb[57].mxu1 }
 0x264   : > { %v11042_v7 = vpop.f32.mrb[58].mxu1  ;;  %v3433_v46 = vrot.slane %v3431_v39, 2  ;;  %v8730_v39 = vld [vmem:[%s12581_s3 + $0x80] sm:$0xff]  }
 0x265   : > { %v11044_v24 = vpop.f32.mrb[76].mxu0  ;;  %v7515_v32 = vpop.f32.mrb[59].mxu1 }
 0x266   : > { %7733 = vmatmul.mubr.bf16.gmra.mrb[160].mxu1 %v2511_v25  ;;  %v3434_v25 = vshll.u32 %v8728_v44, 16  ;;  %13000 = vst [vmem:[#allocation104_spill] sm:$0xff] %v11044_v24  ;;  %v7602_v20 = vpop.f32.mrb[77].mxu0  ;;  %v2994_v44 = vsel %vm2957_vm7, %v2991_v19, %v2993_v31  ;;  %v3448_v32 = vshrl.u32 %v8734_v17, 16  ;;  %v13003_v19 = vld [vmem:[#allocation65_spill] sm:$0xff] }
 0x267   : > { %7736 = vmatprep.mubr.msk.bf16.mxu1 %vm12733_vm13, %v12735_v48  ;;  %v11047_v15 = vpop.f32.mrb[78].mxu0  ;;  %v3451_v20 = vshll.u32 %v8734_v17, 16 }
 0x268   : > { %7821 = vmatmul.mubr.bf16.gmra.mrb[180].mxu0 %v2992_v37  ;;  %v3444_v37 = vrot.slane %v3442_v13, 3  ;;  %13001 = vst [vmem:[#allocation105_spill] sm:$0xff] %v11047_v15  ;;  %v7603_v8 = vpop.f32.mrb[79].mxu0  ;;  %v3436_v0 = vrot.slane %v3434_v25, 3  ;;  %v8737_v15 = vld [vmem:[#allocation2 + $0x2c] sm:$0xff]  }
 0x269   : > { %7824 = vmatprep.mubr.msk.bf16.mxu0 %vm12733_vm13, %v12735_v48  ;;  %v2995_v8 = vrot.slane %v13003_v19, 2 }
 0x26a   : > { %v11052_v24 = vpop.f32.mrb[60].mxu1  ;;  %v3445_v35 = vor.u32 %v3444_v37, %v3441_v30  ;;  %v3437_v13 = vor.u32 %v3436_v0, %v3433_v46  ;;  %v3450_v37 = vrot.slane %v3448_v32, 2  ;;  %v8739_v46 = vld [vmem:[%s12581_s3 + $0x88] sm:$0xff]  }
 0x26b   : > { %v7518_v4 = vpop.f32.mrb[61].mxu1  ;;  %v2996_v19 = vsel %vm2957_vm7, %v2993_v31, %v2995_v8  ;;  %v8743_v31 = vld [vmem:[%s12581_s3 + $0x90] sm:$0xff]  }
 0x26c   : > { %v3446_v17 = vsel %vm3429_vm11, %v3437_v13, %v3445_v35  ;;  %v3453_v4 = vrot.slane %v3451_v20, 3  ;;  %v3457_v13 = vshrl.u32 %v8737_v15, 16 }
 0x26d   : > { %v11061_v25 = vpop.f32.mrb[80].mxu0 }
 0x26e   : > { %7737 = vmatmul.mubr.bf16.gmra.mrb[164].mxu1 %v2510_v38  ;;  %v11056_v38 = vpop.f32.mrb[62].mxu1  ;;  %13002 = vst [vmem:[#allocation106_spill] sm:$0xff] %v11061_v25  ;;  %v7606_v30 = vpop.f32.mrb[81].mxu0  ;;  %v3454_v20 = vor.u32 %v3453_v4, %v3450_v37  ;;  %v3459_v4 = vrot.slane %v3457_v13, 2 }
 0x26f   : > { %7856 = vmatprep.mubr.msk.bf16.mxu1 %vm12733_vm13, %v12735_v48  ;;  %v11065_v33 = vpop.f32.mrb[82].mxu0 }
 0x270   : > { %7825 = vmatmul.mubr.bf16.gmra.mrb[184].mxu0 %v2994_v44  ;;  %v7519_v44 = vpop.f32.mrb[63].mxu1  ;;  %13004 = vst [vmem:[#allocation65_spill] sm:$0xff] %v11065_v33  ;;  %v7607_v0 = vpop.f32.mrb[83].mxu0  ;;  %v8740_v33 = vld [vmem:[#allocation2 + $0x34] sm:$0xff]  }
 0x271   : > { %7828 = vmatprep.mubr.msk.bf16.mxu0 %vm12733_vm13, %v12735_v48  ;;  %v3460_v44 = vshll.u32 %v8737_v15, 16  ;;  %v3455_v15 = vsel %vm3429_vm11, %v3445_v35, %v3454_v20 }
 0x272   : > { %v11074_v32 = vpop.f32.mrb[64].mxu1 }
 0x273   : > { %v7522_v30 = vpop.f32.mrb[65].mxu1 }
 0x274   : > { %v3462_v30 = vrot.slane %v3460_v44, 3  ;;  %v3466_v44 = vshrl.u32 %v8740_v33, 16 }
 0x275   : > { %v11083_v0 = vpop.f32.mrb[84].mxu0 }
 0x276   : > { %7857 = vmatmul.mubr.bf16.vlgmr.msra.gmra.mrb[168].mxu1 %v3446_v17  ;;  %v11078_v17 = vpop.f32.mrb[66].mxu1  ;;  %13005 = vst [vmem:[#allocation107_spill] sm:$0xff] %v11083_v0  ;;  %v7610_v37 = vpop.f32.mrb[85].mxu0  ;;  %v3463_v13 = vor.u32 %v3462_v30, %v3459_v4  ;;  %v8741_v30 = vld [vmem:[#allocation2 + $0x3c] sm:$0xff]  }
 0x277   : > { %8041 = vmatpush3.bf16.msra.mxu1 %v8730_v39  ;;  %7860 = vmatprep.mubr.msk.bf16.mxu1 %vm12733_vm13, %v12735_v48  ;;  %v2997_v39 = vrot.slane %v8732_v18, 2  ;;  %v11087_v25 = vpop.f32.mrb[86].mxu0  ;;  %v3469_v37 = vshll.u32 %v8740_v33, 16  ;;  %v3468_v33 = vrot.slane %v3466_v44, 2  ;;  %v3475_v44 = vshrl.u32 %v8741_v30, 16 }
 0x278   : > { %8042 = vmatprep.subr.bf16.mxu1 %v12735_v48  ;;  %7829 = vmatmul.mubr.bf16.gmra.mrb[188].mxu0 %v2996_v19  ;;  %v7523_v19 = vpop.f32.mrb[67].mxu1  ;;  %13006 = vst [vmem:[#allocation108_spill] sm:$0xff] %v11087_v25  ;;  %v3464_v4 = vsel %vm3429_vm11, %v3454_v20, %v3463_v13 }
 0x279   : > { %7832 = vmatprep.mubr.msk.bf16.mxu0 %vm12733_vm13, %v12735_v48  ;;  %v2998_v18 = vsel %vm2957_vm7, %v2995_v8, %v2997_v39  ;;  %v8746_v19 = vld [vmem:[%s12581_s3 + $0x98] sm:$0xff]  }
 0x27a   : > { %v11096_v35 = vpop.f32.mrb[68].mxu1 }
 0x27b   : > { %8043 = vmatpush3.bf16.msra.mxu1 %v8739_v46  ;;  %v7611_v46 = vpop.f32.mrb[87].mxu0  ;;  %v7526_v25 = vpop.f32.mrb[69].mxu1 }
 0x27c   : > { %8044 = vmatprep.subr.bf16.mxu1 %v12735_v48  ;;  %v11100_v8 = vpop.f32.mrb[70].mxu1  ;;  %v3471_v25 = vrot.slane %v3469_v37, 3  ;;  %v3478_v37 = vshll.u32 %v8741_v30, 16 }
 0x27d   : > { %v7527_v46 = vpop.f32.mrb[71].mxu1 }
 0x27e   : > { %7861 = vmatmul.mubr.bf16.gmra.mrb[172].mxu1 %v3455_v15  ;;  %v11105_v15 = vpop.f32.mrb[88].mxu0  ;;  %v3472_v20 = vor.u32 %v3471_v25, %v3468_v33  ;;  %v3477_v25 = vrot.slane %v3475_v44, 2  ;;  %v3480_v30 = vrot.slane %v3478_v37, 3 }
 0x27f   : > { %7864 = vmatprep.mubr.msk.bf16.mxu1 %vm12733_vm13, %v12735_v48  ;;  %8045 = vmatpush3.bf16.msra.mxu1 %v8743_v31  ;;  %v8750_v31 = vld [vmem:[%s12581_s3 + $0xa0] sm:$0xff]   ;;  %13007 = vst [vmem:[#allocation109_spill] sm:$0xff] %v11105_v15 }
 0x280   : > { %8046 = vmatprep.subr.bf16.mxu1 %v12735_v48  ;;  %7833 = vmatmul.mubr.bf16.gmra.mrb[192].mxu0 %v2998_v18  ;;  %v7614_v18 = vpop.f32.mrb[89].mxu0  ;;  %v3473_v33 = vsel %vm3429_vm11, %v3463_v13, %v3472_v20  ;;  %v3481_v44 = vor.u32 %v3480_v30, %v3477_v25  ;;  %v8744_v25 = vld [vmem:[#allocation2 + $0x4c] sm:$0xff]  }
 0x281   : > { %7836 = vmatprep.mubr.msk.bf16.mxu0 %vm12733_vm13, %v12735_v48  ;;  %v11109_v0 = vpop.f32.mrb[90].mxu0  ;;  %v3496_v2 = vshll.u32 %v8744_v25, 16 }
 0x282   : > { %13008 = vst [vmem:[#allocation110_spill] sm:$0xff] %v11109_v0  ;;  %v7615_v9 = vpop.f32.mrb[91].mxu0  ;;  %v11117_v46 = vpop.f32.mrb[72].mxu1 }
 0x283   : > { %8047 = vmatpush3.bf16.msra.mxu1 %v8746_v19  ;;  %v8754_v19 = vld [vmem:[%s12581_s3 + $0xa8] sm:$0xff]   ;;  %v7530_v18 = vpop.f32.mrb[73].mxu1 }
 0x284   : > { %8048 = vmatprep.subr.bf16.mxu1 %v12735_v48  ;;  %v11121_v9 = vpop.f32.mrb[74].mxu1  ;;  %v8742_v18 = vld [vmem:[#allocation2 + $0x44] sm:$0xff]  }
 0x285   : > { %v7531_v0 = vpop.f32.mrb[75].mxu1  ;;  %v3484_v37 = vshrl.u32 %v8742_v18, 16 }
 0x286   : > { %7865 = vmatmul.mubr.bf16.gmra.mrb[176].mxu1 %v3464_v4  ;;  %v11126_v4 = vpop.f32.mrb[92].mxu0  ;;  %v8761_v0 = vld [vmem:[%s12581_s3 + $0xb8] sm:$0xff]  }
 0x287   : > { %7868 = vmatprep.mubr.msk.bf16.mxu1 %vm12733_vm13, %v12735_v48  ;;  %8049 = vmatpush3.bf16.msra.mxu1 %v8750_v31  ;;  %v8757_v31 = vld [vmem:[%s12581_s3 + $0xb0] sm:$0xff]   ;;  %13009 = vst [vmem:[#allocation111_spill] sm:$0xff] %v11126_v4  ;;  %v3486_v10 = vrot.slane %v3484_v37, 2 }
 0x288   : > { %8050 = vmatprep.subr.bf16.mxu1 %v12735_v48  ;;  %7837 = vmatmul.mubr.bf16.gmra.mrb[196].mxu0 %v2997_v39  ;;  %v7618_v39 = vpop.f32.mrb[93].mxu0 }
 0x289   : > { %7956 = vmatprep.mubr.msk.bf16.mxu0 %vm12733_vm13, %v12735_v48  ;;  %v11130_v15 = vpop.f32.mrb[94].mxu0  ;;  %v3487_v39 = vshll.u32 %v8742_v18, 16  ;;  %v13015_v18 = vld [vmem:[#allocation33_spill] sm:$0xff] }
 0x28a   : > { %13010 = vst [vmem:[#allocation112_spill] sm:$0xff] %v11130_v15  ;;  %v7619_v55 = vpop.f32.mrb[95].mxu0  ;;  %v11139_v13 = vpop.f32.mrb[76].mxu1 }
 0x28b   : > { %8051 = vmatpush3.bf16.msra.mxu1 %v8754_v19  ;;  %v13011_v19 = vld [vmem:[#allocation54_spill] sm:$0xff]  ;;  %v7534_v15 = vpop.f32.mrb[77].mxu1  ;;  %v3489_v16 = vrot.slane %v3487_v39, 3 }
 0x28c   : > { %8052 = vmatprep.subr.bf16.mxu1 %v12735_v48  ;;  %v11143_v55 = vpop.f32.mrb[78].mxu1  ;;  %v13016_v39 = vld [vmem:[#allocation22_spill] sm:$0xff] }
 0x28d   : > { %13012 = vst [vmem:[#allocation54_spill] sm:$0xff] %v11143_v55 }
 0x28e   : > { %7869 = vmatmul.mubr.bf16.gmra.mrb[180].mxu1 %v3473_v33  ;;  %v7535_v33 = vpop.f32.mrb[79].mxu1 }
 0x28f   : > { %7872 = vmatprep.mubr.msk.bf16.mxu1 %vm12733_vm13, %v12735_v48  ;;  %8053 = vmatpush3.bf16.msra.mxu1 %v8757_v31  ;;  %v11145_v31 = vpop.f32.mrb[96].mxu0  ;;  %v3493_v33 = vshrl.u32 %v8744_v25, 16 }
 0x290   : > { %8054 = vmatprep.subr.bf16.mxu1 %v12735_v48  ;;  %7957 = vmatmul.mubr.bf16.vlgmr.msra.gmra.mrb[200].mxu0 %v13011_v19  ;;  %13013 = vst [vmem:[#allocation113_spill] sm:$0xff] %v11145_v31  ;;  %v7622_v4 = vpop.f32.mrb[97].mxu0  ;;  %v3482_v19 = vsel %vm3429_vm11, %v3472_v20, %v3481_v44  ;;  %v3490_v31 = vor.u32 %v3489_v16, %v3486_v10  ;;  %v8763_v20 = vld [vmem:[%s12581_s3 + $0x100] sm:$0xff]  }
 0x291   : > { %7960 = vmatprep.mubr.msk.bf16.mxu0 %vm12733_vm13, %v12735_v48  ;;  %v11149_v30 = vpop.f32.mrb[98].mxu0  ;;  %8141 = vmatpush3.bf16.msra.mxu0 %v8763_v20  ;;  %v3495_v25 = vrot.slane %v3493_v33, 2  ;;  %v8764_v20 = vld [vmem:[%s12581_s3 + $0x108] sm:$0xff]  }
 0x292   : > { %13014 = vst [vmem:[#allocation114_spill] sm:$0xff] %v11149_v30  ;;  %v7623_v15 = vpop.f32.mrb[99].mxu0  ;;  %8142 = vmatprep.subr.bf16.mxu0 %v12735_v48  ;;  %v3491_v10 = vsel %vm3429_vm11, %v3481_v44, %v3490_v31 }
 0x293   : > { %8055 = vmatpush3.bf16.msra.mxu1 %v8761_v0  ;;  %v1758_v0 = vpop.f32.mrb[80].mxu1 }
 0x294   : > { %8240 = vmatprep.subr.bf16.mxu1 %v12735_v48  ;;  %v7538_v4 = vpop.f32.mrb[81].mxu1  ;;  %v8745_v0 = vld [vmem:[#allocation2 + $0x54] sm:$0xff]  }
 0x295   : > { %v1760_v37 = vpop.f32.mrb[82].mxu1  ;;  %v11160_v15 = vpop.f32.mrb[100].mxu0  ;;  %8143 = vmatpush3.bf16.msra.mxu0 %v8764_v20  ;;  %v3502_v33 = vshrl.u32 %v8745_v0, 16 }
 0x296   : > { %7873 = vmatmul.mubr.bf16.gmra.mrb[184].mxu1 %v3482_v19  ;;  %v4368_v19 = vshll.u32 %v13016_v39, 16  ;;  %13017 = vst [vmem:[#allocation33_spill] sm:$0xff] %v11160_v15  ;;  %v7539_v30 = vpop.f32.mrb[83].mxu1  ;;  %v7626_v16 = vpop.f32.mrb[101].mxu0  ;;  %v3505_v15 = vshll.u32 %v8745_v0, 16  ;;  %8144 = vmatprep.subr.bf16.mxu0 %v12735_v48 }
 0x297   : > { %7876 = vmatprep.mubr.msk.bf16.mxu1 %vm12733_vm13, %v12735_v48  ;;  %v11164_v5 = vpop.f32.mrb[102].mxu0  ;;  %v4366_v30 = vshrl.u32 %v13016_v39, 16  ;;  %v13019_v16 = vld [vmem:[#allocation39_spill] sm:$0xff] }
 0x298   : > { %7961 = vmatmul.mubr.bf16.gmra.mrb[204].mxu0 %v13015_v18  ;;  %v3498_v18 = vrot.slane %v3496_v2, 3  ;;  %13018 = vst [vmem:[#allocation22_spill] sm:$0xff] %v11164_v5  ;;  %v7627_v4 = vpop.f32.mrb[103].mxu0  ;;  %v4370_v37 = vrot.slane %v4368_v19, 1  ;;  %v3507_v0 = vrot.slane %v3505_v15, 3 }
 0x299   : > { %7964 = vmatprep.mubr.msk.bf16.mxu0 %vm12733_vm13, %v12735_v48 }
 0x29a   : > { %v2615_v44 = vpop.f32.mrb[84].mxu1  ;;  %v3499_v2 = vor.u32 %v3498_v18, %v3495_v25  ;;  %v4371_v20 = vor.u32 %v4370_v37, %v4366_v30  ;;  %v3504_v18 = vrot.slane %v3502_v33, 2 }
 0x29b   : > { %v7658_v4 = vpop.f32.mrb[85].mxu1  ;;  %v8747_v44 = vld [vmem:[#allocation2 + $0x5c] sm:$0xff]  }
 0x29c   : > { %v2617_v5 = vpop.f32.mrb[86].mxu1  ;;  %v3500_v25 = vsel %vm3429_vm11, %v3490_v31, %v3499_v2  ;;  %v13022_v4 = vld [vmem:[#allocation40_spill] sm:$0xff]  ;;  %v13023_v31 = vld [vmem:[#allocation35_spill] sm:$0xff]  ;;  %v3508_v37 = vor.u32 %v3507_v0, %v3504_v18  ;;  %v3511_v33 = vshrl.u32 %v8747_v44, 16 }
 0x29d   : > { %v11179_v39 = vpop.f32.mrb[104].mxu0  ;;  %v7659_v19 = vpop.f32.mrb[87].mxu1  ;;  %v11187_v1 = vsel %vm1942_vm3, %v4371_v20, %v13022_v4  ;;  %v8767_v5 = vld [vmem:[%s12581_s3 + $0x118] sm:$0xff]  }
 0x29e   : > { %7877 = vmatmul.mubr.bf16.gmra.mrb[188].mxu1 %v3491_v10  ;;  %v8765_v10 = vld [vmem:[%s12581_s3 + $0x110] sm:$0xff]   ;;  %13020 = vst [vmem:[#allocation39_spill] sm:$0xff] %v11179_v39  ;;  %v8768_v19 = vld [vmem:[%s12581_s3 + $0x120] sm:$0xff]   ;;  %v3509_v18 = vsel %vm3429_vm11, %v3499_v2, %v3508_v37  ;;  %v3513_v0 = vrot.slane %v3511_v33, 2 }
 0x29f   : > { %7880 = vmatprep.mubr.msk.bf16.mxu1 %vm12733_vm13, %v12735_v48  ;;  %8145 = vmatpush3.bf16.msra.mxu0 %v8765_v10  ;;  %v3514_v10 = vshll.u32 %v8747_v44, 16 }
 0x2a0   : > { %7965 = vmatmul.mubr.bf16.gmra.mrb[208].mxu0 %v13019_v16  ;;  %v7630_v16 = vpop.f32.mrb[105].mxu0  ;;  %8146 = vmatprep.subr.bf16.mxu0 %v12735_v48 }
 0x2a1   : > { %7968 = vmatprep.mubr.msk.bf16.mxu0 %vm12733_vm13, %v12735_v48  ;;  %v11183_v55 = vpop.f32.mrb[106].mxu0  ;;  %v3516_v44 = vrot.slane %v3514_v10, 3 }
 0x2a2   : > { %13021 = vst [vmem:[#allocation115_spill] sm:$0xff] %v11183_v55  ;;  %v7631_v30 = vpop.f32.mrb[107].mxu0  ;;  %v11195_v15 = vpop.f32.mrb[88].mxu1 }
 0x2a3   : > { %8147 = vmatpush3.bf16.msra.mxu0 %v8767_v5  ;;  %13024 = vst [vmem:[#allocation40_spill] sm:$0xff] %v11195_v15  ;;  %v7662_v20 = vpop.f32.mrb[89].mxu1  ;;  %v8748_v30 = vld [vmem:[#allocation2 + $0x64] sm:$0xff]   ;;  %v3517_v33 = vor.u32 %v3516_v44, %v3513_v0  ;;  %v8751_v15 = vld [vmem:[#allocation2 + $0x74] sm:$0xff]  }
 0x2a4   : > { %8148 = vmatprep.subr.bf16.mxu0 %v12735_v48  ;;  %v11203_v16 = vpop.f32.mrb[90].mxu1  ;;  %v8769_v20 = vld [vmem:[%s12581_s3 + $0x128] sm:$0xff]   ;;  %v3520_v10 = vshrl.u32 %v8748_v30, 16 }
 0x2a5   : > { %13025 = vst [vmem:[#allocation35_spill] sm:$0xff] %v11203_v16  ;;  %v7663_v4 = vpop.f32.mrb[91].mxu1  ;;  %v3518_v0 = vsel %vm3429_vm11, %v3508_v37, %v3517_v33 }
 0x2a6   : > { %7881 = vmatmul.mubr.bf16.gmra.mrb[192].mxu1 %v3500_v25  ;;  %v11205_v25 = vpop.f32.mrb[108].mxu0  ;;  %v3523_v4 = vshll.u32 %v8748_v30, 16  ;;  %v3522_v44 = vrot.slane %v3520_v10, 2 }
 0x2a7   : > { %7884 = vmatprep.mubr.msk.bf16.mxu1 %vm12733_vm13, %v12735_v48  ;;  %13026 = vst [vmem:[#allocation116_spill] sm:$0xff] %v11205_v25  ;;  %8149 = vmatpush3.bf16.msra.mxu0 %v8768_v19  ;;  %v7634_v5 = vpop.f32.mrb[109].mxu0  ;;  %v13028_v19 = vld [vmem:[#allocation26_spill] sm:$0xff]  ;;  %v8749_v25 = vld [vmem:[#allocation2 + $0x6c] sm:$0xff]  }
 0x2a8   : > { %7969 = vmatmul.mubr.bf16.gmra.mrb[212].mxu0 %v13023_v31  ;;  %8150 = vmatprep.subr.bf16.mxu0 %v12735_v48  ;;  %v11209_v31 = vpop.f32.mrb[110].mxu0  ;;  %v8770_v5 = vld [vmem:[%s12581_s3 + $0x130] sm:$0xff]   ;;  %v3525_v30 = vrot.slane %v3523_v4, 3  ;;  %v3529_v10 = vshrl.u32 %v8749_v25, 16  ;;  %v3532_v4 = vshll.u32 %v8749_v25, 16 }
 0x2a9   : > { %7972 = vmatprep.mubr.msk.bf16.mxu0 %vm12733_vm13, %v12735_v48  ;;  %13027 = vst [vmem:[#allocation117_spill] sm:$0xff] %v11209_v31  ;;  %v7635_v55 = vpop.f32.mrb[111].mxu0  ;;  %v13034_v25 = vld [vmem:[#allocation37_spill] sm:$0xff] }
 0x2aa   : > { %v11217_v2 = vpop.f32.mrb[92].mxu1  ;;  %v3526_v37 = vor.u32 %v3525_v30, %v3522_v44  ;;  %v3531_v16 = vrot.slane %v3529_v10, 2 }
 0x2ab   : > { %8151 = vmatpush3.bf16.msra.mxu0 %v8769_v20  ;;  %13029 = vst [vmem:[#allocation26_spill] sm:$0xff] %v11217_v2 }
 0x2ac   : > { %8152 = vmatprep.subr.bf16.mxu0 %v12735_v48 }
 0x2ad   : > { %v2371_v20 = vpop.f32.mrb[112].mxu0 }
 0x2ae   : > { %7885 = vmatmul.mubr.bf16.gmra.mrb[196].mxu1 %v3509_v18  ;;  %v7666_v18 = vpop.f32.mrb[93].mxu1 }
 0x2af   : > { %7888 = vmatprep.mubr.msk.bf16.mxu1 %vm12733_vm13, %v12735_v48  ;;  %v11225_v55 = vpop.f32.mrb[94].mxu1  ;;  %8153 = vmatpush3.bf16.msra.mxu0 %v8770_v5  ;;  %v8771_v18 = vld [vmem:[%s12581_s3 + $0x138] sm:$0xff]  }
 0x2b0   : > { %7973 = vmatmul.mubr.bf16.gmra.mrb[216].mxu0 %v13028_v19  ;;  %13030 = vst [vmem:[#allocation118_spill] sm:$0xff] %v11225_v55  ;;  %v7667_v31 = vpop.f32.mrb[95].mxu1  ;;  %v7638_v19 = vpop.f32.mrb[113].mxu0  ;;  %8154 = vmatprep.subr.bf16.mxu0 %v12735_v48  ;;  %v3527_v55 = vsel %vm3429_vm11, %v3517_v33, %v3526_v37 }
 0x2b1   : > { %7976 = vmatprep.mubr.msk.bf16.mxu0 %vm12733_vm13, %v12735_v48  ;;  %v2373_v39 = vpop.f32.mrb[114].mxu0  ;;  %v13031_v31 = vld [vmem:[#allocation27_spill] sm:$0xff] }
 0x2b2   : > { %v7639_v2 = vpop.f32.mrb[115].mxu0  ;;  %v11235_v5 = vpop.f32.mrb[96].mxu1 }
 0x2b3   : > { %8155 = vmatpush3.bf16.msra.mxu0 %v8771_v18  ;;  %13032 = vst [vmem:[#allocation27_spill] sm:$0xff] %v11235_v5  ;;  %v7670_v20 = vpop.f32.mrb[97].mxu1  ;;  %v3534_v18 = vrot.slane %v3532_v4, 3 }
 0x2b4   : > { %v11239_v39 = vpop.f32.mrb[98].mxu1  ;;  %v3538_v20 = vshrl.u32 %v8751_v15, 16 }
 0x2b5   : > { %13033 = vst [vmem:[#allocation119_spill] sm:$0xff] %v11239_v39  ;;  %v3102_v19 = vpop.f32.mrb[116].mxu0  ;;  %v3535_v30 = vor.u32 %v3534_v18, %v3531_v16 }
 0x2b6   : > { %7889 = vmatmul.mubr.bf16.gmra.mrb[200].mxu1 %v3518_v0  ;;  %v7671_v0 = vpop.f32.mrb[99].mxu1  ;;  %v7758_v2 = vpop.f32.mrb[117].mxu0  ;;  %v3541_v19 = vshll.u32 %v8751_v15, 16  ;;  %v13039_v15 = vld [vmem:[#allocation29_spill] sm:$0xff] }
 0x2b7   : > { %7892 = vmatprep.mubr.msk.bf16.mxu1 %vm12733_vm13, %v12735_v48  ;;  %v3536_v4 = vsel %vm3429_vm11, %v3526_v37, %v3535_v30  ;;  %v3540_v2 = vrot.slane %v3538_v20, 2 }
 0x2b8   : > { %7977 = vmatmul.mubr.bf16.gmra.mrb[220].mxu0 %v13031_v31  ;;  %v3104_v31 = vpop.f32.mrb[118].mxu0 }
 0x2b9   : > { %7980 = vmatprep.mubr.msk.bf16.mxu0 %vm12733_vm13, %v12735_v48  ;;  %v7759_v5 = vpop.f32.mrb[119].mxu0  ;;  %v3543_v31 = vrot.slane %v3541_v19, 3 }
 0x2ba   : > { %v11245_v44 = vpop.f32.mrb[100].mxu1 }
 0x2bb   : > { %13035 = vst [vmem:[#allocation37_spill] sm:$0xff] %v11245_v44  ;;  %v7674_v0 = vpop.f32.mrb[101].mxu1 }
 0x2bc   : > { %v11249_v33 = vpop.f32.mrb[102].mxu1  ;;  %v3544_v0 = vor.u32 %v3543_v31, %v3540_v2  ;;  %v13044_v31 = vld [vmem:[#allocation69_spill] sm:$0xff] }
 0x2bd   : > { %13036 = vst [vmem:[#allocation120_spill] sm:$0xff] %v11249_v33 }
 0x2be   : > { %7893 = vmatmul.mubr.bf16.gmra.mrb[204].mxu1 %v3527_v55  ;;  %v7675_v55 = vpop.f32.mrb[103].mxu1 }
 0x2bf   : > { %7896 = vmatprep.mubr.msk.bf16.mxu1 %vm12733_vm13, %v12735_v48  ;;  %v11251_v10 = vpop.f32.mrb[120].mxu0 }
 0x2c0   : > { %7981 = vmatmul.mubr.bf16.gmra.mrb[224].mxu0 %v13034_v25  ;;  %13037 = vst [vmem:[#allocation121_spill] sm:$0xff] %v11251_v10  ;;  %v7762_v5 = vpop.f32.mrb[121].mxu0  ;;  %v8752_v25 = vld [vmem:[#allocation2 + $0x7c] sm:$0xff]  }
 0x2c1   : > { %7984 = vmatprep.mubr.msk.bf16.mxu0 %vm12733_vm13, %v12735_v48  ;;  %v11254_v39 = vpop.f32.mrb[122].mxu0  ;;  %v3547_v10 = vshrl.u32 %v8752_v25, 16  ;;  %v3550_v55 = vshll.u32 %v8752_v25, 16 }
 0x2c2   : > { %13038 = vst [vmem:[#allocation122_spill] sm:$0xff] %v11254_v39  ;;  %v7763_v16 = vpop.f32.mrb[123].mxu0 }
 0x2c3   : > { %v11259_v18 = vpop.f32.mrb[104].mxu1  ;;  %v3545_v16 = vsel %vm3429_vm11, %v3535_v30, %v3544_v0  ;;  %v3549_v39 = vrot.slane %v3547_v10, 2  ;;  %v3552_v33 = vrot.slane %v3550_v55, 3 }
 0x2c4   : > { %13040 = vst [vmem:[#allocation29_spill] sm:$0xff] %v11259_v18  ;;  %v7678_v5 = vpop.f32.mrb[105].mxu1 }
 0x2c5   : > { %v11263_v37 = vpop.f32.mrb[106].mxu1  ;;  %v3553_v5 = vor.u32 %v3552_v33, %v3549_v39  ;;  %v13049_v33 = vld [vmem:[#allocation71_spill] sm:$0xff] }
 0x2c6   : > { %7897 = vmatmul.mubr.bf16.gmra.mrb[208].mxu1 %v3536_v4  ;;  %13041 = vst [vmem:[#allocation123_spill] sm:$0xff] %v11263_v37  ;;  %v7679_v19 = vpop.f32.mrb[107].mxu1 }
 0x2c7   : > { %7900 = vmatprep.mubr.msk.bf16.mxu1 %vm12733_vm13, %v12735_v48 }
 0x2c8   : > { %7985 = vmatmul.mubr.bf16.gmra.mrb[228].mxu0 %v13039_v15  ;;  %v8753_v15 = vld [vmem:[#allocation2 + $0x84] sm:$0xff]  }
 0x2c9   : > { %7988 = vmatprep.mubr.msk.bf16.mxu0 %vm12733_vm13, %v12735_v48  ;;  %v11265_v20 = vpop.f32.mrb[124].mxu0  ;;  %v3559_v19 = vshll.u32 %v8753_v15, 16 }
 0x2ca   : > { %13042 = vst [vmem:[#allocation124_spill] sm:$0xff] %v11265_v20  ;;  %v7766_v4 = vpop.f32.mrb[125].mxu0  ;;  %v3556_v20 = vshrl.u32 %v8753_v15, 16 }
 0x2cb   : > { %v11268_v44 = vpop.f32.mrb[126].mxu0  ;;  %v3561_v37 = vrot.slane %v3559_v19, 3 }
 0x2cc   : > { %13043 = vst [vmem:[#allocation125_spill] sm:$0xff] %v11268_v44  ;;  %v7767_v2 = vpop.f32.mrb[127].mxu0  ;;  %v3558_v44 = vrot.slane %v3556_v20, 2 }
 0x2cd   : > { %v11273_v25 = vpop.f32.mrb[108].mxu1  ;;  %v3554_v2 = vsel %vm3429_vm11, %v3544_v0, %v3553_v5 }
 0x2ce   : > { %7901 = vmatmul.mubr.bf16.gmra.mrb[212].mxu1 %v3545_v16  ;;  %13045 = vst [vmem:[#allocation69_spill] sm:$0xff] %v11273_v25  ;;  %v7682_v4 = vpop.f32.mrb[109].mxu1 }
 0x2cf   : > { %7904 = vmatprep.mubr.msk.bf16.mxu1 %vm12733_vm13, %v12735_v48  ;;  %v11277_v30 = vpop.f32.mrb[110].mxu1  ;;  %v3562_v4 = vor.u32 %v3561_v37, %v3558_v44  ;;  %v13054_v37 = vld [vmem:[#allocation72_spill] sm:$0xff] }
 0x2d0   : > { %7989 = vmatmul.mubr.bf16.gmra.mrb[232].mxu0 %v13044_v31  ;;  %13046 = vst [vmem:[#allocation126_spill] sm:$0xff] %v11277_v30  ;;  %v7683_v55 = vpop.f32.mrb[111].mxu1  ;;  %v8755_v31 = vld [vmem:[#allocation2 + $0x8c] sm:$0xff]  }
 0x2d1   : > { %7992 = vmatprep.mubr.msk.bf16.mxu0 %vm12733_vm13, %v12735_v48  ;;  %v11279_v10 = vpop.f32.mrb[128].mxu0  ;;  %v3568_v55 = vshll.u32 %v8755_v31, 16 }
 0x2d2   : > { %13047 = vst [vmem:[#allocation127_spill] sm:$0xff] %v11279_v10  ;;  %v7770_v16 = vpop.f32.mrb[129].mxu0  ;;  %v3565_v10 = vshrl.u32 %v8755_v31, 16 }
 0x2d3   : > { %v11282_v18 = vpop.f32.mrb[130].mxu0  ;;  %v3570_v30 = vrot.slane %v3568_v55, 3 }
 0x2d4   : > { %13048 = vst [vmem:[#allocation128_spill] sm:$0xff] %v11282_v18  ;;  %v7771_v39 = vpop.f32.mrb[131].mxu0  ;;  %v3567_v18 = vrot.slane %v3565_v10, 2 }
 0x2d5   : > { %v3563_v39 = vsel %vm3429_vm11, %v3553_v5, %v3562_v4 }
 0x2d6   : > { %7905 = vmatmul.mubr.bf16.gmra.mrb[216].mxu1 %v3554_v2  ;;  %v11287_v15 = vpop.f32.mrb[112].mxu1 }
 0x2d7   : > { %7908 = vmatprep.mubr.msk.bf16.mxu1 %vm12733_vm13, %v12735_v48  ;;  %13050 = vst [vmem:[#allocation71_spill] sm:$0xff] %v11287_v15  ;;  %v7686_v16 = vpop.f32.mrb[113].mxu1 }
 0x2d8   : > { %7993 = vmatmul.mubr.bf16.gmra.mrb[236].mxu0 %v13049_v33  ;;  %v11291_v0 = vpop.f32.mrb[114].mxu1  ;;  %v8756_v33 = vld [vmem:[#allocation2 + $0x94] sm:$0xff]   ;;  %v3571_v16 = vor.u32 %v3570_v30, %v3567_v18 }
 0x2d9   : > { %7996 = vmatprep.mubr.msk.bf16.mxu0 %vm12733_vm13, %v12735_v48  ;;  %13051 = vst [vmem:[#allocation129_spill] sm:$0xff] %v11291_v0  ;;  %v11293_v20 = vpop.f32.mrb[132].mxu0  ;;  %v7687_v19 = vpop.f32.mrb[115].mxu1  ;;  %v13059_v30 = vld [vmem:[#allocation73_spill] sm:$0xff] }
 0x2da   : > { %13052 = vst [vmem:[#allocation130_spill] sm:$0xff] %v11293_v20  ;;  %v7774_v2 = vpop.f32.mrb[133].mxu0  ;;  %v3574_v20 = vshrl.u32 %v8756_v33, 16  ;;  %v3577_v19 = vshll.u32 %v8756_v33, 16 }
 0x2db   : > { %v11296_v25 = vpop.f32.mrb[134].mxu0 }
 0x2dc   : > { %13053 = vst [vmem:[#allocation131_spill] sm:$0xff] %v11296_v25  ;;  %v7775_v44 = vpop.f32.mrb[135].mxu0  ;;  %v3576_v25 = vrot.slane %v3574_v20, 2  ;;  %v3579_v0 = vrot.slane %v3577_v19, 3 }
 0x2dd   : > { %v3572_v44 = vsel %vm3429_vm11, %v3562_v4, %v3571_v16 }
 0x2de   : > { %7909 = vmatmul.mubr.bf16.gmra.mrb[220].mxu1 %v3563_v39 }
 0x2df   : > { %7912 = vmatprep.mubr.msk.bf16.mxu1 %vm12733_vm13, %v12735_v48  ;;  %v11301_v31 = vpop.f32.mrb[116].mxu1 }
 0x2e0   : > { %7997 = vmatmul.mubr.bf16.gmra.mrb[240].mxu0 %v13054_v37  ;;  %13055 = vst [vmem:[#allocation72_spill] sm:$0xff] %v11301_v31  ;;  %v7690_v2 = vpop.f32.mrb[117].mxu1  ;;  %v8758_v37 = vld [vmem:[#allocation2 + $0x9c] sm:$0xff]  }
 0x2e1   : > { %8000 = vmatprep.mubr.msk.bf16.mxu0 %vm12733_vm13, %v12735_v48  ;;  %v11305_v5 = vpop.f32.mrb[118].mxu1  ;;  %v11307_v10 = vpop.f32.mrb[136].mxu0  ;;  %v3580_v2 = vor.u32 %v3579_v0, %v3576_v25  ;;  %v13064_v0 = vld [vmem:[#allocation77_spill] sm:$0xff] }
 0x2e2   : > { %13056 = vst [vmem:[#allocation132_spill] sm:$0xff] %v11305_v5  ;;  %13057 = vst [vmem:[#allocation133_spill] sm:$0xff] %v11307_v10  ;;  %v7691_v55 = vpop.f32.mrb[119].mxu1  ;;  %v7778_v39 = vpop.f32.mrb[137].mxu0  ;;  %v3583_v10 = vshrl.u32 %v8758_v37, 16 }
 0x2e3   : > { %v11310_v15 = vpop.f32.mrb[138].mxu0  ;;  %v3586_v55 = vshll.u32 %v8758_v37, 16 }
 0x2e4   : > { %13058 = vst [vmem:[#allocation134_spill] sm:$0xff] %v11310_v15  ;;  %v7779_v18 = vpop.f32.mrb[139].mxu0  ;;  %v3585_v15 = vrot.slane %v3583_v10, 2 }
 0x2e5   : > { %v3581_v18 = vsel %vm3429_vm11, %v3571_v16, %v3580_v2  ;;  %v3588_v5 = vrot.slane %v3586_v55, 3 }
 0x2e6   : > { %7913 = vmatmul.mubr.bf16.gmra.mrb[224].mxu1 %v3572_v44 }
 0x2e7   : > { %7916 = vmatprep.mubr.msk.bf16.mxu1 %vm12733_vm13, %v12735_v48 }
 0x2e8   : > { %8001 = vmatmul.mubr.bf16.gmra.mrb[244].mxu0 %v13059_v30  ;;  %v8759_v30 = vld [vmem:[#allocation2 + $0xa4] sm:$0xff]  }
 0x2e9   : > { %v11315_v33 = vpop.f32.mrb[120].mxu1  ;;  %8004 = vmatprep.mubr.msk.bf16.mxu0 %vm12733_vm13, %v12735_v48  ;;  %v11321_v20 = vpop.f32.mrb[140].mxu0 }
 0x2ea   : > { %13060 = vst [vmem:[#allocation73_spill] sm:$0xff] %v11315_v33  ;;  %v7694_v39 = vpop.f32.mrb[121].mxu1  ;;  %13062 = vst [vmem:[#allocation136_spill] sm:$0xff] %v11321_v20  ;;  %v7782_v44 = vpop.f32.mrb[141].mxu0  ;;  %v3592_v20 = vshrl.u32 %v8759_v30, 16 }
 0x2eb   : > { %v11319_v4 = vpop.f32.mrb[122].mxu1  ;;  %v11324_v31 = vpop.f32.mrb[142].mxu0  ;;  %v3589_v39 = vor.u32 %v3588_v5, %v3585_v15  ;;  %v13069_v5 = vld [vmem:[#allocation79_spill] sm:$0xff] }
 0x2ec   : > { %13061 = vst [vmem:[#allocation135_spill] sm:$0xff] %v11319_v4  ;;  %v7695_v19 = vpop.f32.mrb[123].mxu1  ;;  %13063 = vst [vmem:[#allocation137_spill] sm:$0xff] %v11324_v31  ;;  %v7783_v25 = vpop.f32.mrb[143].mxu0  ;;  %v3594_v31 = vrot.slane %v3592_v20, 2 }
 0x2ed   : > { %v3595_v19 = vshll.u32 %v8759_v30, 16  ;;  %v3590_v25 = vsel %vm3429_vm11, %v3580_v2, %v3589_v39  ;;  %v8762_v20 = vld [vmem:[#allocation2 + $0xb4] sm:$0x1f]  }
 0x2ee   : > { %7917 = vmatmul.mubr.bf16.gmra.mrb[228].mxu1 %v3581_v18 }
 0x2ef   : > { %7920 = vmatprep.mubr.msk.bf16.mxu1 %vm12733_vm13, %v12735_v48  ;;  %v3597_v4 = vrot.slane %v3595_v19, 3 }
 0x2f0   : > { %8005 = vmatmul.mubr.bf16.gmra.mrb[248].mxu0 %v13064_v0  ;;  %v8760_v0 = vld [vmem:[#allocation2 + $0xac] sm:$0xff]  }
 0x2f1   : > { %v11329_v37 = vpop.f32.mrb[124].mxu1  ;;  %8008 = vmatprep.mubr.msk.bf16.mxu0 %vm12733_vm13, %v12735_v48 }
 0x2f2   : > { %13065 = vst [vmem:[#allocation77_spill] sm:$0xff] %v11329_v37  ;;  %v7698_v44 = vpop.f32.mrb[125].mxu1 }
 0x2f3   : > { %v11333_v16 = vpop.f32.mrb[126].mxu1  ;;  %v11335_v10 = vpop.f32.mrb[144].mxu0  ;;  %v3598_v44 = vor.u32 %v3597_v4, %v3594_v31  ;;  %v3610_v4 = vshrl.u32 %v8762_v20, 16 }
 0x2f4   : > { %13066 = vst [vmem:[#allocation138_spill] sm:$0xff] %v11333_v16  ;;  %13067 = vst [vmem:[#allocation139_spill] sm:$0xff] %v11335_v10  ;;  %v7699_v55 = vpop.f32.mrb[127].mxu1  ;;  %v7786_v18 = vpop.f32.mrb[145].mxu0  ;;  %v3601_v10 = vshrl.u32 %v8760_v0, 16 }
 0x2f5   : > { %v11338_v33 = vpop.f32.mrb[146].mxu0  ;;  %v3604_v55 = vshll.u32 %v8760_v0, 16  ;;  %v3613_v0 = vshll.u32 %v8762_v20, 16 }
 0x2f6   : > { %13068 = vst [vmem:[#allocation140_spill] sm:$0xff] %v11338_v33  ;;  %7921 = vmatmul.mubr.bf16.gmra.mrb[232].mxu1 %v3590_v25  ;;  %v7787_v15 = vpop.f32.mrb[147].mxu0  ;;  %v3599_v33 = vsel %vm3429_vm11, %v3589_v39, %v3598_v44  ;;  %v3603_v16 = vrot.slane %v3601_v10, 2  ;;  %v3612_v10 = vrot.slane %v3610_v4, 2 }
 0x2f7   : > { %7924 = vmatprep.mubr.msk.bf16.mxu1 %vm12733_vm13, %v12735_v48 }
 0x2f8   : > { %8009 = vmatmul.mubr.bf16.gmra.mrb[252].mxu0 %v13069_v5  ;;  %v3606_v5 = vrot.slane %v3604_v55, 3  ;;  %v3615_v55 = vrot.slane %v3613_v0, 3 }
 0x2f9   : > { %v11343_v30 = vpop.f32.mrb[128].mxu1  ;;  %8012 = vmatprep.mubr.msk.bf16.mxu0 %vm12733_vm13, %v12735_v48 }
 0x2fa   : > { %13070 = vst [vmem:[#allocation79_spill] sm:$0xff] %v11343_v30  ;;  %v7702_v18 = vpop.f32.mrb[129].mxu1  ;;  %v13150_v30 = vld [vmem:[#allocation42_spill] sm:$0xff] }
 0x2fb   : > { %v11347_v2 = vpop.f32.mrb[130].mxu1  ;;  %v11349_v19 = vpop.f32.mrb[148].mxu0  ;;  %v13074_v18 = vld [vmem:[#allocation80_spill] sm:$0xff] }
 0x2fc   : > { %13071 = vst [vmem:[#allocation141_spill] sm:$0xff] %v11347_v2  ;;  %13072 = vst [vmem:[#allocation142_spill] sm:$0xff] %v11349_v19  ;;  %v7703_v25 = vpop.f32.mrb[131].mxu1  ;;  %v7790_v15 = vpop.f32.mrb[149].mxu0  ;;  %v3607_v19 = vor.u32 %v3606_v5, %v3603_v16  ;;  %v3616_v16 = vor.u32 %v3615_v55, %v3612_v10  ;;  %v13079_v5 = vld [vmem:[#allocation81_spill] sm:$0xff]  ;;  %v13084_v55 = vld [vmem:[#allocation82_spill] sm:$0xff] }
 0x2fd   : > { %v11352_v37 = vpop.f32.mrb[150].mxu0 }
 0x2fe   : > { %13073 = vst [vmem:[#allocation143_spill] sm:$0xff] %v11352_v37  ;;  %7925 = vmatmul.mubr.bf16.gmra.mrb[236].mxu1 %v3599_v33  ;;  %v7791_v31 = vpop.f32.mrb[151].mxu0  ;;  %v3608_v37 = vsel %vm3429_vm11, %v3598_v44, %v3607_v19  ;;  %v3617_v44 = vsel %vm3429_vm11, %v3607_v19, %v3616_v16 }
 0x2ff   : > { %7928 = vmatprep.mubr.msk.bf16.mxu1 %vm12733_vm13, %v12735_v48 }
 0x300   : > { %8013 = vmatmul.mubr.bf16.gmra.mrb[0].mxu0 %v13074_v18 }
 0x301   : > { %v11357_v2 = vpop.f32.mrb[132].mxu1  ;;  %8016 = vmatprep.mubr.msk.bf16.mxu0 %vm12733_vm13, %v12735_v48 }
 0x302   : > { %13075 = vst [vmem:[#allocation80_spill] sm:$0xff] %v11357_v2  ;;  %v7706_v25 = vpop.f32.mrb[133].mxu1 }
 0x303   : > { %v11361_v39 = vpop.f32.mrb[134].mxu1  ;;  %v11363_v33 = vpop.f32.mrb[152].mxu0 }
 0x304   : > { %13076 = vst [vmem:[#allocation144_spill] sm:$0xff] %v11361_v39  ;;  %13077 = vst [vmem:[#allocation145_spill] sm:$0xff] %v11363_v33  ;;  %v7707_v15 = vpop.f32.mrb[135].mxu1  ;;  %v7794_v31 = vpop.f32.mrb[153].mxu0  ;;  %v13099_v33 = vld [vmem:[#allocation86_spill] sm:$0xff]  ;;  %v13145_v39 = vld [vmem:[#allocation41_spill] sm:$0xff] }
 0x305   : > { %v11366_v20 = vpop.f32.mrb[154].mxu0 }
 0x306   : > { %13078 = vst [vmem:[#allocation146_spill] sm:$0xff] %v11366_v20  ;;  %7929 = vmatmul.mubr.bf16.gmra.mrb[240].mxu1 %v3608_v37  ;;  %v7795_v18 = vpop.f32.mrb[155].mxu0 }
 0x307   : > { %7932 = vmatprep.mubr.msk.bf16.mxu1 %vm12733_vm13, %v12735_v48 }
 0x308   : > { %8017 = vmatmul.mubr.bf16.gmra.mrb[4].mxu0 %v13079_v5 }
 0x309   : > { %v11371_v25 = vpop.f32.mrb[136].mxu1  ;;  %8020 = vmatprep.mubr.msk.bf16.mxu0 %vm12733_vm13, %v12735_v48 }
 0x30a   : > { %13080 = vst [vmem:[#allocation81_spill] sm:$0xff] %v11371_v25  ;;  %v7710_v4 = vpop.f32.mrb[137].mxu1 }
 0x30b   : > { %v11375_v0 = vpop.f32.mrb[138].mxu1  ;;  %v11378_v15 = vpop.f32.mrb[156].mxu0 }
 0x30c   : > { %13081 = vst [vmem:[#allocation147_spill] sm:$0xff] %v11375_v0  ;;  %13082 = vst [vmem:[#allocation148_spill] sm:$0xff] %v11378_v15  ;;  %v7711_v37 = vpop.f32.mrb[139].mxu1  ;;  %v7798_v31 = vpop.f32.mrb[157].mxu0  ;;  %v13140_v0 = vld [vmem:[#allocation58_spill] sm:$0xff] }
 0x30d   : > { %v11380_v18 = vpop.f32.mrb[158].mxu0 }
 0x30e   : > { %13083 = vst [vmem:[#allocation149_spill] sm:$0xff] %v11380_v18  ;;  %7933 = vmatmul.mubr.bf16.gmra.mrb[244].mxu1 %v3617_v44  ;;  %v7799_v10 = vpop.f32.mrb[159].mxu0 }
 0x30f   : > { %7936 = vmatprep.mubr.msk.bf16.mxu1 %vm12733_vm13, %v12735_v48  ;;  %v13089_v10 = vld [vmem:[#allocation83_spill] sm:$0xff] }
 0x310   : > { %8021 = vmatmul.mubr.bf16.gmra.mrb[8].mxu0 %v13084_v55 }
 0x311   : > { %v11385_v5 = vpop.f32.mrb[140].mxu1  ;;  %8024 = vmatprep.mubr.msk.bf16.mxu0 %vm12733_vm13, %v12735_v48 }
 0x312   : > { %13085 = vst [vmem:[#allocation82_spill] sm:$0xff] %v11385_v5  ;;  %v7714_v4 = vpop.f32.mrb[141].mxu1  ;;  %v13122_v5 = vld [vmem:[#allocation47_spill] sm:$0xff] }
 0x313   : > { %v11389_v19 = vpop.f32.mrb[142].mxu1  ;;  %v11391_v15 = vpop.f32.mrb[160].mxu0 }
 0x314   : > { %13086 = vst [vmem:[#allocation150_spill] sm:$0xff] %v11389_v19  ;;  %13087 = vst [vmem:[#allocation151_spill] sm:$0xff] %v11391_v15  ;;  %v7715_v37 = vpop.f32.mrb[143].mxu1  ;;  %v7802_v31 = vpop.f32.mrb[161].mxu0  ;;  %v13094_v15 = vld [vmem:[#allocation84_spill] sm:$0xff] }
 0x315   : > { %v11393_v18 = vpop.f32.mrb[162].mxu0  ;;  %v8766_v37 = vld [vmem:[%s12581_s3 + $0x180] sm:$0xff]  }
 0x316   : > { %13088 = vst [vmem:[#allocation152_spill] sm:$0xff] %v11393_v18  ;;  %7937 = vmatmul.mubr.bf16.gmra.mrb[248].mxu1 %v3616_v16  ;;  %v7803_v44 = vpop.f32.mrb[163].mxu0 }
 0x317   : > { %8056 = vmatprep.mubr.msk.bf16.mxu1 %vm12733_vm13, %v12735_v48 }
 0x318   : > { %8025 = vmatmul.mubr.bf16.gmra.mrb[12].mxu0 %v13089_v10 }
 0x319   : > { %v11398_v55 = vpop.f32.mrb[144].mxu1  ;;  %8028 = vmatprep.mubr.msk.bf16.mxu0 %vm12733_vm13, %v12735_v48 }
 0x31a   : > { %13090 = vst [vmem:[#allocation83_spill] sm:$0xff] %v11398_v55  ;;  %v7718_v4 = vpop.f32.mrb[145].mxu1  ;;  %v13117_v55 = vld [vmem:[#allocation45_spill] sm:$0xff] }
 0x31b   : > { %v11402_v20 = vpop.f32.mrb[146].mxu1  ;;  %v11407_v31 = vpop.f32.mrb[164].mxu0  ;;  %v8772_v4 = vld [vmem:[%s12581_s3 + $0x188] sm:$0xff]  }
 0x31c   : > { %13091 = vst [vmem:[#allocation153_spill] sm:$0xff] %v11402_v20  ;;  %13092 = vst [vmem:[#allocation154_spill] sm:$0xff] %v11407_v31  ;;  %v7719_v16 = vpop.f32.mrb[147].mxu1  ;;  %v7806_v44 = vpop.f32.mrb[165].mxu0 }
 0x31d   : > { %v11409_v18 = vpop.f32.mrb[166].mxu0 }
 0x31e   : > { %13093 = vst [vmem:[#allocation155_spill] sm:$0xff] %v11409_v18  ;;  %8057 = vmatmul.mubr.bf16.vlgmr.msra.gmra.mrb[252].mxu1 %v11187_v1  ;;  %v7807_v10 = vpop.f32.mrb[167].mxu0 }
 0x31f   : > { %8241 = vmatpush3.bf16.msra.mxu1 %v8766_v37  ;;  %8060 = vmatprep.mubr.msk.bf16.mxu1 %vm12733_vm13, %v12735_v48  ;;  %v8773_v37 = vld [vmem:[%s12581_s3 + $0x190] sm:$0xff]  }
 0x320   : > { %8242 = vmatprep.subr.bf16.mxu1 %v12735_v48  ;;  %8029 = vmatmul.mubr.bf16.gmra.mrb[16].mxu0 %v13094_v15 }
 0x321   : > { %v11419_v31 = vpop.f32.mrb[148].mxu1  ;;  %8032 = vmatprep.mubr.msk.bf16.mxu0 %vm12733_vm13, %v12735_v48 }
 0x322   : > { %13095 = vst [vmem:[#allocation84_spill] sm:$0xff] %v11419_v31  ;;  %v7722_v16 = vpop.f32.mrb[149].mxu1 }
 0x323   : > { %v11423_v1 = vpop.f32.mrb[150].mxu1  ;;  %8243 = vmatpush3.bf16.msra.mxu1 %v8772_v4  ;;  %v11428_v44 = vpop.f32.mrb[168].mxu0  ;;  %v8774_v4 = vld [vmem:[%s12581_s3 + $0x198] sm:$0xff]  }
 0x324   : > { %13096 = vst [vmem:[#allocation156_spill] sm:$0xff] %v11423_v1  ;;  %13097 = vst [vmem:[#allocation157_spill] sm:$0xff] %v11428_v44  ;;  %v7723_v10 = vpop.f32.mrb[151].mxu1  ;;  %8244 = vmatprep.subr.bf16.mxu1 %v12735_v48  ;;  %v7810_v18 = vpop.f32.mrb[169].mxu0  ;;  %v13100_v44 = vld [vmem:[#allocation85_spill] sm:$0xff] }
 0x325   : > { %v11431_v15 = vpop.f32.mrb[170].mxu0 }
 0x326   : > { %13098 = vst [vmem:[#allocation158_spill] sm:$0xff] %v11431_v15  ;;  %8061 = vmatmul.mubr.bf16.gmra.mrb[0].mxu1 %v13099_v33  ;;  %v7811_v16 = vpop.f32.mrb[171].mxu0 }
 0x327   : > { %8064 = vmatprep.mubr.msk.bf16.mxu1 %vm12733_vm13, %v12735_v48  ;;  %8245 = vmatpush3.bf16.msra.mxu1 %v8773_v37  ;;  %v8775_v37 = vld [vmem:[%s12581_s3 + $0x1a0] sm:$0xff]  }
 0x328   : > { %8246 = vmatprep.subr.bf16.mxu1 %v12735_v48  ;;  %8033 = vmatmul.mubr.bf16.gmra.mrb[20].mxu0 %v13100_v44 }
 0x329   : > { %v11441_v10 = vpop.f32.mrb[152].mxu1  ;;  %8036 = vmatprep.mubr.msk.bf16.mxu0 %vm12733_vm13, %v12735_v48 }
 0x32a   : > { %13101 = vst [vmem:[#allocation86_spill] sm:$0xff] %v11441_v10  ;;  %v7726_v18 = vpop.f32.mrb[153].mxu1  ;;  %v13105_v10 = vld [vmem:[#allocation87_spill] sm:$0xff] }
 0x32b   : > { %v11445_v33 = vpop.f32.mrb[154].mxu1  ;;  %8247 = vmatpush3.bf16.msra.mxu1 %v8774_v4  ;;  %v11450_v16 = vpop.f32.mrb[172].mxu0  ;;  %v8776_v4 = vld [vmem:[%s12581_s3 + $0x1a8] sm:$0xff]  }
 0x32c   : > { %13102 = vst [vmem:[#allocation85_spill] sm:$0xff] %v11445_v33  ;;  %13103 = vst [vmem:[#allocation159_spill] sm:$0xff] %v11450_v16  ;;  %v7727_v15 = vpop.f32.mrb[155].mxu1  ;;  %8248 = vmatprep.subr.bf16.mxu1 %v12735_v48  ;;  %v7814_v1 = vpop.f32.mrb[173].mxu0  ;;  %v13106_v16 = vld [vmem:[#allocation70_spill] sm:$0xff] }
 0x32d   : > { %v11453_v44 = vpop.f32.mrb[174].mxu0 }
 0x32e   : > { %13104 = vst [vmem:[#allocation160_spill] sm:$0xff] %v11453_v44  ;;  %8065 = vmatmul.mubr.bf16.gmra.mrb[4].mxu1 %v13105_v10  ;;  %v7815_v18 = vpop.f32.mrb[175].mxu0 }
 0x32f   : > { %8068 = vmatprep.mubr.msk.bf16.mxu1 %vm12733_vm13, %v12735_v48  ;;  %8249 = vmatpush3.bf16.msra.mxu1 %v8775_v37  ;;  %v8777_v37 = vld [vmem:[%s12581_s3 + $0x1b0] sm:$0xff]  }
 0x330   : > { %8250 = vmatprep.subr.bf16.mxu1 %v12735_v48  ;;  %8037 = vmatmul.mubr.bf16.gmra.mrb[24].mxu0 %v13106_v16 }
 0x331   : > { %v11463_v15 = vpop.f32.mrb[156].mxu1  ;;  %8156 = vmatprep.mubr.msk.bf16.mxu0 %vm12733_vm13, %v12735_v48 }
 0x332   : > { %13107 = vst [vmem:[#allocation87_spill] sm:$0xff] %v11463_v15  ;;  %v7730_v1 = vpop.f32.mrb[157].mxu1  ;;  %v13111_v15 = vld [vmem:[#allocation44_spill] sm:$0xff] }
 0x333   : > { %v11467_v10 = vpop.f32.mrb[158].mxu1  ;;  %8251 = vmatpush3.bf16.msra.mxu1 %v8776_v4  ;;  %v11472_v18 = vpop.f32.mrb[176].mxu0  ;;  %v8778_v4 = vld [vmem:[%s12581_s3 + $0x1b8] sm:$0xff]  }
 0x334   : > { %13108 = vst [vmem:[#allocation70_spill] sm:$0xff] %v11467_v10  ;;  %13109 = vst [vmem:[#allocation161_spill] sm:$0xff] %v11472_v18  ;;  %v7731_v44 = vpop.f32.mrb[159].mxu1  ;;  %8252 = vmatprep.subr.bf16.mxu1 %v12735_v48  ;;  %v7818_v33 = vpop.f32.mrb[177].mxu0  ;;  %v13112_v18 = vld [vmem:[#allocation88_spill] sm:$0xff] }
 0x335   : > { %v11475_v16 = vpop.f32.mrb[178].mxu0 }
 0x336   : > { %13110 = vst [vmem:[#allocation162_spill] sm:$0xff] %v11475_v16  ;;  %8069 = vmatmul.mubr.bf16.gmra.mrb[8].mxu1 %v13111_v15  ;;  %v7819_v1 = vpop.f32.mrb[179].mxu0 }
 0x337   : > { %8072 = vmatprep.mubr.msk.bf16.mxu1 %vm12733_vm13, %v12735_v48  ;;  %8253 = vmatpush3.bf16.msra.mxu1 %v8777_v37  ;;  %v8802_v37 = vld [vmem:[#allocation2 + $0x1c] sm:$0xff]  }
 0x338   : > { %8254 = vmatprep.subr.bf16.mxu1 %v12735_v48  ;;  %8157 = vmatmul.mubr.bf16.vlgmr.msra.gmra.mrb[28].mxu0 %v13112_v18  ;;  %v4802_v16 = vrot.slane %v8802_v37, 1  ;;  %v8803_v37 = vld [vmem:[#allocation2 + $0x24] sm:$0xff]  }
 0x339   : > { %v11485_v44 = vpop.f32.mrb[160].mxu1  ;;  %8160 = vmatprep.mubr.msk.bf16.mxu0 %vm12733_vm13, %v12735_v48 }
 0x33a   : > { %13113 = vst [vmem:[#allocation44_spill] sm:$0xff] %v11485_v44  ;;  %v7734_v33 = vpop.f32.mrb[161].mxu1 }
 0x33b   : > { %v11489_v15 = vpop.f32.mrb[162].mxu1  ;;  %8255 = vmatpush3.bf16.msra.mxu1 %v8778_v4  ;;  %v11491_v1 = vpop.f32.mrb[180].mxu0  ;;  %v13118_v33 = vld [vmem:[#allocation43_spill] sm:$0xff] }
 0x33c   : > { %13114 = vst [vmem:[#allocation88_spill] sm:$0xff] %v11489_v15  ;;  %13115 = vst [vmem:[#allocation163_spill] sm:$0xff] %v11491_v1  ;;  %v7735_v10 = vpop.f32.mrb[163].mxu1  ;;  %v7822_v31 = vpop.f32.mrb[181].mxu0  ;;  %v13119_v44 = vrot.slane %v13118_v33, 1 }
 0x33d   : > { %v11493_v20 = vpop.f32.mrb[182].mxu0 }
 0x33e   : > { %13116 = vst [vmem:[#allocation164_spill] sm:$0xff] %v11493_v20  ;;  %8073 = vmatmul.mubr.bf16.gmra.mrb[12].mxu1 %v13117_v55  ;;  %v7823_v18 = vpop.f32.mrb[183].mxu0  ;;  %v4803_v19 = vsel %vm4798_vm9, %v13119_v44, %v4802_v16  ;;  %v4804_v20 = vrot.slane %v8803_v37, 1  ;;  %v8804_v37 = vld [vmem:[#allocation2 + $0x2c] sm:$0xff]  }
 0x33f   : > { %8076 = vmatprep.mubr.msk.bf16.mxu1 %vm12733_vm13, %v12735_v48 }
 0x340   : > { %8161 = vmatmul.mubr.bf16.gmra.mrb[32].mxu0 %v4803_v19  ;;  %v4805_v19 = vsel %vm4798_vm9, %v4802_v16, %v4804_v20 }
 0x341   : > { %v2773_v4 = vpop.f32.mrb[164].mxu1  ;;  %8164 = vmatprep.mubr.msk.bf16.mxu0 %vm12733_vm13, %v12735_v48 }
 0x342   : > { %v7738_v15 = vpop.f32.mrb[165].mxu1 }
 0x343   : > { %v2775_v10 = vpop.f32.mrb[166].mxu1  ;;  %v11503_v31 = vpop.f32.mrb[184].mxu0 }
 0x344   : > { %13120 = vst [vmem:[#allocation45_spill] sm:$0xff] %v11503_v31  ;;  %v7739_v55 = vpop.f32.mrb[167].mxu1  ;;  %v7826_v18 = vpop.f32.mrb[185].mxu0 }
 0x345   : > { %v11505_v1 = vpop.f32.mrb[186].mxu0  ;;  %v4806_v55 = vrot.slane %v8804_v37, 1 }
 0x346   : > { %13121 = vst [vmem:[#allocation43_spill] sm:$0xff] %v11505_v1  ;;  %8077 = vmatmul.mubr.bf16.gmra.mrb[16].mxu1 %v13122_v5  ;;  %v7827_v33 = vpop.f32.mrb[187].mxu0 }
 0x347   : > { %8080 = vmatprep.mubr.msk.bf16.mxu1 %vm12733_vm13, %v12735_v48  ;;  %v13125_v33 = vld [vmem:[#allocation46_spill] sm:$0xff]  ;;  %v4807_v16 = vsel %vm4798_vm9, %v4804_v20, %v4806_v55 }
 0x348   : > { %8165 = vmatmul.mubr.bf16.gmra.mrb[36].mxu0 %v4805_v19 }
 0x349   : > { %v3721_v44 = vpop.f32.mrb[168].mxu1  ;;  %8168 = vmatprep.mubr.msk.bf16.mxu0 %vm12733_vm13, %v12735_v48 }
 0x34a   : > { %v7858_v15 = vpop.f32.mrb[169].mxu1 }
 0x34b   : > { %v3723_v4 = vpop.f32.mrb[170].mxu1  ;;  %v11513_v10 = vpop.f32.mrb[188].mxu0 }
 0x34c   : > { %13123 = vst [vmem:[#allocation47_spill] sm:$0xff] %v11513_v10  ;;  %v7859_v18 = vpop.f32.mrb[171].mxu1  ;;  %v7830_v1 = vpop.f32.mrb[189].mxu0 }
 0x34d   : > { %v11515_v5 = vpop.f32.mrb[190].mxu0  ;;  %v8805_v1 = vld [vmem:[#allocation2 + $0x34] sm:$0xff]  }
 0x34e   : > { %13124 = vst [vmem:[#allocation165_spill] sm:$0xff] %v11515_v5  ;;  %8081 = vmatmul.mubr.bf16.gmra.mrb[20].mxu1 %v13125_v33  ;;  %v7831_v31 = vpop.f32.mrb[191].mxu0  ;;  %v4808_v4 = vrot.slane %v8805_v1, 1  ;;  %v13129_v33 = vld [vmem:[#allocation50_spill] sm:$0xff] }
 0x34f   : > { %8084 = vmatprep.mubr.msk.bf16.mxu1 %vm12733_vm13, %v12735_v48 }
 0x350   : > { %8169 = vmatmul.mubr.bf16.gmra.mrb[40].mxu0 %v4807_v16  ;;  %v4809_v16 = vsel %vm4798_vm9, %v4806_v55, %v4808_v4 }
 0x351   : > { %v11521_v19 = vpop.f32.mrb[172].mxu1  ;;  %8172 = vmatprep.mubr.msk.bf16.mxu0 %vm12733_vm13, %v12735_v48 }
 0x352   : > { %13126 = vst [vmem:[#allocation46_spill] sm:$0xff] %v11521_v19  ;;  %v7862_v44 = vpop.f32.mrb[173].mxu1 }
 0x353   : > { %v11525_v15 = vpop.f32.mrb[174].mxu1  ;;  %v11527_v18 = vpop.f32.mrb[192].mxu0 }
 0x354   : > { %13127 = vst [vmem:[#allocation166_spill] sm:$0xff] %v11525_v15  ;;  %v7863_v37 = vpop.f32.mrb[175].mxu1  ;;  %13128 = vst [vmem:[#allocation167_spill] sm:$0xff] %v11527_v18  ;;  %v7834_v31 = vpop.f32.mrb[193].mxu0 }
 0x355   : > { %v11530_v5 = vpop.f32.mrb[194].mxu0  ;;  %v8806_v37 = vld [vmem:[#allocation2 + $0x3c] sm:$0xff]  }
 0x356   : > { %8085 = vmatmul.mubr.bf16.gmra.mrb[24].mxu1 %v13129_v33  ;;  %13130 = vst [vmem:[#allocation50_spill] sm:$0xff] %v11530_v5  ;;  %v7835_v20 = vpop.f32.mrb[195].mxu0  ;;  %v4810_v31 = vrot.slane %v8806_v37, 1 }
 0x357   : > { %8088 = vmatprep.mubr.msk.bf16.mxu1 %vm12733_vm13, %v12735_v48  ;;  %v13133_v20 = vld [vmem:[#allocation55_spill] sm:$0xff] }
 0x358   : > { %8173 = vmatmul.mubr.bf16.gmra.mrb[44].mxu0 %v4809_v16  ;;  %v4811_v55 = vsel %vm4798_vm9, %v4808_v4, %v4810_v31 }
 0x359   : > { %v11535_v44 = vpop.f32.mrb[176].mxu1  ;;  %8176 = vmatprep.mubr.msk.bf16.mxu0 %vm12733_vm13, %v12735_v48 }
 0x35a   : > { %13131 = vst [vmem:[#allocation168_spill] sm:$0xff] %v11535_v44  ;;  %v7866_v10 = vpop.f32.mrb[177].mxu1 }
 0x35b   : > { %v11539_v1 = vpop.f32.mrb[178].mxu1  ;;  %v3260_v18 = vpop.f32.mrb[196].mxu0 }
 0x35c   : > { %13132 = vst [vmem:[#allocation169_spill] sm:$0xff] %v11539_v1  ;;  %v7867_v33 = vpop.f32.mrb[179].mxu1  ;;  %v7838_v5 = vpop.f32.mrb[197].mxu0  ;;  %v13136_v1 = vld [vmem:[#allocation52_spill] sm:$0xff] }
 0x35d   : > { %v3262_v15 = vpop.f32.mrb[198].mxu0  ;;  %v8807_v5 = vld [vmem:[#allocation2 + $0x44] sm:$0xff]  }
 0x35e   : > { %8089 = vmatmul.mubr.bf16.gmra.mrb[28].mxu1 %v13133_v20  ;;  %v7839_v19 = vpop.f32.mrb[199].mxu0  ;;  %v4812_v33 = vrot.slane %v8807_v5, 1 }
 0x35f   : > { %8092 = vmatprep.mubr.msk.bf16.mxu1 %vm12733_vm13, %v12735_v48 }
 0x360   : > { %8177 = vmatmul.mubr.bf16.gmra.mrb[48].mxu0 %v4811_v55  ;;  %v4813_v4 = vsel %vm4798_vm9, %v4810_v31, %v4812_v33  ;;  %v13141_v31 = vld [vmem:[#allocation32_spill] sm:$0xff] }
 0x361   : > { %v11545_v10 = vpop.f32.mrb[180].mxu1  ;;  %8180 = vmatprep.mubr.msk.bf16.mxu0 %vm12733_vm13, %v12735_v48 }
 0x362   : > { %13134 = vst [vmem:[#allocation55_spill] sm:$0xff] %v11545_v10  ;;  %v7870_v16 = vpop.f32.mrb[181].mxu1 }
 0x363   : > { %v11549_v37 = vpop.f32.mrb[182].mxu1  ;;  %v4199_v18 = vpop.f32.mrb[200].mxu0 }
 0x364   : > { %13135 = vst [vmem:[#allocation170_spill] sm:$0xff] %v11549_v37  ;;  %v7871_v20 = vpop.f32.mrb[183].mxu1  ;;  %v7958_v15 = vpop.f32.mrb[201].mxu0 }
 0x365   : > { %v4201_v19 = vpop.f32.mrb[202].mxu0  ;;  %v8808_v20 = vld [vmem:[#allocation2 + $0x4c] sm:$0xff]  }
 0x366   : > { %8093 = vmatmul.mubr.bf16.gmra.mrb[32].mxu1 %v13136_v1  ;;  %v7959_v44 = vpop.f32.mrb[203].mxu0  ;;  %v4814_v15 = vrot.slane %v8808_v20, 1  ;;  %v13139_v1 = vld [vmem:[#allocation31_spill] sm:$0xff] }
 0x367   : > { %8096 = vmatprep.mubr.msk.bf16.mxu1 %vm12733_vm13, %v12735_v48 }
 0x368   : > { %8181 = vmatmul.mubr.bf16.gmra.mrb[52].mxu0 %v4813_v4 }
 0x369   : > { %v11555_v55 = vpop.f32.mrb[184].mxu1  ;;  %8184 = vmatprep.mubr.msk.bf16.mxu0 %vm12733_vm13, %v12735_v48 }
 0x36a   : > { %13137 = vst [vmem:[#allocation52_spill] sm:$0xff] %v11555_v55  ;;  %v7874_v16 = vpop.f32.mrb[185].mxu1 }
 0x36b   : > { %v11559_v18 = vpop.f32.mrb[186].mxu1  ;;  %v4205_v5 = vpop.f32.mrb[204].mxu0 }
 0x36c   : > { %13138 = vst [vmem:[#allocation171_spill] sm:$0xff] %v11559_v18  ;;  %v7875_v19 = vpop.f32.mrb[187].mxu1  ;;  %v11562_v44 = vadd.f32 %v4205_v5, %v13139_v1  ;;  %v7962_v37 = vpop.f32.mrb[205].mxu0  ;;  %v4815_v18 = vsel %vm4798_vm9, %v4812_v33, %v4814_v15  ;;  %v13144_v1 = vld [vmem:[#allocation76_spill] sm:$0xff]  ;;  %v13146_v33 = vld [vmem:[#allocation78_spill] sm:$0xff] }
 0x36d   : > { %v4208_v10 = vpop.f32.mrb[206].mxu0 }
 0x36e   : > { %8097 = vmatmul.mubr.bf16.gmra.mrb[36].mxu1 %v13140_v0  ;;  %v11566_v4 = vadd.f32 %v4208_v10, %v13141_v31  ;;  %v7963_v16 = vpop.f32.mrb[207].mxu0  ;;  %v8809_v0 = vld [vmem:[#allocation2 + $0x54] sm:$0xff]  }
 0x36f   : > { %8100 = vmatprep.mubr.msk.bf16.mxu1 %vm12733_vm13, %v12735_v48  ;;  %v4816_v19 = vrot.slane %v8809_v0, 1 }
 0x370   : > { %8185 = vmatmul.mubr.bf16.gmra.mrb[56].mxu0 %v4815_v18 }
 0x371   : > { %v11571_v55 = vpop.f32.mrb[188].mxu1  ;;  %8188 = vmatprep.mubr.msk.bf16.mxu0 %vm12733_vm13, %v12735_v48 }
 0x372   : > { %13142 = vst [vmem:[#allocation31_spill] sm:$0xff] %v11571_v55  ;;  %v7878_v20 = vpop.f32.mrb[189].mxu1 }
 0x373   : > { %v11575_v37 = vpop.f32.mrb[190].mxu1  ;;  %v4213_v5 = vpop.f32.mrb[208].mxu0 }
 0x374   : > { %13143 = vst [vmem:[#allocation58_spill] sm:$0xff] %v11575_v37  ;;  %v7879_v10 = vpop.f32.mrb[191].mxu1  ;;  %v11578_v31 = vadd.f32 %v4213_v5, %v13144_v1  ;;  %v7966_v16 = vpop.f32.mrb[209].mxu0  ;;  %v4817_v37 = vsel %vm4798_vm9, %v4814_v15, %v4816_v19  ;;  %v13151_v15 = vld [vmem:[#allocation28_spill] sm:$0xff] }
 0x375   : > { %v4216_v25 = vpop.f32.mrb[210].mxu0  ;;  %v13149_v16 = vld [vmem:[#allocation51_spill] sm:$0xff] }
 0x376   : > { %8101 = vmatmul.mubr.bf16.gmra.mrb[40].mxu1 %v13145_v39  ;;  %v11582_v18 = vadd.f32 %v4216_v25, %v13146_v33  ;;  %v7967_v20 = vpop.f32.mrb[211].mxu0  ;;  %v8810_v39 = vld [vmem:[#allocation2 + $0x5c] sm:$0xff]  }
 0x377   : > { %8104 = vmatprep.mubr.msk.bf16.mxu1 %vm12733_vm13, %v12735_v48  ;;  %v4818_v1 = vrot.slane %v8810_v39, 1 }
 0x378   : > { %8189 = vmatmul.mubr.bf16.gmra.mrb[60].mxu0 %v4817_v37 }
 0x379   : > { %v11587_v55 = vpop.f32.mrb[192].mxu1  ;;  %8192 = vmatprep.mubr.msk.bf16.mxu0 %vm12733_vm13, %v12735_v48 }
 0x37a   : > { %13147 = vst [vmem:[#allocation32_spill] sm:$0xff] %v11587_v55  ;;  %v7882_v0 = vpop.f32.mrb[193].mxu1 }
 0x37b   : > { %v11591_v5 = vpop.f32.mrb[194].mxu1  ;;  %v4221_v10 = vpop.f32.mrb[212].mxu0 }
 0x37c   : > { %13148 = vst [vmem:[#allocation76_spill] sm:$0xff] %v11591_v5  ;;  %v7883_v25 = vpop.f32.mrb[195].mxu1  ;;  %v11594_v33 = vadd.f32 %v4221_v10, %v13149_v16  ;;  %v7970_v20 = vpop.f32.mrb[213].mxu0  ;;  %v4819_v5 = vsel %vm4798_vm9, %v4816_v19, %v4818_v1 }
 0x37d   : > { %v4224_v2 = vpop.f32.mrb[214].mxu0 }
 0x37e   : > { %8105 = vmatmul.mubr.bf16.gmra.mrb[44].mxu1 %v13150_v30  ;;  %v11598_v37 = vadd.f32 %v4224_v2, %v13151_v15  ;;  %v7971_v0 = vpop.f32.mrb[215].mxu0  ;;  %v8811_v30 = vld [vmem:[#allocation2 + $0x64] sm:$0xff]  }
 0x37f   : > { %8108 = vmatprep.mubr.msk.bf16.mxu1 %vm12733_vm13, %v12735_v48  ;;  %v4820_v16 = vrot.slane %v8811_v30, 1 }
 0x380   : > { %13152 = vst [vmem:[#allocation41_spill] sm:$0xff] %v11598_v37  ;;  %8193 = vmatmul.mubr.bf16.gmra.mrb[64].mxu0 %v4819_v5  ;;  %v13155_v37 = vld [vmem:[#allocation67_spill] sm:$0xff] }
 0x381   : > { %v11603_v55 = vpop.f32.mrb[196].mxu1  ;;  %8196 = vmatprep.mubr.msk.bf16.mxu0 %vm12733_vm13, %v12735_v48 }
 0x382   : > { %13153 = vst [vmem:[#allocation78_spill] sm:$0xff] %v11603_v55  ;;  %v7886_v39 = vpop.f32.mrb[197].mxu1  ;;  %v13158_v55 = vld [vmem:[#allocation38_spill] sm:$0xff] }
 0x383   : > { %v11607_v10 = vpop.f32.mrb[198].mxu1  ;;  %v4229_v25 = vpop.f32.mrb[216].mxu0  ;;  %v4821_v39 = vsel %vm4798_vm9, %v4818_v1, %v4820_v16 }
 0x384   : > { %13154 = vst [vmem:[#allocation51_spill] sm:$0xff] %v11607_v10  ;;  %v7887_v2 = vpop.f32.mrb[199].mxu1  ;;  %v11610_v20 = vadd.f32 %v4229_v25, %v10789_v14  ;;  %v7974_v15 = vpop.f32.mrb[217].mxu0 }
 0x385   : > { %v4232_v0 = vpop.f32.mrb[218].mxu0 }
 0x386   : > { %8109 = vmatmul.mubr.bf16.gmra.mrb[48].mxu1 %v13155_v37  ;;  %v11614_v19 = vadd.f32 %v4232_v0, %v10807_v63  ;;  %v7975_v5 = vpop.f32.mrb[219].mxu0  ;;  %v8812_v37 = vld [vmem:[#allocation2 + $0x6c] sm:$0xff]  }
 0x387   : > { %8112 = vmatprep.mubr.msk.bf16.mxu1 %vm12733_vm13, %v12735_v48  ;;  %v4822_v2 = vrot.slane %v8812_v37, 1 }
 0x388   : > { %8197 = vmatmul.mubr.bf16.gmra.mrb[68].mxu0 %v4821_v39 }
 0x389   : > { %v11619_v10 = vpop.f32.mrb[200].mxu1  ;;  %8200 = vmatprep.mubr.msk.bf16.mxu0 %vm12733_vm13, %v12735_v48 }
 0x38a   : > { %13156 = vst [vmem:[#allocation42_spill] sm:$0xff] %v11619_v10  ;;  %v7890_v30 = vpop.f32.mrb[201].mxu1  ;;  %v13161_v10 = vld [vmem:[#allocation68_spill] sm:$0xff] }
 0x38b   : > { %v11623_v14 = vpop.f32.mrb[202].mxu1  ;;  %v4237_v25 = vpop.f32.mrb[220].mxu0  ;;  %v4823_v30 = vsel %vm4798_vm9, %v4820_v16, %v4822_v2 }
 0x38c   : > { %13157 = vst [vmem:[#allocation28_spill] sm:$0xff] %v11623_v14  ;;  %v7891_v63 = vpop.f32.mrb[203].mxu1  ;;  %v11626_v15 = vadd.f32 %v4237_v25, %v10876_v53  ;;  %v7978_v0 = vpop.f32.mrb[221].mxu0 }
 0x38d   : > { %v4240_v5 = vpop.f32.mrb[222].mxu0 }
 0x38e   : > { %8113 = vmatmul.mubr.bf16.gmra.mrb[52].mxu1 %v13158_v55  ;;  %v11630_v1 = vadd.f32 %v4240_v5, %v10885_v29  ;;  %v7979_v39 = vpop.f32.mrb[223].mxu0  ;;  %v8813_v55 = vld [vmem:[#allocation2 + $0x74] sm:$0xff]  }
 0x38f   : > { %8116 = vmatprep.mubr.msk.bf16.mxu1 %vm12733_vm13, %v12735_v48  ;;  %v4824_v63 = vrot.slane %v8813_v55, 1 }
 0x390   : > { %8201 = vmatmul.mubr.bf16.gmra.mrb[72].mxu0 %v4823_v30 }
 0x391   : > { %v11635_v14 = vpop.f32.mrb[204].mxu1  ;;  %8204 = vmatprep.mubr.msk.bf16.mxu0 %vm12733_vm13, %v12735_v48 }
 0x392   : > { %13159 = vst [vmem:[#allocation67_spill] sm:$0xff] %v11635_v14  ;;  %v7894_v37 = vpop.f32.mrb[205].mxu1  ;;  %v13164_v14 = vld [vmem:[#allocation25_spill] sm:$0xff] }
 0x393   : > { %v11639_v53 = vpop.f32.mrb[206].mxu1  ;;  %v4245_v25 = vpop.f32.mrb[224].mxu0  ;;  %v4825_v37 = vsel %vm4798_vm9, %v4822_v2, %v4824_v63 }
 0x394   : > { %13160 = vst [vmem:[#allocation38_spill] sm:$0xff] %v11639_v53  ;;  %v7895_v29 = vpop.f32.mrb[207].mxu1  ;;  %v11642_v0 = vadd.f32 %v4245_v25, %v10917_v6  ;;  %v7982_v5 = vpop.f32.mrb[225].mxu0 }
 0x395   : > { %v4248_v39 = vpop.f32.mrb[226].mxu0 }
 0x396   : > { %8117 = vmatmul.mubr.bf16.gmra.mrb[56].mxu1 %v13161_v10  ;;  %v11646_v16 = vadd.f32 %v4248_v39, %v10921_v62  ;;  %v7983_v30 = vpop.f32.mrb[227].mxu0  ;;  %v8814_v10 = vld [vmem:[#allocation2 + $0x7c] sm:$0xff]  }
 0x397   : > { %8120 = vmatprep.mubr.msk.bf16.mxu1 %vm12733_vm13, %v12735_v48  ;;  %v4826_v29 = vrot.slane %v8814_v10, 1 }
 0x398   : > { %8205 = vmatmul.mubr.bf16.gmra.mrb[76].mxu0 %v4825_v37 }
 0x399   : > { %v11651_v53 = vpop.f32.mrb[208].mxu1  ;;  %8208 = vmatprep.mubr.msk.bf16.mxu0 %vm12733_vm13, %v12735_v48 }
 0x39a   : > { %13162 = vst [vmem:[#allocation68_spill] sm:$0xff] %v11651_v53  ;;  %v7898_v55 = vpop.f32.mrb[209].mxu1  ;;  %v13167_v53 = vld [vmem:[#allocation34_spill] sm:$0xff] }
 0x39b   : > { %v11655_v6 = vpop.f32.mrb[210].mxu1  ;;  %v4253_v25 = vpop.f32.mrb[228].mxu0  ;;  %v4827_v55 = vsel %vm4798_vm9, %v4824_v63, %v4826_v29 }
 0x39c   : > { %13163 = vst [vmem:[#allocation172_spill] sm:$0xff] %v11655_v6  ;;  %v7899_v62 = vpop.f32.mrb[211].mxu1  ;;  %v11658_v5 = vadd.f32 %v4253_v25, %v10932_v27  ;;  %v7986_v39 = vpop.f32.mrb[229].mxu0 }
 0x39d   : > { %v4256_v30 = vpop.f32.mrb[230].mxu0 }
 0x39e   : > { %8121 = vmatmul.mubr.bf16.gmra.mrb[60].mxu1 %v13164_v14  ;;  %v11662_v2 = vadd.f32 %v4256_v30, %v10936_v56  ;;  %v7987_v37 = vpop.f32.mrb[231].mxu0  ;;  %v8815_v14 = vld [vmem:[#allocation2 + $0x84] sm:$0xff]  }
 0x39f   : > { %8124 = vmatprep.mubr.msk.bf16.mxu1 %vm12733_vm13, %v12735_v48  ;;  %v4828_v62 = vrot.slane %v8815_v14, 1  ;;  %v8779_v14 = vld [vmem:[#allocation2 + $0xa4] ss:$0 sps:$4 sm:$0x77]  }
 0x3a0   : > { %8209 = vmatmul.mubr.bf16.gmra.mrb[80].mxu0 %v4827_v55 }
 0x3a1   : > { %v11667_v6 = vpop.f32.mrb[212].mxu1  ;;  %8212 = vmatprep.mubr.msk.bf16.mxu0 %vm12733_vm13, %v12735_v48 }
 0x3a2   : > { %13165 = vst [vmem:[#allocation25_spill] sm:$0xff] %v11667_v6  ;;  %v7902_v10 = vpop.f32.mrb[213].mxu1 }
 0x3a3   : > { %v11671_v27 = vpop.f32.mrb[214].mxu1  ;;  %v4261_v25 = vpop.f32.mrb[232].mxu0  ;;  %v4829_v10 = vsel %vm4798_vm9, %v4826_v29, %v4828_v62 }
 0x3a4   : > { %13166 = vst [vmem:[#allocation173_spill] sm:$0xff] %v11671_v27  ;;  %v7903_v56 = vpop.f32.mrb[215].mxu1  ;;  %v11674_v39 = vadd.f32 %v4261_v25, %v10947_v41  ;;  %v7990_v30 = vpop.f32.mrb[233].mxu0  ;;  %v8816_v25 = vld [vmem:[#allocation2 + $0x8c] sm:$0xff]  }
 0x3a5   : > { %v4264_v37 = vpop.f32.mrb[234].mxu0 }
 0x3a6   : > { %8125 = vmatmul.mubr.bf16.gmra.mrb[64].mxu1 %v13167_v53  ;;  %v11678_v63 = vadd.f32 %v4264_v37, %v10951_v26  ;;  %v7991_v55 = vpop.f32.mrb[235].mxu0  ;;  %v4830_v26 = vrot.slane %v8816_v25, 1  ;;  %v13171_v37 = vld [vmem:[#allocation48_spill] sm:$0xff] }
 0x3a7   : > { %8128 = vmatprep.mubr.msk.bf16.mxu1 %vm12733_vm13, %v12735_v48  ;;  %v4521_v55 = vshrl.u32 %v13171_v37, 16 }
 0x3a8   : > { %13168 = vst [vmem:[#allocation34_spill] sm:$0xff] %v11678_v63  ;;  %8213 = vmatmul.mubr.bf16.gmra.mrb[84].mxu0 %v4829_v10  ;;  %v4525_v10 = vshll.u32 %v8779_v14, 16  ;;  %v4831_v25 = vsel %vm4798_vm9, %v4828_v62, %v4830_v26 }
 0x3a9   : > { %v11683_v27 = vpop.f32.mrb[216].mxu1  ;;  %8216 = vmatprep.mubr.msk.bf16.mxu0 %vm12733_vm13, %v12735_v48 }
 0x3aa   : > { %13169 = vst [vmem:[#allocation174_spill] sm:$0xff] %v11683_v27  ;;  %v7906_v56 = vpop.f32.mrb[217].mxu1 }
 0x3ab   : > { %v11687_v41 = vpop.f32.mrb[218].mxu1  ;;  %v4269_v53 = vpop.f32.mrb[236].mxu0 }
 0x3ac   : > { %13170 = vst [vmem:[#allocation175_spill] sm:$0xff] %v11687_v41  ;;  %v7907_v30 = vpop.f32.mrb[219].mxu1  ;;  %v11691_v6 = vadd.f32 %v4269_v53, %v10962_v22  ;;  %v7994_v29 = vpop.f32.mrb[237].mxu0  ;;  %v4527_v22 = vrot.slane %v4525_v10, 1 }
 0x3ad   : > { %v4272_v63 = vpop.f32.mrb[238].mxu0  ;;  %v13173_v30 = vld [vmem:[#allocation36_spill] sm:$0xff] }
 0x3ae   : > { %8129 = vmatmul.mubr.bf16.gmra.mrb[68].mxu1 %v10786_v49  ;;  %v11695_v56 = vadd.f32 %v4272_v63, %v10966_v59  ;;  %v7995_v27 = vpop.f32.mrb[239].mxu0  ;;  %v4523_v41 = vor.u32 %v4521_v55, %v13173_v30  ;;  %v8817_v63 = vld [vmem:[#allocation2 + $0x94] sm:$0xff]  }
 0x3af   : > { %8132 = vmatprep.mubr.msk.bf16.mxu1 %vm12733_vm13, %v12735_v48  ;;  %v4832_v27 = vrot.slane %v8817_v63, 1 }
 0x3b0   : > { %13172 = vst [vmem:[#allocation48_spill] sm:$0xff] %v11695_v56  ;;  %8217 = vmatmul.mubr.bf16.gmra.mrb[88].mxu0 %v4831_v25  ;;  %v4528_v55 = vsel %vm1942_vm3, %v4523_v41, %v4527_v22 }
 0x3b1   : > { %v11701_v37 = vpop.f32.mrb[220].mxu1  ;;  %8220 = vmatprep.mubr.msk.bf16.mxu0 %vm12733_vm13, %v12735_v48 }
 0x3b2   : > { %13174 = vst [vmem:[#allocation36_spill] sm:$0xff] %v11701_v37  ;;  %v7910_v53 = vpop.f32.mrb[221].mxu1  ;;  %v13227_v37 = vld [vmem:[#allocation91_spill] sm:$0xff] }
 0x3b3   : > { %v11705_v49 = vpop.f32.mrb[222].mxu1  ;;  %v4277_v59 = vpop.f32.mrb[240].mxu0  ;;  %v4833_v53 = vsel %vm4798_vm9, %v4830_v26, %v4832_v27 }
 0x3b4   : > { %13175 = vst [vmem:[#allocation176_spill] sm:$0xff] %v11705_v49  ;;  %v7911_v29 = vpop.f32.mrb[223].mxu1  ;;  %v11708_v56 = vadd.f32 %v4277_v59, %v10977_v36  ;;  %v7998_v62 = vpop.f32.mrb[241].mxu0  ;;  %v4529_v49 = vshrl.u32 %v8779_v14, 16 }
 0x3b5   : > { %v4280_v25 = vpop.f32.mrb[242].mxu0 }
 0x3b6   : > { %8133 = vmatmul.mubr.bf16.gmra.mrb[72].mxu1 %v4528_v55  ;;  %v11712_v10 = vadd.f32 %v4280_v25, %v10981_v28  ;;  %v7999_v30 = vpop.f32.mrb[243].mxu0  ;;  %v4531_v29 = vor.u32 %v4529_v49, %v4527_v22  ;;  %v8818_v28 = vld [vmem:[#allocation2 + $0x9c] sm:$0xff]  }
 0x3b7   : > { %8136 = vmatprep.mubr.msk.bf16.mxu1 %vm12733_vm13, %v12735_v48  ;;  %v4834_v62 = vrot.slane %v8818_v28, 1 }
 0x3b8   : > { %8221 = vmatmul.mubr.bf16.gmra.mrb[92].mxu0 %v4833_v53 }
 0x3b9   : > { %v11717_v63 = vpop.f32.mrb[224].mxu1  ;;  %8224 = vmatprep.mubr.msk.bf16.mxu0 %vm12733_vm13, %v12735_v48 }
 0x3ba   : > { %13176 = vst [vmem:[#allocation177_spill] sm:$0xff] %v11717_v63  ;;  %v7914_v36 = vpop.f32.mrb[225].mxu1 }
 0x3bb   : > { %v11721_v41 = vpop.f32.mrb[226].mxu1  ;;  %v4285_v59 = vpop.f32.mrb[244].mxu0  ;;  %v4835_v36 = vsel %vm4798_vm9, %v4832_v27, %v4834_v62 }
 0x3bc   : > { %13177 = vst [vmem:[#allocation178_spill] sm:$0xff] %v11721_v41  ;;  %v7915_v55 = vpop.f32.mrb[227].mxu1  ;;  %v11724_v25 = vadd.f32 %v4285_v59, %v10992_v3  ;;  %v8002_v30 = vpop.f32.mrb[245].mxu0 }
 0x3bd   : > { %v4288_v26 = vpop.f32.mrb[246].mxu0  ;;  %v13180_v30 = vld [vmem:[#allocation53_spill] sm:$0xff] }
 0x3be   : > { %8137 = vmatmul.mubr.bf16.gmra.mrb[76].mxu1 %v4531_v29  ;;  %v11727_v14 = vadd.f32 %v4288_v26, %v10996_v50  ;;  %v8003_v53 = vpop.f32.mrb[247].mxu0 }
 0x3bf   : > { %8256 = vmatprep.mubr.msk.bf16.mxu1 %vm12733_vm13, %v12735_v48  ;;  %v13181_v53 = vrot.slane %v12950_v34, 1 }
 0x3c0   : > { %8225 = vmatmul.mubr.bf16.gmra.mrb[96].mxu0 %v4835_v36 }
 0x3c1   : > { %v11732_v22 = vpop.f32.mrb[228].mxu1  ;;  %8228 = vmatprep.mubr.msk.bf16.mxu0 %vm12733_vm13, %v12735_v48  ;;  %v4837_v36 = vsel %vm4798_vm9, %v4834_v62, %v13181_v53 }
 0x3c2   : > { %13178 = vst [vmem:[#allocation179_spill] sm:$0xff] %v11732_v22  ;;  %v7918_v49 = vpop.f32.mrb[229].mxu1  ;;  %v13219_v22 = vld [vmem:[#allocation90_spill] sm:$0xff] }
 0x3c3   : > { %v11736_v3 = vpop.f32.mrb[230].mxu1  ;;  %v4293_v59 = vpop.f32.mrb[248].mxu0 }
 0x3c4   : > { %13179 = vst [vmem:[#allocation180_spill] sm:$0xff] %v11736_v3  ;;  %v7919_v29 = vpop.f32.mrb[231].mxu1  ;;  %v11739_v50 = vadd.f32 %v4293_v59, %v11007_v61  ;;  %v8006_v28 = vpop.f32.mrb[249].mxu0 }
 0x3c5   : > { %v4296_v55 = vpop.f32.mrb[250].mxu0 }
 0x3c6   : > { %8257 = vmatmul.mubr.bf16.vlgmr.msra.gmra.mrb[80].mxu1 %v13180_v30  ;;  %v11743_v27 = vadd.f32 %v4296_v55, %v11011_v23  ;;  %v8007_v26 = vpop.f32.mrb[251].mxu0 }
 0x3c7   : > { %8260 = vmatprep.mubr.msk.bf16.mxu1 %vm12733_vm13, %v12735_v48 }
 0x3c8   : > { %8229 = vmatmul.mubr.bf16.gmra.mrb[100].mxu0 %v4837_v36 }
 0x3c9   : > { %v11750_v49 = vpop.f32.mrb[232].mxu1  ;;  %8232 = vmatprep.mubr.msk.bf16.mxu0 %vm12733_vm13, %v12735_v48 }
 0x3ca   : > { %13182 = vst [vmem:[#allocation53_spill] sm:$0xff] %v11750_v49  ;;  %v7922_v61 = vpop.f32.mrb[233].mxu1 }
 0x3cb   : > { %v11754_v59 = vpop.f32.mrb[234].mxu1  ;;  %v4301_v29 = vpop.f32.mrb[252].mxu0 }
 0x3cc   : > { %13183 = vst [vmem:[#allocation181_spill] sm:$0xff] %v11754_v59  ;;  %v7923_v23 = vpop.f32.mrb[235].mxu1  ;;  %v11757_v28 = vadd.f32 %v4301_v29, %v11022_v54  ;;  %v8010_v55 = vpop.f32.mrb[253].mxu0 }
 0x3cd   : > { %v4304_v30 = vpop.f32.mrb[254].mxu0 }
 0x3ce   : > { %8261 = vmatmul.mubr.bf16.gmra.mrb[84].mxu1 %v10820_v42  ;;  %v11761_v34 = vadd.f32 %v4304_v30, %v11026_v51  ;;  %v8011_v62 = vpop.f32.mrb[255].mxu0  ;;  %v13187_v30 = vrot.slane %v12955_v60, 1 }
 0x3cf   : > { %8264 = vmatprep.mubr.msk.bf16.mxu1 %vm12733_vm13, %v12735_v48 }
 0x3d0   : > { %8233 = vmatmul.mubr.bf16.gmra.mrb[104].mxu0 %v10814_v58 }
 0x3d1   : > { %v11766_v26 = vpop.f32.mrb[236].mxu1  ;;  %8236 = vmatprep.mubr.msk.bf16.mxu0 %vm12733_vm13, %v12735_v48 }
 0x3d2   : > { %13184 = vst [vmem:[#allocation182_spill] sm:$0xff] %v11766_v26  ;;  %v7926_v53 = vpop.f32.mrb[237].mxu1 }
 0x3d3   : > { %v11770_v54 = vpop.f32.mrb[238].mxu1  ;;  %v4309_v36 = vpop.f32.mrb[0].mxu0 }
 0x3d4   : > { %13185 = vst [vmem:[#allocation183_spill] sm:$0xff] %v11770_v54  ;;  %v7927_v61 = vpop.f32.mrb[239].mxu1  ;;  %v11773_v42 = vadd.f32 %v4309_v36, %v11038_v52  ;;  %v8014_v51 = vpop.f32.mrb[1].mxu0 }
 0x3d5   : > { %v4312_v29 = vpop.f32.mrb[2].mxu0  ;;  %v8819_v61 = vld [vmem:[#allocation2 + $0xb4] ss:$0 sps:$4 sm:$0xff]  }
 0x3d6   : > { %8265 = vmatmul.mubr.bf16.gmra.mrb[88].mxu1 %v10823_v47  ;;  %v11777_v23 = vadd.f32 %v4312_v29, %v11042_v7  ;;  %v8015_v58 = vpop.f32.mrb[3].mxu0  ;;  %v5289_v51 = vshrl.u32 %v8819_v61, 16  ;;  %v5292_v47 = vshll.u32 %v8819_v61, 16 }
 0x3d7   : > { %8268 = vmatprep.mubr.msk.bf16.mxu1 %vm12733_vm13, %v12735_v48 }
 0x3d8   : > { %8237 = vmatmul.mubr.bf16.gmra.mrb[108].mxu0 %v13187_v30  ;;  %v8780_v30 = vld [vmem:[%s12583_s5] sm:$0xff]  }
 0x3d9   : > { %v11781_v55 = vpop.f32.mrb[240].mxu1  ;;  %8340 = vmatprep.subr.bf16.mxu0 %v8780_v30  ;;  %8436 = vmatprep.subr.bf16.mxu1 %v8780_v30 }
 0x3da   : > { %13186 = vst [vmem:[#allocation184_spill] sm:$0xff] %v11781_v55  ;;  %v7930_v62 = vpop.f32.mrb[241].mxu1  ;;  %8341 = vmatpush3.bf16.msra.mxu0 %v8780_v30  ;;  %8444 = vmatpush3.bf16.msra.mxu1 %v8780_v30 }
 0x3db   : > { %v11785_v53 = vpop.f32.mrb[242].mxu1  ;;  %v4317_v52 = vpop.f32.mrb[4].mxu0  ;;  %v5291_v62 = vrot.slane %v5289_v51, 1 }
 0x3dc   : > { %13188 = vst [vmem:[#allocation185_spill] sm:$0xff] %v11785_v53  ;;  %v7931_v36 = vpop.f32.mrb[243].mxu1  ;;  %v11788_v7 = vadd.f32 %v4317_v52, %v11052_v24  ;;  %v8018_v29 = vpop.f32.mrb[5].mxu0 }
 0x3dd   : > { %v4320_v58 = vpop.f32.mrb[6].mxu0  ;;  %v5294_v36 = vrot.slane %v5292_v47, 2 }
 0x3de   : > { %8269 = vmatmul.mubr.bf16.gmra.mrb[92].mxu1 %v10826_v21  ;;  %v11792_v55 = vadd.f32 %v4320_v58, %v11056_v38  ;;  %v8019_v60 = vpop.f32.mrb[7].mxu0 }
 0x3df   : > { %8272 = vmatprep.mubr.msk.bf16.mxu1 %vm12733_vm13, %v12735_v48  ;;  %v11806_v60 = vor.u32 %v5294_v36, %v5291_v62 }
 0x3e1   : > { %v11799_v61 = vpop.f32.mrb[244].mxu1  ;;  %v11817_v30 = vsel %vm2418_vm6, %v10883_v43, %v11806_v60  ;;  %v8781_v43 = vld [vmem:[%s12583_s5 + $0x8] sm:$0xff]  }
 0x3e2   : > { %13189 = vst [vmem:[#allocation186_spill] sm:$0xff] %v11799_v61  ;;  %v7934_v24 = vpop.f32.mrb[245].mxu1  ;;  %8342 = vmatprep.subr.bf16.mxu0 %v8781_v43  ;;  %8437 = vmatprep.subr.bf16.mxu1 %v8781_v43 }
 0x3e3   : > { %v11801_v21 = vpop.f32.mrb[246].mxu1  ;;  %v4325_v38 = vpop.f32.mrb[8].mxu0  ;;  %8343 = vmatpush3.bf16.msra.mxu0 %v8781_v43  ;;  %8445 = vmatpush3.bf16.msra.mxu1 %v8781_v43 }
 0x3e4   : > { %13190 = vst [vmem:[#allocation187_spill] sm:$0xff] %v11801_v21  ;;  %v7935_v52 = vpop.f32.mrb[247].mxu1  ;;  %v11804_v29 = vadd.f32 %v4325_v38, %v11074_v32  ;;  %v8022_v58 = vpop.f32.mrb[9].mxu0  ;;  %v13199_v21 = vld [vmem:[#allocation75_spill] sm:$0xff] }
 0x3e5   : > { %v4328_v53 = vpop.f32.mrb[10].mxu0 }
 0x3e6   : > { %8273 = vmatmul.mubr.bf16.gmra.mrb[96].mxu1 %v10842_v12  ;;  %v11810_v51 = vadd.f32 %v4328_v53, %v11078_v17  ;;  %v8023_v47 = vpop.f32.mrb[11].mxu0 }
 0x3e7   : > { %8276 = vmatprep.mubr.msk.bf16.mxu1 %vm12733_vm13, %v12735_v48 }
 0x3e9   : > { %v3879_v32 = vpop.f32.mrb[248].mxu1 }
 0x3ea   : > { %v7938_v24 = vpop.f32.mrb[249].mxu1 }
 0x3eb   : > { %v3881_v38 = vpop.f32.mrb[250].mxu1  ;;  %v4333_v62 = vpop.f32.mrb[12].mxu0 }
 0x3ec   : > { %v7939_v36 = vpop.f32.mrb[251].mxu1  ;;  %v11820_v52 = vadd.f32 %v4333_v62, %v11096_v35  ;;  %v8026_v12 = vpop.f32.mrb[13].mxu0 }
 0x3ed   : > { %v4336_v17 = vpop.f32.mrb[14].mxu0 }
 0x3ee   : > { %8277 = vmatmul.mubr.bf16.gmra.mrb[100].mxu1 %v10853_v40  ;;  %v11824_v53 = vadd.f32 %v4336_v17, %v11100_v8  ;;  %v8027_v58 = vpop.f32.mrb[15].mxu0 }
 0x3ef   : > { %8280 = vmatprep.mubr.msk.bf16.mxu1 %vm12733_vm13, %v12735_v48 }
 0x3f1   : > { %v4635_v47 = vpop.f32.mrb[252].mxu1 }
 0x3f2   : > { %v8058_v35 = vpop.f32.mrb[253].mxu1 }
 0x3f3   : > { %v4637_v32 = vpop.f32.mrb[254].mxu1  ;;  %v4341_v24 = vpop.f32.mrb[16].mxu0 }
 0x3f4   : > { %v8059_v40 = vpop.f32.mrb[255].mxu1  ;;  %v11832_v8 = vadd.f32 %v4341_v24, %v11117_v46  ;;  %v8030_v38 = vpop.f32.mrb[17].mxu0 }
 0x3f5   : > { %v4344_v62 = vpop.f32.mrb[18].mxu0 }
 0x3f6   : > { %8281 = vmatmul.mubr.bf16.gmra.mrb[104].mxu1 %v10856_v11  ;;  %v11836_v36 = vadd.f32 %v4344_v62, %v11121_v9  ;;  %v8031_v12 = vpop.f32.mrb[19].mxu0  ;;  %v13191_v62 = vld [vmem:[#allocation56_spill] sm:$0xff] }
 0x3f7   : > { %8284 = vmatprep.mubr.msk.bf16.mxu1 %vm12733_vm13, %v12735_v48 }
 0x3f9   : > { %v4641_v17 = vpop.f32.mrb[0].mxu1 }
 0x3fa   : > { %v4642_v58 = vadd.f32 %v4641_v17, %v10816_v45  ;;  %v8062_v43 = vpop.f32.mrb[1].mxu1  ;;  %v13192_v45 = vld [vmem:[#allocation54_spill] sm:$0xff] }
 0x3fb   : > { %v4644_v47 = vpop.f32.mrb[2].mxu1  ;;  %v4349_v35 = vpop.f32.mrb[20].mxu0 }
 0x3fc   : > { %v11842_v46 = vadd.f32 %v4642_v58, %v11562_v44  ;;  %v4645_v32 = vadd.f32 %v4644_v47, %v10838_v57  ;;  %v8063_v24 = vpop.f32.mrb[3].mxu1  ;;  %v11846_v11 = vadd.f32 %v4349_v35, %v11139_v13  ;;  %v8034_v9 = vpop.f32.mrb[21].mxu0  ;;  %v13193_v57 = vld [vmem:[#allocation94_spill] sm:$0xff] }
 0x3fd   : > { %v4352_v40 = vpop.f32.mrb[22].mxu0 }
 0x3fe   : > { %v11849_v38 = vadd.f32 %v4645_v32, %v11566_v4  ;;  %8285 = vmatmul.mubr.bf16.gmra.mrb[108].mxu1 %v13191_v62  ;;  %v11853_v12 = vadd.f32 %v4352_v40, %v13192_v45  ;;  %v8035_v17 = vpop.f32.mrb[23].mxu0  ;;  %v13194_v4 = vld [vmem:[#allocation97_spill] sm:$0xff]  ;;  %v13195_v45 = vld [vmem:[#allocation74_spill] sm:$0xff] }
 0x3ff   : > { %8288 = vmatprep.mubr.msk.bf16.mxu1 %vm12733_vm13, %v12735_v48 }
 0x401   : > { %v4649_v44 = vpop.f32.mrb[4].mxu1 }
 0x402   : > { %v4650_v58 = vadd.f32 %v4649_v44, %v13193_v57  ;;  %v8066_v43 = vpop.f32.mrb[5].mxu1  ;;  %v8782_v44 = vld [vmem:[%s12583_s5 + $0x10] sm:$0xff]   ;;  %v13196_v57 = vld [vmem:[#allocation59_spill] sm:$0xff] }
 0x403   : > { %v4652_v13 = vpop.f32.mrb[6].mxu1  ;;  %v4357_v47 = vpop.f32.mrb[24].mxu0  ;;  %8344 = vmatprep.subr.bf16.mxu0 %v8782_v44  ;;  %8438 = vmatprep.subr.bf16.mxu1 %v8782_v44 }
 0x404   : > { %v11859_v35 = vadd.f32 %v4650_v58, %v11578_v31  ;;  %v4653_v32 = vadd.f32 %v4652_v13, %v13194_v4  ;;  %v8067_v24 = vpop.f32.mrb[7].mxu1  ;;  %v8038_v9 = vpop.f32.mrb[25].mxu0  ;;  %8345 = vmatpush3.bf16.msra.mxu0 %v8782_v44  ;;  %8446 = vmatpush3.bf16.msra.mxu1 %v8782_v44  ;;  %v13197_v4 = vld [vmem:[#allocation98_spill] sm:$0xff] }
 0x405   : > { %v4359_v62 = vpop.f32.mrb[26].mxu0 }
 0x406   : > { %v11863_v40 = vadd.f32 %v4653_v32, %v11582_v18  ;;  %8289 = vmatmul.mubr.bf16.gmra.mrb[112].mxu1 %v13195_v45  ;;  %v8039_v17 = vpop.f32.mrb[27].mxu0  ;;  %v13198_v45 = vld [vmem:[#allocation41_spill] sm:$0xff] }
 0x407   : > { %8292 = vmatprep.mubr.msk.bf16.mxu1 %vm12733_vm13, %v12735_v48 }
 0x409   : > { %v4657_v31 = vpop.f32.mrb[8].mxu1 }
 0x40a   : > { %v4658_v58 = vadd.f32 %v4657_v31, %v13196_v57  ;;  %v8070_v43 = vpop.f32.mrb[9].mxu1  ;;  %v13200_v31 = vld [vmem:[#allocation30_spill] sm:$0xff] }
 0x40b   : > { %v4660_v18 = vpop.f32.mrb[10].mxu1  ;;  %v4943_v13 = vpop.f32.mrb[28].mxu0 }
 0x40c   : > { %v11873_v47 = vadd.f32 %v4658_v58, %v11594_v33  ;;  %v4661_v32 = vadd.f32 %v4660_v18, %v13197_v4  ;;  %v8071_v24 = vpop.f32.mrb[11].mxu1  ;;  %v8158_v9 = vpop.f32.mrb[29].mxu0  ;;  %v13201_v13 = vld [vmem:[#allocation99_spill] sm:$0xff] }
 0x40d   : > { %v4945_v62 = vpop.f32.mrb[30].mxu0 }
 0x40e   : > { %v11877_v17 = vadd.f32 %v4661_v32, %v13198_v45  ;;  %8293 = vmatmul.mubr.bf16.gmra.mrb[116].mxu1 %v13199_v21  ;;  %v8159_v61 = vpop.f32.mrb[31].mxu0  ;;  %v13202_v32 = vld [vmem:[#allocation40_spill] sm:$0xff] }
 0x40f   : > { %8296 = vmatprep.mubr.msk.bf16.mxu1 %vm12733_vm13, %v12735_v48  ;;  %v13203_v45 = vld [vmem:[#allocation60_spill] sm:$0xff] }
 0x411   : > { %v4665_v44 = vpop.f32.mrb[12].mxu1 }
 0x412   : > { %v4666_v57 = vadd.f32 %v4665_v44, %v13200_v31  ;;  %v8074_v43 = vpop.f32.mrb[13].mxu1  ;;  %v13204_v44 = vld [vmem:[#allocation35_spill] sm:$0xff] }
 0x413   : > { %v4668_v33 = vpop.f32.mrb[14].mxu1  ;;  %v4949_v58 = vpop.f32.mrb[32].mxu0 }
 0x414   : > { %v11884_v18 = vadd.f32 %v4666_v57, %v11610_v20  ;;  %v4669_v4 = vadd.f32 %v4668_v33, %v13201_v13  ;;  %v8075_v24 = vpop.f32.mrb[15].mxu1  ;;  %v11888_v9 = vadd.f32 %v4949_v58, %v13202_v32  ;;  %v8162_v21 = vpop.f32.mrb[33].mxu0  ;;  %v13205_v57 = vld [vmem:[#allocation61_spill] sm:$0xff] }
 0x415   : > { %v4952_v61 = vpop.f32.mrb[34].mxu0 }
 0x416   : > { %v11891_v62 = vadd.f32 %v4669_v4, %v11614_v19  ;;  %8297 = vmatmul.mubr.bf16.gmra.mrb[120].mxu1 %v13203_v45  ;;  %v11895_v31 = vadd.f32 %v4952_v61, %v13204_v44  ;;  %v8163_v43 = vpop.f32.mrb[35].mxu0  ;;  %v13206_v19 = vld [vmem:[#allocation100_spill] sm:$0xff]  ;;  %v13207_v45 = vld [vmem:[#allocation26_spill] sm:$0xff] }
 0x417   : > { %8300 = vmatprep.mubr.msk.bf16.mxu1 %vm12733_vm13, %v12735_v48  ;;  %v8783_v44 = vld [vmem:[%s12583_s5 + $0x18] sm:$0xff]  }
 0x418   : > { %8346 = vmatprep.subr.bf16.mxu0 %v8783_v44  ;;  %8439 = vmatprep.subr.bf16.mxu1 %v8783_v44 }
 0x419   : > { %v4673_v20 = vpop.f32.mrb[16].mxu1  ;;  %8347 = vmatpush3.bf16.msra.mxu0 %v8783_v44  ;;  %8447 = vmatpush3.bf16.msra.mxu1 %v8783_v44  ;;  %v13213_v44 = vld [vmem:[#allocation89_spill] sm:$0xff] }
 0x41a   : > { %v4674_v33 = vadd.f32 %v4673_v20, %v13205_v57  ;;  %v8078_v13 = vpop.f32.mrb[17].mxu1  ;;  %v13208_v57 = vld [vmem:[#allocation57_spill] sm:$0xff] }
 0x41b   : > { %v4676_v58 = vpop.f32.mrb[18].mxu1  ;;  %v4957_v24 = vpop.f32.mrb[36].mxu0  ;;  %v13209_v13 = vld [vmem:[#allocation118_spill] sm:$0xff] }
 0x41c   : > { %v11901_v32 = vadd.f32 %v4674_v33, %v11626_v15  ;;  %v4677_v4 = vadd.f32 %v4676_v58, %v13206_v19  ;;  %v8079_v21 = vpop.f32.mrb[19].mxu1  ;;  %v11905_v54 = vadd.f32 %v4957_v24, %v13207_v45  ;;  %v8166_v61 = vpop.f32.mrb[37].mxu0  ;;  %v13210_v24 = vld [vmem:[#allocation23_spill] sm:$0xff] }
 0x41d   : > { %v4960_v43 = vpop.f32.mrb[38].mxu0  ;;  %v13211_v61 = vld [vmem:[#allocation101_spill] sm:$0xff] }
 0x41e   : > { %v11911_v20 = vadd.f32 %v4677_v4, %v11630_v1  ;;  %8301 = vmatmul.mubr.bf16.gmra.mrb[124].mxu1 %v13208_v57  ;;  %v11915_v15 = vadd.f32 %v4960_v43, %v13209_v13  ;;  %v8167_v33 = vpop.f32.mrb[39].mxu0  ;;  %v13212_v13 = vld [vmem:[#allocation27_spill] sm:$0xff] }
 0x41f   : > { %8304 = vmatprep.mubr.msk.bf16.mxu1 %vm12733_vm13, %v12735_v48 }
 0x421   : > { %v4681_v58 = vpop.f32.mrb[20].mxu1 }
 0x422   : > { %v4682_v19 = vadd.f32 %v4681_v58, %v13210_v24  ;;  %v8082_v21 = vpop.f32.mrb[21].mxu1  ;;  %v13214_v58 = vld [vmem:[#allocation119_spill] sm:$0xff] }
 0x423   : > { %v4684_v45 = vpop.f32.mrb[22].mxu1  ;;  %v4965_v1 = vpop.f32.mrb[40].mxu0 }
 0x424   : > { %v11921_v4 = vadd.f32 %v4682_v19, %v11642_v0  ;;  %v4685_v43 = vadd.f32 %v4684_v45, %v13211_v61  ;;  %v8083_v57 = vpop.f32.mrb[23].mxu1  ;;  %v11925_v33 = vadd.f32 %v4965_v1, %v13212_v13  ;;  %v8170_v26 = vpop.f32.mrb[41].mxu0  ;;  %v13215_v19 = vld [vmem:[#allocation62_spill] sm:$0xff] }
 0x425   : > { %v4968_v59 = vpop.f32.mrb[42].mxu0 }
 0x426   : > { %v11928_v49 = vadd.f32 %v4685_v43, %v11646_v16  ;;  %8305 = vmatmul.mubr.bf16.gmra.mrb[128].mxu1 %v13213_v44  ;;  %v11932_v24 = vadd.f32 %v4968_v59, %v13214_v58  ;;  %v8171_v21 = vpop.f32.mrb[43].mxu0  ;;  %v13216_v16 = vld [vmem:[#allocation102_spill] sm:$0xff]  ;;  %v13217_v44 = vld [vmem:[#allocation37_spill] sm:$0xff] }
 0x427   : > { %8308 = vmatprep.mubr.msk.bf16.mxu1 %vm12733_vm13, %v12735_v48 }
 0x429   : > { %v4689_v0 = vpop.f32.mrb[24].mxu1 }
 0x42a   : > { %v4690_v45 = vadd.f32 %v4689_v0, %v13215_v19  ;;  %v8086_v61 = vpop.f32.mrb[25].mxu1  ;;  %v13220_v0 = vld [vmem:[#allocation120_spill] sm:$0xff] }
 0x42b   : > { %v4692_v1 = vpop.f32.mrb[26].mxu1  ;;  %v4973_v57 = vpop.f32.mrb[44].mxu0 }
 0x42c   : > { %v11938_v26 = vadd.f32 %v4690_v45, %v11658_v5  ;;  %v4693_v43 = vadd.f32 %v4692_v1, %v13216_v16  ;;  %v8087_v13 = vpop.f32.mrb[27].mxu1  ;;  %v11942_v3 = vadd.f32 %v4973_v57, %v13217_v44  ;;  %v8174_v59 = vpop.f32.mrb[45].mxu0  ;;  %v13221_v45 = vld [vmem:[#allocation63_spill] sm:$0xff] }
 0x42d   : > { %v4976_v58 = vpop.f32.mrb[46].mxu0 }
 0x42e   : > { %v11945_v21 = vadd.f32 %v4693_v43, %v11662_v2  ;;  %8309 = vmatmul.mubr.bf16.gmra.mrb[132].mxu1 %v13219_v22  ;;  %v11949_v19 = vadd.f32 %v4976_v58, %v13220_v0  ;;  %v8175_v61 = vpop.f32.mrb[47].mxu0  ;;  %v13223_v2 = vld [vmem:[#allocation49_spill] sm:$0xff] }
 0x42f   : > { %8312 = vmatprep.mubr.msk.bf16.mxu1 %vm12733_vm13, %v12735_v48  ;;  %v13224_v22 = vld [vmem:[#allocation29_spill] sm:$0xff]  ;;  %v13225_v61 = vld [vmem:[#allocation34_spill] sm:$0xff] }
 0x430   : > { %13218 = vst [vmem:[#allocation56_spill] sm:$0xff] %v11945_v21 }
 0x431   : > { %v4697_v5 = vpop.f32.mrb[28].mxu1 }
 0x432   : > { %v4698_v1 = vadd.f32 %v4697_v5, %v13221_v45  ;;  %v8090_v16 = vpop.f32.mrb[29].mxu1  ;;  %v13228_v5 = vld [vmem:[#allocation123_spill] sm:$0xff] }
 0x433   : > { %v4700_v57 = vpop.f32.mrb[30].mxu1  ;;  %v4981_v13 = vpop.f32.mrb[48].mxu0 }
 0x434   : > { %v11955_v44 = vadd.f32 %v4698_v1, %v11674_v39  ;;  %v4701_v43 = vadd.f32 %v4700_v57, %v13223_v2  ;;  %v8091_v59 = vpop.f32.mrb[31].mxu1  ;;  %v11959_v41 = vadd.f32 %v4981_v13, %v13224_v22  ;;  %v8178_v58 = vpop.f32.mrb[49].mxu0  ;;  %v8784_v39 = vld [vmem:[%s12583_s5 + $0x20] sm:$0xff]   ;;  %v13229_v57 = vld [vmem:[#allocation24_spill] sm:$0xff] }
 0x435   : > { %v4984_v0 = vpop.f32.mrb[50].mxu0  ;;  %8348 = vmatprep.subr.bf16.mxu0 %v8784_v39  ;;  %8440 = vmatprep.subr.bf16.mxu1 %v8784_v39  ;;  %v13231_v22 = vld [vmem:[#allocation103_spill] sm:$0xff] }
 0x436   : > { %13222 = vst [vmem:[#allocation54_spill] sm:$0xff] %v11955_v44  ;;  %v11962_v63 = vadd.f32 %v4701_v43, %v13225_v61  ;;  %8313 = vmatmul.mubr.bf16.gmra.mrb[136].mxu1 %v13227_v37  ;;  %v11966_v45 = vadd.f32 %v4984_v0, %v13228_v5  ;;  %v8179_v16 = vpop.f32.mrb[51].mxu0  ;;  %8349 = vmatpush3.bf16.msra.mxu0 %v8784_v39  ;;  %v13232_v61 = vld [vmem:[#allocation69_spill] sm:$0xff]  ;;  %v13233_v44 = vld [vmem:[#allocation48_spill] sm:$0xff] }
 0x437   : > { %8316 = vmatprep.mubr.msk.bf16.mxu1 %vm12733_vm13, %v12735_v48  ;;  %8448 = vmatpush3.bf16.msra.mxu1 %v8784_v39 }
 0x438   : > { %13226 = vst [vmem:[#allocation94_spill] sm:$0xff] %v11962_v63 }
 0x439   : > { %v4705_v1 = vpop.f32.mrb[32].mxu1 }
 0x43a   : > { %v4706_v13 = vadd.f32 %v4705_v1, %v13229_v57  ;;  %v8094_v2 = vpop.f32.mrb[33].mxu1  ;;  %v13235_v57 = vld [vmem:[#allocation92_spill] sm:$0xff] }
 0x43b   : > { %v4708_v43 = vpop.f32.mrb[34].mxu1  ;;  %v4989_v37 = vpop.f32.mrb[52].mxu0  ;;  %v13236_v2 = vld [vmem:[#allocation126_spill] sm:$0xff] }
 0x43c   : > { %v11975_v59 = vadd.f32 %v4706_v13, %v11691_v6  ;;  %v4709_v58 = vadd.f32 %v4708_v43, %v13231_v22  ;;  %v8095_v0 = vpop.f32.mrb[35].mxu1  ;;  %v11979_v5 = vadd.f32 %v4989_v37, %v13232_v61  ;;  %v8182_v16 = vpop.f32.mrb[53].mxu0  ;;  %v13237_v13 = vld [vmem:[#allocation66_spill] sm:$0xff] }
 0x43d   : > { %v4992_v63 = vpop.f32.mrb[54].mxu0 }
 0x43e   : > { %13230 = vst [vmem:[#allocation97_spill] sm:$0xff] %v11975_v59  ;;  %v11982_v1 = vadd.f32 %v4709_v58, %v13233_v44  ;;  %8317 = vmatmul.mubr.bf16.gmra.mrb[140].mxu1 %v13235_v57  ;;  %v11986_v21 = vadd.f32 %v4992_v63, %v13236_v2  ;;  %v8183_v39 = vpop.f32.mrb[55].mxu0  ;;  %v13239_v44 = vld [vmem:[#allocation64_spill] sm:$0xff]  ;;  %v13240_v57 = vld [vmem:[#allocation71_spill] sm:$0xff]  ;;  %v13242_v59 = vld [vmem:[#allocation93_spill] sm:$0xff] }
 0x43f   : > { %8320 = vmatprep.mubr.msk.bf16.mxu1 %vm12733_vm13, %v12735_v48 }
 0x440   : > { %13234 = vst [vmem:[#allocation74_spill] sm:$0xff] %v11982_v1 }
 0x441   : > { %v4713_v6 = vpop.f32.mrb[36].mxu1 }
 0x442   : > { %v4714_v43 = vadd.f32 %v4713_v6, %v13237_v13  ;;  %v8098_v22 = vpop.f32.mrb[37].mxu1  ;;  %v13243_v6 = vld [vmem:[#allocation129_spill] sm:$0xff] }
 0x443   : > { %v4716_v37 = vpop.f32.mrb[38].mxu1  ;;  %v4997_v0 = vpop.f32.mrb[56].mxu0 }
 0x444   : > { %v11992_v61 = vadd.f32 %v4714_v43, %v11708_v56  ;;  %v4717_v58 = vadd.f32 %v4716_v37, %v13239_v44  ;;  %v8099_v16 = vpop.f32.mrb[39].mxu1  ;;  %v11996_v1 = vadd.f32 %v4997_v0, %v13240_v57  ;;  %v8186_v63 = vpop.f32.mrb[57].mxu0  ;;  %v8785_v56 = vld [vmem:[%s12583_s5 + $0x28] sm:$0xff]  }
 0x445   : > { %v5000_v2 = vpop.f32.mrb[58].mxu0  ;;  %v13244_v37 = vld [vmem:[#allocation104_spill] sm:$0xff]  ;;  %8350 = vmatprep.subr.bf16.mxu0 %v8785_v56  ;;  %8441 = vmatprep.subr.bf16.mxu1 %v8785_v56  ;;  %v13246_v16 = vld [vmem:[#allocation105_spill] sm:$0xff] }
 0x446   : > { %13238 = vst [vmem:[#allocation59_spill] sm:$0xff] %v11992_v61  ;;  %v11999_v39 = vadd.f32 %v4717_v58, %v11712_v10  ;;  %8321 = vmatmul.mubr.bf16.gmra.mrb[144].mxu1 %v13242_v59  ;;  %v12003_v13 = vadd.f32 %v5000_v2, %v13243_v6  ;;  %v8187_v22 = vpop.f32.mrb[59].mxu0  ;;  %8351 = vmatpush3.bf16.msra.mxu0 %v8785_v56  ;;  %v13247_v2 = vld [vmem:[#allocation72_spill] sm:$0xff] }
 0x447   : > { %8324 = vmatprep.mubr.msk.bf16.mxu1 %vm12733_vm13, %v12735_v48  ;;  %8449 = vmatpush3.bf16.msra.mxu1 %v8785_v56  ;;  %v13249_v56 = vld [vmem:[#allocation95_spill] sm:$0xff] }
 0x448   : > { %13241 = vst [vmem:[#allocation98_spill] sm:$0xff] %v11999_v39  ;;  %v13250_v39 = vld [vmem:[#allocation132_spill] sm:$0xff] }
 0x449   : > { %v4721_v43 = vpop.f32.mrb[40].mxu1 }
 0x44a   : > { %v4722_v0 = vadd.f32 %v4721_v43, %v13244_v37  ;;  %v8102_v44 = vpop.f32.mrb[41].mxu1  ;;  %v8786_v43 = vld [vmem:[%s12583_s5 + $0x30] sm:$0xff]  }
 0x44b   : > { %v4724_v10 = vpop.f32.mrb[42].mxu1  ;;  %v5005_v59 = vpop.f32.mrb[60].mxu0  ;;  %8352 = vmatprep.subr.bf16.mxu0 %v8786_v43  ;;  %8442 = vmatprep.subr.bf16.mxu1 %v8786_v43 }
 0x44c   : > { %v12012_v58 = vadd.f32 %v4722_v0, %v11724_v25  ;;  %v4725_v57 = vadd.f32 %v4724_v10, %v13246_v16  ;;  %v8103_v63 = vpop.f32.mrb[43].mxu1  ;;  %v12016_v6 = vadd.f32 %v5005_v59, %v13247_v2  ;;  %v8190_v22 = vpop.f32.mrb[61].mxu0  ;;  %8353 = vmatpush3.bf16.msra.mxu0 %v8786_v43  ;;  %8450 = vmatpush3.bf16.msra.mxu1 %v8786_v43  ;;  %v13251_v59 = vld [vmem:[#allocation106_spill] sm:$0xff] }
 0x44d   : > { %v5008_v37 = vpop.f32.mrb[62].mxu0  ;;  %v13253_v22 = vld [vmem:[#allocation65_spill] sm:$0xff] }
 0x44e   : > { %13245 = vst [vmem:[#allocation41_spill] sm:$0xff] %v12012_v58  ;;  %v12022_v44 = vadd.f32 %v4725_v57, %v11727_v14  ;;  %8325 = vmatmul.mubr.bf16.gmra.mrb[148].mxu1 %v13249_v56  ;;  %v12026_v25 = vadd.f32 %v5008_v37, %v13250_v39  ;;  %v8191_v0 = vpop.f32.mrb[63].mxu0  ;;  %v13254_v56 = vld [vmem:[#allocation73_spill] sm:$0xff] }
 0x44f   : > { %8328 = vmatprep.mubr.msk.bf16.mxu1 %vm12733_vm13, %v12735_v48  ;;  %v8787_v58 = vld [vmem:[%s12583_s5 + $0x38] sm:$0xff]  }
 0x450   : > { %13248 = vst [vmem:[#allocation75_spill] sm:$0xff] %v12022_v44  ;;  %8354 = vmatprep.subr.bf16.mxu0 %v8787_v58  ;;  %8443 = vmatprep.subr.bf16.mxu1 %v8787_v58 }
 0x451   : > { %v4729_v10 = vpop.f32.mrb[44].mxu1  ;;  %8355 = vmatpush3.bf16.msra.mxu0 %v8787_v58  ;;  %8451 = vmatpush3.bf16.msra.mxu1 %v8787_v58  ;;  %v13262_v58 = vld [vmem:[#allocation138_spill] sm:$0xff] }
 0x452   : > { %v4730_v16 = vadd.f32 %v4729_v10, %v13251_v59  ;;  %v8106_v63 = vpop.f32.mrb[45].mxu1  ;;  %v13256_v59 = vld [vmem:[#allocation96_spill] sm:$0xff] }
 0x453   : > { %v4732_v2 = vpop.f32.mrb[46].mxu1  ;;  %v5013_v14 = vpop.f32.mrb[64].mxu0  ;;  %v13257_v63 = vld [vmem:[#allocation135_spill] sm:$0xff] }
 0x454   : > { %v12032_v57 = vadd.f32 %v4730_v16, %v11739_v50  ;;  %v4733_v39 = vadd.f32 %v4732_v2, %v13253_v22  ;;  %v8107_v37 = vpop.f32.mrb[47].mxu1  ;;  %v12036_v0 = vadd.f32 %v5013_v14, %v13254_v56  ;;  %v8194_v44 = vpop.f32.mrb[65].mxu0  ;;  %v13258_v2 = vld [vmem:[#allocation107_spill] sm:$0xff]  ;;  %v13259_v56 = vld [vmem:[#allocation108_spill] sm:$0xff] }
 0x455   : > { %v5016_v43 = vpop.f32.mrb[66].mxu0 }
 0x456   : > { %13252 = vst [vmem:[#allocation30_spill] sm:$0xff] %v12032_v57  ;;  %v12042_v10 = vadd.f32 %v4733_v39, %v11743_v27  ;;  %8329 = vmatmul.mubr.bf16.gmra.mrb[152].mxu1 %v13256_v59  ;;  %v12046_v50 = vadd.f32 %v5016_v43, %v13257_v63  ;;  %v8195_v16 = vpop.f32.mrb[67].mxu0  ;;  %v13260_v63 = vld [vmem:[#allocation77_spill] sm:$0xff] }
 0x457   : > { %8332 = vmatprep.mubr.msk.bf16.mxu1 %vm12733_vm13, %v12735_v48 }
 0x458   : > { %13255 = vst [vmem:[#allocation99_spill] sm:$0xff] %v12042_v10 }
 0x459   : > { %v4737_v44 = vpop.f32.mrb[48].mxu1 }
 0x45a   : > { %v4738_v14 = vadd.f32 %v4737_v44, %v13258_v2  ;;  %v8110_v22 = vpop.f32.mrb[49].mxu1 }
 0x45b   : > { %v4740_v37 = vpop.f32.mrb[50].mxu1  ;;  %v5021_v27 = vpop.f32.mrb[68].mxu0 }
 0x45c   : > { %v12052_v39 = vadd.f32 %v4738_v14, %v11757_v28  ;;  %v4741_v43 = vadd.f32 %v4740_v37, %v13259_v56  ;;  %v8111_v59 = vpop.f32.mrb[51].mxu1  ;;  %v12056_v16 = vadd.f32 %v5021_v27, %v13260_v63  ;;  %v8198_v10 = vpop.f32.mrb[69].mxu0  ;;  %v13263_v14 = vld [vmem:[#allocation109_spill] sm:$0xff] }
 0x45d   : > { %v5024_v57 = vpop.f32.mrb[70].mxu0 }
 0x45e   : > { %v12059_v61 = vadd.f32 %v4741_v43, %v11761_v34  ;;  %8333 = vmatmul.mubr.bf16.gmra.mrb[156].mxu1 %v11817_v30  ;;  %v12063_v44 = vadd.f32 %v5024_v57, %v13262_v58  ;;  %v8199_v2 = vpop.f32.mrb[71].mxu0  ;;  %v13265_v34 = vld [vmem:[#allocation110_spill] sm:$0xff]  ;;  %v13266_v30 = vld [vmem:[#allocation79_spill] sm:$0xff] }
 0x45f   : > { %8336 = vmatprep.mubr.msk.bf16.mxu1 %vm12733_vm13, %v12735_v48  ;;  %v13268_v48 = vld [vmem:[#allocation141_spill] sm:$0xff] }
 0x460   : > { %13261 = vst [vmem:[#allocation40_spill] sm:$0xff] %v12059_v61 }
 0x461   : > { %v4745_v28 = vpop.f32.mrb[52].mxu1 }
 0x462   : > { %v4746_v22 = vadd.f32 %v4745_v28, %v13263_v14  ;;  %v8114_v37 = vpop.f32.mrb[53].mxu1 }
 0x463   : > { %v4748_v27 = vpop.f32.mrb[54].mxu1  ;;  %v5029_v56 = vpop.f32.mrb[72].mxu0 }
 0x464   : > { %v12069_v10 = vadd.f32 %v4746_v22, %v11773_v42  ;;  %v4749_v43 = vadd.f32 %v4748_v27, %v13265_v34  ;;  %v8115_v59 = vpop.f32.mrb[55].mxu1  ;;  %v12073_v63 = vadd.f32 %v5029_v56, %v13266_v30  ;;  %v8202_v57 = vpop.f32.mrb[73].mxu0  ;;  %v13269_v42 = vld [vmem:[#allocation111_spill] sm:$0xff] }
 0x465   : > { %v5032_v58 = vpop.f32.mrb[74].mxu0  ;;  %v13271_v59 = vld [vmem:[#allocation112_spill] sm:$0xff] }
 0x466   : > { %13264 = vst [vmem:[#allocation60_spill] sm:$0xff] %v12069_v10  ;;  %v12076_v2 = vadd.f32 %v4749_v43, %v11777_v23  ;;  %8337 = vmatmul.mubr.bf16.gmra.mrb[160].mxu1 %v11806_v60  ;;  %v12080_v28 = vadd.f32 %v5032_v58, %v13268_v48  ;;  %v8203_v14 = vpop.f32.mrb[75].mxu0  ;;  %v13272_v23 = vld [vmem:[#allocation80_spill] sm:$0xff] }
 0x467   : > { %v13274_v48 = vld [vmem:[#allocation144_spill] sm:$0xff] }
 0x468   : > { %13267 = vst [vmem:[#allocation35_spill] sm:$0xff] %v12076_v2 }
 0x469   : > { %v4753_v37 = vpop.f32.mrb[56].mxu1 }
 0x46a   : > { %v4754_v22 = vadd.f32 %v4753_v37, %v13269_v42  ;;  %v8118_v10 = vpop.f32.mrb[57].mxu1  ;;  %v13275_v42 = vld [vmem:[#allocation113_spill] sm:$0xff] }
 0x46b   : > { %v4756_v27 = vpop.f32.mrb[58].mxu1  ;;  %v5037_v34 = vpop.f32.mrb[76].mxu0 }
 0x46c   : > { %v12084_v56 = vadd.f32 %v4754_v22, %v11788_v7  ;;  %v4757_v30 = vadd.f32 %v4756_v27, %v13271_v59  ;;  %v8119_v57 = vpop.f32.mrb[59].mxu1  ;;  %v12088_v43 = vadd.f32 %v5037_v34, %v13272_v23  ;;  %v8206_v60 = vpop.f32.mrb[77].mxu0  ;;  %v13277_v34 = vld [vmem:[#allocation114_spill] sm:$0xff]  ;;  %v13278_v23 = vld [vmem:[#allocation81_spill] sm:$0xff] }
 0x46d   : > { %v5040_v2 = vpop.f32.mrb[78].mxu0 }
 0x46e   : > { %13270 = vst [vmem:[#allocation61_spill] sm:$0xff] %v12084_v56  ;;  %v12091_v58 = vadd.f32 %v4757_v30, %v11792_v55  ;;  %v12094_v14 = vadd.f32 %v5040_v2, %v13274_v48  ;;  %v8207_v10 = vpop.f32.mrb[79].mxu0  ;;  %v13280_v48 = vld [vmem:[#allocation147_spill] sm:$0xff] }
 0x470   : > { %13273 = vst [vmem:[#allocation100_spill] sm:$0xff] %v12091_v58 }
 0x471   : > { %v4761_v37 = vpop.f32.mrb[60].mxu1 }
 0x472   : > { %v4762_v61 = vadd.f32 %v4761_v37, %v13275_v42  ;;  %v8122_v7 = vpop.f32.mrb[61].mxu1 }
 0x473   : > { %v4764_v22 = vpop.f32.mrb[62].mxu1  ;;  %v5045_v56 = vpop.f32.mrb[80].mxu0  ;;  %v13281_v7 = vld [vmem:[#allocation33_spill] sm:$0xff] }
 0x474   : > { %v12098_v27 = vadd.f32 %v4762_v61, %v11804_v29  ;;  %v4765_v59 = vadd.f32 %v4764_v22, %v13277_v34  ;;  %v8123_v57 = vpop.f32.mrb[63].mxu1  ;;  %v12102_v60 = vadd.f32 %v5045_v56, %v13278_v23  ;;  %v8210_v55 = vpop.f32.mrb[81].mxu0  ;;  %v13283_v56 = vld [vmem:[#allocation22_spill] sm:$0xff] }
 0x475   : > { %v5048_v30 = vpop.f32.mrb[82].mxu0  ;;  %v13284_v23 = vld [vmem:[#allocation82_spill] sm:$0xff] }
 0x476   : > { %13276 = vst [vmem:[#allocation26_spill] sm:$0xff] %v12098_v27  ;;  %v12105_v2 = vadd.f32 %v4765_v59, %v11810_v51  ;;  %v12108_v10 = vadd.f32 %v5048_v30, %v13280_v48  ;;  %v8211_v37 = vpop.f32.mrb[83].mxu0  ;;  %v13286_v48 = vld [vmem:[#allocation150_spill] sm:$0xff] }
 0x478   : > { %13279 = vst [vmem:[#allocation57_spill] sm:$0xff] %v12105_v2 }
 0x479   : > { %v4769_v42 = vpop.f32.mrb[64].mxu1 }
 0x47a   : > { %v4770_v58 = vadd.f32 %v4769_v42, %v13281_v7  ;;  %v8126_v29 = vpop.f32.mrb[65].mxu1 }
 0x47b   : > { %v4772_v61 = vpop.f32.mrb[66].mxu1  ;;  %v5053_v27 = vpop.f32.mrb[84].mxu0  ;;  %v13287_v29 = vld [vmem:[#allocation39_spill] sm:$0xff] }
 0x47c   : > { %v12112_v22 = vadd.f32 %v4770_v58, %v11820_v52  ;;  %v4773_v34 = vadd.f32 %v4772_v61, %v13283_v56  ;;  %v8127_v57 = vpop.f32.mrb[67].mxu1  ;;  %v12116_v55 = vadd.f32 %v5053_v27, %v13284_v23  ;;  %v8214_v51 = vpop.f32.mrb[85].mxu0  ;;  %v13289_v27 = vld [vmem:[#allocation115_spill] sm:$0xff] }
 0x47d   : > { %v5056_v59 = vpop.f32.mrb[86].mxu0  ;;  %v13290_v23 = vld [vmem:[#allocation83_spill] sm:$0xff] }
 0x47e   : > { %13282 = vst [vmem:[#allocation118_spill] sm:$0xff] %v12112_v22  ;;  %v12119_v30 = vadd.f32 %v4773_v34, %v11824_v53  ;;  %v12122_v37 = vadd.f32 %v5056_v59, %v13286_v48  ;;  %v8215_v42 = vpop.f32.mrb[87].mxu0  ;;  %v13292_v48 = vld [vmem:[#allocation153_spill] sm:$0xff] }
 0x480   : > { %13285 = vst [vmem:[#allocation23_spill] sm:$0xff] %v12119_v30 }
 0x481   : > { %v4777_v7 = vpop.f32.mrb[68].mxu1 }
 0x482   : > { %v4778_v2 = vadd.f32 %v4777_v7, %v13287_v29  ;;  %v8130_v52 = vpop.f32.mrb[69].mxu1 }
 0x483   : > { %v4780_v58 = vpop.f32.mrb[70].mxu1  ;;  %v5061_v22 = vpop.f32.mrb[88].mxu0  ;;  %v13293_v52 = vld [vmem:[#allocation116_spill] sm:$0xff] }
 0x484   : > { %v12126_v61 = vadd.f32 %v4778_v2, %v11832_v8  ;;  %v4781_v56 = vadd.f32 %v4780_v58, %v13289_v27  ;;  %v8131_v57 = vpop.f32.mrb[71].mxu1  ;;  %v12130_v51 = vadd.f32 %v5061_v22, %v13290_v23  ;;  %v8218_v53 = vpop.f32.mrb[89].mxu0  ;;  %v13295_v22 = vld [vmem:[#allocation117_spill] sm:$0xff]  ;;  %v13296_v23 = vld [vmem:[#allocation84_spill] sm:$0xff] }
 0x485   : > { %v5064_v34 = vpop.f32.mrb[90].mxu0 }
 0x486   : > { %13288 = vst [vmem:[#allocation101_spill] sm:$0xff] %v12126_v61  ;;  %v12133_v59 = vadd.f32 %v4781_v56, %v11836_v36  ;;  %v12136_v42 = vadd.f32 %v5064_v34, %v13292_v48  ;;  %v8219_v7 = vpop.f32.mrb[91].mxu0  ;;  %v12149_v56 = vld [vmem:[%s12585_s7] sm:$0xff]  }
 0x487   : > { %v13299_v7 = vld [vmem:[#allocation156_spill] sm:$0xff]  ;;  %8388 = vmatprep.subr.bf16.mxu0 %v12149_v56 }
 0x488   : > { %13291 = vst [vmem:[#allocation27_spill] sm:$0xff] %v12133_v59 }
 0x489   : > { %v4785_v29 = vpop.f32.mrb[72].mxu1 }
 0x48a   : > { %v4786_v30 = vadd.f32 %v4785_v29, %v13293_v52  ;;  %v8134_v8 = vpop.f32.mrb[73].mxu1 }
 0x48b   : > { %v4788_v2 = vpop.f32.mrb[74].mxu1  ;;  %v5069_v61 = vpop.f32.mrb[92].mxu0 }
 0x48c   : > { %v12140_v58 = vadd.f32 %v4786_v30, %v11846_v11  ;;  %v4789_v27 = vadd.f32 %v4788_v2, %v13295_v22  ;;  %v8135_v57 = vpop.f32.mrb[75].mxu1  ;;  %v12144_v53 = vadd.f32 %v5069_v61, %v13296_v23  ;;  %v8222_v36 = vpop.f32.mrb[93].mxu0  ;;  %v13301_v22 = vld [vmem:[#allocation86_spill] sm:$0xff] }
 0x48d   : > { %v5072_v34 = vpop.f32.mrb[94].mxu0 }
 0x48e   : > { %13294 = vst [vmem:[#allocation89_spill] sm:$0xff] %v12140_v58  ;;  %13297 = vst [vmem:[#allocation119_spill] sm:$0xff] %v12144_v53  ;;  %v12152_v48 = vadd.f32 %v4789_v27, %v11853_v12  ;;  %v12155_v29 = vadd.f32 %v5072_v34, %v13299_v7  ;;  %v8223_v11 = vpop.f32.mrb[95].mxu0  ;;  %v13303_v58 = vld [vmem:[#allocation85_spill] sm:$0xff] }
 0x490   : > { %13298 = vst [vmem:[#allocation62_spill] sm:$0xff] %v12152_v48  ;;  %13300 = vst [vmem:[#allocation102_spill] sm:$0xff] %v12155_v29  ;;  %v13305_v29 = vld [vmem:[#allocation87_spill] sm:$0xff] }
 0x491   : > { %v4793_v30 = vpop.f32.mrb[76].mxu1 }
 0x492   : > { %v8138_v52 = vpop.f32.mrb[77].mxu1 }
 0x493   : > { %v4795_v61 = vpop.f32.mrb[78].mxu1  ;;  %v5077_v8 = vpop.f32.mrb[96].mxu0 }
 0x494   : > { %v8139_v2 = vpop.f32.mrb[79].mxu1  ;;  %v12159_v57 = vadd.f32 %v5077_v8, %v13301_v22  ;;  %v8226_v23 = vpop.f32.mrb[97].mxu0 }
 0x495   : > { %v5080_v36 = vpop.f32.mrb[98].mxu0  ;;  %v13306_v2 = vld [vmem:[#allocation70_spill] sm:$0xff]  ;;  %v13308_v23 = vld [vmem:[#allocation121_spill] sm:$0xff] }
 0x496   : > { %13302 = vst [vmem:[#allocation37_spill] sm:$0xff] %v12159_v57  ;;  %v12162_v59 = vadd.f32 %v5080_v36, %v13303_v58  ;;  %v8227_v12 = vpop.f32.mrb[99].mxu0 }
 0x498   : > { %13304 = vst [vmem:[#allocation90_spill] sm:$0xff] %v12162_v59  ;;  %v13310_v59 = vld [vmem:[#allocation44_spill] sm:$0xff] }
 0x499   : > { %v5400_v27 = vpop.f32.mrb[80].mxu1 }
 0x49a   : > { %v8258_v34 = vpop.f32.mrb[81].mxu1 }
 0x49b   : > { %v5402_v7 = vpop.f32.mrb[82].mxu1  ;;  %v5085_v11 = vpop.f32.mrb[100].mxu0  ;;  %v13309_v34 = vld [vmem:[#allocation122_spill] sm:$0xff] }
 0x49c   : > { %v8259_v48 = vpop.f32.mrb[83].mxu1  ;;  %v12165_v30 = vadd.f32 %v5085_v11, %v13305_v29  ;;  %v8230_v52 = vpop.f32.mrb[101].mxu0 }
 0x49d   : > { %v5088_v61 = vpop.f32.mrb[102].mxu0 }
 0x49e   : > { %v12168_v53 = vadd.f32 %v5088_v61, %v13306_v2  ;;  %v8231_v8 = vpop.f32.mrb[103].mxu0 }
 0x49f   : > { %v13312_v8 = vld [vmem:[#allocation88_spill] sm:$0xff] }
 0x4a0   : > { %13307 = vst [vmem:[#allocation120_spill] sm:$0xff] %v12168_v53 }
 0x4a1   : > { %v5406_v22 = vpop.f32.mrb[84].mxu1 }
 0x4a2   : > { %v5407_v57 = vadd.f32 %v5406_v22, %v13308_v23  ;;  %v8262_v58 = vpop.f32.mrb[85].mxu1 }
 0x4a3   : > { %v5409_v36 = vpop.f32.mrb[86].mxu1  ;;  %v5093_v12 = vpop.f32.mrb[104].mxu0 }
 0x4a4   : > { %v5601_v27 = vadd.f32 %v5407_v57, %v11888_v9  ;;  %v5410_v7 = vadd.f32 %v5409_v36, %v13309_v34  ;;  %v8263_v48 = vpop.f32.mrb[87].mxu1  ;;  %v12174_v29 = vadd.f32 %v5093_v12, %v13310_v59  ;;  %v8234_v11 = vpop.f32.mrb[105].mxu0  ;;  %v12184_v9 = vld [vmem:[%s12582_s4] ss:$0 sm:$0xff] }
 0x4a5   : > { %v5096_v52 = vpop.f32.mrb[106].mxu0  ;;  %v13314_v57 = vld [vmem:[#allocation46_spill] sm:$0xff] }
 0x4a6   : > { %13311 = vst [vmem:[#allocation63_spill] sm:$0xff] %v12174_v29  ;;  %v5639_v61 = vadd.f32 %v5601_v27, %v11842_v46  ;;  %v5602_v2 = vadd.f32 %v5410_v7, %v11895_v31  ;;  %v12179_v53 = vadd.f32 %v5096_v52, %v13312_v8  ;;  %v8235_v22 = vpop.f32.mrb[107].mxu0  ;;  %v13315_v12 = vld [vmem:[#allocation166_spill] sm:$0xff]  ;;  %v13316_v27 = vld [vmem:[#allocation124_spill] sm:$0xff]  ;;  %v13317_v52 = vld [vmem:[#allocation125_spill] sm:$0xff] }
 0x4a8   : > { %13313 = vst [vmem:[#allocation49_spill] sm:$0xff] %v12179_v53  ;;  %v5677_v23 = vadd.f32 %v5639_v61, %v13314_v57  ;;  %v5640_v59 = vadd.f32 %v5602_v2, %v11849_v38 }
 0x4a9   : > { %v5414_v58 = vpop.f32.mrb[88].mxu1 }
 0x4aa   : > { %v5721_v36 = vadd.f32 %v12184_v9, %v5677_v23  ;;  %v5678_v46 = vadd.f32 %v5640_v59, %v13315_v12  ;;  %v5415_v31 = vadd.f32 %v5414_v58, %v13316_v27  ;;  %v8266_v34 = vpop.f32.mrb[89].mxu1  ;;  %v13318_v58 = vld [vmem:[#allocation168_spill] sm:$0xff] }
 0x4ab   : > { %v5417_v7 = vpop.f32.mrb[90].mxu1  ;;  %v5101_v53 = vpop.f32.mrb[108].mxu0 }
 0x4ac   : > { %v5722_v48 = vadd.f32 %v12184_v9, %v5678_v46  ;;  %v5603_v11 = vadd.f32 %v5415_v31, %v11905_v54  ;;  %v5418_v8 = vadd.f32 %v5417_v7, %v13317_v52  ;;  %v8267_v22 = vpop.f32.mrb[91].mxu1  ;;  %v8238_v61 = vpop.f32.mrb[109].mxu0  ;;  %v5759_v57 = vmax.f32 %v5721_v36, 0.0  ;;  %v13319_v31 = vld [vmem:[#allocation169_spill] sm:$0xff]  ;;  %v13320_v53 = vld [vmem:[#allocation127_spill] sm:$0xff] }
 0x4ad   : > { %v5103_v59 = vpop.f32.mrb[110].mxu0 }
 0x4ae   : > { %v5760_v38 = vmax.f32 %v5722_v48, 0.0  ;;  %v5641_v2 = vadd.f32 %v5603_v11, %v11859_v35  ;;  %v5604_v23 = vadd.f32 %v5418_v8, %v11915_v15  ;;  %v8239_v12 = vpop.f32.mrb[111].mxu0  ;;  %v13321_v11 = vld [vmem:[#allocation128_spill] sm:$0xff] }
 0x4af   : > { %v13322_v12 = vld [vmem:[#allocation55_spill] sm:$0xff] }
 0x4b0   : > { %v5679_v27 = vadd.f32 %v5641_v2, %v13318_v58  ;;  %v5642_v34 = vadd.f32 %v5604_v23, %v11863_v40  ;;  %v5797_v46 = vpack.c.bf16 %v5760_v38, %v5759_v57 }
 0x4b1   : > { %v5422_v29 = vpop.f32.mrb[92].mxu1 }
 0x4b2   : > { %v5723_v54 = vadd.f32 %v12184_v9, %v5679_v27  ;;  %v5680_v7 = vadd.f32 %v5642_v34, %v13319_v31  ;;  %v5423_v52 = vadd.f32 %v5422_v29, %v13320_v53  ;;  %v8270_v36 = vpop.f32.mrb[93].mxu1  ;;  %v5817_v38 = vshrl.u32 %v5797_v46, 16 }
 0x4b3   : > { %v5425_v48 = vpop.f32.mrb[94].mxu1  ;;  %v5820_v23 = vshll.u32 %v5797_v46, 16 }
 0x4b4   : > { %v5724_v35 = vadd.f32 %v12184_v9, %v5680_v7  ;;  %v5605_v15 = vadd.f32 %v5423_v52, %v11925_v33  ;;  %v5426_v8 = vadd.f32 %v5425_v48, %v13321_v11  ;;  %v8271_v22 = vpop.f32.mrb[95].mxu1  ;;  %v5761_v61 = vmax.f32 %v5723_v54, 0.0  ;;  %v13323_v33 = vld [vmem:[#allocation170_spill] sm:$0xff] }
 0x4b5   : > { %v13324_v7 = vld [vmem:[#allocation130_spill] sm:$0xff]  ;;  %v5822_v48 = vrot.slane %v5820_v23, 2  ;;  %v13326_v23 = vld [vmem:[#allocation52_spill] sm:$0xff] }
 0x4b6   : > { %v5762_v2 = vmax.f32 %v5724_v35, 0.0  ;;  %v5643_v40 = vadd.f32 %v5605_v15, %v11873_v47  ;;  %v5606_v57 = vadd.f32 %v5426_v8, %v11932_v24  ;;  %v5819_v47 = vrot.slane %v5817_v38, 1  ;;  %v13325_v15 = vld [vmem:[#allocation131_spill] sm:$0xff] }
 0x4b8   : > { %v5798_v59 = vpack.c.bf16 %v5762_v2, %v5761_v61  ;;  %v5681_v29 = vadd.f32 %v5643_v40, %v13322_v12  ;;  %v5644_v58 = vadd.f32 %v5606_v57, %v11877_v17  ;;  %v5823_v12 = vor.u32 %v5822_v48, %v5819_v47 }
 0x4b9   : > { %v5430_v27 = vpop.f32.mrb[96].mxu1 }
 0x4ba   : > { %v5725_v34 = vadd.f32 %v12184_v9, %v5681_v29  ;;  %v5682_v31 = vadd.f32 %v5644_v58, %v13323_v33  ;;  %v5431_v53 = vadd.f32 %v5430_v27, %v13324_v7  ;;  %v8274_v54 = vpop.f32.mrb[97].mxu1  ;;  %v5825_v52 = vshrl.u32 %v5798_v59, 16 }
 0x4bb   : > { %v5433_v36 = vpop.f32.mrb[98].mxu1  ;;  %v5828_v24 = vshll.u32 %v5798_v59, 16  ;;  %v13327_v54 = vld [vmem:[#allocation171_spill] sm:$0xff] }
 0x4bc   : > { %v5726_v46 = vadd.f32 %v12184_v9, %v5682_v31  ;;  %v5607_v35 = vadd.f32 %v5431_v53, %v11942_v3  ;;  %v5434_v11 = vadd.f32 %v5433_v36, %v13325_v15  ;;  %v8275_v17 = vpop.f32.mrb[99].mxu1  ;;  %v5827_v8 = vrot.slane %v5825_v52, 1  ;;  %v13328_v36 = vld [vmem:[#allocation133_spill] sm:$0xff] }
 0x4bd   : > { %v5830_v22 = vrot.slane %v5828_v24, 2  ;;  %v5763_v61 = vmax.f32 %v5725_v34, 0.0  ;;  %v5834_v33 = vrot.slane %v5825_v52, 2  ;;  %v5835_v31 = vrot.slane %v5828_v24, 3  ;;  %v13329_v52 = vld [vmem:[#allocation134_spill] sm:$0xff] }
 0x4be   : > { %v5764_v2 = vmax.f32 %v5726_v46, 0.0  ;;  %v5645_v40 = vadd.f32 %v5607_v35, %v11884_v18  ;;  %v5608_v57 = vadd.f32 %v5434_v11, %v11949_v19 }
 0x4bf   : > { %v5831_v29 = vor.u32 %v5830_v22, %v5827_v8 }
 0x4c0   : > { %v5799_v38 = vpack.c.bf16 %v5764_v2, %v5763_v61  ;;  %v5683_v59 = vadd.f32 %v5645_v40, %v13326_v23  ;;  %v5646_v58 = vadd.f32 %v5608_v57, %v11891_v62  ;;  %v5836_v61 = vor.u32 %v5835_v31, %v5834_v33  ;;  %v8789_v57 = vld [vmem:[%s12585_s7 + $0x8] sm:$0xff]  }
 0x4c1   : > { %v5438_v27 = vpop.f32.mrb[100].mxu1  ;;  %v5832_v3 = vsel %vm2418_vm6, %v5823_v12, %v5831_v29 }
 0x4c2   : > { %v5838_v7 = vshrl.u32 %v5799_v38, 16  ;;  %v5841_v53 = vshll.u32 %v5799_v38, 16  ;;  %v5727_v34 = vadd.f32 %v12184_v9, %v5683_v59  ;;  %v5684_v18 = vadd.f32 %v5646_v58, %v13327_v54  ;;  %8356 = vmatprep.mubr.bf16.mxu0 %v5832_v3  ;;  %v8278_v19 = vpop.f32.mrb[101].mxu1  ;;  %v13330_v38 = vld [vmem:[#allocation31_spill] sm:$0xff]  ;;  %v13332_v54 = vld [vmem:[#allocation58_spill] sm:$0xff] }
 0x4c3   : > { %v5439_v47 = vadd.f32 %v5438_v27, %v13328_v36  ;;  %v5441_v48 = vpop.f32.mrb[102].mxu1  ;;  %v13331_v27 = vld [vmem:[#allocation136_spill] sm:$0xff]  ;;  %v13333_v36 = vld [vmem:[#allocation137_spill] sm:$0xff] }
 0x4c4   : > { %v5840_v46 = vrot.slane %v5838_v7, 2  ;;  %v5843_v35 = vrot.slane %v5841_v53, 3  ;;  %v5728_v62 = vadd.f32 %v12184_v9, %v5684_v18  ;;  %v8279_v15 = vpop.f32.mrb[103].mxu1  ;;  %v5442_v24 = vadd.f32 %v5441_v48, %v13329_v52 }
 0x4c5   : > { %v5609_v11 = vadd.f32 %v5439_v47, %v11959_v41  ;;  %v5765_v8 = vmax.f32 %v5727_v34, 0.0  ;;  %v5847_v58 = vrot.slane %v5838_v7, 3 }
 0x4c6   : > { %v5844_v17 = vor.u32 %v5843_v35, %v5840_v46  ;;  %v5766_v22 = vmax.f32 %v5728_v62, 0.0  ;;  %v5610_v40 = vadd.f32 %v5442_v24, %v11966_v45 }
 0x4c7   : > { %v5647_v2 = vadd.f32 %v5609_v11, %v11901_v32  ;;  %v5848_v32 = vrot.slane %v5841_v53, 4 }
 0x4c8   : > { %v5800_v12 = vpack.c.bf16 %v5766_v22, %v5765_v8  ;;  %v5845_v29 = vsel %vm3429_vm11, %v5836_v61, %v5844_v17  ;;  %v5648_v41 = vadd.f32 %v5610_v40, %v11911_v20  ;;  %v8790_v20 = vld [vmem:[%s12585_s7 + $0x10] sm:$0xff]  }
 0x4c9   : > { %v5685_v23 = vadd.f32 %v5647_v2, %v13330_v38  ;;  %v5446_v59 = vpop.f32.mrb[104].mxu1  ;;  %8357 = vmatmul.mubr.bf16.vlgmr.msra.gmra.mrb[112].mxu0 %v5845_v29  ;;  %v5849_v15 = vor.u32 %v5848_v32, %v5847_v58  ;;  %v13334_v17 = vld [vmem:[#allocation32_spill] sm:$0xff] }
 0x4ca   : > { %v5447_v3 = vadd.f32 %v5446_v59, %v13331_v27  ;;  %v8282_v33 = vpop.f32.mrb[105].mxu1  ;;  %v5851_v31 = vshrl.u32 %v5800_v12, 16  ;;  %v5854_v45 = vshll.u32 %v5800_v12, 16  ;;  %8389 = vmatpush3.bf16.msra.mxu0 %v12149_v56  ;;  %v5686_v18 = vadd.f32 %v5648_v41, %v13332_v54  ;;  %v13335_v40 = vld [vmem:[#allocation76_spill] sm:$0xff]  ;;  %v13336_v12 = vld [vmem:[#allocation139_spill] sm:$0xff] }
 0x4cb   : > { %v5729_v34 = vadd.f32 %v12184_v9, %v5685_v23  ;;  %v5449_v19 = vpop.f32.mrb[106].mxu1  ;;  %8390 = vmatprep.subr.bf16.mxu0 %v8789_v57  ;;  %v13337_v32 = vld [vmem:[#allocation140_spill] sm:$0xff] }
 0x4cc   : > { %v5611_v7 = vadd.f32 %v5447_v3, %v11979_v5  ;;  %v5450_v47 = vadd.f32 %v5449_v19, %v13333_v36  ;;  %v8283_v48 = vpop.f32.mrb[107].mxu1  ;;  %v5853_v53 = vrot.slane %v5851_v31, 3  ;;  %v5856_v46 = vrot.slane %v5854_v45, 4  ;;  %v8791_v5 = vld [vmem:[%s12585_s7 + $0x18] sm:$0xff]  }
 0x4cd   : > { %v5730_v35 = vadd.f32 %v12184_v9, %v5686_v18  ;;  %v5767_v52 = vmax.f32 %v5729_v34, 0.0  ;;  %v5860_v59 = vrot.slane %v5851_v31, 4  ;;  %v5861_v58 = vrot.slane %v5854_v45, 5 }
 0x4ce   : > { %v5649_v56 = vadd.f32 %v5611_v7, %v11921_v4  ;;  %v5612_v62 = vadd.f32 %v5450_v47, %v11986_v21  ;;  %v5857_v11 = vor.u32 %v5856_v46, %v5853_v53  ;;  %8391 = vmatpush3.bf16.msra.mxu0 %v8789_v57  ;;  %v13338_v53 = vld [vmem:[#allocation78_spill] sm:$0xff] }
 0x4cf   : > { %v5768_v24 = vmax.f32 %v5730_v35, 0.0  ;;  %8392 = vmatprep.subr.bf16.mxu0 %v8790_v20  ;;  %v5862_v36 = vor.u32 %v5861_v58, %v5860_v59  ;;  %v13339_v35 = vld [vmem:[#allocation56_spill] sm:$0xff] }
 0x4d0   : > { %v5687_v8 = vadd.f32 %v5649_v56, %v13334_v17  ;;  %v5650_v22 = vadd.f32 %v5612_v62, %v11928_v49  ;;  %v5858_v61 = vsel %vm3907_vm8, %v5849_v15, %v5857_v11  ;;  %v8792_v49 = vld [vmem:[%s12585_s7 + $0x20] sm:$0xff]   ;;  %v8793_v56 = vld [vmem:[%s12585_s7 + $0x28] sm:$0xff]  }
 0x4d1   : > { %v5801_v2 = vpack.c.bf16 %v5768_v24, %v5767_v52  ;;  %v5454_v4 = vpop.f32.mrb[108].mxu1  ;;  %8360 = vmatprep.mubr.bf16.mxu0 %v5858_v61  ;;  %v13341_v11 = vld [vmem:[#allocation51_spill] sm:$0xff]  ;;  %v13342_v52 = vld [vmem:[#allocation142_spill] sm:$0xff] }
 0x4d2   : > { %v5731_v21 = vadd.f32 %v12184_v9, %v5687_v8  ;;  %v5688_v57 = vadd.f32 %v5650_v22, %v13335_v40  ;;  %v5455_v29 = vadd.f32 %v5454_v4, %v13336_v12  ;;  %v8286_v38 = vpop.f32.mrb[109].mxu1  ;;  %8393 = vmatpush3.bf16.msra.mxu0 %v8790_v20  ;;  %v13343_v40 = vld [vmem:[#allocation143_spill] sm:$0xff] }
 0x4d3   : > { %v5864_v23 = vshrl.u32 %v5801_v2, 16  ;;  %v5867_v41 = vshll.u32 %v5801_v2, 16  ;;  %v5457_v27 = vpop.f32.mrb[110].mxu1  ;;  %8394 = vmatprep.subr.bf16.mxu0 %v8791_v5 }
 0x4d4   : > { %v5732_v3 = vadd.f32 %v12184_v9, %v5688_v57  ;;  %v5613_v33 = vadd.f32 %v5455_v29, %v11996_v1  ;;  %v5458_v34 = vadd.f32 %v5457_v27, %v13337_v32  ;;  %v8287_v54 = vpop.f32.mrb[111].mxu1  ;;  %v5769_v20 = vmax.f32 %v5731_v21, 0.0  ;;  %v8794_v29 = vld [vmem:[%s12585_s7 + $0x30] sm:$0xff]   ;;  %v13345_v32 = vld [vmem:[#allocation42_spill] sm:$0xff] }
 0x4d5   : > { %v5866_v18 = vrot.slane %v5864_v23, 4  ;;  %v5869_v19 = vrot.slane %v5867_v41, 5  ;;  %v5873_v22 = vrot.slane %v5864_v23, 5  ;;  %v5874_v61 = vrot.slane %v5867_v41, 6  ;;  %v13344_v23 = vld [vmem:[#allocation54_spill] sm:$0xff] }
 0x4d6   : > { %v5770_v7 = vmax.f32 %v5732_v3, 0.0  ;;  %v5651_v31 = vadd.f32 %v5613_v33, %v11938_v26  ;;  %v5614_v45 = vadd.f32 %v5458_v34, %v12003_v13  ;;  %8395 = vmatpush3.bf16.msra.mxu0 %v8791_v5  ;;  %v13346_v54 = vld [vmem:[#allocation94_spill] sm:$0xff] }
 0x4d7   : > { %v5870_v47 = vor.u32 %v5869_v19, %v5866_v18  ;;  %8396 = vmatprep.subr.bf16.mxu0 %v8792_v49  ;;  %v5875_v3 = vor.u32 %v5874_v61, %v5873_v22  ;;  %v8795_v19 = vld [vmem:[%s12585_s7 + $0x38] sm:$0xff]  }
 0x4d8   : > { %v5802_v48 = vpack.c.bf16 %v5770_v7, %v5769_v20  ;;  %v5689_v46 = vadd.f32 %v5651_v31, %v13338_v53  ;;  %v5652_v1 = vadd.f32 %v5614_v45, %v13339_v35  ;;  %v13349_v35 = vld [vmem:[#allocation145_spill] sm:$0xff] }
 0x4d9   : > { %v5462_v62 = vpop.f32.mrb[112].mxu1  ;;  %v5871_v15 = vsel %vm13340_vm12, %v5862_v36, %v5870_v47  ;;  %v13351_v61 = vld [vmem:[#allocation97_spill] sm:$0xff] }
 0x4da   : > { %v5733_v26 = vadd.f32 %v12184_v9, %v5689_v46  ;;  %v5690_v13 = vadd.f32 %v5652_v1, %v13341_v11  ;;  %v5463_v24 = vadd.f32 %v5462_v62, %v13342_v52  ;;  %8361 = vmatmul.mubr.bf16.gmra.mrb[116].mxu0 %v5871_v15  ;;  %v8290_v5 = vpop.f32.mrb[113].mxu1  ;;  %v5877_v17 = vshrl.u32 %v5802_v48, 16  ;;  %v13350_v52 = vld [vmem:[#allocation146_spill] sm:$0xff] }
 0x4db   : > { %v5465_v8 = vpop.f32.mrb[114].mxu1  ;;  %v5880_v2 = vshll.u32 %v5802_v48, 16  ;;  %8397 = vmatpush3.bf16.msra.mxu0 %v8792_v49  ;;  %v13348_v48 = vld [vmem:[#allocation28_spill] sm:$0xff] }
 0x4dc   : > { %v5734_v4 = vadd.f32 %v12184_v9, %v5690_v13  ;;  %v5615_v21 = vadd.f32 %v5463_v24, %v12016_v6  ;;  %v5466_v57 = vadd.f32 %v5465_v8, %v13343_v40  ;;  %v8291_v12 = vpop.f32.mrb[115].mxu1  ;;  %8398 = vmatprep.subr.bf16.mxu0 %v8793_v56  ;;  %v5879_v38 = vrot.slane %v5877_v17, 5 }
 0x4dd   : > { %v5882_v59 = vrot.slane %v5880_v2, 6  ;;  %v5771_v58 = vmax.f32 %v5733_v26, 0.0  ;;  %v5886_v31 = vrot.slane %v5877_v17, 6  ;;  %v5887_v45 = vrot.slane %v5880_v2, 7 }
 0x4de   : > { %v5772_v27 = vmax.f32 %v5734_v4, 0.0  ;;  %v5653_v41 = vadd.f32 %v5615_v21, %v13344_v23  ;;  %v5616_v49 = vadd.f32 %v5466_v57, %v12026_v25  ;;  %v13352_v57 = vld [vmem:[#allocation67_spill] sm:$0xff] }
 0x4df   : > { %v5883_v33 = vor.u32 %v5882_v59, %v5879_v38  ;;  %8399 = vmatpush3.bf16.msra.mxu0 %v8793_v56  ;;  %v5888_v22 = vor.u32 %v5887_v45, %v5886_v31 }
 0x4e0   : > { %v5803_v6 = vpack.c.bf16 %v5772_v27, %v5771_v58  ;;  %v5691_v34 = vadd.f32 %v5653_v41, %v13345_v32  ;;  %v5654_v18 = vadd.f32 %v5616_v49, %v13346_v54  ;;  %8400 = vmatprep.subr.bf16.mxu0 %v8794_v29  ;;  %v13355_v49 = vld [vmem:[#allocation38_spill] sm:$0xff] }
 0x4e1   : > { %v5470_v20 = vpop.f32.mrb[116].mxu1  ;;  %v5884_v7 = vsel %vm13347_vm10, %v5875_v3, %v5883_v33 }
 0x4e2   : > { %v5890_v36 = vshrl.u32 %v5803_v6, 16  ;;  %v5893_v25 = vshll.u32 %v5803_v6, 16  ;;  %v5735_v47 = vadd.f32 %v12184_v9, %v5691_v34  ;;  %v5692_v53 = vadd.f32 %v5654_v18, %v13348_v48  ;;  %8364 = vmatprep.mubr.bf16.mxu0 %v5884_v7  ;;  %v8294_v46 = vpop.f32.mrb[117].mxu1  ;;  %v13356_v6 = vld [vmem:[#allocation149_spill] sm:$0xff] }
 0x4e3   : > { %v5471_v1 = vadd.f32 %v5470_v20, %v13349_v35  ;;  %v5473_v56 = vpop.f32.mrb[118].mxu1  ;;  %8401 = vmatpush3.bf16.msra.mxu0 %v8794_v29  ;;  %v13353_v29 = vld [vmem:[#allocation74_spill] sm:$0xff]  ;;  %v13357_v20 = vld [vmem:[#allocation59_spill] sm:$0xff] }
 0x4e4   : > { %v5892_v62 = vrot.slane %v5890_v36, 6  ;;  %v5895_v15 = vrot.slane %v5893_v25, 7  ;;  %v5736_v26 = vadd.f32 %v12184_v9, %v5692_v53  ;;  %v8295_v11 = vpop.f32.mrb[119].mxu1  ;;  %8402 = vmatprep.subr.bf16.mxu0 %v8795_v19  ;;  %v5474_v24 = vadd.f32 %v5473_v56, %v13350_v52  ;;  %v13358_v53 = vld [vmem:[#allocation68_spill] sm:$0xff]  ;;  %v13359_v35 = vld [vmem:[#allocation98_spill] sm:$0xff] }
 0x4e5   : > { %v5617_v13 = vadd.f32 %v5471_v1, %v12036_v0  ;;  %v5773_v17 = vmax.f32 %v5735_v47, 0.0  ;;  %v13354_v0 = vld [vmem:[#allocation148_spill] sm:$0xff]  ;;  %v5899_v45 = vrot.slane %v5890_v36, 7 }
 0x4e6   : > { %v5896_v5 = vor.u32 %v5895_v15, %v5892_v62  ;;  %v5774_v8 = vmax.f32 %v5736_v26, 0.0  ;;  %v5618_v4 = vadd.f32 %v5474_v24, %v12046_v50  ;;  %v13361_v26 = vld [vmem:[#allocation172_spill] sm:$0xff] }
 0x4e7   : > { %v5655_v2 = vadd.f32 %v5617_v13, %v13351_v61  ;;  %8403 = vmatpush3.bf16.msra.mxu0 %v8795_v19  ;;  %v13362_v13 = vld [vmem:[#allocation151_spill] sm:$0xff] }
 0x4e8   : > { %v5897_v21 = vsel %vm884_vm1, %v5888_v22, %v5896_v5  ;;  %v5804_v40 = vpack.c.bf16 %v5774_v8, %v5773_v17  ;;  %v5656_v38 = vadd.f32 %v5618_v4, %v13353_v29  ;;  %v13363_v8 = vld [vmem:[#allocation152_spill] sm:$0xff] }
 0x4e9   : > { %v5693_v12 = vadd.f32 %v5655_v2, %v13352_v57  ;;  %v5478_v59 = vpop.f32.mrb[120].mxu1  ;;  %8365 = vmatmul.mubr.bf16.gmra.mrb[120].mxu0 %v5897_v21  ;;  %v13364_v21 = vld [vmem:[#allocation41_spill] sm:$0xff] }
 0x4ea   : > { %v5479_v58 = vadd.f32 %v5478_v59, %v13354_v0  ;;  %v8298_v27 = vpop.f32.mrb[121].mxu1  ;;  %v5901_v23 = vshrl.u32 %v5804_v40, 16  ;;  %v5694_v3 = vadd.f32 %v5656_v38, %v13355_v49  ;;  %v5904_v18 = vshll.u32 %v5804_v40, 16  ;;  %v13365_v38 = vld [vmem:[#allocation25_spill] sm:$0xff]  ;;  %v13366_v0 = vld [vmem:[#allocation75_spill] sm:$0xff] }
 0x4eb   : > { %v5737_v41 = vadd.f32 %v12184_v9, %v5693_v12  ;;  %v5481_v33 = vpop.f32.mrb[122].mxu1  ;;  %v13367_v49 = vld [vmem:[#allocation173_spill] sm:$0xff] }
 0x4ec   : > { %v5619_v50 = vadd.f32 %v5479_v58, %v12056_v16  ;;  %v5482_v32 = vadd.f32 %v5481_v33, %v13356_v6  ;;  %v8299_v34 = vpop.f32.mrb[123].mxu1  ;;  %v5903_v54 = vrot.slane %v5901_v23, 7  ;;  %v5738_v19 = vadd.f32 %v12184_v9, %v5694_v3  ;;  %v13368_v33 = vld [vmem:[#allocation154_spill] sm:$0xff] }
 0x4ed   : > { %v5775_v47 = vmax.f32 %v5737_v41, 0.0 }
 0x4ee   : > { %v5657_v7 = vadd.f32 %v5619_v50, %v13357_v20  ;;  %v5620_v31 = vadd.f32 %v5482_v32, %v12063_v44  ;;  %v5906_v25 = vor.u32 %v5904_v18, %v5903_v54  ;;  %v5776_v48 = vmax.f32 %v5738_v19, 0.0  ;;  %v13369_v20 = vld [vmem:[#allocation155_spill] sm:$0xff] }
 0x4f0   : > { %v5695_v46 = vadd.f32 %v5657_v7, %v13358_v53  ;;  %v5658_v1 = vadd.f32 %v5620_v31, %v13359_v35  ;;  %v5907_v16 = vsel %vm13360_vm15, %v5899_v45, %v5906_v25  ;;  %v5805_v56 = vpack.c.bf16 %v5776_v48, %v5775_v47  ;;  %v13370_v25 = vld [vmem:[#allocation30_spill] sm:$0xff] }
 0x4f1   : > { %v5486_v62 = vpop.f32.mrb[124].mxu1  ;;  %8368 = vmatprep.mubr.bf16.mxu0 %v5907_v16 }
 0x4f2   : > { %v5739_v15 = vadd.f32 %v12184_v9, %v5695_v46  ;;  %v5696_v11 = vadd.f32 %v5658_v1, %v13361_v26  ;;  %v5487_v52 = vadd.f32 %v5486_v62, %v13362_v13  ;;  %v8302_v44 = vpop.f32.mrb[125].mxu1  ;;  %v5912_v24 = vshll.u32 %v5805_v56, 16  ;;  %v13371_v1 = vld [vmem:[#allocation174_spill] sm:$0xff] }
 0x4f3   : > { %v5489_v36 = vpop.f32.mrb[126].mxu1  ;;  %v5910_v27 = vshrl.u32 %v5805_v56, 16  ;;  %v13372_v56 = vld [vmem:[#allocation99_spill] sm:$0xff] }
 0x4f4   : > { %v5740_v5 = vadd.f32 %v12184_v9, %v5696_v11  ;;  %v5621_v17 = vadd.f32 %v5487_v52, %v12073_v63  ;;  %v5490_v22 = vadd.f32 %v5489_v36, %v13363_v8  ;;  %v8303_v61 = vpop.f32.mrb[127].mxu1  ;;  %v5777_v2 = vmax.f32 %v5739_v15, 0.0  ;;  %v13374_v36 = vld [vmem:[#allocation175_spill] sm:$0xff] }
 0x4f5   : > { %v5914_v12 = vrot.slane %v5912_v24, 1 }
 0x4f6   : > { %v5778_v4 = vmax.f32 %v5740_v5, 0.0  ;;  %v5659_v40 = vadd.f32 %v5621_v17, %v13364_v21  ;;  %v5622_v57 = vadd.f32 %v5490_v22, %v12080_v28  ;;  %v13375_v22 = vld [vmem:[#allocation158_spill] sm:$0xff] }
 0x4f7   : > { %v5915_v34 = vor.u32 %v5914_v12, %v5910_v27 }
 0x4f8   : > { %v5806_v29 = vpack.c.bf16 %v5778_v4, %v5777_v2  ;;  %v5697_v59 = vadd.f32 %v5659_v40, %v13365_v38  ;;  %v5660_v58 = vadd.f32 %v5622_v57, %v13366_v0 }
 0x4f9   : > { %v5494_v23 = vpop.f32.mrb[128].mxu1 }
 0x4fa   : > { %v5917_v41 = vshll.u32 %v5806_v29, 16  ;;  %v5741_v63 = vadd.f32 %v12184_v9, %v5697_v59  ;;  %v5698_v3 = vadd.f32 %v5660_v58, %v13367_v49  ;;  %v5495_v50 = vadd.f32 %v5494_v23, %v13368_v33  ;;  %v8306_v6 = vpop.f32.mrb[129].mxu1  ;;  %v13376_v58 = vld [vmem:[#allocation36_spill] sm:$0xff] }
 0x4fb   : > { %v5497_v32 = vpop.f32.mrb[130].mxu1  ;;  %v5922_v46 = vshrl.u32 %v5806_v29, 16  ;;  %v13377_v23 = vld [vmem:[#allocation40_spill] sm:$0xff]  ;;  %v13379_v6 = vld [vmem:[#allocation159_spill] sm:$0xff] }
 0x4fc   : > { %v5919_v54 = vrot.slane %v5917_v41, 1  ;;  %v5742_v28 = vadd.f32 %v12184_v9, %v5698_v3  ;;  %v5623_v18 = vadd.f32 %v5495_v50, %v12088_v43  ;;  %v8307_v19 = vpop.f32.mrb[131].mxu1  ;;  %v5498_v7 = vadd.f32 %v5497_v32, %v13369_v20  ;;  %v13373_v43 = vld [vmem:[#allocation157_spill] sm:$0xff]  ;;  %v13378_v33 = vld [vmem:[#allocation176_spill] sm:$0xff] }
 0x4fd   : > { %v5779_v31 = vmax.f32 %v5741_v63, 0.0  ;;  %v5924_v17 = vrot.slane %v5922_v46, 1  ;;  %v13381_v46 = vld [vmem:[#allocation60_spill] sm:$0xff] }
 0x4fe   : > { %v5780_v45 = vmax.f32 %v5742_v28, 0.0  ;;  %v5661_v47 = vadd.f32 %v5623_v18, %v13370_v25  ;;  %v5920_v48 = vsel %vm1942_vm3, %v5915_v34, %v5919_v54  ;;  %v5624_v53 = vadd.f32 %v5498_v7, %v12094_v14  ;;  %v13380_v7 = vld [vmem:[#allocation160_spill] sm:$0xff] }
 0x4ff   : > { %8369 = vmatmul.mubr.bf16.gmra.mrb[124].mxu0 %v5920_v48  ;;  %v5925_v14 = vrot.slane %v5917_v41, 2 }
 0x500   : > { %v5807_v35 = vpack.c.bf16 %v5780_v45, %v5779_v31  ;;  %v5699_v16 = vadd.f32 %v5661_v47, %v13371_v1  ;;  %v5662_v62 = vadd.f32 %v5624_v53, %v13372_v56 }
 0x501   : > { %v5502_v15 = vpop.f32.mrb[132].mxu1  ;;  %v5926_v59 = vor.u32 %v5925_v14, %v5924_v17 }
 0x502   : > { %v5503_v26 = vadd.f32 %v5502_v15, %v13373_v43  ;;  %v8310_v11 = vpop.f32.mrb[133].mxu1  ;;  %v5928_v13 = vshrl.u32 %v5807_v35, 16  ;;  %v5931_v52 = vshll.u32 %v5807_v35, 16  ;;  %v5743_v44 = vadd.f32 %v12184_v9, %v5699_v16  ;;  %v13382_v15 = vld [vmem:[#allocation177_spill] sm:$0xff] }
 0x503   : > { %v5700_v24 = vadd.f32 %v5662_v62, %v13374_v36  ;;  %v5505_v5 = vpop.f32.mrb[134].mxu1 }
 0x504   : > { %v5625_v8 = vadd.f32 %v5503_v26, %v12102_v60  ;;  %v5506_v61 = vadd.f32 %v5505_v5, %v13375_v22  ;;  %v8311_v2 = vpop.f32.mrb[135].mxu1  ;;  %v5930_v4 = vrot.slane %v5928_v13, 1  ;;  %v5933_v40 = vrot.slane %v5931_v52, 2  ;;  %v13383_v26 = vld [vmem:[#allocation35_spill] sm:$0xff] }
 0x505   : > { %v5744_v21 = vadd.f32 %v12184_v9, %v5700_v24  ;;  %v5781_v29 = vmax.f32 %v5743_v44, 0.0  ;;  %v5937_v54 = vrot.slane %v5928_v13, 2  ;;  %v5938_v28 = vrot.slane %v5931_v52, 3  ;;  %v13384_v44 = vld [vmem:[#allocation178_spill] sm:$0xff]  ;;  %v13385_v24 = vld [vmem:[#allocation161_spill] sm:$0xff] }
 0x506   : > { %v5663_v57 = vadd.f32 %v5625_v8, %v12052_v39  ;;  %v5626_v12 = vadd.f32 %v5506_v61, %v12108_v10  ;;  %v5934_v0 = vor.u32 %v5933_v40, %v5930_v4 }
 0x507   : > { %v5782_v38 = vmax.f32 %v5744_v21, 0.0  ;;  %v5939_v16 = vor.u32 %v5938_v28, %v5937_v54  ;;  %v13386_v21 = vld [vmem:[#allocation162_spill] sm:$0xff]  ;;  %v13390_v54 = vld [vmem:[#allocation180_spill] sm:$0xff] }
 0x508   : > { %v5701_v27 = vadd.f32 %v5663_v57, %v13376_v58  ;;  %v5664_v41 = vadd.f32 %v5626_v12, %v13377_v23  ;;  %v5935_v49 = vsel %vm2418_vm6, %v5926_v59, %v5934_v0  ;;  %v13387_v0 = vld [vmem:[#allocation61_spill] sm:$0xff] }
 0x509   : > { %v5808_v60 = vpack.c.bf16 %v5782_v38, %v5781_v29  ;;  %v5510_v63 = vpop.f32.mrb[136].mxu1  ;;  %8372 = vmatprep.mubr.bf16.mxu0 %v5935_v49 }
 0x50a   : > { %v5745_v3 = vadd.f32 %v12184_v9, %v5701_v27  ;;  %v5702_v50 = vadd.f32 %v5664_v41, %v13378_v33  ;;  %v5511_v39 = vadd.f32 %v5510_v63, %v13379_v6  ;;  %v8314_v10 = vpop.f32.mrb[137].mxu1  ;;  %v13388_v63 = vld [vmem:[#allocation179_spill] sm:$0xff] }
 0x50b   : > { %v5941_v32 = vshrl.u32 %v5808_v60, 16  ;;  %v5944_v34 = vshll.u32 %v5808_v60, 16  ;;  %v5513_v18 = vpop.f32.mrb[138].mxu1 }
 0x50c   : > { %v5746_v19 = vadd.f32 %v12184_v9, %v5702_v50  ;;  %v5627_v20 = vadd.f32 %v5511_v39, %v12116_v55  ;;  %v5514_v31 = vadd.f32 %v5513_v18, %v13380_v7  ;;  %v8315_v45 = vpop.f32.mrb[139].mxu1  ;;  %v5783_v48 = vmax.f32 %v5745_v3, 0.0  ;;  %v13389_v3 = vld [vmem:[#allocation100_spill] sm:$0xff]  ;;  %v13391_v18 = vld [vmem:[#allocation163_spill] sm:$0xff] }
 0x50d   : > { %v5943_v25 = vrot.slane %v5941_v32, 2  ;;  %v5946_v47 = vrot.slane %v5944_v34, 3  ;;  %v5950_v8 = vrot.slane %v5941_v32, 3  ;;  %v5951_v22 = vrot.slane %v5944_v34, 4 }
 0x50e   : > { %v5784_v53 = vmax.f32 %v5746_v19, 0.0  ;;  %v5665_v35 = vadd.f32 %v5627_v20, %v13381_v46  ;;  %v5628_v1 = vadd.f32 %v5514_v31, %v12122_v37 }
 0x50f   : > { %v5947_v56 = vor.u32 %v5946_v47, %v5943_v25  ;;  %v5952_v23 = vor.u32 %v5951_v22, %v5950_v8  ;;  %v13392_v47 = vld [vmem:[#allocation119_spill] sm:$0xff] }
 0x510   : > { %v5809_v62 = vpack.c.bf16 %v5784_v53, %v5783_v48  ;;  %v5703_v43 = vadd.f32 %v5665_v35, %v13382_v15  ;;  %v5666_v11 = vadd.f32 %v5628_v1, %v13383_v26  ;;  %v13393_v53 = vld [vmem:[#allocation164_spill] sm:$0xff] }
 0x511   : > { %v5518_v13 = vpop.f32.mrb[140].mxu1  ;;  %v5948_v55 = vsel %vm3429_vm11, %v5939_v16, %v5947_v56 }
 0x512   : > { %v5747_v52 = vadd.f32 %v12184_v9, %v5703_v43  ;;  %v5704_v36 = vadd.f32 %v5666_v11, %v13384_v44  ;;  %v5519_v5 = vadd.f32 %v5518_v13, %v13385_v24  ;;  %8373 = vmatmul.mubr.bf16.gmra.mrb[128].mxu0 %v5948_v55  ;;  %v8318_v17 = vpop.f32.mrb[141].mxu1  ;;  %v5954_v14 = vshrl.u32 %v5809_v62, 16  ;;  %v13395_v43 = vld [vmem:[#allocation102_spill] sm:$0xff]  ;;  %v13397_v55 = vld [vmem:[#allocation53_spill] sm:$0xff] }
 0x513   : > { %v5521_v37 = vpop.f32.mrb[142].mxu1  ;;  %v5957_v61 = vshll.u32 %v5809_v62, 16  ;;  %v13394_v62 = vld [vmem:[#allocation26_spill] sm:$0xff]  ;;  %v13398_v44 = vld [vmem:[#allocation57_spill] sm:$0xff] }
 0x514   : > { %v5748_v2 = vadd.f32 %v12184_v9, %v5704_v36  ;;  %v5629_v4 = vadd.f32 %v5519_v5, %v12130_v51  ;;  %v5522_v40 = vadd.f32 %v5521_v37, %v13386_v21  ;;  %v8319_v57 = vpop.f32.mrb[143].mxu1  ;;  %v5956_v12 = vrot.slane %v5954_v14, 3  ;;  %v13399_v17 = vld [vmem:[#allocation45_spill] sm:$0xff] }
 0x515   : > { %v5959_v29 = vrot.slane %v5957_v61, 4  ;;  %v5785_v38 = vmax.f32 %v5747_v52, 0.0  ;;  %v5963_v6 = vrot.slane %v5954_v14, 4  ;;  %v5964_v39 = vrot.slane %v5957_v61, 5  ;;  %v13401_v57 = vld [vmem:[#allocation37_spill] sm:$0xff] }
 0x516   : > { %v5786_v59 = vmax.f32 %v5748_v2, 0.0  ;;  %v5667_v58 = vadd.f32 %v5629_v4, %v13387_v0  ;;  %v5630_v27 = vadd.f32 %v5522_v40, %v12136_v42  ;;  %v13400_v4 = vld [vmem:[#allocation181_spill] sm:$0xff] }
 0x517   : > { %v5960_v41 = vor.u32 %v5959_v29, %v5956_v12  ;;  %v5965_v16 = vor.u32 %v5964_v39, %v5963_v6  ;;  %v13402_v29 = vld [vmem:[#allocation43_spill] sm:$0xff] }
 0x518   : > { %v5810_v60 = vpack.c.bf16 %v5786_v59, %v5785_v38  ;;  %v5705_v49 = vadd.f32 %v5667_v58, %v13388_v63  ;;  %v5668_v33 = vadd.f32 %v5630_v27, %v13389_v3  ;;  %v13406_v39 = vld [vmem:[#allocation23_spill] sm:$0xff] }
 0x519   : > { %v5526_v50 = vpop.f32.mrb[144].mxu1  ;;  %v5961_v51 = vsel %vm3907_vm8, %v5952_v23, %v5960_v41  ;;  %v13403_v23 = vld [vmem:[#allocation118_spill] sm:$0xff] }
 0x51a   : > { %v5967_v10 = vshrl.u32 %v5810_v60, 16  ;;  %v5970_v32 = vshll.u32 %v5810_v60, 16  ;;  %v5749_v34 = vadd.f32 %v12184_v9, %v5705_v49  ;;  %v5706_v28 = vadd.f32 %v5668_v33, %v13390_v54  ;;  %8376 = vmatprep.mubr.bf16.mxu0 %v5961_v51  ;;  %v8322_v42 = vpop.f32.mrb[145].mxu1  ;;  %v13404_v60 = vld [vmem:[#allocation90_spill] sm:$0xff] }
 0x51b   : > { %v5527_v19 = vadd.f32 %v5526_v50, %v13391_v18  ;;  %v5529_v20 = vpop.f32.mrb[146].mxu1  ;;  %v13405_v51 = vld [vmem:[#allocation182_spill] sm:$0xff]  ;;  %v13408_v42 = vld [vmem:[#allocation183_spill] sm:$0xff] }
 0x51c   : > { %v5969_v7 = vrot.slane %v5967_v10, 4  ;;  %v5972_v31 = vrot.slane %v5970_v32, 5  ;;  %v5750_v45 = vadd.f32 %v12184_v9, %v5706_v28  ;;  %v8323_v25 = vpop.f32.mrb[147].mxu1  ;;  %v5530_v46 = vadd.f32 %v5529_v20, %v13393_v53 }
 0x51d   : > { %v5631_v48 = vadd.f32 %v5527_v19, %v13392_v47  ;;  %v5787_v35 = vmax.f32 %v5749_v34, 0.0  ;;  %v5976_v5 = vrot.slane %v5967_v10, 5  ;;  %v5977_v8 = vrot.slane %v5970_v32, 6  ;;  %v13409_v19 = vld [vmem:[#allocation47_spill] sm:$0xff] }
 0x51e   : > { %v5788_v1 = vmax.f32 %v5750_v45, 0.0  ;;  %v5973_v56 = vor.u32 %v5972_v31, %v5969_v7  ;;  %v5632_v26 = vadd.f32 %v5530_v46, %v13395_v43 }
 0x51f   : > { %v5669_v15 = vadd.f32 %v5631_v48, %v13394_v62  ;;  %v5978_v49 = vor.u32 %v5977_v8, %v5976_v5  ;;  %v13414_v5 = vld [vmem:[#allocation27_spill] sm:$0xff] }
 0x520   : > { %v5811_v11 = vpack.c.bf16 %v5788_v1, %v5787_v35  ;;  %v5974_v13 = vsel %vm13396_vm5, %v5965_v16, %v5973_v56  ;;  %v5670_v36 = vadd.f32 %v5632_v26, %v13398_v44  ;;  %v13410_v35 = vld [vmem:[#allocation165_spill] sm:$0xff] }
 0x521   : > { %v5707_v52 = vadd.f32 %v5669_v15, %v13397_v55  ;;  %v5534_v24 = vpop.f32.mrb[148].mxu1  ;;  %8377 = vmatmul.mubr.bf16.gmra.mrb[132].mxu0 %v5974_v13  ;;  %v13411_v26 = vld [vmem:[#allocation101_spill] sm:$0xff]  ;;  %v13412_v13 = vld [vmem:[#allocation120_spill] sm:$0xff] }
 0x522   : > { %v5535_v14 = vadd.f32 %v5534_v24, %v13399_v17  ;;  %v8326_v37 = vpop.f32.mrb[149].mxu1  ;;  %v5980_v22 = vshrl.u32 %v5811_v11, 16  ;;  %v5983_v61 = vshll.u32 %v5811_v11, 16  ;;  %v5708_v21 = vadd.f32 %v5670_v36, %v13400_v4  ;;  %v13413_v36 = vld [vmem:[#allocation184_spill] sm:$0xff] }
 0x523   : > { %v5751_v2 = vadd.f32 %v12184_v9, %v5707_v52  ;;  %v5537_v40 = vpop.f32.mrb[150].mxu1 }
 0x524   : > { %v5633_v12 = vadd.f32 %v5535_v14, %v13401_v57  ;;  %v5538_v38 = vadd.f32 %v5537_v40, %v13402_v29  ;;  %v8327_v59 = vpop.f32.mrb[151].mxu1  ;;  %v5982_v0 = vrot.slane %v5980_v22, 5  ;;  %v5985_v58 = vrot.slane %v5983_v61, 6 }
 0x525   : > { %v5752_v27 = vadd.f32 %v12184_v9, %v5708_v21  ;;  %v5789_v33 = vmax.f32 %v5751_v2, 0.0  ;;  %v5989_v25 = vrot.slane %v5980_v22, 6  ;;  %v5990_v47 = vrot.slane %v5983_v61, 7  ;;  %v13415_v22 = vld [vmem:[#allocation185_spill] sm:$0xff]  ;;  %v13416_v2 = vld [vmem:[#allocation167_spill] sm:$0xff] }
 0x526   : > { %v5671_v41 = vadd.f32 %v5633_v12, %v13403_v23  ;;  %v5634_v63 = vadd.f32 %v5538_v38, %v13404_v60  ;;  %v5986_v3 = vor.u32 %v5985_v58, %v5982_v0  ;;  %v13417_v12 = vld [vmem:[#allocation6_spill] sm:$0xff]  ;;  %v13418_v38 = vld [vmem:[#allocation63_spill] sm:$0xff] }
 0x527   : > { %v5790_v50 = vmax.f32 %v5752_v27, 0.0  ;;  %v5991_v44 = vor.u32 %v5990_v47, %v5989_v25  ;;  %v13419_v0 = vld [vmem:[#allocation50_spill] sm:$0xff]  ;;  %v13427_v25 = vld [vmem:[#allocation8_spill] sm:$0xff] }
 0x528   : > { %v5709_v6 = vadd.f32 %v5671_v41, %v13405_v51  ;;  %v5672_v10 = vadd.f32 %v5634_v63, %v13406_v39  ;;  %v5987_v32 = vsel %vm13407_vm0, %v5978_v49, %v5986_v3  ;;  %v13420_v49 = vld [vmem:[#allocation89_spill] sm:$0xff] }
 0x529   : > { %v5812_v34 = vpack.c.bf16 %v5790_v50, %v5789_v33  ;;  %v5542_v54 = vpop.f32.mrb[152].mxu1  ;;  %8380 = vmatprep.mubr.bf16.mxu0 %v5987_v32  ;;  %v13421_v33 = vld [vmem:[#allocation49_spill] sm:$0xff] }
 0x52a   : > { %v5753_v28 = vadd.f32 %v12184_v9, %v5709_v6  ;;  %v5710_v18 = vadd.f32 %v5672_v10, %v13408_v42  ;;  %v5543_v20 = vadd.f32 %v5542_v54, %v13409_v19  ;;  %v8330_v7 = vpop.f32.mrb[153].mxu1  ;;  %v13422_v10 = vld [vmem:[#allocation186_spill] sm:$0xff]  ;;  %v13425_v19 = vld [vmem:[#allocation187_spill] sm:$0xff] }
 0x52b   : > { %v5993_v31 = vshrl.u32 %v5812_v34, 16  ;;  %v5996_v45 = vshll.u32 %v5812_v34, 16  ;;  %v5545_v48 = vpop.f32.mrb[154].mxu1  ;;  %v13423_v34 = vld [vmem:[#allocation62_spill] sm:$0xff]  ;;  %v13426_v7 = vld [vmem:[#allocation7_spill] sm:$0xff] }
 0x52c   : > { %v5754_v53 = vadd.f32 %v12184_v9, %v5710_v18  ;;  %v5635_v46 = vadd.f32 %v5543_v20, %v12165_v30  ;;  %v5546_v1 = vadd.f32 %v5545_v48, %v13410_v35  ;;  %v8331_v16 = vpop.f32.mrb[155].mxu1  ;;  %v5791_v15 = vmax.f32 %v5753_v28, 0.0 }
 0x52d   : > { %v5995_v56 = vrot.slane %v5993_v31, 6  ;;  %v5998_v62 = vrot.slane %v5996_v45, 7  ;;  %v6002_v51 = vrot.slane %v5993_v31, 7 }
 0x52e   : > { %v5792_v43 = vmax.f32 %v5754_v53, 0.0  ;;  %v5673_v11 = vadd.f32 %v5635_v46, %v13411_v26  ;;  %v5636_v55 = vadd.f32 %v5546_v1, %v13412_v13 }
 0x52f   : > { %v5999_v52 = vor.u32 %v5998_v62, %v5995_v56 }
 0x530   : > { %v5711_v24 = vadd.f32 %v5673_v11, %v13413_v36  ;;  %v5674_v17 = vadd.f32 %v5636_v55, %v13414_v5  ;;  %v5813_v14 = vpack.c.bf16 %v5792_v43, %v5791_v15  ;;  %v13428_v15 = vld [vmem:[#allocation9_spill] sm:$0xff]  ;;  %v13429_v43 = vld [vmem:[#allocation10_spill] sm:$0xff]  ;;  %v13430_v55 = vld [vmem:[#allocation11_spill] sm:$0xff] }
 0x531   : > { %v5550_v37 = vpop.f32.mrb[156].mxu1  ;;  %v6000_v30 = vsel %vm884_vm1, %v5991_v44, %v5999_v52  ;;  %vm13424_vm1 = vmmov %vm12730_vm2  ;;  %v13432_v52 = vld [vmem:[#allocation13_spill] sm:$0xff]  ;;  %v13433_v44 = vld [vmem:[#allocation14_spill] sm:$0xff] }
 0x532   : > { %v5755_v8 = vadd.f32 %v12184_v9, %v5711_v24  ;;  %v5712_v61 = vadd.f32 %v5674_v17, %v13415_v22  ;;  %v5551_v4 = vadd.f32 %v5550_v37, %v13416_v2  ;;  %8381 = vmatmul.mubr.bf16.gmra.mrb[136].mxu0 %v6000_v30  ;;  %v8334_v21 = vpop.f32.mrb[157].mxu1  ;;  %v6004_v40 = vshrl.u32 %v5813_v14, 16  ;;  %v13434_v36 = vld [vmem:[#allocation15_spill] sm:$0xff]  ;;  %v13435_v24 = vld [vmem:[#allocation16_spill] sm:$0xff]  ;;  %v13436_v5 = vld [vmem:[#allocation17_spill] sm:$0xff] }
 0x533   : > { %v5553_v57 = vpop.f32.mrb[158].mxu1  ;;  %8404 = vmatprep.mubr.bf16.mxu0 %v13417_v12  ;;  %v6007_v41 = vshll.u32 %v5813_v14, 16  ;;  %v13437_v17 = vld [vmem:[#allocation18_spill] sm:$0xff]  ;;  %v13438_v14 = vld [vmem:[#allocation19_spill] sm:$0xff]  ;;  %v13439_v37 = vld [vmem:[#allocation20_spill] sm:$0xff] }
 0x534   : > { %v5756_v29 = vadd.f32 %v12184_v9, %v5712_v61  ;;  %v5637_v59 = vadd.f32 %v5551_v4, %v13418_v38  ;;  %v5554_v58 = vadd.f32 %v5553_v57, %v13419_v0  ;;  %v8335_v27 = vpop.f32.mrb[159].mxu1  ;;  %v6006_v23 = vrot.slane %v6004_v40, 7  ;;  %v13440_v30 = vld [vmem:[#allocation21_spill] sm:$0xff]  ;;  %v12433_v22 = vld [vmem:[%s12586_s8] ss:$0 sm:$0xff] }
 0x535   : > { %v5793_v60 = vmax.f32 %v5755_v8, 0.0  ;;  %v12428_v8 = vld [vmem:[%s12584_s6] ss:$0 sm:$0xff] }
 0x536   : > { %v5794_v63 = vmax.f32 %v5756_v29, 0.0  ;;  %v5675_v3 = vadd.f32 %v5637_v59, %v13420_v49  ;;  %v5638_v50 = vadd.f32 %v5554_v58, %v13421_v33  ;;  %v6009_v6 = vor.u32 %v6007_v41, %v6006_v23 }
 0x537   : > { %v12438_v61 = vadd.f32 %v12433_v22, %v12428_v8 }
 0x538   : > { %v5814_v39 = vpack.c.bf16 %v5794_v63, %v5793_v60  ;;  %v5713_v32 = vadd.f32 %v5675_v3, %v13422_v10  ;;  %v5676_v54 = vadd.f32 %v5638_v50, %v13423_v34  ;;  %v6010_v28 = vsel %vm13424_vm1, %v6002_v51, %v6009_v6 }
 0x539   : > { %v5558_v42 = vpop.f32.mrb[160].mxu1  ;;  %8384 = vmatprep.mubr.bf16.mxu1 %v6010_v28 }
 0x53a   : > { %v5757_v18 = vadd.f32 %v12184_v9, %v5713_v32  ;;  %v5714_v20 = vadd.f32 %v5676_v54, %v13425_v19  ;;  %8405 = vmatmul.mubr.bf16.vlgmr.msra.gmra.mrb[112].mxu0 %v13426_v7  ;;  %v8338_v45 = vpop.f32.mrb[161].mxu1  ;;  %v6015_v47 = vshll.u32 %v5814_v39, 16  ;;  %v6013_v56 = vshrl.u32 %v5814_v39, 16 }
 0x53b   : > { %8408 = vmatprep.mubr.bf16.mxu0 %v13427_v25  ;;  %v5560_v31 = vpop.f32.mrb[162].mxu1 }
 0x53c   : > { %v5758_v48 = vadd.f32 %v12184_v9, %v5714_v20  ;;  %v8339_v53 = vpop.f32.mrb[163].mxu1  ;;  %v5795_v46 = vmax.f32 %v5757_v18, 0.0  ;;  %v6017_v1 = vrot.slane %v6015_v47, 1  ;;  %v13431_v9 = vld [vmem:[#allocation12_spill] sm:$0xff] }
 0x53e   : > { %v5796_v35 = vmax.f32 %v5758_v48, 0.0  ;;  %v6018_v26 = vor.u32 %v6017_v1, %v6013_v56 }
 0x540   : > { %v5815_v16 = vpack.c.bf16 %v5796_v35, %v5795_v46 }
 0x542   : > { %v6020_v62 = vshll.u32 %v5815_v16, 16  ;;  %8409 = vmatmul.mubr.bf16.gmra.mrb[116].mxu0 %v13428_v15 }
 0x543   : > { %8412 = vmatprep.mubr.bf16.mxu0 %v13429_v43 }
 0x544   : > { %v6022_v11 = vrot.slane %v6020_v62, 1 }
 0x546   : > { %v6023_v13 = vsel %vm1942_vm3, %v6018_v26, %v6022_v11 }
 0x547   : > { %8385 = vmatmul.mubr.bf16.vlgmr.msra.gmra.mrb[164].mxu1 %v6023_v13 }
 0x54a   : > { %8413 = vmatmul.mubr.bf16.gmra.mrb[120].mxu0 %v13430_v55 }
 0x54b   : > { %8416 = vmatprep.mubr.bf16.mxu0 %v13431_v9 }
 0x552   : > { %8417 = vmatmul.mubr.bf16.gmra.mrb[124].mxu0 %v13432_v52 }
 0x553   : > { %8420 = vmatprep.mubr.bf16.mxu0 %v13433_v44 }
 0x55a   : > { %8421 = vmatmul.mubr.bf16.gmra.mrb[128].mxu0 %v13434_v36 }
 0x55b   : > { %8424 = vmatprep.mubr.bf16.mxu0 %v13435_v24 }
 0x562   : > { %8425 = vmatmul.mubr.bf16.gmra.mrb[132].mxu0 %v13436_v5 }
 0x563   : > { %8428 = vmatprep.mubr.bf16.mxu0 %v13437_v17 }
 0x56a   : > { %8429 = vmatmul.mubr.bf16.gmra.mrb[136].mxu0 %v13438_v14 }
 0x56b   : > { %8432 = vmatprep.mubr.bf16.mxu0 %v13439_v37 }
 0x572   : > { %8433 = vmatmul.mubr.bf16.gmra.mrb[140].mxu0 %v13440_v30 }
 0x60d   : > { %v8406_v2 = vpop.f32.mrb[112].mxu0 }
 0x60e   : > { %v8452_v4 = vadd.f32 %v8406_v2, %v12428_v8  ;;  %v6345_v21 = vpop.f32.mrb[113].mxu0 }
 0x60f   : > { %v8454_v40 = vadd.f32 %v12428_v8, %v6345_v21  ;;  %v8407_v57 = vpop.f32.mrb[114].mxu0 }
 0x610   : > { %v8453_v12 = vadd.f32 %v8452_v4, %v12433_v22  ;;  %v8457_v29 = vadd.f32 %v12438_v61, %v8407_v57  ;;  %v6348_v38 = vpop.f32.mrb[115].mxu0 }
 0x611   : > { %v8455_v59 = vadd.f32 %v8454_v40, %v12433_v22  ;;  %v8459_v0 = vadd.f32 %v12438_v61, %v6348_v38 }
 0x612   : > { %v6506_v58 = vmax.f32 %v8453_v12, 0.0  ;;  %v6507_v27 = vmax.f32 %v8457_v29, 0.0 }
 0x613   : > { %v6504_v23 = vmax.f32 %v8455_v59, 0.0  ;;  %v6505_v41 = vmax.f32 %v8459_v0, 0.0 }
 0x614   : > { %6538 = vst [vmem:[%s12448_s27 + $0x10] sm:$0xff] %v6506_v58  ;;  %6539 = vst [vmem:[%s12448_s27 + $0x18] sm:$0xff] %v6507_v27 }
 0x615   : > { %6536 = vst [vmem:[%s12448_s27] sm:$0xff] %v6504_v23  ;;  %6537 = vst [vmem:[%s12448_s27 + $0x8] sm:$0xff] %v6505_v41  ;;  %v8410_v60 = vpop.f32.mrb[116].mxu0 }
 0x616   : > { %v8461_v63 = vadd.f32 %v12438_v61, %v8410_v60  ;;  %v6361_v49 = vpop.f32.mrb[117].mxu0 }
 0x617   : > { %v8463_v3 = vadd.f32 %v12438_v61, %v6361_v49  ;;  %v8411_v33 = vpop.f32.mrb[118].mxu0 }
 0x618   : > { %v6510_v50 = vmax.f32 %v8461_v63, 0.0  ;;  %v8465_v51 = vadd.f32 %v12438_v61, %v8411_v33  ;;  %v6364_v6 = vpop.f32.mrb[119].mxu0 }
 0x619   : > { %v6508_v39 = vmax.f32 %v8463_v3, 0.0  ;;  %v8467_v10 = vadd.f32 %v12438_v61, %v6364_v6 }
 0x61a   : > { %6542 = vst [vmem:[%s12448_s27 + $0x30] sm:$0xff] %v6510_v50  ;;  %v6511_v32 = vmax.f32 %v8465_v51, 0.0  ;;  %v12459_v34 = vpop.f32.mrb[164].mxu1 }
 0x61b   : > { %6540 = vst [vmem:[%s12448_s27 + $0x20] sm:$0xff] %v6508_v39  ;;  %v6509_v54 = vmax.f32 %v8467_v10, 0.0  ;;  %v12462_v28 = vpop.f32.mrb[165].mxu1  ;;  %v6234_v39 = vadd.f32 %v12459_v34, %v12428_v8 }
 0x61c   : > { %6543 = vst [vmem:[%s12448_s27 + $0x38] sm:$0xff] %v6511_v32  ;;  %v12465_v42 = vpop.f32.mrb[166].mxu1 }
 0x61d   : > { %6541 = vst [vmem:[%s12448_s27 + $0x28] sm:$0xff] %v6509_v54  ;;  %v8414_v18 = vpop.f32.mrb[120].mxu0  ;;  %v12468_v19 = vpop.f32.mrb[167].mxu1 }
 0x61e   : > { %v8469_v20 = vadd.f32 %v12438_v61, %v8414_v18  ;;  %v6377_v7 = vpop.f32.mrb[121].mxu0  ;;  %v6226_v18 = vadd.f32 %v12428_v8, %v12462_v28  ;;  %v6229_v34 = vadd.f32 %v12428_v8, %v12468_v19 }
 0x61f   : > { %v8471_v45 = vadd.f32 %v12438_v61, %v6377_v7  ;;  %v8415_v25 = vpop.f32.mrb[122].mxu0 }
 0x620   : > { %v6514_v31 = vmax.f32 %v8469_v20, 0.0  ;;  %v8473_v47 = vadd.f32 %v12438_v61, %v8415_v25  ;;  %v6380_v48 = vpop.f32.mrb[123].mxu0 }
 0x621   : > { %v6512_v53 = vmax.f32 %v8471_v45, 0.0  ;;  %v8475_v46 = vadd.f32 %v12438_v61, %v6380_v48  ;;  %v6237_v45 = vadd.f32 %v12465_v42, %v12428_v8  ;;  %v8518_v8 = vadd.f32 %v12433_v22, %v6229_v34 }
 0x622   : > { %6546 = vst [vmem:[%s12448_s27 + $0x50] sm:$0xff] %v6514_v31  ;;  %v6515_v35 = vmax.f32 %v8473_v47, 0.0  ;;  %v8509_v47 = vadd.f32 %v12433_v22, %v6234_v39 }
 0x623   : > { %6544 = vst [vmem:[%s12448_s27 + $0x40] sm:$0xff] %v6512_v53  ;;  %v6513_v1 = vmax.f32 %v8475_v46, 0.0  ;;  %v8515_v42 = vadd.f32 %v12433_v22, %v6237_v45 }
 0x624   : > { %6547 = vst [vmem:[%s12448_s27 + $0x58] sm:$0xff] %v6515_v35 }
 0x625   : > { %6545 = vst [vmem:[%s12448_s27 + $0x48] sm:$0xff] %v6513_v1  ;;  %v8418_v16 = vpop.f32.mrb[124].mxu0 }
 0x626   : > { %v8477_v56 = vadd.f32 %v12438_v61, %v8418_v16  ;;  %v6393_v62 = vpop.f32.mrb[125].mxu0 }
 0x627   : > { %v8479_v15 = vadd.f32 %v12438_v61, %v6393_v62  ;;  %v8419_v43 = vpop.f32.mrb[126].mxu0 }
 0x628   : > { %v6518_v26 = vmax.f32 %v8477_v56, 0.0  ;;  %v8481_v11 = vadd.f32 %v12438_v61, %v8419_v43  ;;  %v6396_v13 = vpop.f32.mrb[127].mxu0 }
 0x629   : > { %v6516_v55 = vmax.f32 %v8479_v15, 0.0  ;;  %v8483_v9 = vadd.f32 %v12438_v61, %v6396_v13 }
 0x62a   : > { %6550 = vst [vmem:[%s12448_s27 + $0x70] sm:$0xff] %v6518_v26  ;;  %v6519_v52 = vmax.f32 %v8481_v11, 0.0 }
 0x62b   : > { %6548 = vst [vmem:[%s12448_s27 + $0x60] sm:$0xff] %v6516_v55  ;;  %v6517_v44 = vmax.f32 %v8483_v9, 0.0 }
 0x62c   : > { %6551 = vst [vmem:[%s12448_s27 + $0x78] sm:$0xff] %v6519_v52 }
 0x62d   : > { %6549 = vst [vmem:[%s12448_s27 + $0x68] sm:$0xff] %v6517_v44  ;;  %v8422_v36 = vpop.f32.mrb[128].mxu0 }
 0x62e   : > { %v8485_v24 = vadd.f32 %v12438_v61, %v8422_v36  ;;  %v6409_v5 = vpop.f32.mrb[129].mxu0 }
 0x62f   : > { %v8487_v17 = vadd.f32 %v12438_v61, %v6409_v5  ;;  %v8423_v14 = vpop.f32.mrb[130].mxu0 }
 0x630   : > { %v6522_v37 = vmax.f32 %v8485_v24, 0.0  ;;  %v8489_v30 = vadd.f32 %v12438_v61, %v8423_v14  ;;  %v6412_v2 = vpop.f32.mrb[131].mxu0 }
 0x631   : > { %v6520_v4 = vmax.f32 %v8487_v17, 0.0  ;;  %v8491_v21 = vadd.f32 %v12438_v61, %v6412_v2 }
 0x632   : > { %6554 = vst [vmem:[%s12448_s27 + $0x90] sm:$0xff] %v6522_v37  ;;  %v6523_v40 = vmax.f32 %v8489_v30, 0.0 }
 0x633   : > { %6552 = vst [vmem:[%s12448_s27 + $0x80] sm:$0xff] %v6520_v4  ;;  %v6521_v57 = vmax.f32 %v8491_v21, 0.0 }
 0x634   : > { %6555 = vst [vmem:[%s12448_s27 + $0x98] sm:$0xff] %v6523_v40 }
 0x635   : > { %6553 = vst [vmem:[%s12448_s27 + $0x88] sm:$0xff] %v6521_v57  ;;  %v8426_v12 = vpop.f32.mrb[132].mxu0 }
 0x636   : > { %v8493_v29 = vadd.f32 %v12438_v61, %v8426_v12  ;;  %v6425_v38 = vpop.f32.mrb[133].mxu0 }
 0x637   : > { %v8495_v59 = vadd.f32 %v12438_v61, %v6425_v38  ;;  %v8427_v0 = vpop.f32.mrb[134].mxu0 }
 0x638   : > { %v6526_v58 = vmax.f32 %v8493_v29, 0.0  ;;  %v8497_v27 = vadd.f32 %v12438_v61, %v8427_v0  ;;  %v6428_v23 = vpop.f32.mrb[135].mxu0 }
 0x639   : > { %v6524_v41 = vmax.f32 %v8495_v59, 0.0  ;;  %v8499_v60 = vadd.f32 %v12438_v61, %v6428_v23 }
 0x63a   : > { %6558 = vst [vmem:[%s12448_s27 + $0xb0] sm:$0xff] %v6526_v58  ;;  %v6527_v63 = vmax.f32 %v8497_v27, 0.0 }
 0x63b   : > { %6556 = vst [vmem:[%s12448_s27 + $0xa0] sm:$0xff] %v6524_v41  ;;  %v6525_v49 = vmax.f32 %v8499_v60, 0.0 }
 0x63c   : > { %6559 = vst [vmem:[%s12448_s27 + $0xb8] sm:$0xff] %v6527_v63 }
 0x63d   : > { %6557 = vst [vmem:[%s12448_s27 + $0xa8] sm:$0xff] %v6525_v49  ;;  %v8430_v3 = vpop.f32.mrb[136].mxu0 }
 0x63e   : > { %v8501_v33 = vadd.f32 %v12438_v61, %v8430_v3  ;;  %v6441_v50 = vpop.f32.mrb[137].mxu0 }
 0x63f   : > { %v8503_v51 = vadd.f32 %v12438_v61, %v6441_v50  ;;  %v8431_v6 = vpop.f32.mrb[138].mxu0 }
 0x640   : > { %v6530_v10 = vmax.f32 %v8501_v33, 0.0  ;;  %v8505_v32 = vadd.f32 %v12438_v61, %v8431_v6  ;;  %v6444_v54 = vpop.f32.mrb[139].mxu0 }
 0x641   : > { %v6528_v20 = vmax.f32 %v8503_v51, 0.0  ;;  %v8507_v7 = vadd.f32 %v12438_v61, %v6444_v54  ;;  %v8512_v61 = vadd.f32 %v12433_v22, %v6226_v18 }
 0x642   : > { %6562 = vst [vmem:[%s12448_s27 + $0xd0] sm:$0xff] %v6530_v10  ;;  %v6531_v25 = vmax.f32 %v8505_v32, 0.0 }
 0x643   : > { %6560 = vst [vmem:[%s12448_s27 + $0xc0] sm:$0xff] %v6528_v20  ;;  %v6529_v31 = vmax.f32 %v8507_v7, 0.0 }
 0x644   : > { %6563 = vst [vmem:[%s12448_s27 + $0xd8] sm:$0xff] %v6531_v25 }
 0x645   : > { %6561 = vst [vmem:[%s12448_s27 + $0xc8] sm:$0xff] %v6529_v31  ;;  %v8434_v28 = vpop.f32.mrb[140].mxu0 }
 0x646   : > { %v8510_v48 = vadd.f32 %v8509_v47, %v8434_v28  ;;  %v6457_v53 = vpop.f32.mrb[141].mxu0 }
 0x647   : > { %v8513_v46 = vadd.f32 %v8512_v61, %v6457_v53  ;;  %v8435_v35 = vpop.f32.mrb[142].mxu0 }
 0x648   : > { %v6534_v19 = vmax.f32 %v8510_v48, 0.0  ;;  %v8516_v1 = vadd.f32 %v8515_v42, %v8435_v35  ;;  %v6460_v16 = vpop.f32.mrb[143].mxu0 }
 0x649   : > { %v6532_v56 = vmax.f32 %v8513_v46, 0.0  ;;  %v8519_v62 = vadd.f32 %v8518_v8, %v6460_v16 }
 0x64a   : > { %6566 = vst [vmem:[%s12448_s27 + $0xf0] sm:$0xff] %v6534_v19  ;;  %v6535_v15 = vmax.f32 %v8516_v1, 0.0 }
 0x64b   : > { %6564 = vst [vmem:[%s12448_s27 + $0xe0] sm:$0xff] %v6532_v56  ;;  %v6533_v22 = vmax.f32 %v8519_v62, 0.0 }
 0x64c   : > { %6567 = vst [vmem:[%s12448_s27 + $0xf8] sm:$0xff] %v6535_v15 }
 0x64d   : > { %6565 = vst [vmem:[%s12448_s27 + $0xe8] sm:$0xff] %v6533_v22 }
 0x64e   : > { %8833 = shalt.err (!%p8830_p3)
}
 0x64f   : > { %s8834_s25 = scalar_lea.hbm %s12528_s21, 4096  ;;  %s8838_s28 = scalar_lea.hbm %s12587_s9, 8192 }
 0x650   : > { %p8835_p4 = scmp.ne.s32.totalorder %s12528_s21, %s8834_s25  ;;  %p8839_p9 = scmp.lt.u32.totalorder %s12528_s21, %s12587_s9 }
 0x651   : > { %p8840_p10 = scmp.lt.u32.totalorder %s8838_s28, %s8834_s25  ;;  %p8842_p12 = scmp.lt.u32.totalorder %s8834_s25, %s12528_s21 }
 0x652   : > { %p8836_p7 = pnand %p8835_p4, %p8978_p5 }
 0x653   : > { %p8841_p11 = por %p8840_p10, %p8839_p9 }
 0x654   : > { %p8837_p8 = pneg %p8836_p7 }
 0x655   : > { %p8843_p13 = por %p8842_p12, %p8841_p11 }
 0x657   : > { %p8844_p0 = pnand %p8843_p13, %p8837_p8 }
 0x659   : > { %8847 = shalt.err (!%p8844_p0)
}
 0x65a   : > { %s8888_s22 = smov 128   ;;  %s8889_s23 = smov 8  }
 0x65b   : > { %8548 = dma.vmem_to_hbm [thread:$0]  (%p8978_p5), %s12530_s29, 4096, %s12528_s21, %s12537_s13, %s8888_s22, %s8888_s22, %s8889_s23  }
 0x65c PF: > { %p8554_p1 = scmp.ge.s32.totalorder %s8882_s12, 2  ;;  %s6597_s16 = sand.u32 1, %s8870_s30  }
 0x65d   : > { %s6598_s24 = scalar_lea.sflag [#allocation4], %s6597_s16 }
 0x65e   : > { %p8551_p2 = pnand %p8554_p1, %p8982_p6 }
 0x660   : > { %8865 = dma.done.wait (!%p8551_p2), %s6598_s24, 4096  }
 0x661   : > { %8867 = vsyncadd (!%p8551_p2), %s6598_s24, 4294963200  ;;  %p19_p3 = scmp.ge.s32.totalorder %s8965_s15, 4   ;;  %s13441_s30 = smov %s8874_s10 }
 0x662   : > { %s13442_s10 = smov %s8878_s11  ;;  %s13443_s11 = smov %s8976_s18 }
 0x663   : > { %s13444_s12 = smov %s8965_s15  ;;  %21 = sbr.rel (!%p19_p3) target bundleno = 3 (0x3), region = 99 }
 0x66a   :  { %6603 = vsyncpa [#allocation4], 1 }
 0x66b   :  { %6605 = vsyncpa [#allocation4 + $0x1], 1 }

</bundles_post_ra>
